<compile_context>
chip_gen: v7x
topology: tpu7x:2x2x1
jax: 0.10.0
libtpu: 0.0.40
codegen_flags: <defaults>
</compile_context>

<pallas_src>
import functools

import jax
import jax.numpy as jnp
from jax import lax
from jax.experimental import pallas as pl
from jax.experimental.pallas import tpu as pltpu

EPS = 1e-5            # BatchNorm3d default eps
C = 4                 # channel width of the network
CIN = 2               # input channels
KS = 3                # conv kernel size
MXU_DTYPE = jnp.bfloat16   # dtype of the conv-matmul operands (flip to f32 if needed)


def _vmem_spec():
    return pl.BlockSpec(memory_space=pltpu.MemorySpace.VMEM)


# ----------------------------- Pallas kernel -------------------------------

def _strutnet_kernel(deltas, ncols,
                     x_ref, w_ref, m_ref, gm_ref, g_ref, be_ref, b2_ref,
                     l_ref, nm_ref, lb_ref, o_ref, scr_ref):
    """Fused StrutNet forward.

    x_ref : (C*W, N*D*H)          activation, rows ordered (channel, w), f32
    w_ref : (15, C*W, 9*C*W)      concatenated banded conv weights, bf16
    m_ref : (9, 1, N*D*H)         per-tap (kd, kh) boundary masks, f32
    gm_ref: (C*W, C*W)            per-channel averaging operator (BN stats)
    g_ref / be_ref : (10, C*W, 1) BN gamma / beta expanded over w-rows
    b2_ref: (5, C*W, 1)           bias of the 2nd conv of each residual block
    l_ref : (C*W, 1)              linear weight / (D*H*W), expanded over rows
    nm_ref: (N, N*D*H)            per-sample column one-hot
    lb_ref: (1, 1)                linear bias
    o_ref : (N, 1)
    scr_ref: (9*C*W, N*D*H)       bf16 scratch holding the 9 stacked tap slices
    """
    f32 = jnp.float32
    cw = x_ref.shape[0]
    gm = gm_ref[...]
    # Hoist the 9 tap masks out of the 15-conv loop (one (1, ncols) vreg each).
    mvals = [m_ref[j] for j in range(KS * KS)]

    def conv(act, layer):
        # Nine lane-rolled + boundary-masked copies of the activation go into
        # the (9*CW, ncols) VMEM scratch (bf16), then ONE K=9*CW MXU matmul
        # with the concatenated banded weight produces the conv output (f32).
        for j, delta in enumerate(deltas):
            if delta == 0:
                tap = act                               # center tap: no shift, all valid
            else:
                rolled = pltpu.roll(act, shift=(-delta) % ncols, axis=1)  # XLU
                tap = rolled * mvals[j]                                   # VPU
            scr_ref[j * cw:(j + 1) * cw, :] = tap.astype(scr_ref.dtype)
        return jnp.dot(w_ref[layer], scr_ref[...], preferred_element_type=f32)

    def bn_relu(acc, j):
        # Training-mode BatchNorm3d in f32.  Lane-reduce first (XLU), then a
        # tiny (CW, CW) x (CW, 1) per-channel averaging dot; centered two-pass
        # variance for numerical safety.
        s1 = jnp.sum(acc, axis=-1, keepdims=True)                    # (CW, 1)
        mean = jnp.dot(gm, s1, preferred_element_type=f32)            # (CW, 1)
        cen = acc - mean
        s2 = jnp.sum(cen * cen, axis=-1, keepdims=True)               # (CW, 1)
        var = jnp.dot(gm, s2, preferred_element_type=f32)             # (CW, 1)
        scale = lax.rsqrt(var + EPS) * g_ref[j]                       # (CW, 1)
        return jnp.maximum(cen * scale + be_ref[j], 0.0)

    x = x_ref[...]
    for st in range(5):
        x = bn_relu(conv(x, 3 * st + 0), 2 * st + 0)          # convolution_{st+1}
        r = bn_relu(conv(x, 3 * st + 1), 2 * st + 1)          # residual conv1+BN+ReLU
        x = jnp.maximum(x + conv(r, 3 * st + 2) + b2_ref[st], 0.0)   # skip + conv2 + ReLU

    # AdaptiveAvgPool3d((1,1,1)) + Linear(C -> 1) on VPU/XLU only.
    scaled = x * l_ref[...]                                   # (CW, ncols)   VPU
    colsum = jnp.sum(scaled, axis=0, keepdims=True)           # (1, ncols)    XLU
    per = nm_ref[...] * colsum                                # (N, ncols)    VPU
    o_ref[...] = jnp.sum(per, axis=-1, keepdims=True) + lb_ref[...]   # (N, 1)


# --------------------------- one-time packing -------------------------------

def pack_params(params, n, d, h, w):
    """Weight-only preprocessing, done once at parameter-load time."""
    c = C
    ncols = n * d * h
    cw = c * w

    # 15 conv kernels in forward order (conv_i, res_i.conv1, res_i.conv2),
    # input channels zero-padded to C.
    ws = []
    for i in range(1, 6):
        w1 = params[f'conv{i}']['w']
        w1 = jnp.pad(w1, ((0, 0), (0, c - w1.shape[1]), (0, 0), (0, 0), (0, 0)))
        ws += [w1, params[f'res{i}']['w1'], params[f'res{i}']['w2']]
    wstack = jnp.stack(ws)                                  # (15, C, C, 3, 3, 3)

    # Fold the kw tap into a banded (C*W, C*W) operator per (kd, kh), then
    # concatenate the 9 taps along columns -> (15, C*W, 9*C*W), bf16.
    wi = jnp.arange(w)
    taps = jnp.stack([(wi[None, :] == wi[:, None] + (kw - 1)).astype(jnp.float32)
                      for kw in range(KS)])                 # (3, W, W)
    w_ops = jnp.einsum('loiabk,kwp->labowip', wstack, taps)
    w_ops = w_ops.reshape(15, KS * KS, cw, cw)
    w_cat = jnp.transpose(w_ops, (0, 2, 1, 3)).reshape(15, cw, KS * KS * cw)
    w_cat = w_cat.astype(MXU_DTYPE)

    # (kd, kh) boundary masks on the (N*D*H) column (lane) axis.  Any circular
    # wrap of the lane roll coincides with an out-of-range (d, h) index, so
    # the masks also handle wraparound and sample-boundary crossings exactly.
    col = jnp.arange(ncols)
    di, hi = (col // h) % d, col % h
    masks = []
    for kd in range(KS):
        for kh in range(KS):
            dd, hh = di + (kd - 1), hi + (kh - 1)
            valid = (dd >= 0) & (dd < d) & (hh >= 0) & (hh < h)
            masks.append(valid.astype(jnp.float32))
    mask_arr = jnp.stack(masks)[:, None, :]                 # (9, 1, ncols)

    # Per-channel averaging operator (applied to lane-reduced (CW,1) sums).
    crow = jnp.arange(cw) // w
    gmat = (crow[:, None] == crow[None, :]).astype(jnp.float32) / float(n * d * h * w)

    # BN affine params / residual-conv2 bias expanded over the folded w-rows.
    g_rows, b_rows = [], []
    for i in range(1, 6):
        g_rows += [params[f'conv{i}']['gamma'], params[f'res{i}']['gamma']]
        b_rows += [params[f'conv{i}']['beta'], params[f'res{i}']['beta']]
    gam = jnp.stack([jnp.repeat(v, w)[:, None] for v in g_rows])      # (10, CW, 1)
    bet = jnp.stack([jnp.repeat(v, w)[:, None] for v in b_rows])      # (10, CW, 1)
    b2 = jnp.stack([jnp.repeat(params[f'res{i}']['b2'], w)[:, None]
                    for i in range(1, 6)])                            # (5, CW, 1)

    # Pool + linear folded into a per-row scale, a per-sample column one-hot
    # and the bias (epilogue runs entirely on VPU/XLU).
    lrow = (jnp.repeat(params['linear']['w'].reshape(c), w)
            / float(d * h * w))[:, None]                              # (CW, 1)
    ni = col // (d * h)
    nmask = (ni[None, :] == jnp.arange(n)[:, None]).astype(jnp.float32)  # (N, ncols)
    lbias = params['linear']['b'].reshape(1, 1)

    return dict(w_cat=w_cat, masks=mask_arr, gm=gmat, gamma=gam, beta=bet,
                b2=b2, lrow=lrow, nmask=nmask, lbias=lbias)


# ------------------------------ JAX glue -----------------------------------

def strutnet_forward(x, packed):
    """x: (N, 2, D, H, W) float32, packed: pack_params(...) -> (N, 1) float32."""
    n, cin, d, h, w = x.shape
    c = C
    ncols = n * d * h
    cw = c * w

    # Activation layout: channel-pad to C, fold W into rows -> (C*W, N*D*H).
    xp = jnp.pad(x.astype(jnp.float32),
                 ((0, 0), (0, c - cin), (0, 0), (0, 0), (0, 0)))
    x0 = jnp.transpose(xp, (1, 4, 0, 2, 3)).reshape(cw, ncols)

    # Static lane-shift amounts for the 9 (kd, kh) taps (same order as masks).
    deltas = tuple((kd - 1) * h + (kh - 1) for kd in range(KS) for kh in range(KS))
    kernel = functools.partial(_strutnet_kernel, deltas, ncols)

    # Advisory cost hint for XLA scheduling around the custom call.
    flops = 15 * 2 * cw * (KS * KS * cw) * ncols \
        + 20 * 2 * cw * cw * 2 \
        + 15 * KS * KS * 2 * cw * ncols
    bytes_accessed = (sum(int(v.size) * v.dtype.itemsize for v in packed.values())
                      + x0.size * 4 + n * 4)

    out = pl.pallas_call(
        kernel,
        out_shape=jax.ShapeDtypeStruct((n, 1), jnp.float32),
        in_specs=[_vmem_spec()] * 10,
        out_specs=_vmem_spec(),
        scratch_shapes=[pltpu.VMEM((KS * KS * cw, ncols), MXU_DTYPE)],
        cost_estimate=pl.CostEstimate(flops=int(flops),
                                      transcendentals=20 * cw,
                                      bytes_accessed=int(bytes_accessed)),
    )(x0, packed['w_cat'], packed['masks'], packed['gm'], packed['gamma'],
      packed['beta'], packed['b2'], packed['lrow'], packed['nmask'],
      packed['lbias'])
    return out


# --------------------------- parameter init --------------------------------

def init_params(key):
    c = C
    keys = iter(jax.random.split(key, 64))

    def u(shape, fan_in):
        bound = 1.0 / float(fan_in) ** 0.5
        return jax.random.uniform(next(keys), shape, minval=-bound,
                                  maxval=bound, dtype=jnp.float32)

    params = {}
    cin = CIN
    for i in range(1, 6):
        # Conv biases that feed a training-mode BatchNorm are omitted: they
        # are cancelled exactly by the batch-mean subtraction.
        params[f'conv{i}'] = dict(w=u((c, cin, 3, 3, 3), cin * 27),
                                  gamma=jnp.ones((c,), jnp.float32),
                                  beta=jnp.zeros((c,), jnp.float32))
        cin = c
        params[f'res{i}'] = dict(w1=u((c, c, 3, 3, 3), c * 27),
                                 gamma=jnp.ones((c,), jnp.float32),
                                 beta=jnp.zeros((c,), jnp.float32),
                                 w2=u((c, c, 3, 3, 3), c * 27),
                                 b2=u((c,), c * 27))
    params['linear'] = dict(w=u((1, c), c), b=u((1,), c))
    return params


if __name__ == "__main__":
    key = jax.random.PRNGKey(0)
    kp, kx = jax.random.split(key)
    params = init_params(kp)
    # small shapes consistent with the module: batch=2, in_channels=2, 8^3 vol
    n, d, h, w = 2, 8, 8, 8
    x = jax.random.normal(kx, (n, CIN, d, h, w), dtype=jnp.float32)
    packed = pack_params(params, n, d, h, w)        # one-time, weight-only
    fwd = jax.jit(strutnet_forward)
    y = fwd(x, packed)
    jax.block_until_ready(y)
    assert y.shape == (n, 1) and y.dtype == jnp.float32
    assert bool(jnp.all(jnp.isfinite(y)))
    print("KERNEL_OK")
</pallas_src>

<mosaic_0001>
module attributes {stable_mosaic.version = 11 : i64} {
  func.func @_strutnet_kernel(%arg0: memref<32x128xf32, #tpu.memory_space<vmem>>, %arg1: memref<15x32x288xbf16, #tpu.memory_space<vmem>>, %arg2: memref<9x1x128xf32, #tpu.memory_space<vmem>>, %arg3: memref<32x32xf32, #tpu.memory_space<vmem>>, %arg4: memref<10x32x1xf32, #tpu.memory_space<vmem>>, %arg5: memref<10x32x1xf32, #tpu.memory_space<vmem>>, %arg6: memref<5x32x1xf32, #tpu.memory_space<vmem>>, %arg7: memref<32x1xf32, #tpu.memory_space<vmem>>, %arg8: memref<2x128xf32, #tpu.memory_space<vmem>>, %arg9: memref<1x1xf32, #tpu.memory_space<vmem>>, %arg10: memref<2x1xf32, #tpu.memory_space<vmem>>, %arg11: memref<288x128xbf16, #tpu.memory_space<vmem>>) attributes {dimension_semantics = [], scalar_prefetch = 0 : i64, scratch_operands = 1 : i64, tpu.core_type = #tpu.core_type<tc>} {
    %c0 = arith.constant 0 : index
    %c0_0 = arith.constant 0 : index
    %0 = vector.load %arg3[%c0, %c0_0] : memref<32x32xf32, #tpu.memory_space<vmem>>, vector<32x32xf32>
    %c0_1 = arith.constant 0 : index
    %c0_2 = arith.constant 0 : index
    %c0_3 = arith.constant 0 : index
    %1 = vector.load %arg2[%c0_1, %c0_2, %c0_3] : memref<9x1x128xf32, #tpu.memory_space<vmem>>, vector<1x1x128xf32>
    %2 = vector.shape_cast %1 : vector<1x1x128xf32> to vector<1x128xf32>
    %c1 = arith.constant 1 : index
    %c0_4 = arith.constant 0 : index
    %c0_5 = arith.constant 0 : index
    %3 = vector.load %arg2[%c1, %c0_4, %c0_5] : memref<9x1x128xf32, #tpu.memory_space<vmem>>, vector<1x1x128xf32>
    %4 = vector.shape_cast %3 : vector<1x1x128xf32> to vector<1x128xf32>
    %c2 = arith.constant 2 : index
    %c0_6 = arith.constant 0 : index
    %c0_7 = arith.constant 0 : index
    %5 = vector.load %arg2[%c2, %c0_6, %c0_7] : memref<9x1x128xf32, #tpu.memory_space<vmem>>, vector<1x1x128xf32>
    %6 = vector.shape_cast %5 : vector<1x1x128xf32> to vector<1x128xf32>
    %c3 = arith.constant 3 : index
    %c0_8 = arith.constant 0 : index
    %c0_9 = arith.constant 0 : index
    %7 = vector.load %arg2[%c3, %c0_8, %c0_9] : memref<9x1x128xf32, #tpu.memory_space<vmem>>, vector<1x1x128xf32>
    %8 = vector.shape_cast %7 : vector<1x1x128xf32> to vector<1x128xf32>
    %c5 = arith.constant 5 : index
    %c0_10 = arith.constant 0 : index
    %c0_11 = arith.constant 0 : index
    %9 = vector.load %arg2[%c5, %c0_10, %c0_11] : memref<9x1x128xf32, #tpu.memory_space<vmem>>, vector<1x1x128xf32>
    %10 = vector.shape_cast %9 : vector<1x1x128xf32> to vector<1x128xf32>
    %c6 = arith.constant 6 : index
    %c0_12 = arith.constant 0 : index
    %c0_13 = arith.constant 0 : index
    %11 = vector.load %arg2[%c6, %c0_12, %c0_13] : memref<9x1x128xf32, #tpu.memory_space<vmem>>, vector<1x1x128xf32>
    %12 = vector.shape_cast %11 : vector<1x1x128xf32> to vector<1x128xf32>
    %c7 = arith.constant 7 : index
    %c0_14 = arith.constant 0 : index
    %c0_15 = arith.constant 0 : index
    %13 = vector.load %arg2[%c7, %c0_14, %c0_15] : memref<9x1x128xf32, #tpu.memory_space<vmem>>, vector<1x1x128xf32>
    %14 = vector.shape_cast %13 : vector<1x1x128xf32> to vector<1x128xf32>
    %c8 = arith.constant 8 : index
    %c0_16 = arith.constant 0 : index
    %c0_17 = arith.constant 0 : index
    %15 = vector.load %arg2[%c8, %c0_16, %c0_17] : memref<9x1x128xf32, #tpu.memory_space<vmem>>, vector<1x1x128xf32>
    %16 = vector.shape_cast %15 : vector<1x1x128xf32> to vector<1x128xf32>
    %c0_18 = arith.constant 0 : index
    %c0_19 = arith.constant 0 : index
    %17 = vector.load %arg0[%c0_18, %c0_19] : memref<32x128xf32, #tpu.memory_space<vmem>>, vector<32x128xf32>
    %c9_i32 = arith.constant 9 : i32
    %18 = tpu.dynamic_rotate %17 by %c9_i32 dim 1 : vector<32x128xf32>, i32 -> vector<32x128xf32>
    %19 = vector.broadcast %2 : vector<1x128xf32> to vector<32x128xf32>
    %20 = arith.mulf %18, %19 : vector<32x128xf32>
    %21 = arith.truncf %20 : vector<32x128xf32> to vector<32x128xbf16>
    %c0_20 = arith.constant 0 : index
    %c0_21 = arith.constant 0 : index
    %22 = vector.load %arg11[%c0_20, %c0_21] : memref<288x128xbf16, #tpu.memory_space<vmem>>, vector<32x128xbf16>
    tpu.vector_store %arg11[%c0_20, %c0_21], %21 {strides = array<i32>} : memref<288x128xbf16, #tpu.memory_space<vmem>>, vector<32x128xbf16>,
    %c8_i32 = arith.constant 8 : i32
    %23 = tpu.dynamic_rotate %17 by %c8_i32 dim 1 : vector<32x128xf32>, i32 -> vector<32x128xf32>
    %24 = vector.broadcast %4 : vector<1x128xf32> to vector<32x128xf32>
    %25 = arith.mulf %23, %24 : vector<32x128xf32>
    %26 = arith.truncf %25 : vector<32x128xf32> to vector<32x128xbf16>
    %c32 = arith.constant 32 : index
    %c0_22 = arith.constant 0 : index
    %27 = vector.load %arg11[%c32, %c0_22] : memref<288x128xbf16, #tpu.memory_space<vmem>>, vector<32x128xbf16>
    tpu.vector_store %arg11[%c32, %c0_22], %26 {strides = array<i32>} : memref<288x128xbf16, #tpu.memory_space<vmem>>, vector<32x128xbf16>,
    %c7_i32 = arith.constant 7 : i32
    %28 = tpu.dynamic_rotate %17 by %c7_i32 dim 1 : vector<32x128xf32>, i32 -> vector<32x128xf32>
    %29 = vector.broadcast %6 : vector<1x128xf32> to vector<32x128xf32>
    %30 = arith.mulf %28, %29 : vector<32x128xf32>
    %31 = arith.truncf %30 : vector<32x128xf32> to vector<32x128xbf16>
    %c64 = arith.constant 64 : index
    %c0_23 = arith.constant 0 : index
    %32 = vector.load %arg11[%c64, %c0_23] : memref<288x128xbf16, #tpu.memory_space<vmem>>, vector<32x128xbf16>
    tpu.vector_store %arg11[%c64, %c0_23], %31 {strides = array<i32>} : memref<288x128xbf16, #tpu.memory_space<vmem>>, vector<32x128xbf16>,
    %c1_i32 = arith.constant 1 : i32
    %33 = tpu.dynamic_rotate %17 by %c1_i32 dim 1 : vector<32x128xf32>, i32 -> vector<32x128xf32>
    %34 = vector.broadcast %8 : vector<1x128xf32> to vector<32x128xf32>
    %35 = arith.mulf %33, %34 : vector<32x128xf32>
    %36 = arith.truncf %35 : vector<32x128xf32> to vector<32x128xbf16>
    %c96 = arith.constant 96 : index
    %c0_24 = arith.constant 0 : index
    %37 = vector.load %arg11[%c96, %c0_24] : memref<288x128xbf16, #tpu.memory_space<vmem>>, vector<32x128xbf16>
    tpu.vector_store %arg11[%c96, %c0_24], %36 {strides = array<i32>} : memref<288x128xbf16, #tpu.memory_space<vmem>>, vector<32x128xbf16>,
    %38 = arith.truncf %17 : vector<32x128xf32> to vector<32x128xbf16>
    %c128 = arith.constant 128 : index
    %c0_25 = arith.constant 0 : index
    %39 = vector.load %arg11[%c128, %c0_25] : memref<288x128xbf16, #tpu.memory_space<vmem>>, vector<32x128xbf16>
    tpu.vector_store %arg11[%c128, %c0_25], %38 {strides = array<i32>} : memref<288x128xbf16, #tpu.memory_space<vmem>>, vector<32x128xbf16>,
    %c127_i32 = arith.constant 127 : i32
    %40 = tpu.dynamic_rotate %17 by %c127_i32 dim 1 : vector<32x128xf32>, i32 -> vector<32x128xf32>
    %41 = vector.broadcast %10 : vector<1x128xf32> to vector<32x128xf32>
    %42 = arith.mulf %40, %41 : vector<32x128xf32>
    %43 = arith.truncf %42 : vector<32x128xf32> to vector<32x128xbf16>
    %c160 = arith.constant 160 : index
    %c0_26 = arith.constant 0 : index
    %44 = vector.load %arg11[%c160, %c0_26] : memref<288x128xbf16, #tpu.memory_space<vmem>>, vector<32x128xbf16>
    tpu.vector_store %arg11[%c160, %c0_26], %43 {strides = array<i32>} : memref<288x128xbf16, #tpu.memory_space<vmem>>, vector<32x128xbf16>,
    %c121_i32 = arith.constant 121 : i32
    %45 = tpu.dynamic_rotate %17 by %c121_i32 dim 1 : vector<32x128xf32>, i32 -> vector<32x128xf32>
    %46 = vector.broadcast %12 : vector<1x128xf32> to vector<32x128xf32>
    %47 = arith.mulf %45, %46 : vector<32x128xf32>
    %48 = arith.truncf %47 : vector<32x128xf32> to vector<32x128xbf16>
    %c192 = arith.constant 192 : index
    %c0_27 = arith.constant 0 : index
    %49 = vector.load %arg11[%c192, %c0_27] : memref<288x128xbf16, #tpu.memory_space<vmem>>, vector<32x128xbf16>
    tpu.vector_store %arg11[%c192, %c0_27], %48 {strides = array<i32>} : memref<288x128xbf16, #tpu.memory_space<vmem>>, vector<32x128xbf16>,
    %c120_i32 = arith.constant 120 : i32
    %50 = tpu.dynamic_rotate %17 by %c120_i32 dim 1 : vector<32x128xf32>, i32 -> vector<32x128xf32>
    %51 = vector.broadcast %14 : vector<1x128xf32> to vector<32x128xf32>
    %52 = arith.mulf %50, %51 : vector<32x128xf32>
    %53 = arith.truncf %52 : vector<32x128xf32> to vector<32x128xbf16>
    %c224 = arith.constant 224 : index
    %c0_28 = arith.constant 0 : index
    %54 = vector.load %arg11[%c224, %c0_28] : memref<288x128xbf16, #tpu.memory_space<vmem>>, vector<32x128xbf16>
    tpu.vector_store %arg11[%c224, %c0_28], %53 {strides = array<i32>} : memref<288x128xbf16, #tpu.memory_space<vmem>>, vector<32x128xbf16>,
    %c119_i32 = arith.constant 119 : i32
    %55 = tpu.dynamic_rotate %17 by %c119_i32 dim 1 : vector<32x128xf32>, i32 -> vector<32x128xf32>
    %56 = vector.broadcast %16 : vector<1x128xf32> to vector<32x128xf32>
    %57 = arith.mulf %55, %56 : vector<32x128xf32>
    %58 = arith.truncf %57 : vector<32x128xf32> to vector<32x128xbf16>
    %c256 = arith.constant 256 : index
    %c0_29 = arith.constant 0 : index
    %59 = vector.load %arg11[%c256, %c0_29] : memref<288x128xbf16, #tpu.memory_space<vmem>>, vector<32x128xbf16>
    tpu.vector_store %arg11[%c256, %c0_29], %58 {strides = array<i32>} : memref<288x128xbf16, #tpu.memory_space<vmem>>, vector<32x128xbf16>,
    %c0_30 = arith.constant 0 : index
    %c0_31 = arith.constant 0 : index
    %c0_32 = arith.constant 0 : index
    %60 = vector.load %arg1[%c0_30, %c0_31, %c0_32] : memref<15x32x288xbf16, #tpu.memory_space<vmem>>, vector<1x32x288xbf16>
    %61 = vector.shape_cast %60 : vector<1x32x288xbf16> to vector<32x288xbf16>
    %c0_33 = arith.constant 0 : index
    %c0_34 = arith.constant 0 : index
    %62 = vector.load %arg11[%c0_33, %c0_34] : memref<288x128xbf16, #tpu.memory_space<vmem>>, vector<288x128xbf16>
    %cst = arith.constant dense<0.000000e+00> : vector<32x128xf32>
    %63 = tpu.matmul %61, %62, %cst {dimension_numbers = #tpu.dot_dimension_numbers<[1], [0], [0], [1], [0, 0, 1, 1], [], []>} : vector<32x288xbf16>, vector<288x128xbf16>, vector<32x128xf32> -> vector<32x128xf32>
    %cst_35 = arith.constant dense<0.000000e+00> : vector<32xf32>
    %64 = vector.multi_reduction <add>, %63, %cst_35 [1] : vector<32x128xf32> to vector<32xf32>
    %65 = vector.shape_cast %64 : vector<32xf32> to vector<32x1xf32>
    %cst_36 = arith.constant dense<0.000000e+00> : vector<32x1xf32>
    %66 = tpu.matmul %0, %65, %cst_36 {dimension_numbers = #tpu.dot_dimension_numbers<[1], [0], [0], [1], [0, 0, 1, 1], [], []>} : vector<32x32xf32>, vector<32x1xf32>, vector<32x1xf32> -> vector<32x1xf32>
    %67 = vector.broadcast %66 : vector<32x1xf32> to vector<32x128xf32>
    %68 = arith.subf %63, %67 : vector<32x128xf32>
    %69 = arith.mulf %68, %68 : vector<32x128xf32>
    %cst_37 = arith.constant dense<0.000000e+00> : vector<32xf32>
    %70 = vector.multi_reduction <add>, %69, %cst_37 [1] : vector<32x128xf32> to vector<32xf32>
    %71 = vector.shape_cast %70 : vector<32xf32> to vector<32x1xf32>
    %cst_38 = arith.constant dense<0.000000e+00> : vector<32x1xf32>
    %72 = tpu.matmul %0, %71, %cst_38 {dimension_numbers = #tpu.dot_dimension_numbers<[1], [0], [0], [1], [0, 0, 1, 1], [], []>} : vector<32x32xf32>, vector<32x1xf32>, vector<32x1xf32> -> vector<32x1xf32>
    %cst_39 = arith.constant 9.99999974E-6 : f32
    %73 = vector.broadcast %cst_39 : f32 to vector<32x1xf32>
    %74 = arith.addf %72, %73 : vector<32x1xf32>
    %75 = math.rsqrt %74 : vector<32x1xf32>
    %c0_40 = arith.constant 0 : index
    %c0_41 = arith.constant 0 : index
    %c0_42 = arith.constant 0 : index
    %76 = vector.load %arg4[%c0_40, %c0_41, %c0_42] : memref<10x32x1xf32, #tpu.memory_space<vmem>>, vector<1x32x1xf32>
    %77 = vector.shape_cast %76 : vector<1x32x1xf32> to vector<32x1xf32>
    %78 = arith.mulf %75, %77 : vector<32x1xf32>
    %79 = vector.broadcast %78 : vector<32x1xf32> to vector<32x128xf32>
    %80 = arith.mulf %68, %79 : vector<32x128xf32>
    %c0_43 = arith.constant 0 : index
    %c0_44 = arith.constant 0 : index
    %c0_45 = arith.constant 0 : index
    %81 = vector.load %arg5[%c0_43, %c0_44, %c0_45] : memref<10x32x1xf32, #tpu.memory_space<vmem>>, vector<1x32x1xf32>
    %82 = vector.shape_cast %81 : vector<1x32x1xf32> to vector<32x1xf32>
    %83 = vector.broadcast %82 : vector<32x1xf32> to vector<32x128xf32>
    %84 = arith.addf %80, %83 : vector<32x128xf32>
    %cst_46 = arith.constant 0.000000e+00 : f32
    %85 = vector.broadcast %cst_46 : f32 to vector<32x128xf32>
    %86 = arith.maximumf %84, %85 : vector<32x128xf32>
    %c9_i32_47 = arith.constant 9 : i32
    %87 = tpu.dynamic_rotate %86 by %c9_i32_47 dim 1 : vector<32x128xf32>, i32 -> vector<32x128xf32>
    %88 = vector.broadcast %2 : vector<1x128xf32> to vector<32x128xf32>
    %89 = arith.mulf %87, %88 : vector<32x128xf32>
    %90 = arith.truncf %89 : vector<32x128xf32> to vector<32x128xbf16>
    %c0_48 = arith.constant 0 : index
    %c0_49 = arith.constant 0 : index
    %91 = vector.load %arg11[%c0_48, %c0_49] : memref<288x128xbf16, #tpu.memory_space<vmem>>, vector<32x128xbf16>
    tpu.vector_store %arg11[%c0_48, %c0_49], %90 {strides = array<i32>} : memref<288x128xbf16, #tpu.memory_space<vmem>>, vector<32x128xbf16>,
    %c8_i32_50 = arith.constant 8 : i32
    %92 = tpu.dynamic_rotate %86 by %c8_i32_50 dim 1 : vector<32x128xf32>, i32 -> vector<32x128xf32>
    %93 = vector.broadcast %4 : vector<1x128xf32> to vector<32x128xf32>
    %94 = arith.mulf %92, %93 : vector<32x128xf32>
    %95 = arith.truncf %94 : vector<32x128xf32> to vector<32x128xbf16>
    %c32_51 = arith.constant 32 : index
    %c0_52 = arith.constant 0 : index
    %96 = vector.load %arg11[%c32_51, %c0_52] : memref<288x128xbf16, #tpu.memory_space<vmem>>, vector<32x128xbf16>
    tpu.vector_store %arg11[%c32_51, %c0_52], %95 {strides = array<i32>} : memref<288x128xbf16, #tpu.memory_space<vmem>>, vector<32x128xbf16>,
    %c7_i32_53 = arith.constant 7 : i32
    %97 = tpu.dynamic_rotate %86 by %c7_i32_53 dim 1 : vector<32x128xf32>, i32 -> vector<32x128xf32>
    %98 = vector.broadcast %6 : vector<1x128xf32> to vector<32x128xf32>
    %99 = arith.mulf %97, %98 : vector<32x128xf32>
    %100 = arith.truncf %99 : vector<32x128xf32> to vector<32x128xbf16>
    %c64_54 = arith.constant 64 : index
    %c0_55 = arith.constant 0 : index
    %101 = vector.load %arg11[%c64_54, %c0_55] : memref<288x128xbf16, #tpu.memory_space<vmem>>, vector<32x128xbf16>
    tpu.vector_store %arg11[%c64_54, %c0_55], %100 {strides = array<i32>} : memref<288x128xbf16, #tpu.memory_space<vmem>>, vector<32x128xbf16>,
    %c1_i32_56 = arith.constant 1 : i32
    %102 = tpu.dynamic_rotate %86 by %c1_i32_56 dim 1 : vector<32x128xf32>, i32 -> vector<32x128xf32>
    %103 = vector.broadcast %8 : vector<1x128xf32> to vector<32x128xf32>
    %104 = arith.mulf %102, %103 : vector<32x128xf32>
    %105 = arith.truncf %104 : vector<32x128xf32> to vector<32x128xbf16>
    %c96_57 = arith.constant 96 : index
    %c0_58 = arith.constant 0 : index
    %106 = vector.load %arg11[%c96_57, %c0_58] : memref<288x128xbf16, #tpu.memory_space<vmem>>, vector<32x128xbf16>
    tpu.vector_store %arg11[%c96_57, %c0_58], %105 {strides = array<i32>} : memref<288x128xbf16, #tpu.memory_space<vmem>>, vector<32x128xbf16>,
    %107 = arith.truncf %86 : vector<32x128xf32> to vector<32x128xbf16>
    %c128_59 = arith.constant 128 : index
    %c0_60 = arith.constant 0 : index
    %108 = vector.load %arg11[%c128_59, %c0_60] : memref<288x128xbf16, #tpu.memory_space<vmem>>, vector<32x128xbf16>
    tpu.vector_store %arg11[%c128_59, %c0_60], %107 {strides = array<i32>} : memref<288x128xbf16, #tpu.memory_space<vmem>>, vector<32x128xbf16>,
    %c127_i32_61 = arith.constant 127 : i32
    %109 = tpu.dynamic_rotate %86 by %c127_i32_61 dim 1 : vector<32x128xf32>, i32 -> vector<32x128xf32>
    %110 = vector.broadcast %10 : vector<1x128xf32> to vector<32x128xf32>
    %111 = arith.mulf %109, %110 : vector<32x128xf32>
    %112 = arith.truncf %111 : vector<32x128xf32> to vector<32x128xbf16>
    %c160_62 = arith.constant 160 : index
    %c0_63 = arith.constant 0 : index
    %113 = vector.load %arg11[%c160_62, %c0_63] : memref<288x128xbf16, #tpu.memory_space<vmem>>, vector<32x128xbf16>
    tpu.vector_store %arg11[%c160_62, %c0_63], %112 {strides = array<i32>} : memref<288x128xbf16, #tpu.memory_space<vmem>>, vector<32x128xbf16>,
    %c121_i32_64 = arith.constant 121 : i32
    %114 = tpu.dynamic_rotate %86 by %c121_i32_64 dim 1 : vector<32x128xf32>, i32 -> vector<32x128xf32>
    %115 = vector.broadcast %12 : vector<1x128xf32> to vector<32x128xf32>
    %116 = arith.mulf %114, %115 : vector<32x128xf32>
    %117 = arith.truncf %116 : vector<32x128xf32> to vector<32x128xbf16>
    %c192_65 = arith.constant 192 : index
    %c0_66 = arith.constant 0 : index
    %118 = vector.load %arg11[%c192_65, %c0_66] : memref<288x128xbf16, #tpu.memory_space<vmem>>, vector<32x128xbf16>
    tpu.vector_store %arg11[%c192_65, %c0_66], %117 {strides = array<i32>} : memref<288x128xbf16, #tpu.memory_space<vmem>>, vector<32x128xbf16>,
    %c120_i32_67 = arith.constant 120 : i32
    %119 = tpu.dynamic_rotate %86 by %c120_i32_67 dim 1 : vector<32x128xf32>, i32 -> vector<32x128xf32>
    %120 = vector.broadcast %14 : vector<1x128xf32> to vector<32x128xf32>
    %121 = arith.mulf %119, %120 : vector<32x128xf32>
    %122 = arith.truncf %121 : vector<32x128xf32> to vector<32x128xbf16>
    %c224_68 = arith.constant 224 : index
    %c0_69 = arith.constant 0 : index
    %123 = vector.load %arg11[%c224_68, %c0_69] : memref<288x128xbf16, #tpu.memory_space<vmem>>, vector<32x128xbf16>
    tpu.vector_store %arg11[%c224_68, %c0_69], %122 {strides = array<i32>} : memref<288x128xbf16, #tpu.memory_space<vmem>>, vector<32x128xbf16>,
    %c119_i32_70 = arith.constant 119 : i32
    %124 = tpu.dynamic_rotate %86 by %c119_i32_70 dim 1 : vector<32x128xf32>, i32 -> vector<32x128xf32>
    %125 = vector.broadcast %16 : vector<1x128xf32> to vector<32x128xf32>
    %126 = arith.mulf %124, %125 : vector<32x128xf32>
    %127 = arith.truncf %126 : vector<32x128xf32> to vector<32x128xbf16>
    %c256_71 = arith.constant 256 : index
    %c0_72 = arith.constant 0 : index
    %128 = vector.load %arg11[%c256_71, %c0_72] : memref<288x128xbf16, #tpu.memory_space<vmem>>, vector<32x128xbf16>
    tpu.vector_store %arg11[%c256_71, %c0_72], %127 {strides = array<i32>} : memref<288x128xbf16, #tpu.memory_space<vmem>>, vector<32x128xbf16>,
    %c1_73 = arith.constant 1 : index
    %c0_74 = arith.constant 0 : index
    %c0_75 = arith.constant 0 : index
    %129 = vector.load %arg1[%c1_73, %c0_74, %c0_75] : memref<15x32x288xbf16, #tpu.memory_space<vmem>>, vector<1x32x288xbf16>
    %130 = vector.shape_cast %129 : vector<1x32x288xbf16> to vector<32x288xbf16>
    %c0_76 = arith.constant 0 : index
    %c0_77 = arith.constant 0 : index
    %131 = vector.load %arg11[%c0_76, %c0_77] : memref<288x128xbf16, #tpu.memory_space<vmem>>, vector<288x128xbf16>
    %cst_78 = arith.constant dense<0.000000e+00> : vector<32x128xf32>
    %132 = tpu.matmul %130, %131, %cst_78 {dimension_numbers = #tpu.dot_dimension_numbers<[1], [0], [0], [1], [0, 0, 1, 1], [], []>} : vector<32x288xbf16>, vector<288x128xbf16>, vector<32x128xf32> -> vector<32x128xf32>
    %cst_79 = arith.constant dense<0.000000e+00> : vector<32xf32>
    %133 = vector.multi_reduction <add>, %132, %cst_79 [1] : vector<32x128xf32> to vector<32xf32>
    %134 = vector.shape_cast %133 : vector<32xf32> to vector<32x1xf32>
    %cst_80 = arith.constant dense<0.000000e+00> : vector<32x1xf32>
    %135 = tpu.matmul %0, %134, %cst_80 {dimension_numbers = #tpu.dot_dimension_numbers<[1], [0], [0], [1], [0, 0, 1, 1], [], []>} : vector<32x32xf32>, vector<32x1xf32>, vector<32x1xf32> -> vector<32x1xf32>
    %136 = vector.broadcast %135 : vector<32x1xf32> to vector<32x128xf32>
    %137 = arith.subf %132, %136 : vector<32x128xf32>
    %138 = arith.mulf %137, %137 : vector<32x128xf32>
    %cst_81 = arith.constant dense<0.000000e+00> : vector<32xf32>
    %139 = vector.multi_reduction <add>, %138, %cst_81 [1] : vector<32x128xf32> to vector<32xf32>
    %140 = vector.shape_cast %139 : vector<32xf32> to vector<32x1xf32>
    %cst_82 = arith.constant dense<0.000000e+00> : vector<32x1xf32>
    %141 = tpu.matmul %0, %140, %cst_82 {dimension_numbers = #tpu.dot_dimension_numbers<[1], [0], [0], [1], [0, 0, 1, 1], [], []>} : vector<32x32xf32>, vector<32x1xf32>, vector<32x1xf32> -> vector<32x1xf32>
    %cst_83 = arith.constant 9.99999974E-6 : f32
    %142 = vector.broadcast %cst_83 : f32 to vector<32x1xf32>
    %143 = arith.addf %141, %142 : vector<32x1xf32>
    %144 = math.rsqrt %143 : vector<32x1xf32>
    %c1_84 = arith.constant 1 : index
    %c0_85 = arith.constant 0 : index
    %c0_86 = arith.constant 0 : index
    %145 = vector.load %arg4[%c1_84, %c0_85, %c0_86] : memref<10x32x1xf32, #tpu.memory_space<vmem>>, vector<1x32x1xf32>
    %146 = vector.shape_cast %145 : vector<1x32x1xf32> to vector<32x1xf32>
    %147 = arith.mulf %144, %146 : vector<32x1xf32>
    %148 = vector.broadcast %147 : vector<32x1xf32> to vector<32x128xf32>
    %149 = arith.mulf %137, %148 : vector<32x128xf32>
    %c1_87 = arith.constant 1 : index
    %c0_88 = arith.constant 0 : index
    %c0_89 = arith.constant 0 : index
    %150 = vector.load %arg5[%c1_87, %c0_88, %c0_89] : memref<10x32x1xf32, #tpu.memory_space<vmem>>, vector<1x32x1xf32>
    %151 = vector.shape_cast %150 : vector<1x32x1xf32> to vector<32x1xf32>
    %152 = vector.broadcast %151 : vector<32x1xf32> to vector<32x128xf32>
    %153 = arith.addf %149, %152 : vector<32x128xf32>
    %cst_90 = arith.constant 0.000000e+00 : f32
    %154 = vector.broadcast %cst_90 : f32 to vector<32x128xf32>
    %155 = arith.maximumf %153, %154 : vector<32x128xf32>
    %c9_i32_91 = arith.constant 9 : i32
    %156 = tpu.dynamic_rotate %155 by %c9_i32_91 dim 1 : vector<32x128xf32>, i32 -> vector<32x128xf32>
    %157 = vector.broadcast %2 : vector<1x128xf32> to vector<32x128xf32>
    %158 = arith.mulf %156, %157 : vector<32x128xf32>
    %159 = arith.truncf %158 : vector<32x128xf32> to vector<32x128xbf16>
    %c0_92 = arith.constant 0 : index
    %c0_93 = arith.constant 0 : index
    %160 = vector.load %arg11[%c0_92, %c0_93] : memref<288x128xbf16, #tpu.memory_space<vmem>>, vector<32x128xbf16>
    tpu.vector_store %arg11[%c0_92, %c0_93], %159 {strides = array<i32>} : memref<288x128xbf16, #tpu.memory_space<vmem>>, vector<32x128xbf16>,
    %c8_i32_94 = arith.constant 8 : i32
    %161 = tpu.dynamic_rotate %155 by %c8_i32_94 dim 1 : vector<32x128xf32>, i32 -> vector<32x128xf32>
    %162 = vector.broadcast %4 : vector<1x128xf32> to vector<32x128xf32>
    %163 = arith.mulf %161, %162 : vector<32x128xf32>
    %164 = arith.truncf %163 : vector<32x128xf32> to vector<32x128xbf16>
    %c32_95 = arith.constant 32 : index
    %c0_96 = arith.constant 0 : index
    %165 = vector.load %arg11[%c32_95, %c0_96] : memref<288x128xbf16, #tpu.memory_space<vmem>>, vector<32x128xbf16>
    tpu.vector_store %arg11[%c32_95, %c0_96], %164 {strides = array<i32>} : memref<288x128xbf16, #tpu.memory_space<vmem>>, vector<32x128xbf16>,
    %c7_i32_97 = arith.constant 7 : i32
    %166 = tpu.dynamic_rotate %155 by %c7_i32_97 dim 1 : vector<32x128xf32>, i32 -> vector<32x128xf32>
    %167 = vector.broadcast %6 : vector<1x128xf32> to vector<32x128xf32>
    %168 = arith.mulf %166, %167 : vector<32x128xf32>
    %169 = arith.truncf %168 : vector<32x128xf32> to vector<32x128xbf16>
    %c64_98 = arith.constant 64 : index
    %c0_99 = arith.constant 0 : index
    %170 = vector.load %arg11[%c64_98, %c0_99] : memref<288x128xbf16, #tpu.memory_space<vmem>>, vector<32x128xbf16>
    tpu.vector_store %arg11[%c64_98, %c0_99], %169 {strides = array<i32>} : memref<288x128xbf16, #tpu.memory_space<vmem>>, vector<32x128xbf16>,
    %c1_i32_100 = arith.constant 1 : i32
    %171 = tpu.dynamic_rotate %155 by %c1_i32_100 dim 1 : vector<32x128xf32>, i32 -> vector<32x128xf32>
    %172 = vector.broadcast %8 : vector<1x128xf32> to vector<32x128xf32>
    %173 = arith.mulf %171, %172 : vector<32x128xf32>
    %174 = arith.truncf %173 : vector<32x128xf32> to vector<32x128xbf16>
    %c96_101 = arith.constant 96 : index
    %c0_102 = arith.constant 0 : index
    %175 = vector.load %arg11[%c96_101, %c0_102] : memref<288x128xbf16, #tpu.memory_space<vmem>>, vector<32x128xbf16>
    tpu.vector_store %arg11[%c96_101, %c0_102], %174 {strides = array<i32>} : memref<288x128xbf16, #tpu.memory_space<vmem>>, vector<32x128xbf16>,
    %176 = arith.truncf %155 : vector<32x128xf32> to vector<32x128xbf16>
    %c128_103 = arith.constant 128 : index
    %c0_104 = arith.constant 0 : index
    %177 = vector.load %arg11[%c128_103, %c0_104] : memref<288x128xbf16, #tpu.memory_space<vmem>>, vector<32x128xbf16>
    tpu.vector_store %arg11[%c128_103, %c0_104], %176 {strides = array<i32>} : memref<288x128xbf16, #tpu.memory_space<vmem>>, vector<32x128xbf16>,
    %c127_i32_105 = arith.constant 127 : i32
    %178 = tpu.dynamic_rotate %155 by %c127_i32_105 dim 1 : vector<32x128xf32>, i32 -> vector<32x128xf32>
    %179 = vector.broadcast %10 : vector<1x128xf32> to vector<32x128xf32>
    %180 = arith.mulf %178, %179 : vector<32x128xf32>
    %181 = arith.truncf %180 : vector<32x128xf32> to vector<32x128xbf16>
    %c160_106 = arith.constant 160 : index
    %c0_107 = arith.constant 0 : index
    %182 = vector.load %arg11[%c160_106, %c0_107] : memref<288x128xbf16, #tpu.memory_space<vmem>>, vector<32x128xbf16>
    tpu.vector_store %arg11[%c160_106, %c0_107], %181 {strides = array<i32>} : memref<288x128xbf16, #tpu.memory_space<vmem>>, vector<32x128xbf16>,
    %c121_i32_108 = arith.constant 121 : i32
    %183 = tpu.dynamic_rotate %155 by %c121_i32_108 dim 1 : vector<32x128xf32>, i32 -> vector<32x128xf32>
    %184 = vector.broadcast %12 : vector<1x128xf32> to vector<32x128xf32>
    %185 = arith.mulf %183, %184 : vector<32x128xf32>
    %186 = arith.truncf %185 : vector<32x128xf32> to vector<32x128xbf16>
    %c192_109 = arith.constant 192 : index
    %c0_110 = arith.constant 0 : index
    %187 = vector.load %arg11[%c192_109, %c0_110] : memref<288x128xbf16, #tpu.memory_space<vmem>>, vector<32x128xbf16>
    tpu.vector_store %arg11[%c192_109, %c0_110], %186 {strides = array<i32>} : memref<288x128xbf16, #tpu.memory_space<vmem>>, vector<32x128xbf16>,
    %c120_i32_111 = arith.constant 120 : i32
    %188 = tpu.dynamic_rotate %155 by %c120_i32_111 dim 1 : vector<32x128xf32>, i32 -> vector<32x128xf32>
    %189 = vector.broadcast %14 : vector<1x128xf32> to vector<32x128xf32>
    %190 = arith.mulf %188, %189 : vector<32x128xf32>
    %191 = arith.truncf %190 : vector<32x128xf32> to vector<32x128xbf16>
    %c224_112 = arith.constant 224 : index
    %c0_113 = arith.constant 0 : index
    %192 = vector.load %arg11[%c224_112, %c0_113] : memref<288x128xbf16, #tpu.memory_space<vmem>>, vector<32x128xbf16>
    tpu.vector_store %arg11[%c224_112, %c0_113], %191 {strides = array<i32>} : memref<288x128xbf16, #tpu.memory_space<vmem>>, vector<32x128xbf16>,
    %c119_i32_114 = arith.constant 119 : i32
    %193 = tpu.dynamic_rotate %155 by %c119_i32_114 dim 1 : vector<32x128xf32>, i32 -> vector<32x128xf32>
    %194 = vector.broadcast %16 : vector<1x128xf32> to vector<32x128xf32>
    %195 = arith.mulf %193, %194 : vector<32x128xf32>
    %196 = arith.truncf %195 : vector<32x128xf32> to vector<32x128xbf16>
    %c256_115 = arith.constant 256 : index
    %c0_116 = arith.constant 0 : index
    %197 = vector.load %arg11[%c256_115, %c0_116] : memref<288x128xbf16, #tpu.memory_space<vmem>>, vector<32x128xbf16>
    tpu.vector_store %arg11[%c256_115, %c0_116], %196 {strides = array<i32>} : memref<288x128xbf16, #tpu.memory_space<vmem>>, vector<32x128xbf16>,
    %c2_117 = arith.constant 2 : index
    %c0_118 = arith.constant 0 : index
    %c0_119 = arith.constant 0 : index
    %198 = vector.load %arg1[%c2_117, %c0_118, %c0_119] : memref<15x32x288xbf16, #tpu.memory_space<vmem>>, vector<1x32x288xbf16>
    %199 = vector.shape_cast %198 : vector<1x32x288xbf16> to vector<32x288xbf16>
    %c0_120 = arith.constant 0 : index
    %c0_121 = arith.constant 0 : index
    %200 = vector.load %arg11[%c0_120, %c0_121] : memref<288x128xbf16, #tpu.memory_space<vmem>>, vector<288x128xbf16>
    %cst_122 = arith.constant dense<0.000000e+00> : vector<32x128xf32>
    %201 = tpu.matmul %199, %200, %cst_122 {dimension_numbers = #tpu.dot_dimension_numbers<[1], [0], [0], [1], [0, 0, 1, 1], [], []>} : vector<32x288xbf16>, vector<288x128xbf16>, vector<32x128xf32> -> vector<32x128xf32>
    %202 = arith.addf %86, %201 : vector<32x128xf32>
    %c0_123 = arith.constant 0 : index
    %c0_124 = arith.constant 0 : index
    %c0_125 = arith.constant 0 : index
    %203 = vector.load %arg6[%c0_123, %c0_124, %c0_125] : memref<5x32x1xf32, #tpu.memory_space<vmem>>, vector<1x32x1xf32>
    %204 = vector.shape_cast %203 : vector<1x32x1xf32> to vector<32x1xf32>
    %205 = vector.broadcast %204 : vector<32x1xf32> to vector<32x128xf32>
    %206 = arith.addf %202, %205 : vector<32x128xf32>
    %cst_126 = arith.constant 0.000000e+00 : f32
    %207 = vector.broadcast %cst_126 : f32 to vector<32x128xf32>
    %208 = arith.maximumf %206, %207 : vector<32x128xf32>
    %c9_i32_127 = arith.constant 9 : i32
    %209 = tpu.dynamic_rotate %208 by %c9_i32_127 dim 1 : vector<32x128xf32>, i32 -> vector<32x128xf32>
    %210 = vector.broadcast %2 : vector<1x128xf32> to vector<32x128xf32>
    %211 = arith.mulf %209, %210 : vector<32x128xf32>
    %212 = arith.truncf %211 : vector<32x128xf32> to vector<32x128xbf16>
    %c0_128 = arith.constant 0 : index
    %c0_129 = arith.constant 0 : index
    %213 = vector.load %arg11[%c0_128, %c0_129] : memref<288x128xbf16, #tpu.memory_space<vmem>>, vector<32x128xbf16>
    tpu.vector_store %arg11[%c0_128, %c0_129], %212 {strides = array<i32>} : memref<288x128xbf16, #tpu.memory_space<vmem>>, vector<32x128xbf16>,
    %c8_i32_130 = arith.constant 8 : i32
    %214 = tpu.dynamic_rotate %208 by %c8_i32_130 dim 1 : vector<32x128xf32>, i32 -> vector<32x128xf32>
    %215 = vector.broadcast %4 : vector<1x128xf32> to vector<32x128xf32>
    %216 = arith.mulf %214, %215 : vector<32x128xf32>
    %217 = arith.truncf %216 : vector<32x128xf32> to vector<32x128xbf16>
    %c32_131 = arith.constant 32 : index
    %c0_132 = arith.constant 0 : index
    %218 = vector.load %arg11[%c32_131, %c0_132] : memref<288x128xbf16, #tpu.memory_space<vmem>>, vector<32x128xbf16>
    tpu.vector_store %arg11[%c32_131, %c0_132], %217 {strides = array<i32>} : memref<288x128xbf16, #tpu.memory_space<vmem>>, vector<32x128xbf16>,
    %c7_i32_133 = arith.constant 7 : i32
    %219 = tpu.dynamic_rotate %208 by %c7_i32_133 dim 1 : vector<32x128xf32>, i32 -> vector<32x128xf32>
    %220 = vector.broadcast %6 : vector<1x128xf32> to vector<32x128xf32>
    %221 = arith.mulf %219, %220 : vector<32x128xf32>
    %222 = arith.truncf %221 : vector<32x128xf32> to vector<32x128xbf16>
    %c64_134 = arith.constant 64 : index
    %c0_135 = arith.constant 0 : index
    %223 = vector.load %arg11[%c64_134, %c0_135] : memref<288x128xbf16, #tpu.memory_space<vmem>>, vector<32x128xbf16>
    tpu.vector_store %arg11[%c64_134, %c0_135], %222 {strides = array<i32>} : memref<288x128xbf16, #tpu.memory_space<vmem>>, vector<32x128xbf16>,
    %c1_i32_136 = arith.constant 1 : i32
    %224 = tpu.dynamic_rotate %208 by %c1_i32_136 dim 1 : vector<32x128xf32>, i32 -> vector<32x128xf32>
    %225 = vector.broadcast %8 : vector<1x128xf32> to vector<32x128xf32>
    %226 = arith.mulf %224, %225 : vector<32x128xf32>
    %227 = arith.truncf %226 : vector<32x128xf32> to vector<32x128xbf16>
    %c96_137 = arith.constant 96 : index
    %c0_138 = arith.constant 0 : index
    %228 = vector.load %arg11[%c96_137, %c0_138] : memref<288x128xbf16, #tpu.memory_space<vmem>>, vector<32x128xbf16>
    tpu.vector_store %arg11[%c96_137, %c0_138], %227 {strides = array<i32>} : memref<288x128xbf16, #tpu.memory_space<vmem>>, vector<32x128xbf16>,
    %229 = arith.truncf %208 : vector<32x128xf32> to vector<32x128xbf16>
    %c128_139 = arith.constant 128 : index
    %c0_140 = arith.constant 0 : index
    %230 = vector.load %arg11[%c128_139, %c0_140] : memref<288x128xbf16, #tpu.memory_space<vmem>>, vector<32x128xbf16>
    tpu.vector_store %arg11[%c128_139, %c0_140], %229 {strides = array<i32>} : memref<288x128xbf16, #tpu.memory_space<vmem>>, vector<32x128xbf16>,
    %c127_i32_141 = arith.constant 127 : i32
    %231 = tpu.dynamic_rotate %208 by %c127_i32_141 dim 1 : vector<32x128xf32>, i32 -> vector<32x128xf32>
    %232 = vector.broadcast %10 : vector<1x128xf32> to vector<32x128xf32>
    %233 = arith.mulf %231, %232 : vector<32x128xf32>
    %234 = arith.truncf %233 : vector<32x128xf32> to vector<32x128xbf16>
    %c160_142 = arith.constant 160 : index
    %c0_143 = arith.constant 0 : index
    %235 = vector.load %arg11[%c160_142, %c0_143] : memref<288x128xbf16, #tpu.memory_space<vmem>>, vector<32x128xbf16>
    tpu.vector_store %arg11[%c160_142, %c0_143], %234 {strides = array<i32>} : memref<288x128xbf16, #tpu.memory_space<vmem>>, vector<32x128xbf16>,
    %c121_i32_144 = arith.constant 121 : i32
    %236 = tpu.dynamic_rotate %208 by %c121_i32_144 dim 1 : vector<32x128xf32>, i32 -> vector<32x128xf32>
    %237 = vector.broadcast %12 : vector<1x128xf32> to vector<32x128xf32>
    %238 = arith.mulf %236, %237 : vector<32x128xf32>
    %239 = arith.truncf %238 : vector<32x128xf32> to vector<32x128xbf16>
    %c192_145 = arith.constant 192 : index
    %c0_146 = arith.constant 0 : index
    %240 = vector.load %arg11[%c192_145, %c0_146] : memref<288x128xbf16, #tpu.memory_space<vmem>>, vector<32x128xbf16>
    tpu.vector_store %arg11[%c192_145, %c0_146], %239 {strides = array<i32>} : memref<288x128xbf16, #tpu.memory_space<vmem>>, vector<32x128xbf16>,
    %c120_i32_147 = arith.constant 120 : i32
    %241 = tpu.dynamic_rotate %208 by %c120_i32_147 dim 1 : vector<32x128xf32>, i32 -> vector<32x128xf32>
    %242 = vector.broadcast %14 : vector<1x128xf32> to vector<32x128xf32>
    %243 = arith.mulf %241, %242 : vector<32x128xf32>
    %244 = arith.truncf %243 : vector<32x128xf32> to vector<32x128xbf16>
    %c224_148 = arith.constant 224 : index
    %c0_149 = arith.constant 0 : index
    %245 = vector.load %arg11[%c224_148, %c0_149] : memref<288x128xbf16, #tpu.memory_space<vmem>>, vector<32x128xbf16>
    tpu.vector_store %arg11[%c224_148, %c0_149], %244 {strides = array<i32>} : memref<288x128xbf16, #tpu.memory_space<vmem>>, vector<32x128xbf16>,
    %c119_i32_150 = arith.constant 119 : i32
    %246 = tpu.dynamic_rotate %208 by %c119_i32_150 dim 1 : vector<32x128xf32>, i32 -> vector<32x128xf32>
    %247 = vector.broadcast %16 : vector<1x128xf32> to vector<32x128xf32>
    %248 = arith.mulf %246, %247 : vector<32x128xf32>
    %249 = arith.truncf %248 : vector<32x128xf32> to vector<32x128xbf16>
    %c256_151 = arith.constant 256 : index
    %c0_152 = arith.constant 0 : index
    %250 = vector.load %arg11[%c256_151, %c0_152] : memref<288x128xbf16, #tpu.memory_space<vmem>>, vector<32x128xbf16>
    tpu.vector_store %arg11[%c256_151, %c0_152], %249 {strides = array<i32>} : memref<288x128xbf16, #tpu.memory_space<vmem>>, vector<32x128xbf16>,
    %c3_153 = arith.constant 3 : index
    %c0_154 = arith.constant 0 : index
    %c0_155 = arith.constant 0 : index
    %251 = vector.load %arg1[%c3_153, %c0_154, %c0_155] : memref<15x32x288xbf16, #tpu.memory_space<vmem>>, vector<1x32x288xbf16>
    %252 = vector.shape_cast %251 : vector<1x32x288xbf16> to vector<32x288xbf16>
    %c0_156 = arith.constant 0 : index
    %c0_157 = arith.constant 0 : index
    %253 = vector.load %arg11[%c0_156, %c0_157] : memref<288x128xbf16, #tpu.memory_space<vmem>>, vector<288x128xbf16>
    %cst_158 = arith.constant dense<0.000000e+00> : vector<32x128xf32>
    %254 = tpu.matmul %252, %253, %cst_158 {dimension_numbers = #tpu.dot_dimension_numbers<[1], [0], [0], [1], [0, 0, 1, 1], [], []>} : vector<32x288xbf16>, vector<288x128xbf16>, vector<32x128xf32> -> vector<32x128xf32>
    %cst_159 = arith.constant dense<0.000000e+00> : vector<32xf32>
    %255 = vector.multi_reduction <add>, %254, %cst_159 [1] : vector<32x128xf32> to vector<32xf32>
    %256 = vector.shape_cast %255 : vector<32xf32> to vector<32x1xf32>
    %cst_160 = arith.constant dense<0.000000e+00> : vector<32x1xf32>
    %257 = tpu.matmul %0, %256, %cst_160 {dimension_numbers = #tpu.dot_dimension_numbers<[1], [0], [0], [1], [0, 0, 1, 1], [], []>} : vector<32x32xf32>, vector<32x1xf32>, vector<32x1xf32> -> vector<32x1xf32>
    %258 = vector.broadcast %257 : vector<32x1xf32> to vector<32x128xf32>
    %259 = arith.subf %254, %258 : vector<32x128xf32>
    %260 = arith.mulf %259, %259 : vector<32x128xf32>
    %cst_161 = arith.constant dense<0.000000e+00> : vector<32xf32>
    %261 = vector.multi_reduction <add>, %260, %cst_161 [1] : vector<32x128xf32> to vector<32xf32>
    %262 = vector.shape_cast %261 : vector<32xf32> to vector<32x1xf32>
    %cst_162 = arith.constant dense<0.000000e+00> : vector<32x1xf32>
    %263 = tpu.matmul %0, %262, %cst_162 {dimension_numbers = #tpu.dot_dimension_numbers<[1], [0], [0], [1], [0, 0, 1, 1], [], []>} : vector<32x32xf32>, vector<32x1xf32>, vector<32x1xf32> -> vector<32x1xf32>
    %cst_163 = arith.constant 9.99999974E-6 : f32
    %264 = vector.broadcast %cst_163 : f32 to vector<32x1xf32>
    %265 = arith.addf %263, %264 : vector<32x1xf32>
    %266 = math.rsqrt %265 : vector<32x1xf32>
    %c2_164 = arith.constant 2 : index
    %c0_165 = arith.constant 0 : index
    %c0_166 = arith.constant 0 : index
    %267 = vector.load %arg4[%c2_164, %c0_165, %c0_166] : memref<10x32x1xf32, #tpu.memory_space<vmem>>, vector<1x32x1xf32>
    %268 = vector.shape_cast %267 : vector<1x32x1xf32> to vector<32x1xf32>
    %269 = arith.mulf %266, %268 : vector<32x1xf32>
    %270 = vector.broadcast %269 : vector<32x1xf32> to vector<32x128xf32>
    %271 = arith.mulf %259, %270 : vector<32x128xf32>
    %c2_167 = arith.constant 2 : index
    %c0_168 = arith.constant 0 : index
    %c0_169 = arith.constant 0 : index
    %272 = vector.load %arg5[%c2_167, %c0_168, %c0_169] : memref<10x32x1xf32, #tpu.memory_space<vmem>>, vector<1x32x1xf32>
    %273 = vector.shape_cast %272 : vector<1x32x1xf32> to vector<32x1xf32>
    %274 = vector.broadcast %273 : vector<32x1xf32> to vector<32x128xf32>
    %275 = arith.addf %271, %274 : vector<32x128xf32>
    %cst_170 = arith.constant 0.000000e+00 : f32
    %276 = vector.broadcast %cst_170 : f32 to vector<32x128xf32>
    %277 = arith.maximumf %275, %276 : vector<32x128xf32>
    %c9_i32_171 = arith.constant 9 : i32
    %278 = tpu.dynamic_rotate %277 by %c9_i32_171 dim 1 : vector<32x128xf32>, i32 -> vector<32x128xf32>
    %279 = vector.broadcast %2 : vector<1x128xf32> to vector<32x128xf32>
    %280 = arith.mulf %278, %279 : vector<32x128xf32>
    %281 = arith.truncf %280 : vector<32x128xf32> to vector<32x128xbf16>
    %c0_172 = arith.constant 0 : index
    %c0_173 = arith.constant 0 : index
    %282 = vector.load %arg11[%c0_172, %c0_173] : memref<288x128xbf16, #tpu.memory_space<vmem>>, vector<32x128xbf16>
    tpu.vector_store %arg11[%c0_172, %c0_173], %281 {strides = array<i32>} : memref<288x128xbf16, #tpu.memory_space<vmem>>, vector<32x128xbf16>,
    %c8_i32_174 = arith.constant 8 : i32
    %283 = tpu.dynamic_rotate %277 by %c8_i32_174 dim 1 : vector<32x128xf32>, i32 -> vector<32x128xf32>
    %284 = vector.broadcast %4 : vector<1x128xf32> to vector<32x128xf32>
    %285 = arith.mulf %283, %284 : vector<32x128xf32>
    %286 = arith.truncf %285 : vector<32x128xf32> to vector<32x128xbf16>
    %c32_175 = arith.constant 32 : index
    %c0_176 = arith.constant 0 : index
    %287 = vector.load %arg11[%c32_175, %c0_176] : memref<288x128xbf16, #tpu.memory_space<vmem>>, vector<32x128xbf16>
    tpu.vector_store %arg11[%c32_175, %c0_176], %286 {strides = array<i32>} : memref<288x128xbf16, #tpu.memory_space<vmem>>, vector<32x128xbf16>,
    %c7_i32_177 = arith.constant 7 : i32
    %288 = tpu.dynamic_rotate %277 by %c7_i32_177 dim 1 : vector<32x128xf32>, i32 -> vector<32x128xf32>
    %289 = vector.broadcast %6 : vector<1x128xf32> to vector<32x128xf32>
    %290 = arith.mulf %288, %289 : vector<32x128xf32>
    %291 = arith.truncf %290 : vector<32x128xf32> to vector<32x128xbf16>
    %c64_178 = arith.constant 64 : index
    %c0_179 = arith.constant 0 : index
    %292 = vector.load %arg11[%c64_178, %c0_179] : memref<288x128xbf16, #tpu.memory_space<vmem>>, vector<32x128xbf16>
    tpu.vector_store %arg11[%c64_178, %c0_179], %291 {strides = array<i32>} : memref<288x128xbf16, #tpu.memory_space<vmem>>, vector<32x128xbf16>,
    %c1_i32_180 = arith.constant 1 : i32
    %293 = tpu.dynamic_rotate %277 by %c1_i32_180 dim 1 : vector<32x128xf32>, i32 -> vector<32x128xf32>
    %294 = vector.broadcast %8 : vector<1x128xf32> to vector<32x128xf32>
    %295 = arith.mulf %293, %294 : vector<32x128xf32>
    %296 = arith.truncf %295 : vector<32x128xf32> to vector<32x128xbf16>
    %c96_181 = arith.constant 96 : index
    %c0_182 = arith.constant 0 : index
    %297 = vector.load %arg11[%c96_181, %c0_182] : memref<288x128xbf16, #tpu.memory_space<vmem>>, vector<32x128xbf16>
    tpu.vector_store %arg11[%c96_181, %c0_182], %296 {strides = array<i32>} : memref<288x128xbf16, #tpu.memory_space<vmem>>, vector<32x128xbf16>,
    %298 = arith.truncf %277 : vector<32x128xf32> to vector<32x128xbf16>
    %c128_183 = arith.constant 128 : index
    %c0_184 = arith.constant 0 : index
    %299 = vector.load %arg11[%c128_183, %c0_184] : memref<288x128xbf16, #tpu.memory_space<vmem>>, vector<32x128xbf16>
    tpu.vector_store %arg11[%c128_183, %c0_184], %298 {strides = array<i32>} : memref<288x128xbf16, #tpu.memory_space<vmem>>, vector<32x128xbf16>,
    %c127_i32_185 = arith.constant 127 : i32
    %300 = tpu.dynamic_rotate %277 by %c127_i32_185 dim 1 : vector<32x128xf32>, i32 -> vector<32x128xf32>
    %301 = vector.broadcast %10 : vector<1x128xf32> to vector<32x128xf32>
    %302 = arith.mulf %300, %301 : vector<32x128xf32>
    %303 = arith.truncf %302 : vector<32x128xf32> to vector<32x128xbf16>
    %c160_186 = arith.constant 160 : index
    %c0_187 = arith.constant 0 : index
    %304 = vector.load %arg11[%c160_186, %c0_187] : memref<288x128xbf16, #tpu.memory_space<vmem>>, vector<32x128xbf16>
    tpu.vector_store %arg11[%c160_186, %c0_187], %303 {strides = array<i32>} : memref<288x128xbf16, #tpu.memory_space<vmem>>, vector<32x128xbf16>,
    %c121_i32_188 = arith.constant 121 : i32
    %305 = tpu.dynamic_rotate %277 by %c121_i32_188 dim 1 : vector<32x128xf32>, i32 -> vector<32x128xf32>
    %306 = vector.broadcast %12 : vector<1x128xf32> to vector<32x128xf32>
    %307 = arith.mulf %305, %306 : vector<32x128xf32>
    %308 = arith.truncf %307 : vector<32x128xf32> to vector<32x128xbf16>
    %c192_189 = arith.constant 192 : index
    %c0_190 = arith.constant 0 : index
    %309 = vector.load %arg11[%c192_189, %c0_190] : memref<288x128xbf16, #tpu.memory_space<vmem>>, vector<32x128xbf16>
    tpu.vector_store %arg11[%c192_189, %c0_190], %308 {strides = array<i32>} : memref<288x128xbf16, #tpu.memory_space<vmem>>, vector<32x128xbf16>,
    %c120_i32_191 = arith.constant 120 : i32
    %310 = tpu.dynamic_rotate %277 by %c120_i32_191 dim 1 : vector<32x128xf32>, i32 -> vector<32x128xf32>
    %311 = vector.broadcast %14 : vector<1x128xf32> to vector<32x128xf32>
    %312 = arith.mulf %310, %311 : vector<32x128xf32>
    %313 = arith.truncf %312 : vector<32x128xf32> to vector<32x128xbf16>
    %c224_192 = arith.constant 224 : index
    %c0_193 = arith.constant 0 : index
    %314 = vector.load %arg11[%c224_192, %c0_193] : memref<288x128xbf16, #tpu.memory_space<vmem>>, vector<32x128xbf16>
    tpu.vector_store %arg11[%c224_192, %c0_193], %313 {strides = array<i32>} : memref<288x128xbf16, #tpu.memory_space<vmem>>, vector<32x128xbf16>,
    %c119_i32_194 = arith.constant 119 : i32
    %315 = tpu.dynamic_rotate %277 by %c119_i32_194 dim 1 : vector<32x128xf32>, i32 -> vector<32x128xf32>
    %316 = vector.broadcast %16 : vector<1x128xf32> to vector<32x128xf32>
    %317 = arith.mulf %315, %316 : vector<32x128xf32>
    %318 = arith.truncf %317 : vector<32x128xf32> to vector<32x128xbf16>
    %c256_195 = arith.constant 256 : index
    %c0_196 = arith.constant 0 : index
    %319 = vector.load %arg11[%c256_195, %c0_196] : memref<288x128xbf16, #tpu.memory_space<vmem>>, vector<32x128xbf16>
    tpu.vector_store %arg11[%c256_195, %c0_196], %318 {strides = array<i32>} : memref<288x128xbf16, #tpu.memory_space<vmem>>, vector<32x128xbf16>,
    %c4 = arith.constant 4 : index
    %c0_197 = arith.constant 0 : index
    %c0_198 = arith.constant 0 : index
    %320 = vector.load %arg1[%c4, %c0_197, %c0_198] : memref<15x32x288xbf16, #tpu.memory_space<vmem>>, vector<1x32x288xbf16>
    %321 = vector.shape_cast %320 : vector<1x32x288xbf16> to vector<32x288xbf16>
    %c0_199 = arith.constant 0 : index
    %c0_200 = arith.constant 0 : index
    %322 = vector.load %arg11[%c0_199, %c0_200] : memref<288x128xbf16, #tpu.memory_space<vmem>>, vector<288x128xbf16>
    %cst_201 = arith.constant dense<0.000000e+00> : vector<32x128xf32>
    %323 = tpu.matmul %321, %322, %cst_201 {dimension_numbers = #tpu.dot_dimension_numbers<[1], [0], [0], [1], [0, 0, 1, 1], [], []>} : vector<32x288xbf16>, vector<288x128xbf16>, vector<32x128xf32> -> vector<32x128xf32>
    %cst_202 = arith.constant dense<0.000000e+00> : vector<32xf32>
    %324 = vector.multi_reduction <add>, %323, %cst_202 [1] : vector<32x128xf32> to vector<32xf32>
    %325 = vector.shape_cast %324 : vector<32xf32> to vector<32x1xf32>
    %cst_203 = arith.constant dense<0.000000e+00> : vector<32x1xf32>
    %326 = tpu.matmul %0, %325, %cst_203 {dimension_numbers = #tpu.dot_dimension_numbers<[1], [0], [0], [1], [0, 0, 1, 1], [], []>} : vector<32x32xf32>, vector<32x1xf32>, vector<32x1xf32> -> vector<32x1xf32>
    %327 = vector.broadcast %326 : vector<32x1xf32> to vector<32x128xf32>
    %328 = arith.subf %323, %327 : vector<32x128xf32>
    %329 = arith.mulf %328, %328 : vector<32x128xf32>
    %cst_204 = arith.constant dense<0.000000e+00> : vector<32xf32>
    %330 = vector.multi_reduction <add>, %329, %cst_204 [1] : vector<32x128xf32> to vector<32xf32>
    %331 = vector.shape_cast %330 : vector<32xf32> to vector<32x1xf32>
    %cst_205 = arith.constant dense<0.000000e+00> : vector<32x1xf32>
    %332 = tpu.matmul %0, %331, %cst_205 {dimension_numbers = #tpu.dot_dimension_numbers<[1], [0], [0], [1], [0, 0, 1, 1], [], []>} : vector<32x32xf32>, vector<32x1xf32>, vector<32x1xf32> -> vector<32x1xf32>
    %cst_206 = arith.constant 9.99999974E-6 : f32
    %333 = vector.broadcast %cst_206 : f32 to vector<32x1xf32>
    %334 = arith.addf %332, %333 : vector<32x1xf32>
    %335 = math.rsqrt %334 : vector<32x1xf32>
    %c3_207 = arith.constant 3 : index
    %c0_208 = arith.constant 0 : index
    %c0_209 = arith.constant 0 : index
    %336 = vector.load %arg4[%c3_207, %c0_208, %c0_209] : memref<10x32x1xf32, #tpu.memory_space<vmem>>, vector<1x32x1xf32>
    %337 = vector.shape_cast %336 : vector<1x32x1xf32> to vector<32x1xf32>
    %338 = arith.mulf %335, %337 : vector<32x1xf32>
    %339 = vector.broadcast %338 : vector<32x1xf32> to vector<32x128xf32>
    %340 = arith.mulf %328, %339 : vector<32x128xf32>
    %c3_210 = arith.constant 3 : index
    %c0_211 = arith.constant 0 : index
    %c0_212 = arith.constant 0 : index
    %341 = vector.load %arg5[%c3_210, %c0_211, %c0_212] : memref<10x32x1xf32, #tpu.memory_space<vmem>>, vector<1x32x1xf32>
    %342 = vector.shape_cast %341 : vector<1x32x1xf32> to vector<32x1xf32>
    %343 = vector.broadcast %342 : vector<32x1xf32> to vector<32x128xf32>
    %344 = arith.addf %340, %343 : vector<32x128xf32>
    %cst_213 = arith.constant 0.000000e+00 : f32
    %345 = vector.broadcast %cst_213 : f32 to vector<32x128xf32>
    %346 = arith.maximumf %344, %345 : vector<32x128xf32>
    %c9_i32_214 = arith.constant 9 : i32
    %347 = tpu.dynamic_rotate %346 by %c9_i32_214 dim 1 : vector<32x128xf32>, i32 -> vector<32x128xf32>
    %348 = vector.broadcast %2 : vector<1x128xf32> to vector<32x128xf32>
    %349 = arith.mulf %347, %348 : vector<32x128xf32>
    %350 = arith.truncf %349 : vector<32x128xf32> to vector<32x128xbf16>
    %c0_215 = arith.constant 0 : index
    %c0_216 = arith.constant 0 : index
    %351 = vector.load %arg11[%c0_215, %c0_216] : memref<288x128xbf16, #tpu.memory_space<vmem>>, vector<32x128xbf16>
    tpu.vector_store %arg11[%c0_215, %c0_216], %350 {strides = array<i32>} : memref<288x128xbf16, #tpu.memory_space<vmem>>, vector<32x128xbf16>,
    %c8_i32_217 = arith.constant 8 : i32
    %352 = tpu.dynamic_rotate %346 by %c8_i32_217 dim 1 : vector<32x128xf32>, i32 -> vector<32x128xf32>
    %353 = vector.broadcast %4 : vector<1x128xf32> to vector<32x128xf32>
    %354 = arith.mulf %352, %353 : vector<32x128xf32>
    %355 = arith.truncf %354 : vector<32x128xf32> to vector<32x128xbf16>
    %c32_218 = arith.constant 32 : index
    %c0_219 = arith.constant 0 : index
    %356 = vector.load %arg11[%c32_218, %c0_219] : memref<288x128xbf16, #tpu.memory_space<vmem>>, vector<32x128xbf16>
    tpu.vector_store %arg11[%c32_218, %c0_219], %355 {strides = array<i32>} : memref<288x128xbf16, #tpu.memory_space<vmem>>, vector<32x128xbf16>,
    %c7_i32_220 = arith.constant 7 : i32
    %357 = tpu.dynamic_rotate %346 by %c7_i32_220 dim 1 : vector<32x128xf32>, i32 -> vector<32x128xf32>
    %358 = vector.broadcast %6 : vector<1x128xf32> to vector<32x128xf32>
    %359 = arith.mulf %357, %358 : vector<32x128xf32>
    %360 = arith.truncf %359 : vector<32x128xf32> to vector<32x128xbf16>
    %c64_221 = arith.constant 64 : index
    %c0_222 = arith.constant 0 : index
    %361 = vector.load %arg11[%c64_221, %c0_222] : memref<288x128xbf16, #tpu.memory_space<vmem>>, vector<32x128xbf16>
    tpu.vector_store %arg11[%c64_221, %c0_222], %360 {strides = array<i32>} : memref<288x128xbf16, #tpu.memory_space<vmem>>, vector<32x128xbf16>,
    %c1_i32_223 = arith.constant 1 : i32
    %362 = tpu.dynamic_rotate %346 by %c1_i32_223 dim 1 : vector<32x128xf32>, i32 -> vector<32x128xf32>
    %363 = vector.broadcast %8 : vector<1x128xf32> to vector<32x128xf32>
    %364 = arith.mulf %362, %363 : vector<32x128xf32>
    %365 = arith.truncf %364 : vector<32x128xf32> to vector<32x128xbf16>
    %c96_224 = arith.constant 96 : index
    %c0_225 = arith.constant 0 : index
    %366 = vector.load %arg11[%c96_224, %c0_225] : memref<288x128xbf16, #tpu.memory_space<vmem>>, vector<32x128xbf16>
    tpu.vector_store %arg11[%c96_224, %c0_225], %365 {strides = array<i32>} : memref<288x128xbf16, #tpu.memory_space<vmem>>, vector<32x128xbf16>,
    %367 = arith.truncf %346 : vector<32x128xf32> to vector<32x128xbf16>
    %c128_226 = arith.constant 128 : index
    %c0_227 = arith.constant 0 : index
    %368 = vector.load %arg11[%c128_226, %c0_227] : memref<288x128xbf16, #tpu.memory_space<vmem>>, vector<32x128xbf16>
    tpu.vector_store %arg11[%c128_226, %c0_227], %367 {strides = array<i32>} : memref<288x128xbf16, #tpu.memory_space<vmem>>, vector<32x128xbf16>,
    %c127_i32_228 = arith.constant 127 : i32
    %369 = tpu.dynamic_rotate %346 by %c127_i32_228 dim 1 : vector<32x128xf32>, i32 -> vector<32x128xf32>
    %370 = vector.broadcast %10 : vector<1x128xf32> to vector<32x128xf32>
    %371 = arith.mulf %369, %370 : vector<32x128xf32>
    %372 = arith.truncf %371 : vector<32x128xf32> to vector<32x128xbf16>
    %c160_229 = arith.constant 160 : index
    %c0_230 = arith.constant 0 : index
    %373 = vector.load %arg11[%c160_229, %c0_230] : memref<288x128xbf16, #tpu.memory_space<vmem>>, vector<32x128xbf16>
    tpu.vector_store %arg11[%c160_229, %c0_230], %372 {strides = array<i32>} : memref<288x128xbf16, #tpu.memory_space<vmem>>, vector<32x128xbf16>,
    %c121_i32_231 = arith.constant 121 : i32
    %374 = tpu.dynamic_rotate %346 by %c121_i32_231 dim 1 : vector<32x128xf32>, i32 -> vector<32x128xf32>
    %375 = vector.broadcast %12 : vector<1x128xf32> to vector<32x128xf32>
    %376 = arith.mulf %374, %375 : vector<32x128xf32>
    %377 = arith.truncf %376 : vector<32x128xf32> to vector<32x128xbf16>
    %c192_232 = arith.constant 192 : index
    %c0_233 = arith.constant 0 : index
    %378 = vector.load %arg11[%c192_232, %c0_233] : memref<288x128xbf16, #tpu.memory_space<vmem>>, vector<32x128xbf16>
    tpu.vector_store %arg11[%c192_232, %c0_233], %377 {strides = array<i32>} : memref<288x128xbf16, #tpu.memory_space<vmem>>, vector<32x128xbf16>,
    %c120_i32_234 = arith.constant 120 : i32
    %379 = tpu.dynamic_rotate %346 by %c120_i32_234 dim 1 : vector<32x128xf32>, i32 -> vector<32x128xf32>
    %380 = vector.broadcast %14 : vector<1x128xf32> to vector<32x128xf32>
    %381 = arith.mulf %379, %380 : vector<32x128xf32>
    %382 = arith.truncf %381 : vector<32x128xf32> to vector<32x128xbf16>
    %c224_235 = arith.constant 224 : index
    %c0_236 = arith.constant 0 : index
    %383 = vector.load %arg11[%c224_235, %c0_236] : memref<288x128xbf16, #tpu.memory_space<vmem>>, vector<32x128xbf16>
    tpu.vector_store %arg11[%c224_235, %c0_236], %382 {strides = array<i32>} : memref<288x128xbf16, #tpu.memory_space<vmem>>, vector<32x128xbf16>,
    %c119_i32_237 = arith.constant 119 : i32
    %384 = tpu.dynamic_rotate %346 by %c119_i32_237 dim 1 : vector<32x128xf32>, i32 -> vector<32x128xf32>
    %385 = vector.broadcast %16 : vector<1x128xf32> to vector<32x128xf32>
    %386 = arith.mulf %384, %385 : vector<32x128xf32>
    %387 = arith.truncf %386 : vector<32x128xf32> to vector<32x128xbf16>
    %c256_238 = arith.constant 256 : index
    %c0_239 = arith.constant 0 : index
    %388 = vector.load %arg11[%c256_238, %c0_239] : memref<288x128xbf16, #tpu.memory_space<vmem>>, vector<32x128xbf16>
    tpu.vector_store %arg11[%c256_238, %c0_239], %387 {strides = array<i32>} : memref<288x128xbf16, #tpu.memory_space<vmem>>, vector<32x128xbf16>,
    %c5_240 = arith.constant 5 : index
    %c0_241 = arith.constant 0 : index
    %c0_242 = arith.constant 0 : index
    %389 = vector.load %arg1[%c5_240, %c0_241, %c0_242] : memref<15x32x288xbf16, #tpu.memory_space<vmem>>, vector<1x32x288xbf16>
    %390 = vector.shape_cast %389 : vector<1x32x288xbf16> to vector<32x288xbf16>
    %c0_243 = arith.constant 0 : index
    %c0_244 = arith.constant 0 : index
    %391 = vector.load %arg11[%c0_243, %c0_244] : memref<288x128xbf16, #tpu.memory_space<vmem>>, vector<288x128xbf16>
    %cst_245 = arith.constant dense<0.000000e+00> : vector<32x128xf32>
    %392 = tpu.matmul %390, %391, %cst_245 {dimension_numbers = #tpu.dot_dimension_numbers<[1], [0], [0], [1], [0, 0, 1, 1], [], []>} : vector<32x288xbf16>, vector<288x128xbf16>, vector<32x128xf32> -> vector<32x128xf32>
    %393 = arith.addf %277, %392 : vector<32x128xf32>
    %c1_246 = arith.constant 1 : index
    %c0_247 = arith.constant 0 : index
    %c0_248 = arith.constant 0 : index
    %394 = vector.load %arg6[%c1_246, %c0_247, %c0_248] : memref<5x32x1xf32, #tpu.memory_space<vmem>>, vector<1x32x1xf32>
    %395 = vector.shape_cast %394 : vector<1x32x1xf32> to vector<32x1xf32>
    %396 = vector.broadcast %395 : vector<32x1xf32> to vector<32x128xf32>
    %397 = arith.addf %393, %396 : vector<32x128xf32>
    %cst_249 = arith.constant 0.000000e+00 : f32
    %398 = vector.broadcast %cst_249 : f32 to vector<32x128xf32>
    %399 = arith.maximumf %397, %398 : vector<32x128xf32>
    %c9_i32_250 = arith.constant 9 : i32
    %400 = tpu.dynamic_rotate %399 by %c9_i32_250 dim 1 : vector<32x128xf32>, i32 -> vector<32x128xf32>
    %401 = vector.broadcast %2 : vector<1x128xf32> to vector<32x128xf32>
    %402 = arith.mulf %400, %401 : vector<32x128xf32>
    %403 = arith.truncf %402 : vector<32x128xf32> to vector<32x128xbf16>
    %c0_251 = arith.constant 0 : index
    %c0_252 = arith.constant 0 : index
    %404 = vector.load %arg11[%c0_251, %c0_252] : memref<288x128xbf16, #tpu.memory_space<vmem>>, vector<32x128xbf16>
    tpu.vector_store %arg11[%c0_251, %c0_252], %403 {strides = array<i32>} : memref<288x128xbf16, #tpu.memory_space<vmem>>, vector<32x128xbf16>,
    %c8_i32_253 = arith.constant 8 : i32
    %405 = tpu.dynamic_rotate %399 by %c8_i32_253 dim 1 : vector<32x128xf32>, i32 -> vector<32x128xf32>
    %406 = vector.broadcast %4 : vector<1x128xf32> to vector<32x128xf32>
    %407 = arith.mulf %405, %406 : vector<32x128xf32>
    %408 = arith.truncf %407 : vector<32x128xf32> to vector<32x128xbf16>
    %c32_254 = arith.constant 32 : index
    %c0_255 = arith.constant 0 : index
    %409 = vector.load %arg11[%c32_254, %c0_255] : memref<288x128xbf16, #tpu.memory_space<vmem>>, vector<32x128xbf16>
    tpu.vector_store %arg11[%c32_254, %c0_255], %408 {strides = array<i32>} : memref<288x128xbf16, #tpu.memory_space<vmem>>, vector<32x128xbf16>,
    %c7_i32_256 = arith.constant 7 : i32
    %410 = tpu.dynamic_rotate %399 by %c7_i32_256 dim 1 : vector<32x128xf32>, i32 -> vector<32x128xf32>
    %411 = vector.broadcast %6 : vector<1x128xf32> to vector<32x128xf32>
    %412 = arith.mulf %410, %411 : vector<32x128xf32>
    %413 = arith.truncf %412 : vector<32x128xf32> to vector<32x128xbf16>
    %c64_257 = arith.constant 64 : index
    %c0_258 = arith.constant 0 : index
    %414 = vector.load %arg11[%c64_257, %c0_258] : memref<288x128xbf16, #tpu.memory_space<vmem>>, vector<32x128xbf16>
    tpu.vector_store %arg11[%c64_257, %c0_258], %413 {strides = array<i32>} : memref<288x128xbf16, #tpu.memory_space<vmem>>, vector<32x128xbf16>,
    %c1_i32_259 = arith.constant 1 : i32
    %415 = tpu.dynamic_rotate %399 by %c1_i32_259 dim 1 : vector<32x128xf32>, i32 -> vector<32x128xf32>
    %416 = vector.broadcast %8 : vector<1x128xf32> to vector<32x128xf32>
    %417 = arith.mulf %415, %416 : vector<32x128xf32>
    %418 = arith.truncf %417 : vector<32x128xf32> to vector<32x128xbf16>
    %c96_260 = arith.constant 96 : index
    %c0_261 = arith.constant 0 : index
    %419 = vector.load %arg11[%c96_260, %c0_261] : memref<288x128xbf16, #tpu.memory_space<vmem>>, vector<32x128xbf16>
    tpu.vector_store %arg11[%c96_260, %c0_261], %418 {strides = array<i32>} : memref<288x128xbf16, #tpu.memory_space<vmem>>, vector<32x128xbf16>,
    %420 = arith.truncf %399 : vector<32x128xf32> to vector<32x128xbf16>
    %c128_262 = arith.constant 128 : index
    %c0_263 = arith.constant 0 : index
    %421 = vector.load %arg11[%c128_262, %c0_263] : memref<288x128xbf16, #tpu.memory_space<vmem>>, vector<32x128xbf16>
    tpu.vector_store %arg11[%c128_262, %c0_263], %420 {strides = array<i32>} : memref<288x128xbf16, #tpu.memory_space<vmem>>, vector<32x128xbf16>,
    %c127_i32_264 = arith.constant 127 : i32
    %422 = tpu.dynamic_rotate %399 by %c127_i32_264 dim 1 : vector<32x128xf32>, i32 -> vector<32x128xf32>
    %423 = vector.broadcast %10 : vector<1x128xf32> to vector<32x128xf32>
    %424 = arith.mulf %422, %423 : vector<32x128xf32>
    %425 = arith.truncf %424 : vector<32x128xf32> to vector<32x128xbf16>
    %c160_265 = arith.constant 160 : index
    %c0_266 = arith.constant 0 : index
    %426 = vector.load %arg11[%c160_265, %c0_266] : memref<288x128xbf16, #tpu.memory_space<vmem>>, vector<32x128xbf16>
    tpu.vector_store %arg11[%c160_265, %c0_266], %425 {strides = array<i32>} : memref<288x128xbf16, #tpu.memory_space<vmem>>, vector<32x128xbf16>,
    %c121_i32_267 = arith.constant 121 : i32
    %427 = tpu.dynamic_rotate %399 by %c121_i32_267 dim 1 : vector<32x128xf32>, i32 -> vector<32x128xf32>
    %428 = vector.broadcast %12 : vector<1x128xf32> to vector<32x128xf32>
    %429 = arith.mulf %427, %428 : vector<32x128xf32>
    %430 = arith.truncf %429 : vector<32x128xf32> to vector<32x128xbf16>
    %c192_268 = arith.constant 192 : index
    %c0_269 = arith.constant 0 : index
    %431 = vector.load %arg11[%c192_268, %c0_269] : memref<288x128xbf16, #tpu.memory_space<vmem>>, vector<32x128xbf16>
    tpu.vector_store %arg11[%c192_268, %c0_269], %430 {strides = array<i32>} : memref<288x128xbf16, #tpu.memory_space<vmem>>, vector<32x128xbf16>,
    %c120_i32_270 = arith.constant 120 : i32
    %432 = tpu.dynamic_rotate %399 by %c120_i32_270 dim 1 : vector<32x128xf32>, i32 -> vector<32x128xf32>
    %433 = vector.broadcast %14 : vector<1x128xf32> to vector<32x128xf32>
    %434 = arith.mulf %432, %433 : vector<32x128xf32>
    %435 = arith.truncf %434 : vector<32x128xf32> to vector<32x128xbf16>
    %c224_271 = arith.constant 224 : index
    %c0_272 = arith.constant 0 : index
    %436 = vector.load %arg11[%c224_271, %c0_272] : memref<288x128xbf16, #tpu.memory_space<vmem>>, vector<32x128xbf16>
    tpu.vector_store %arg11[%c224_271, %c0_272], %435 {strides = array<i32>} : memref<288x128xbf16, #tpu.memory_space<vmem>>, vector<32x128xbf16>,
    %c119_i32_273 = arith.constant 119 : i32
    %437 = tpu.dynamic_rotate %399 by %c119_i32_273 dim 1 : vector<32x128xf32>, i32 -> vector<32x128xf32>
    %438 = vector.broadcast %16 : vector<1x128xf32> to vector<32x128xf32>
    %439 = arith.mulf %437, %438 : vector<32x128xf32>
    %440 = arith.truncf %439 : vector<32x128xf32> to vector<32x128xbf16>
    %c256_274 = arith.constant 256 : index
    %c0_275 = arith.constant 0 : index
    %441 = vector.load %arg11[%c256_274, %c0_275] : memref<288x128xbf16, #tpu.memory_space<vmem>>, vector<32x128xbf16>
    tpu.vector_store %arg11[%c256_274, %c0_275], %440 {strides = array<i32>} : memref<288x128xbf16, #tpu.memory_space<vmem>>, vector<32x128xbf16>,
    %c6_276 = arith.constant 6 : index
    %c0_277 = arith.constant 0 : index
    %c0_278 = arith.constant 0 : index
    %442 = vector.load %arg1[%c6_276, %c0_277, %c0_278] : memref<15x32x288xbf16, #tpu.memory_space<vmem>>, vector<1x32x288xbf16>
    %443 = vector.shape_cast %442 : vector<1x32x288xbf16> to vector<32x288xbf16>
    %c0_279 = arith.constant 0 : index
    %c0_280 = arith.constant 0 : index
    %444 = vector.load %arg11[%c0_279, %c0_280] : memref<288x128xbf16, #tpu.memory_space<vmem>>, vector<288x128xbf16>
    %cst_281 = arith.constant dense<0.000000e+00> : vector<32x128xf32>
    %445 = tpu.matmul %443, %444, %cst_281 {dimension_numbers = #tpu.dot_dimension_numbers<[1], [0], [0], [1], [0, 0, 1, 1], [], []>} : vector<32x288xbf16>, vector<288x128xbf16>, vector<32x128xf32> -> vector<32x128xf32>
    %cst_282 = arith.constant dense<0.000000e+00> : vector<32xf32>
    %446 = vector.multi_reduction <add>, %445, %cst_282 [1] : vector<32x128xf32> to vector<32xf32>
    %447 = vector.shape_cast %446 : vector<32xf32> to vector<32x1xf32>
    %cst_283 = arith.constant dense<0.000000e+00> : vector<32x1xf32>
    %448 = tpu.matmul %0, %447, %cst_283 {dimension_numbers = #tpu.dot_dimension_numbers<[1], [0], [0], [1], [0, 0, 1, 1], [], []>} : vector<32x32xf32>, vector<32x1xf32>, vector<32x1xf32> -> vector<32x1xf32>
    %449 = vector.broadcast %448 : vector<32x1xf32> to vector<32x128xf32>
    %450 = arith.subf %445, %449 : vector<32x128xf32>
    %451 = arith.mulf %450, %450 : vector<32x128xf32>
    %cst_284 = arith.constant dense<0.000000e+00> : vector<32xf32>
    %452 = vector.multi_reduction <add>, %451, %cst_284 [1] : vector<32x128xf32> to vector<32xf32>
    %453 = vector.shape_cast %452 : vector<32xf32> to vector<32x1xf32>
    %cst_285 = arith.constant dense<0.000000e+00> : vector<32x1xf32>
    %454 = tpu.matmul %0, %453, %cst_285 {dimension_numbers = #tpu.dot_dimension_numbers<[1], [0], [0], [1], [0, 0, 1, 1], [], []>} : vector<32x32xf32>, vector<32x1xf32>, vector<32x1xf32> -> vector<32x1xf32>
    %cst_286 = arith.constant 9.99999974E-6 : f32
    %455 = vector.broadcast %cst_286 : f32 to vector<32x1xf32>
    %456 = arith.addf %454, %455 : vector<32x1xf32>
    %457 = math.rsqrt %456 : vector<32x1xf32>
    %c4_287 = arith.constant 4 : index
    %c0_288 = arith.constant 0 : index
    %c0_289 = arith.constant 0 : index
    %458 = vector.load %arg4[%c4_287, %c0_288, %c0_289] : memref<10x32x1xf32, #tpu.memory_space<vmem>>, vector<1x32x1xf32>
    %459 = vector.shape_cast %458 : vector<1x32x1xf32> to vector<32x1xf32>
    %460 = arith.mulf %457, %459 : vector<32x1xf32>
    %461 = vector.broadcast %460 : vector<32x1xf32> to vector<32x128xf32>
    %462 = arith.mulf %450, %461 : vector<32x128xf32>
    %c4_290 = arith.constant 4 : index
    %c0_291 = arith.constant 0 : index
    %c0_292 = arith.constant 0 : index
    %463 = vector.load %arg5[%c4_290, %c0_291, %c0_292] : memref<10x32x1xf32, #tpu.memory_space<vmem>>, vector<1x32x1xf32>
    %464 = vector.shape_cast %463 : vector<1x32x1xf32> to vector<32x1xf32>
    %465 = vector.broadcast %464 : vector<32x1xf32> to vector<32x128xf32>
    %466 = arith.addf %462, %465 : vector<32x128xf32>
    %cst_293 = arith.constant 0.000000e+00 : f32
    %467 = vector.broadcast %cst_293 : f32 to vector<32x128xf32>
    %468 = arith.maximumf %466, %467 : vector<32x128xf32>
    %c9_i32_294 = arith.constant 9 : i32
    %469 = tpu.dynamic_rotate %468 by %c9_i32_294 dim 1 : vector<32x128xf32>, i32 -> vector<32x128xf32>
    %470 = vector.broadcast %2 : vector<1x128xf32> to vector<32x128xf32>
    %471 = arith.mulf %469, %470 : vector<32x128xf32>
    %472 = arith.truncf %471 : vector<32x128xf32> to vector<32x128xbf16>
    %c0_295 = arith.constant 0 : index
    %c0_296 = arith.constant 0 : index
    %473 = vector.load %arg11[%c0_295, %c0_296] : memref<288x128xbf16, #tpu.memory_space<vmem>>, vector<32x128xbf16>
    tpu.vector_store %arg11[%c0_295, %c0_296], %472 {strides = array<i32>} : memref<288x128xbf16, #tpu.memory_space<vmem>>, vector<32x128xbf16>,
    %c8_i32_297 = arith.constant 8 : i32
    %474 = tpu.dynamic_rotate %468 by %c8_i32_297 dim 1 : vector<32x128xf32>, i32 -> vector<32x128xf32>
    %475 = vector.broadcast %4 : vector<1x128xf32> to vector<32x128xf32>
    %476 = arith.mulf %474, %475 : vector<32x128xf32>
    %477 = arith.truncf %476 : vector<32x128xf32> to vector<32x128xbf16>
    %c32_298 = arith.constant 32 : index
    %c0_299 = arith.constant 0 : index
    %478 = vector.load %arg11[%c32_298, %c0_299] : memref<288x128xbf16, #tpu.memory_space<vmem>>, vector<32x128xbf16>
    tpu.vector_store %arg11[%c32_298, %c0_299], %477 {strides = array<i32>} : memref<288x128xbf16, #tpu.memory_space<vmem>>, vector<32x128xbf16>,
    %c7_i32_300 = arith.constant 7 : i32
    %479 = tpu.dynamic_rotate %468 by %c7_i32_300 dim 1 : vector<32x128xf32>, i32 -> vector<32x128xf32>
    %480 = vector.broadcast %6 : vector<1x128xf32> to vector<32x128xf32>
    %481 = arith.mulf %479, %480 : vector<32x128xf32>
    %482 = arith.truncf %481 : vector<32x128xf32> to vector<32x128xbf16>
    %c64_301 = arith.constant 64 : index
    %c0_302 = arith.constant 0 : index
    %483 = vector.load %arg11[%c64_301, %c0_302] : memref<288x128xbf16, #tpu.memory_space<vmem>>, vector<32x128xbf16>
    tpu.vector_store %arg11[%c64_301, %c0_302], %482 {strides = array<i32>} : memref<288x128xbf16, #tpu.memory_space<vmem>>, vector<32x128xbf16>,
    %c1_i32_303 = arith.constant 1 : i32
    %484 = tpu.dynamic_rotate %468 by %c1_i32_303 dim 1 : vector<32x128xf32>, i32 -> vector<32x128xf32>
    %485 = vector.broadcast %8 : vector<1x128xf32> to vector<32x128xf32>
    %486 = arith.mulf %484, %485 : vector<32x128xf32>
    %487 = arith.truncf %486 : vector<32x128xf32> to vector<32x128xbf16>
    %c96_304 = arith.constant 96 : index
    %c0_305 = arith.constant 0 : index
    %488 = vector.load %arg11[%c96_304, %c0_305] : memref<288x128xbf16, #tpu.memory_space<vmem>>, vector<32x128xbf16>
    tpu.vector_store %arg11[%c96_304, %c0_305], %487 {strides = array<i32>} : memref<288x128xbf16, #tpu.memory_space<vmem>>, vector<32x128xbf16>,
    %489 = arith.truncf %468 : vector<32x128xf32> to vector<32x128xbf16>
    %c128_306 = arith.constant 128 : index
    %c0_307 = arith.constant 0 : index
    %490 = vector.load %arg11[%c128_306, %c0_307] : memref<288x128xbf16, #tpu.memory_space<vmem>>, vector<32x128xbf16>
    tpu.vector_store %arg11[%c128_306, %c0_307], %489 {strides = array<i32>} : memref<288x128xbf16, #tpu.memory_space<vmem>>, vector<32x128xbf16>,
    %c127_i32_308 = arith.constant 127 : i32
    %491 = tpu.dynamic_rotate %468 by %c127_i32_308 dim 1 : vector<32x128xf32>, i32 -> vector<32x128xf32>
    %492 = vector.broadcast %10 : vector<1x128xf32> to vector<32x128xf32>
    %493 = arith.mulf %491, %492 : vector<32x128xf32>
    %494 = arith.truncf %493 : vector<32x128xf32> to vector<32x128xbf16>
    %c160_309 = arith.constant 160 : index
    %c0_310 = arith.constant 0 : index
    %495 = vector.load %arg11[%c160_309, %c0_310] : memref<288x128xbf16, #tpu.memory_space<vmem>>, vector<32x128xbf16>
    tpu.vector_store %arg11[%c160_309, %c0_310], %494 {strides = array<i32>} : memref<288x128xbf16, #tpu.memory_space<vmem>>, vector<32x128xbf16>,
    %c121_i32_311 = arith.constant 121 : i32
    %496 = tpu.dynamic_rotate %468 by %c121_i32_311 dim 1 : vector<32x128xf32>, i32 -> vector<32x128xf32>
    %497 = vector.broadcast %12 : vector<1x128xf32> to vector<32x128xf32>
    %498 = arith.mulf %496, %497 : vector<32x128xf32>
    %499 = arith.truncf %498 : vector<32x128xf32> to vector<32x128xbf16>
    %c192_312 = arith.constant 192 : index
    %c0_313 = arith.constant 0 : index
    %500 = vector.load %arg11[%c192_312, %c0_313] : memref<288x128xbf16, #tpu.memory_space<vmem>>, vector<32x128xbf16>
    tpu.vector_store %arg11[%c192_312, %c0_313], %499 {strides = array<i32>} : memref<288x128xbf16, #tpu.memory_space<vmem>>, vector<32x128xbf16>,
    %c120_i32_314 = arith.constant 120 : i32
    %501 = tpu.dynamic_rotate %468 by %c120_i32_314 dim 1 : vector<32x128xf32>, i32 -> vector<32x128xf32>
    %502 = vector.broadcast %14 : vector<1x128xf32> to vector<32x128xf32>
    %503 = arith.mulf %501, %502 : vector<32x128xf32>
    %504 = arith.truncf %503 : vector<32x128xf32> to vector<32x128xbf16>
    %c224_315 = arith.constant 224 : index
    %c0_316 = arith.constant 0 : index
    %505 = vector.load %arg11[%c224_315, %c0_316] : memref<288x128xbf16, #tpu.memory_space<vmem>>, vector<32x128xbf16>
    tpu.vector_store %arg11[%c224_315, %c0_316], %504 {strides = array<i32>} : memref<288x128xbf16, #tpu.memory_space<vmem>>, vector<32x128xbf16>,
    %c119_i32_317 = arith.constant 119 : i32
    %506 = tpu.dynamic_rotate %468 by %c119_i32_317 dim 1 : vector<32x128xf32>, i32 -> vector<32x128xf32>
    %507 = vector.broadcast %16 : vector<1x128xf32> to vector<32x128xf32>
    %508 = arith.mulf %506, %507 : vector<32x128xf32>
    %509 = arith.truncf %508 : vector<32x128xf32> to vector<32x128xbf16>
    %c256_318 = arith.constant 256 : index
    %c0_319 = arith.constant 0 : index
    %510 = vector.load %arg11[%c256_318, %c0_319] : memref<288x128xbf16, #tpu.memory_space<vmem>>, vector<32x128xbf16>
    tpu.vector_store %arg11[%c256_318, %c0_319], %509 {strides = array<i32>} : memref<288x128xbf16, #tpu.memory_space<vmem>>, vector<32x128xbf16>,
    %c7_320 = arith.constant 7 : index
    %c0_321 = arith.constant 0 : index
    %c0_322 = arith.constant 0 : index
    %511 = vector.load %arg1[%c7_320, %c0_321, %c0_322] : memref<15x32x288xbf16, #tpu.memory_space<vmem>>, vector<1x32x288xbf16>
    %512 = vector.shape_cast %511 : vector<1x32x288xbf16> to vector<32x288xbf16>
    %c0_323 = arith.constant 0 : index
    %c0_324 = arith.constant 0 : index
    %513 = vector.load %arg11[%c0_323, %c0_324] : memref<288x128xbf16, #tpu.memory_space<vmem>>, vector<288x128xbf16>
    %cst_325 = arith.constant dense<0.000000e+00> : vector<32x128xf32>
    %514 = tpu.matmul %512, %513, %cst_325 {dimension_numbers = #tpu.dot_dimension_numbers<[1], [0], [0], [1], [0, 0, 1, 1], [], []>} : vector<32x288xbf16>, vector<288x128xbf16>, vector<32x128xf32> -> vector<32x128xf32>
    %cst_326 = arith.constant dense<0.000000e+00> : vector<32xf32>
    %515 = vector.multi_reduction <add>, %514, %cst_326 [1] : vector<32x128xf32> to vector<32xf32>
    %516 = vector.shape_cast %515 : vector<32xf32> to vector<32x1xf32>
    %cst_327 = arith.constant dense<0.000000e+00> : vector<32x1xf32>
    %517 = tpu.matmul %0, %516, %cst_327 {dimension_numbers = #tpu.dot_dimension_numbers<[1], [0], [0], [1], [0, 0, 1, 1], [], []>} : vector<32x32xf32>, vector<32x1xf32>, vector<32x1xf32> -> vector<32x1xf32>
    %518 = vector.broadcast %517 : vector<32x1xf32> to vector<32x128xf32>
    %519 = arith.subf %514, %518 : vector<32x128xf32>
    %520 = arith.mulf %519, %519 : vector<32x128xf32>
    %cst_328 = arith.constant dense<0.000000e+00> : vector<32xf32>
    %521 = vector.multi_reduction <add>, %520, %cst_328 [1] : vector<32x128xf32> to vector<32xf32>
    %522 = vector.shape_cast %521 : vector<32xf32> to vector<32x1xf32>
    %cst_329 = arith.constant dense<0.000000e+00> : vector<32x1xf32>
    %523 = tpu.matmul %0, %522, %cst_329 {dimension_numbers = #tpu.dot_dimension_numbers<[1], [0], [0], [1], [0, 0, 1, 1], [], []>} : vector<32x32xf32>, vector<32x1xf32>, vector<32x1xf32> -> vector<32x1xf32>
    %cst_330 = arith.constant 9.99999974E-6 : f32
    %524 = vector.broadcast %cst_330 : f32 to vector<32x1xf32>
    %525 = arith.addf %523, %524 : vector<32x1xf32>
    %526 = math.rsqrt %525 : vector<32x1xf32>
    %c5_331 = arith.constant 5 : index
    %c0_332 = arith.constant 0 : index
    %c0_333 = arith.constant 0 : index
    %527 = vector.load %arg4[%c5_331, %c0_332, %c0_333] : memref<10x32x1xf32, #tpu.memory_space<vmem>>, vector<1x32x1xf32>
    %528 = vector.shape_cast %527 : vector<1x32x1xf32> to vector<32x1xf32>
    %529 = arith.mulf %526, %528 : vector<32x1xf32>
    %530 = vector.broadcast %529 : vector<32x1xf32> to vector<32x128xf32>
    %531 = arith.mulf %519, %530 : vector<32x128xf32>
    %c5_334 = arith.constant 5 : index
    %c0_335 = arith.constant 0 : index
    %c0_336 = arith.constant 0 : index
    %532 = vector.load %arg5[%c5_334, %c0_335, %c0_336] : memref<10x32x1xf32, #tpu.memory_space<vmem>>, vector<1x32x1xf32>
    %533 = vector.shape_cast %532 : vector<1x32x1xf32> to vector<32x1xf32>
    %534 = vector.broadcast %533 : vector<32x1xf32> to vector<32x128xf32>
    %535 = arith.addf %531, %534 : vector<32x128xf32>
    %cst_337 = arith.constant 0.000000e+00 : f32
    %536 = vector.broadcast %cst_337 : f32 to vector<32x128xf32>
    %537 = arith.maximumf %535, %536 : vector<32x128xf32>
    %c9_i32_338 = arith.constant 9 : i32
    %538 = tpu.dynamic_rotate %537 by %c9_i32_338 dim 1 : vector<32x128xf32>, i32 -> vector<32x128xf32>
    %539 = vector.broadcast %2 : vector<1x128xf32> to vector<32x128xf32>
    %540 = arith.mulf %538, %539 : vector<32x128xf32>
    %541 = arith.truncf %540 : vector<32x128xf32> to vector<32x128xbf16>
    %c0_339 = arith.constant 0 : index
    %c0_340 = arith.constant 0 : index
    %542 = vector.load %arg11[%c0_339, %c0_340] : memref<288x128xbf16, #tpu.memory_space<vmem>>, vector<32x128xbf16>
    tpu.vector_store %arg11[%c0_339, %c0_340], %541 {strides = array<i32>} : memref<288x128xbf16, #tpu.memory_space<vmem>>, vector<32x128xbf16>,
    %c8_i32_341 = arith.constant 8 : i32
    %543 = tpu.dynamic_rotate %537 by %c8_i32_341 dim 1 : vector<32x128xf32>, i32 -> vector<32x128xf32>
    %544 = vector.broadcast %4 : vector<1x128xf32> to vector<32x128xf32>
    %545 = arith.mulf %543, %544 : vector<32x128xf32>
    %546 = arith.truncf %545 : vector<32x128xf32> to vector<32x128xbf16>
    %c32_342 = arith.constant 32 : index
    %c0_343 = arith.constant 0 : index
    %547 = vector.load %arg11[%c32_342, %c0_343] : memref<288x128xbf16, #tpu.memory_space<vmem>>, vector<32x128xbf16>
    tpu.vector_store %arg11[%c32_342, %c0_343], %546 {strides = array<i32>} : memref<288x128xbf16, #tpu.memory_space<vmem>>, vector<32x128xbf16>,
    %c7_i32_344 = arith.constant 7 : i32
    %548 = tpu.dynamic_rotate %537 by %c7_i32_344 dim 1 : vector<32x128xf32>, i32 -> vector<32x128xf32>
    %549 = vector.broadcast %6 : vector<1x128xf32> to vector<32x128xf32>
    %550 = arith.mulf %548, %549 : vector<32x128xf32>
    %551 = arith.truncf %550 : vector<32x128xf32> to vector<32x128xbf16>
    %c64_345 = arith.constant 64 : index
    %c0_346 = arith.constant 0 : index
    %552 = vector.load %arg11[%c64_345, %c0_346] : memref<288x128xbf16, #tpu.memory_space<vmem>>, vector<32x128xbf16>
    tpu.vector_store %arg11[%c64_345, %c0_346], %551 {strides = array<i32>} : memref<288x128xbf16, #tpu.memory_space<vmem>>, vector<32x128xbf16>,
    %c1_i32_347 = arith.constant 1 : i32
    %553 = tpu.dynamic_rotate %537 by %c1_i32_347 dim 1 : vector<32x128xf32>, i32 -> vector<32x128xf32>
    %554 = vector.broadcast %8 : vector<1x128xf32> to vector<32x128xf32>
    %555 = arith.mulf %553, %554 : vector<32x128xf32>
    %556 = arith.truncf %555 : vector<32x128xf32> to vector<32x128xbf16>
    %c96_348 = arith.constant 96 : index
    %c0_349 = arith.constant 0 : index
    %557 = vector.load %arg11[%c96_348, %c0_349] : memref<288x128xbf16, #tpu.memory_space<vmem>>, vector<32x128xbf16>
    tpu.vector_store %arg11[%c96_348, %c0_349], %556 {strides = array<i32>} : memref<288x128xbf16, #tpu.memory_space<vmem>>, vector<32x128xbf16>,
    %558 = arith.truncf %537 : vector<32x128xf32> to vector<32x128xbf16>
    %c128_350 = arith.constant 128 : index
    %c0_351 = arith.constant 0 : index
    %559 = vector.load %arg11[%c128_350, %c0_351] : memref<288x128xbf16, #tpu.memory_space<vmem>>, vector<32x128xbf16>
    tpu.vector_store %arg11[%c128_350, %c0_351], %558 {strides = array<i32>} : memref<288x128xbf16, #tpu.memory_space<vmem>>, vector<32x128xbf16>,
    %c127_i32_352 = arith.constant 127 : i32
    %560 = tpu.dynamic_rotate %537 by %c127_i32_352 dim 1 : vector<32x128xf32>, i32 -> vector<32x128xf32>
    %561 = vector.broadcast %10 : vector<1x128xf32> to vector<32x128xf32>
    %562 = arith.mulf %560, %561 : vector<32x128xf32>
    %563 = arith.truncf %562 : vector<32x128xf32> to vector<32x128xbf16>
    %c160_353 = arith.constant 160 : index
    %c0_354 = arith.constant 0 : index
    %564 = vector.load %arg11[%c160_353, %c0_354] : memref<288x128xbf16, #tpu.memory_space<vmem>>, vector<32x128xbf16>
    tpu.vector_store %arg11[%c160_353, %c0_354], %563 {strides = array<i32>} : memref<288x128xbf16, #tpu.memory_space<vmem>>, vector<32x128xbf16>,
    %c121_i32_355 = arith.constant 121 : i32
    %565 = tpu.dynamic_rotate %537 by %c121_i32_355 dim 1 : vector<32x128xf32>, i32 -> vector<32x128xf32>
    %566 = vector.broadcast %12 : vector<1x128xf32> to vector<32x128xf32>
    %567 = arith.mulf %565, %566 : vector<32x128xf32>
    %568 = arith.truncf %567 : vector<32x128xf32> to vector<32x128xbf16>
    %c192_356 = arith.constant 192 : index
    %c0_357 = arith.constant 0 : index
    %569 = vector.load %arg11[%c192_356, %c0_357] : memref<288x128xbf16, #tpu.memory_space<vmem>>, vector<32x128xbf16>
    tpu.vector_store %arg11[%c192_356, %c0_357], %568 {strides = array<i32>} : memref<288x128xbf16, #tpu.memory_space<vmem>>, vector<32x128xbf16>,
    %c120_i32_358 = arith.constant 120 : i32
    %570 = tpu.dynamic_rotate %537 by %c120_i32_358 dim 1 : vector<32x128xf32>, i32 -> vector<32x128xf32>
    %571 = vector.broadcast %14 : vector<1x128xf32> to vector<32x128xf32>
    %572 = arith.mulf %570, %571 : vector<32x128xf32>
    %573 = arith.truncf %572 : vector<32x128xf32> to vector<32x128xbf16>
    %c224_359 = arith.constant 224 : index
    %c0_360 = arith.constant 0 : index
    %574 = vector.load %arg11[%c224_359, %c0_360] : memref<288x128xbf16, #tpu.memory_space<vmem>>, vector<32x128xbf16>
    tpu.vector_store %arg11[%c224_359, %c0_360], %573 {strides = array<i32>} : memref<288x128xbf16, #tpu.memory_space<vmem>>, vector<32x128xbf16>,
    %c119_i32_361 = arith.constant 119 : i32
    %575 = tpu.dynamic_rotate %537 by %c119_i32_361 dim 1 : vector<32x128xf32>, i32 -> vector<32x128xf32>
    %576 = vector.broadcast %16 : vector<1x128xf32> to vector<32x128xf32>
    %577 = arith.mulf %575, %576 : vector<32x128xf32>
    %578 = arith.truncf %577 : vector<32x128xf32> to vector<32x128xbf16>
    %c256_362 = arith.constant 256 : index
    %c0_363 = arith.constant 0 : index
    %579 = vector.load %arg11[%c256_362, %c0_363] : memref<288x128xbf16, #tpu.memory_space<vmem>>, vector<32x128xbf16>
    tpu.vector_store %arg11[%c256_362, %c0_363], %578 {strides = array<i32>} : memref<288x128xbf16, #tpu.memory_space<vmem>>, vector<32x128xbf16>,
    %c8_364 = arith.constant 8 : index
    %c0_365 = arith.constant 0 : index
    %c0_366 = arith.constant 0 : index
    %580 = vector.load %arg1[%c8_364, %c0_365, %c0_366] : memref<15x32x288xbf16, #tpu.memory_space<vmem>>, vector<1x32x288xbf16>
    %581 = vector.shape_cast %580 : vector<1x32x288xbf16> to vector<32x288xbf16>
    %c0_367 = arith.constant 0 : index
    %c0_368 = arith.constant 0 : index
    %582 = vector.load %arg11[%c0_367, %c0_368] : memref<288x128xbf16, #tpu.memory_space<vmem>>, vector<288x128xbf16>
    %cst_369 = arith.constant dense<0.000000e+00> : vector<32x128xf32>
    %583 = tpu.matmul %581, %582, %cst_369 {dimension_numbers = #tpu.dot_dimension_numbers<[1], [0], [0], [1], [0, 0, 1, 1], [], []>} : vector<32x288xbf16>, vector<288x128xbf16>, vector<32x128xf32> -> vector<32x128xf32>
    %584 = arith.addf %468, %583 : vector<32x128xf32>
    %c2_370 = arith.constant 2 : index
    %c0_371 = arith.constant 0 : index
    %c0_372 = arith.constant 0 : index
    %585 = vector.load %arg6[%c2_370, %c0_371, %c0_372] : memref<5x32x1xf32, #tpu.memory_space<vmem>>, vector<1x32x1xf32>
    %586 = vector.shape_cast %585 : vector<1x32x1xf32> to vector<32x1xf32>
    %587 = vector.broadcast %586 : vector<32x1xf32> to vector<32x128xf32>
    %588 = arith.addf %584, %587 : vector<32x128xf32>
    %cst_373 = arith.constant 0.000000e+00 : f32
    %589 = vector.broadcast %cst_373 : f32 to vector<32x128xf32>
    %590 = arith.maximumf %588, %589 : vector<32x128xf32>
    %c9_i32_374 = arith.constant 9 : i32
    %591 = tpu.dynamic_rotate %590 by %c9_i32_374 dim 1 : vector<32x128xf32>, i32 -> vector<32x128xf32>
    %592 = vector.broadcast %2 : vector<1x128xf32> to vector<32x128xf32>
    %593 = arith.mulf %591, %592 : vector<32x128xf32>
    %594 = arith.truncf %593 : vector<32x128xf32> to vector<32x128xbf16>
    %c0_375 = arith.constant 0 : index
    %c0_376 = arith.constant 0 : index
    %595 = vector.load %arg11[%c0_375, %c0_376] : memref<288x128xbf16, #tpu.memory_space<vmem>>, vector<32x128xbf16>
    tpu.vector_store %arg11[%c0_375, %c0_376], %594 {strides = array<i32>} : memref<288x128xbf16, #tpu.memory_space<vmem>>, vector<32x128xbf16>,
    %c8_i32_377 = arith.constant 8 : i32
    %596 = tpu.dynamic_rotate %590 by %c8_i32_377 dim 1 : vector<32x128xf32>, i32 -> vector<32x128xf32>
    %597 = vector.broadcast %4 : vector<1x128xf32> to vector<32x128xf32>
    %598 = arith.mulf %596, %597 : vector<32x128xf32>
    %599 = arith.truncf %598 : vector<32x128xf32> to vector<32x128xbf16>
    %c32_378 = arith.constant 32 : index
    %c0_379 = arith.constant 0 : index
    %600 = vector.load %arg11[%c32_378, %c0_379] : memref<288x128xbf16, #tpu.memory_space<vmem>>, vector<32x128xbf16>
    tpu.vector_store %arg11[%c32_378, %c0_379], %599 {strides = array<i32>} : memref<288x128xbf16, #tpu.memory_space<vmem>>, vector<32x128xbf16>,
    %c7_i32_380 = arith.constant 7 : i32
    %601 = tpu.dynamic_rotate %590 by %c7_i32_380 dim 1 : vector<32x128xf32>, i32 -> vector<32x128xf32>
    %602 = vector.broadcast %6 : vector<1x128xf32> to vector<32x128xf32>
    %603 = arith.mulf %601, %602 : vector<32x128xf32>
    %604 = arith.truncf %603 : vector<32x128xf32> to vector<32x128xbf16>
    %c64_381 = arith.constant 64 : index
    %c0_382 = arith.constant 0 : index
    %605 = vector.load %arg11[%c64_381, %c0_382] : memref<288x128xbf16, #tpu.memory_space<vmem>>, vector<32x128xbf16>
    tpu.vector_store %arg11[%c64_381, %c0_382], %604 {strides = array<i32>} : memref<288x128xbf16, #tpu.memory_space<vmem>>, vector<32x128xbf16>,
    %c1_i32_383 = arith.constant 1 : i32
    %606 = tpu.dynamic_rotate %590 by %c1_i32_383 dim 1 : vector<32x128xf32>, i32 -> vector<32x128xf32>
    %607 = vector.broadcast %8 : vector<1x128xf32> to vector<32x128xf32>
    %608 = arith.mulf %606, %607 : vector<32x128xf32>
    %609 = arith.truncf %608 : vector<32x128xf32> to vector<32x128xbf16>
    %c96_384 = arith.constant 96 : index
    %c0_385 = arith.constant 0 : index
    %610 = vector.load %arg11[%c96_384, %c0_385] : memref<288x128xbf16, #tpu.memory_space<vmem>>, vector<32x128xbf16>
    tpu.vector_store %arg11[%c96_384, %c0_385], %609 {strides = array<i32>} : memref<288x128xbf16, #tpu.memory_space<vmem>>, vector<32x128xbf16>,
    %611 = arith.truncf %590 : vector<32x128xf32> to vector<32x128xbf16>
    %c128_386 = arith.constant 128 : index
    %c0_387 = arith.constant 0 : index
    %612 = vector.load %arg11[%c128_386, %c0_387] : memref<288x128xbf16, #tpu.memory_space<vmem>>, vector<32x128xbf16>
    tpu.vector_store %arg11[%c128_386, %c0_387], %611 {strides = array<i32>} : memref<288x128xbf16, #tpu.memory_space<vmem>>, vector<32x128xbf16>,
    %c127_i32_388 = arith.constant 127 : i32
    %613 = tpu.dynamic_rotate %590 by %c127_i32_388 dim 1 : vector<32x128xf32>, i32 -> vector<32x128xf32>
    %614 = vector.broadcast %10 : vector<1x128xf32> to vector<32x128xf32>
    %615 = arith.mulf %613, %614 : vector<32x128xf32>
    %616 = arith.truncf %615 : vector<32x128xf32> to vector<32x128xbf16>
    %c160_389 = arith.constant 160 : index
    %c0_390 = arith.constant 0 : index
    %617 = vector.load %arg11[%c160_389, %c0_390] : memref<288x128xbf16, #tpu.memory_space<vmem>>, vector<32x128xbf16>
    tpu.vector_store %arg11[%c160_389, %c0_390], %616 {strides = array<i32>} : memref<288x128xbf16, #tpu.memory_space<vmem>>, vector<32x128xbf16>,
    %c121_i32_391 = arith.constant 121 : i32
    %618 = tpu.dynamic_rotate %590 by %c121_i32_391 dim 1 : vector<32x128xf32>, i32 -> vector<32x128xf32>
    %619 = vector.broadcast %12 : vector<1x128xf32> to vector<32x128xf32>
    %620 = arith.mulf %618, %619 : vector<32x128xf32>
    %621 = arith.truncf %620 : vector<32x128xf32> to vector<32x128xbf16>
    %c192_392 = arith.constant 192 : index
    %c0_393 = arith.constant 0 : index
    %622 = vector.load %arg11[%c192_392, %c0_393] : memref<288x128xbf16, #tpu.memory_space<vmem>>, vector<32x128xbf16>
    tpu.vector_store %arg11[%c192_392, %c0_393], %621 {strides = array<i32>} : memref<288x128xbf16, #tpu.memory_space<vmem>>, vector<32x128xbf16>,
    %c120_i32_394 = arith.constant 120 : i32
    %623 = tpu.dynamic_rotate %590 by %c120_i32_394 dim 1 : vector<32x128xf32>, i32 -> vector<32x128xf32>
    %624 = vector.broadcast %14 : vector<1x128xf32> to vector<32x128xf32>
    %625 = arith.mulf %623, %624 : vector<32x128xf32>
    %626 = arith.truncf %625 : vector<32x128xf32> to vector<32x128xbf16>
    %c224_395 = arith.constant 224 : index
    %c0_396 = arith.constant 0 : index
    %627 = vector.load %arg11[%c224_395, %c0_396] : memref<288x128xbf16, #tpu.memory_space<vmem>>, vector<32x128xbf16>
    tpu.vector_store %arg11[%c224_395, %c0_396], %626 {strides = array<i32>} : memref<288x128xbf16, #tpu.memory_space<vmem>>, vector<32x128xbf16>,
    %c119_i32_397 = arith.constant 119 : i32
    %628 = tpu.dynamic_rotate %590 by %c119_i32_397 dim 1 : vector<32x128xf32>, i32 -> vector<32x128xf32>
    %629 = vector.broadcast %16 : vector<1x128xf32> to vector<32x128xf32>
    %630 = arith.mulf %628, %629 : vector<32x128xf32>
    %631 = arith.truncf %630 : vector<32x128xf32> to vector<32x128xbf16>
    %c256_398 = arith.constant 256 : index
    %c0_399 = arith.constant 0 : index
    %632 = vector.load %arg11[%c256_398, %c0_399] : memref<288x128xbf16, #tpu.memory_space<vmem>>, vector<32x128xbf16>
    tpu.vector_store %arg11[%c256_398, %c0_399], %631 {strides = array<i32>} : memref<288x128xbf16, #tpu.memory_space<vmem>>, vector<32x128xbf16>,
    %c9 = arith.constant 9 : index
    %c0_400 = arith.constant 0 : index
    %c0_401 = arith.constant 0 : index
    %633 = vector.load %arg1[%c9, %c0_400, %c0_401] : memref<15x32x288xbf16, #tpu.memory_space<vmem>>, vector<1x32x288xbf16>
    %634 = vector.shape_cast %633 : vector<1x32x288xbf16> to vector<32x288xbf16>
    %c0_402 = arith.constant 0 : index
    %c0_403 = arith.constant 0 : index
    %635 = vector.load %arg11[%c0_402, %c0_403] : memref<288x128xbf16, #tpu.memory_space<vmem>>, vector<288x128xbf16>
    %cst_404 = arith.constant dense<0.000000e+00> : vector<32x128xf32>
    %636 = tpu.matmul %634, %635, %cst_404 {dimension_numbers = #tpu.dot_dimension_numbers<[1], [0], [0], [1], [0, 0, 1, 1], [], []>} : vector<32x288xbf16>, vector<288x128xbf16>, vector<32x128xf32> -> vector<32x128xf32>
    %cst_405 = arith.constant dense<0.000000e+00> : vector<32xf32>
    %637 = vector.multi_reduction <add>, %636, %cst_405 [1] : vector<32x128xf32> to vector<32xf32>
    %638 = vector.shape_cast %637 : vector<32xf32> to vector<32x1xf32>
    %cst_406 = arith.constant dense<0.000000e+00> : vector<32x1xf32>
    %639 = tpu.matmul %0, %638, %cst_406 {dimension_numbers = #tpu.dot_dimension_numbers<[1], [0], [0], [1], [0, 0, 1, 1], [], []>} : vector<32x32xf32>, vector<32x1xf32>, vector<32x1xf32> -> vector<32x1xf32>
    %640 = vector.broadcast %639 : vector<32x1xf32> to vector<32x128xf32>
    %641 = arith.subf %636, %640 : vector<32x128xf32>
    %642 = arith.mulf %641, %641 : vector<32x128xf32>
    %cst_407 = arith.constant dense<0.000000e+00> : vector<32xf32>
    %643 = vector.multi_reduction <add>, %642, %cst_407 [1] : vector<32x128xf32> to vector<32xf32>
    %644 = vector.shape_cast %643 : vector<32xf32> to vector<32x1xf32>
    %cst_408 = arith.constant dense<0.000000e+00> : vector<32x1xf32>
    %645 = tpu.matmul %0, %644, %cst_408 {dimension_numbers = #tpu.dot_dimension_numbers<[1], [0], [0], [1], [0, 0, 1, 1], [], []>} : vector<32x32xf32>, vector<32x1xf32>, vector<32x1xf32> -> vector<32x1xf32>
    %cst_409 = arith.constant 9.99999974E-6 : f32
    %646 = vector.broadcast %cst_409 : f32 to vector<32x1xf32>
    %647 = arith.addf %645, %646 : vector<32x1xf32>
    %648 = math.rsqrt %647 : vector<32x1xf32>
    %c6_410 = arith.constant 6 : index
    %c0_411 = arith.constant 0 : index
    %c0_412 = arith.constant 0 : index
    %649 = vector.load %arg4[%c6_410, %c0_411, %c0_412] : memref<10x32x1xf32, #tpu.memory_space<vmem>>, vector<1x32x1xf32>
    %650 = vector.shape_cast %649 : vector<1x32x1xf32> to vector<32x1xf32>
    %651 = arith.mulf %648, %650 : vector<32x1xf32>
    %652 = vector.broadcast %651 : vector<32x1xf32> to vector<32x128xf32>
    %653 = arith.mulf %641, %652 : vector<32x128xf32>
    %c6_413 = arith.constant 6 : index
    %c0_414 = arith.constant 0 : index
    %c0_415 = arith.constant 0 : index
    %654 = vector.load %arg5[%c6_413, %c0_414, %c0_415] : memref<10x32x1xf32, #tpu.memory_space<vmem>>, vector<1x32x1xf32>
    %655 = vector.shape_cast %654 : vector<1x32x1xf32> to vector<32x1xf32>
    %656 = vector.broadcast %655 : vector<32x1xf32> to vector<32x128xf32>
    %657 = arith.addf %653, %656 : vector<32x128xf32>
    %cst_416 = arith.constant 0.000000e+00 : f32
    %658 = vector.broadcast %cst_416 : f32 to vector<32x128xf32>
    %659 = arith.maximumf %657, %658 : vector<32x128xf32>
    %c9_i32_417 = arith.constant 9 : i32
    %660 = tpu.dynamic_rotate %659 by %c9_i32_417 dim 1 : vector<32x128xf32>, i32 -> vector<32x128xf32>
    %661 = vector.broadcast %2 : vector<1x128xf32> to vector<32x128xf32>
    %662 = arith.mulf %660, %661 : vector<32x128xf32>
    %663 = arith.truncf %662 : vector<32x128xf32> to vector<32x128xbf16>
    %c0_418 = arith.constant 0 : index
    %c0_419 = arith.constant 0 : index
    %664 = vector.load %arg11[%c0_418, %c0_419] : memref<288x128xbf16, #tpu.memory_space<vmem>>, vector<32x128xbf16>
    tpu.vector_store %arg11[%c0_418, %c0_419], %663 {strides = array<i32>} : memref<288x128xbf16, #tpu.memory_space<vmem>>, vector<32x128xbf16>,
    %c8_i32_420 = arith.constant 8 : i32
    %665 = tpu.dynamic_rotate %659 by %c8_i32_420 dim 1 : vector<32x128xf32>, i32 -> vector<32x128xf32>
    %666 = vector.broadcast %4 : vector<1x128xf32> to vector<32x128xf32>
    %667 = arith.mulf %665, %666 : vector<32x128xf32>
    %668 = arith.truncf %667 : vector<32x128xf32> to vector<32x128xbf16>
    %c32_421 = arith.constant 32 : index
    %c0_422 = arith.constant 0 : index
    %669 = vector.load %arg11[%c32_421, %c0_422] : memref<288x128xbf16, #tpu.memory_space<vmem>>, vector<32x128xbf16>
    tpu.vector_store %arg11[%c32_421, %c0_422], %668 {strides = array<i32>} : memref<288x128xbf16, #tpu.memory_space<vmem>>, vector<32x128xbf16>,
    %c7_i32_423 = arith.constant 7 : i32
    %670 = tpu.dynamic_rotate %659 by %c7_i32_423 dim 1 : vector<32x128xf32>, i32 -> vector<32x128xf32>
    %671 = vector.broadcast %6 : vector<1x128xf32> to vector<32x128xf32>
    %672 = arith.mulf %670, %671 : vector<32x128xf32>
    %673 = arith.truncf %672 : vector<32x128xf32> to vector<32x128xbf16>
    %c64_424 = arith.constant 64 : index
    %c0_425 = arith.constant 0 : index
    %674 = vector.load %arg11[%c64_424, %c0_425] : memref<288x128xbf16, #tpu.memory_space<vmem>>, vector<32x128xbf16>
    tpu.vector_store %arg11[%c64_424, %c0_425], %673 {strides = array<i32>} : memref<288x128xbf16, #tpu.memory_space<vmem>>, vector<32x128xbf16>,
    %c1_i32_426 = arith.constant 1 : i32
    %675 = tpu.dynamic_rotate %659 by %c1_i32_426 dim 1 : vector<32x128xf32>, i32 -> vector<32x128xf32>
    %676 = vector.broadcast %8 : vector<1x128xf32> to vector<32x128xf32>
    %677 = arith.mulf %675, %676 : vector<32x128xf32>
    %678 = arith.truncf %677 : vector<32x128xf32> to vector<32x128xbf16>
    %c96_427 = arith.constant 96 : index
    %c0_428 = arith.constant 0 : index
    %679 = vector.load %arg11[%c96_427, %c0_428] : memref<288x128xbf16, #tpu.memory_space<vmem>>, vector<32x128xbf16>
    tpu.vector_store %arg11[%c96_427, %c0_428], %678 {strides = array<i32>} : memref<288x128xbf16, #tpu.memory_space<vmem>>, vector<32x128xbf16>,
    %680 = arith.truncf %659 : vector<32x128xf32> to vector<32x128xbf16>
    %c128_429 = arith.constant 128 : index
    %c0_430 = arith.constant 0 : index
    %681 = vector.load %arg11[%c128_429, %c0_430] : memref<288x128xbf16, #tpu.memory_space<vmem>>, vector<32x128xbf16>
    tpu.vector_store %arg11[%c128_429, %c0_430], %680 {strides = array<i32>} : memref<288x128xbf16, #tpu.memory_space<vmem>>, vector<32x128xbf16>,
    %c127_i32_431 = arith.constant 127 : i32
    %682 = tpu.dynamic_rotate %659 by %c127_i32_431 dim 1 : vector<32x128xf32>, i32 -> vector<32x128xf32>
    %683 = vector.broadcast %10 : vector<1x128xf32> to vector<32x128xf32>
    %684 = arith.mulf %682, %683 : vector<32x128xf32>
    %685 = arith.truncf %684 : vector<32x128xf32> to vector<32x128xbf16>
    %c160_432 = arith.constant 160 : index
    %c0_433 = arith.constant 0 : index
    %686 = vector.load %arg11[%c160_432, %c0_433] : memref<288x128xbf16, #tpu.memory_space<vmem>>, vector<32x128xbf16>
    tpu.vector_store %arg11[%c160_432, %c0_433], %685 {strides = array<i32>} : memref<288x128xbf16, #tpu.memory_space<vmem>>, vector<32x128xbf16>,
    %c121_i32_434 = arith.constant 121 : i32
    %687 = tpu.dynamic_rotate %659 by %c121_i32_434 dim 1 : vector<32x128xf32>, i32 -> vector<32x128xf32>
    %688 = vector.broadcast %12 : vector<1x128xf32> to vector<32x128xf32>
    %689 = arith.mulf %687, %688 : vector<32x128xf32>
    %690 = arith.truncf %689 : vector<32x128xf32> to vector<32x128xbf16>
    %c192_435 = arith.constant 192 : index
    %c0_436 = arith.constant 0 : index
    %691 = vector.load %arg11[%c192_435, %c0_436] : memref<288x128xbf16, #tpu.memory_space<vmem>>, vector<32x128xbf16>
    tpu.vector_store %arg11[%c192_435, %c0_436], %690 {strides = array<i32>} : memref<288x128xbf16, #tpu.memory_space<vmem>>, vector<32x128xbf16>,
    %c120_i32_437 = arith.constant 120 : i32
    %692 = tpu.dynamic_rotate %659 by %c120_i32_437 dim 1 : vector<32x128xf32>, i32 -> vector<32x128xf32>
    %693 = vector.broadcast %14 : vector<1x128xf32> to vector<32x128xf32>
    %694 = arith.mulf %692, %693 : vector<32x128xf32>
    %695 = arith.truncf %694 : vector<32x128xf32> to vector<32x128xbf16>
    %c224_438 = arith.constant 224 : index
    %c0_439 = arith.constant 0 : index
    %696 = vector.load %arg11[%c224_438, %c0_439] : memref<288x128xbf16, #tpu.memory_space<vmem>>, vector<32x128xbf16>
    tpu.vector_store %arg11[%c224_438, %c0_439], %695 {strides = array<i32>} : memref<288x128xbf16, #tpu.memory_space<vmem>>, vector<32x128xbf16>,
    %c119_i32_440 = arith.constant 119 : i32
    %697 = tpu.dynamic_rotate %659 by %c119_i32_440 dim 1 : vector<32x128xf32>, i32 -> vector<32x128xf32>
    %698 = vector.broadcast %16 : vector<1x128xf32> to vector<32x128xf32>
    %699 = arith.mulf %697, %698 : vector<32x128xf32>
    %700 = arith.truncf %699 : vector<32x128xf32> to vector<32x128xbf16>
    %c256_441 = arith.constant 256 : index
    %c0_442 = arith.constant 0 : index
    %701 = vector.load %arg11[%c256_441, %c0_442] : memref<288x128xbf16, #tpu.memory_space<vmem>>, vector<32x128xbf16>
    tpu.vector_store %arg11[%c256_441, %c0_442], %700 {strides = array<i32>} : memref<288x128xbf16, #tpu.memory_space<vmem>>, vector<32x128xbf16>,
    %c10 = arith.constant 10 : index
    %c0_443 = arith.constant 0 : index
    %c0_444 = arith.constant 0 : index
    %702 = vector.load %arg1[%c10, %c0_443, %c0_444] : memref<15x32x288xbf16, #tpu.memory_space<vmem>>, vector<1x32x288xbf16>
    %703 = vector.shape_cast %702 : vector<1x32x288xbf16> to vector<32x288xbf16>
    %c0_445 = arith.constant 0 : index
    %c0_446 = arith.constant 0 : index
    %704 = vector.load %arg11[%c0_445, %c0_446] : memref<288x128xbf16, #tpu.memory_space<vmem>>, vector<288x128xbf16>
    %cst_447 = arith.constant dense<0.000000e+00> : vector<32x128xf32>
    %705 = tpu.matmul %703, %704, %cst_447 {dimension_numbers = #tpu.dot_dimension_numbers<[1], [0], [0], [1], [0, 0, 1, 1], [], []>} : vector<32x288xbf16>, vector<288x128xbf16>, vector<32x128xf32> -> vector<32x128xf32>
    %cst_448 = arith.constant dense<0.000000e+00> : vector<32xf32>
    %706 = vector.multi_reduction <add>, %705, %cst_448 [1] : vector<32x128xf32> to vector<32xf32>
    %707 = vector.shape_cast %706 : vector<32xf32> to vector<32x1xf32>
    %cst_449 = arith.constant dense<0.000000e+00> : vector<32x1xf32>
    %708 = tpu.matmul %0, %707, %cst_449 {dimension_numbers = #tpu.dot_dimension_numbers<[1], [0], [0], [1], [0, 0, 1, 1], [], []>} : vector<32x32xf32>, vector<32x1xf32>, vector<32x1xf32> -> vector<32x1xf32>
    %709 = vector.broadcast %708 : vector<32x1xf32> to vector<32x128xf32>
    %710 = arith.subf %705, %709 : vector<32x128xf32>
    %711 = arith.mulf %710, %710 : vector<32x128xf32>
    %cst_450 = arith.constant dense<0.000000e+00> : vector<32xf32>
    %712 = vector.multi_reduction <add>, %711, %cst_450 [1] : vector<32x128xf32> to vector<32xf32>
    %713 = vector.shape_cast %712 : vector<32xf32> to vector<32x1xf32>
    %cst_451 = arith.constant dense<0.000000e+00> : vector<32x1xf32>
    %714 = tpu.matmul %0, %713, %cst_451 {dimension_numbers = #tpu.dot_dimension_numbers<[1], [0], [0], [1], [0, 0, 1, 1], [], []>} : vector<32x32xf32>, vector<32x1xf32>, vector<32x1xf32> -> vector<32x1xf32>
    %cst_452 = arith.constant 9.99999974E-6 : f32
    %715 = vector.broadcast %cst_452 : f32 to vector<32x1xf32>
    %716 = arith.addf %714, %715 : vector<32x1xf32>
    %717 = math.rsqrt %716 : vector<32x1xf32>
    %c7_453 = arith.constant 7 : index
    %c0_454 = arith.constant 0 : index
    %c0_455 = arith.constant 0 : index
    %718 = vector.load %arg4[%c7_453, %c0_454, %c0_455] : memref<10x32x1xf32, #tpu.memory_space<vmem>>, vector<1x32x1xf32>
    %719 = vector.shape_cast %718 : vector<1x32x1xf32> to vector<32x1xf32>
    %720 = arith.mulf %717, %719 : vector<32x1xf32>
    %721 = vector.broadcast %720 : vector<32x1xf32> to vector<32x128xf32>
    %722 = arith.mulf %710, %721 : vector<32x128xf32>
    %c7_456 = arith.constant 7 : index
    %c0_457 = arith.constant 0 : index
    %c0_458 = arith.constant 0 : index
    %723 = vector.load %arg5[%c7_456, %c0_457, %c0_458] : memref<10x32x1xf32, #tpu.memory_space<vmem>>, vector<1x32x1xf32>
    %724 = vector.shape_cast %723 : vector<1x32x1xf32> to vector<32x1xf32>
    %725 = vector.broadcast %724 : vector<32x1xf32> to vector<32x128xf32>
    %726 = arith.addf %722, %725 : vector<32x128xf32>
    %cst_459 = arith.constant 0.000000e+00 : f32
    %727 = vector.broadcast %cst_459 : f32 to vector<32x128xf32>
    %728 = arith.maximumf %726, %727 : vector<32x128xf32>
    %c9_i32_460 = arith.constant 9 : i32
    %729 = tpu.dynamic_rotate %728 by %c9_i32_460 dim 1 : vector<32x128xf32>, i32 -> vector<32x128xf32>
    %730 = vector.broadcast %2 : vector<1x128xf32> to vector<32x128xf32>
    %731 = arith.mulf %729, %730 : vector<32x128xf32>
    %732 = arith.truncf %731 : vector<32x128xf32> to vector<32x128xbf16>
    %c0_461 = arith.constant 0 : index
    %c0_462 = arith.constant 0 : index
    %733 = vector.load %arg11[%c0_461, %c0_462] : memref<288x128xbf16, #tpu.memory_space<vmem>>, vector<32x128xbf16>
    tpu.vector_store %arg11[%c0_461, %c0_462], %732 {strides = array<i32>} : memref<288x128xbf16, #tpu.memory_space<vmem>>, vector<32x128xbf16>,
    %c8_i32_463 = arith.constant 8 : i32
    %734 = tpu.dynamic_rotate %728 by %c8_i32_463 dim 1 : vector<32x128xf32>, i32 -> vector<32x128xf32>
    %735 = vector.broadcast %4 : vector<1x128xf32> to vector<32x128xf32>
    %736 = arith.mulf %734, %735 : vector<32x128xf32>
    %737 = arith.truncf %736 : vector<32x128xf32> to vector<32x128xbf16>
    %c32_464 = arith.constant 32 : index
    %c0_465 = arith.constant 0 : index
    %738 = vector.load %arg11[%c32_464, %c0_465] : memref<288x128xbf16, #tpu.memory_space<vmem>>, vector<32x128xbf16>
    tpu.vector_store %arg11[%c32_464, %c0_465], %737 {strides = array<i32>} : memref<288x128xbf16, #tpu.memory_space<vmem>>, vector<32x128xbf16>,
    %c7_i32_466 = arith.constant 7 : i32
    %739 = tpu.dynamic_rotate %728 by %c7_i32_466 dim 1 : vector<32x128xf32>, i32 -> vector<32x128xf32>
    %740 = vector.broadcast %6 : vector<1x128xf32> to vector<32x128xf32>
    %741 = arith.mulf %739, %740 : vector<32x128xf32>
    %742 = arith.truncf %741 : vector<32x128xf32> to vector<32x128xbf16>
    %c64_467 = arith.constant 64 : index
    %c0_468 = arith.constant 0 : index
    %743 = vector.load %arg11[%c64_467, %c0_468] : memref<288x128xbf16, #tpu.memory_space<vmem>>, vector<32x128xbf16>
    tpu.vector_store %arg11[%c64_467, %c0_468], %742 {strides = array<i32>} : memref<288x128xbf16, #tpu.memory_space<vmem>>, vector<32x128xbf16>,
    %c1_i32_469 = arith.constant 1 : i32
    %744 = tpu.dynamic_rotate %728 by %c1_i32_469 dim 1 : vector<32x128xf32>, i32 -> vector<32x128xf32>
    %745 = vector.broadcast %8 : vector<1x128xf32> to vector<32x128xf32>
    %746 = arith.mulf %744, %745 : vector<32x128xf32>
    %747 = arith.truncf %746 : vector<32x128xf32> to vector<32x128xbf16>
    %c96_470 = arith.constant 96 : index
    %c0_471 = arith.constant 0 : index
    %748 = vector.load %arg11[%c96_470, %c0_471] : memref<288x128xbf16, #tpu.memory_space<vmem>>, vector<32x128xbf16>
    tpu.vector_store %arg11[%c96_470, %c0_471], %747 {strides = array<i32>} : memref<288x128xbf16, #tpu.memory_space<vmem>>, vector<32x128xbf16>,
    %749 = arith.truncf %728 : vector<32x128xf32> to vector<32x128xbf16>
    %c128_472 = arith.constant 128 : index
    %c0_473 = arith.constant 0 : index
    %750 = vector.load %arg11[%c128_472, %c0_473] : memref<288x128xbf16, #tpu.memory_space<vmem>>, vector<32x128xbf16>
    tpu.vector_store %arg11[%c128_472, %c0_473], %749 {strides = array<i32>} : memref<288x128xbf16, #tpu.memory_space<vmem>>, vector<32x128xbf16>,
    %c127_i32_474 = arith.constant 127 : i32
    %751 = tpu.dynamic_rotate %728 by %c127_i32_474 dim 1 : vector<32x128xf32>, i32 -> vector<32x128xf32>
    %752 = vector.broadcast %10 : vector<1x128xf32> to vector<32x128xf32>
    %753 = arith.mulf %751, %752 : vector<32x128xf32>
    %754 = arith.truncf %753 : vector<32x128xf32> to vector<32x128xbf16>
    %c160_475 = arith.constant 160 : index
    %c0_476 = arith.constant 0 : index
    %755 = vector.load %arg11[%c160_475, %c0_476] : memref<288x128xbf16, #tpu.memory_space<vmem>>, vector<32x128xbf16>
    tpu.vector_store %arg11[%c160_475, %c0_476], %754 {strides = array<i32>} : memref<288x128xbf16, #tpu.memory_space<vmem>>, vector<32x128xbf16>,
    %c121_i32_477 = arith.constant 121 : i32
    %756 = tpu.dynamic_rotate %728 by %c121_i32_477 dim 1 : vector<32x128xf32>, i32 -> vector<32x128xf32>
    %757 = vector.broadcast %12 : vector<1x128xf32> to vector<32x128xf32>
    %758 = arith.mulf %756, %757 : vector<32x128xf32>
    %759 = arith.truncf %758 : vector<32x128xf32> to vector<32x128xbf16>
    %c192_478 = arith.constant 192 : index
    %c0_479 = arith.constant 0 : index
    %760 = vector.load %arg11[%c192_478, %c0_479] : memref<288x128xbf16, #tpu.memory_space<vmem>>, vector<32x128xbf16>
    tpu.vector_store %arg11[%c192_478, %c0_479], %759 {strides = array<i32>} : memref<288x128xbf16, #tpu.memory_space<vmem>>, vector<32x128xbf16>,
    %c120_i32_480 = arith.constant 120 : i32
    %761 = tpu.dynamic_rotate %728 by %c120_i32_480 dim 1 : vector<32x128xf32>, i32 -> vector<32x128xf32>
    %762 = vector.broadcast %14 : vector<1x128xf32> to vector<32x128xf32>
    %763 = arith.mulf %761, %762 : vector<32x128xf32>
    %764 = arith.truncf %763 : vector<32x128xf32> to vector<32x128xbf16>
    %c224_481 = arith.constant 224 : index
    %c0_482 = arith.constant 0 : index
    %765 = vector.load %arg11[%c224_481, %c0_482] : memref<288x128xbf16, #tpu.memory_space<vmem>>, vector<32x128xbf16>
    tpu.vector_store %arg11[%c224_481, %c0_482], %764 {strides = array<i32>} : memref<288x128xbf16, #tpu.memory_space<vmem>>, vector<32x128xbf16>,
    %c119_i32_483 = arith.constant 119 : i32
    %766 = tpu.dynamic_rotate %728 by %c119_i32_483 dim 1 : vector<32x128xf32>, i32 -> vector<32x128xf32>
    %767 = vector.broadcast %16 : vector<1x128xf32> to vector<32x128xf32>
    %768 = arith.mulf %766, %767 : vector<32x128xf32>
    %769 = arith.truncf %768 : vector<32x128xf32> to vector<32x128xbf16>
    %c256_484 = arith.constant 256 : index
    %c0_485 = arith.constant 0 : index
    %770 = vector.load %arg11[%c256_484, %c0_485] : memref<288x128xbf16, #tpu.memory_space<vmem>>, vector<32x128xbf16>
    tpu.vector_store %arg11[%c256_484, %c0_485], %769 {strides = array<i32>} : memref<288x128xbf16, #tpu.memory_space<vmem>>, vector<32x128xbf16>,
    %c11 = arith.constant 11 : index
    %c0_486 = arith.constant 0 : index
    %c0_487 = arith.constant 0 : index
    %771 = vector.load %arg1[%c11, %c0_486, %c0_487] : memref<15x32x288xbf16, #tpu.memory_space<vmem>>, vector<1x32x288xbf16>
    %772 = vector.shape_cast %771 : vector<1x32x288xbf16> to vector<32x288xbf16>
    %c0_488 = arith.constant 0 : index
    %c0_489 = arith.constant 0 : index
    %773 = vector.load %arg11[%c0_488, %c0_489] : memref<288x128xbf16, #tpu.memory_space<vmem>>, vector<288x128xbf16>
    %cst_490 = arith.constant dense<0.000000e+00> : vector<32x128xf32>
    %774 = tpu.matmul %772, %773, %cst_490 {dimension_numbers = #tpu.dot_dimension_numbers<[1], [0], [0], [1], [0, 0, 1, 1], [], []>} : vector<32x288xbf16>, vector<288x128xbf16>, vector<32x128xf32> -> vector<32x128xf32>
    %775 = arith.addf %659, %774 : vector<32x128xf32>
    %c3_491 = arith.constant 3 : index
    %c0_492 = arith.constant 0 : index
    %c0_493 = arith.constant 0 : index
    %776 = vector.load %arg6[%c3_491, %c0_492, %c0_493] : memref<5x32x1xf32, #tpu.memory_space<vmem>>, vector<1x32x1xf32>
    %777 = vector.shape_cast %776 : vector<1x32x1xf32> to vector<32x1xf32>
    %778 = vector.broadcast %777 : vector<32x1xf32> to vector<32x128xf32>
    %779 = arith.addf %775, %778 : vector<32x128xf32>
    %cst_494 = arith.constant 0.000000e+00 : f32
    %780 = vector.broadcast %cst_494 : f32 to vector<32x128xf32>
    %781 = arith.maximumf %779, %780 : vector<32x128xf32>
    %c9_i32_495 = arith.constant 9 : i32
    %782 = tpu.dynamic_rotate %781 by %c9_i32_495 dim 1 : vector<32x128xf32>, i32 -> vector<32x128xf32>
    %783 = vector.broadcast %2 : vector<1x128xf32> to vector<32x128xf32>
    %784 = arith.mulf %782, %783 : vector<32x128xf32>
    %785 = arith.truncf %784 : vector<32x128xf32> to vector<32x128xbf16>
    %c0_496 = arith.constant 0 : index
    %c0_497 = arith.constant 0 : index
    %786 = vector.load %arg11[%c0_496, %c0_497] : memref<288x128xbf16, #tpu.memory_space<vmem>>, vector<32x128xbf16>
    tpu.vector_store %arg11[%c0_496, %c0_497], %785 {strides = array<i32>} : memref<288x128xbf16, #tpu.memory_space<vmem>>, vector<32x128xbf16>,
    %c8_i32_498 = arith.constant 8 : i32
    %787 = tpu.dynamic_rotate %781 by %c8_i32_498 dim 1 : vector<32x128xf32>, i32 -> vector<32x128xf32>
    %788 = vector.broadcast %4 : vector<1x128xf32> to vector<32x128xf32>
    %789 = arith.mulf %787, %788 : vector<32x128xf32>
    %790 = arith.truncf %789 : vector<32x128xf32> to vector<32x128xbf16>
    %c32_499 = arith.constant 32 : index
    %c0_500 = arith.constant 0 : index
    %791 = vector.load %arg11[%c32_499, %c0_500] : memref<288x128xbf16, #tpu.memory_space<vmem>>, vector<32x128xbf16>
    tpu.vector_store %arg11[%c32_499, %c0_500], %790 {strides = array<i32>} : memref<288x128xbf16, #tpu.memory_space<vmem>>, vector<32x128xbf16>,
    %c7_i32_501 = arith.constant 7 : i32
    %792 = tpu.dynamic_rotate %781 by %c7_i32_501 dim 1 : vector<32x128xf32>, i32 -> vector<32x128xf32>
    %793 = vector.broadcast %6 : vector<1x128xf32> to vector<32x128xf32>
    %794 = arith.mulf %792, %793 : vector<32x128xf32>
    %795 = arith.truncf %794 : vector<32x128xf32> to vector<32x128xbf16>
    %c64_502 = arith.constant 64 : index
    %c0_503 = arith.constant 0 : index
    %796 = vector.load %arg11[%c64_502, %c0_503] : memref<288x128xbf16, #tpu.memory_space<vmem>>, vector<32x128xbf16>
    tpu.vector_store %arg11[%c64_502, %c0_503], %795 {strides = array<i32>} : memref<288x128xbf16, #tpu.memory_space<vmem>>, vector<32x128xbf16>,
    %c1_i32_504 = arith.constant 1 : i32
    %797 = tpu.dynamic_rotate %781 by %c1_i32_504 dim 1 : vector<32x128xf32>, i32 -> vector<32x128xf32>
    %798 = vector.broadcast %8 : vector<1x128xf32> to vector<32x128xf32>
    %799 = arith.mulf %797, %798 : vector<32x128xf32>
    %800 = arith.truncf %799 : vector<32x128xf32> to vector<32x128xbf16>
    %c96_505 = arith.constant 96 : index
    %c0_506 = arith.constant 0 : index
    %801 = vector.load %arg11[%c96_505, %c0_506] : memref<288x128xbf16, #tpu.memory_space<vmem>>, vector<32x128xbf16>
    tpu.vector_store %arg11[%c96_505, %c0_506], %800 {strides = array<i32>} : memref<288x128xbf16, #tpu.memory_space<vmem>>, vector<32x128xbf16>,
    %802 = arith.truncf %781 : vector<32x128xf32> to vector<32x128xbf16>
    %c128_507 = arith.constant 128 : index
    %c0_508 = arith.constant 0 : index
    %803 = vector.load %arg11[%c128_507, %c0_508] : memref<288x128xbf16, #tpu.memory_space<vmem>>, vector<32x128xbf16>
    tpu.vector_store %arg11[%c128_507, %c0_508], %802 {strides = array<i32>} : memref<288x128xbf16, #tpu.memory_space<vmem>>, vector<32x128xbf16>,
    %c127_i32_509 = arith.constant 127 : i32
    %804 = tpu.dynamic_rotate %781 by %c127_i32_509 dim 1 : vector<32x128xf32>, i32 -> vector<32x128xf32>
    %805 = vector.broadcast %10 : vector<1x128xf32> to vector<32x128xf32>
    %806 = arith.mulf %804, %805 : vector<32x128xf32>
    %807 = arith.truncf %806 : vector<32x128xf32> to vector<32x128xbf16>
    %c160_510 = arith.constant 160 : index
    %c0_511 = arith.constant 0 : index
    %808 = vector.load %arg11[%c160_510, %c0_511] : memref<288x128xbf16, #tpu.memory_space<vmem>>, vector<32x128xbf16>
    tpu.vector_store %arg11[%c160_510, %c0_511], %807 {strides = array<i32>} : memref<288x128xbf16, #tpu.memory_space<vmem>>, vector<32x128xbf16>,
    %c121_i32_512 = arith.constant 121 : i32
    %809 = tpu.dynamic_rotate %781 by %c121_i32_512 dim 1 : vector<32x128xf32>, i32 -> vector<32x128xf32>
    %810 = vector.broadcast %12 : vector<1x128xf32> to vector<32x128xf32>
    %811 = arith.mulf %809, %810 : vector<32x128xf32>
    %812 = arith.truncf %811 : vector<32x128xf32> to vector<32x128xbf16>
    %c192_513 = arith.constant 192 : index
    %c0_514 = arith.constant 0 : index
    %813 = vector.load %arg11[%c192_513, %c0_514] : memref<288x128xbf16, #tpu.memory_space<vmem>>, vector<32x128xbf16>
    tpu.vector_store %arg11[%c192_513, %c0_514], %812 {strides = array<i32>} : memref<288x128xbf16, #tpu.memory_space<vmem>>, vector<32x128xbf16>,
    %c120_i32_515 = arith.constant 120 : i32
    %814 = tpu.dynamic_rotate %781 by %c120_i32_515 dim 1 : vector<32x128xf32>, i32 -> vector<32x128xf32>
    %815 = vector.broadcast %14 : vector<1x128xf32> to vector<32x128xf32>
    %816 = arith.mulf %814, %815 : vector<32x128xf32>
    %817 = arith.truncf %816 : vector<32x128xf32> to vector<32x128xbf16>
    %c224_516 = arith.constant 224 : index
    %c0_517 = arith.constant 0 : index
    %818 = vector.load %arg11[%c224_516, %c0_517] : memref<288x128xbf16, #tpu.memory_space<vmem>>, vector<32x128xbf16>
    tpu.vector_store %arg11[%c224_516, %c0_517], %817 {strides = array<i32>} : memref<288x128xbf16, #tpu.memory_space<vmem>>, vector<32x128xbf16>,
    %c119_i32_518 = arith.constant 119 : i32
    %819 = tpu.dynamic_rotate %781 by %c119_i32_518 dim 1 : vector<32x128xf32>, i32 -> vector<32x128xf32>
    %820 = vector.broadcast %16 : vector<1x128xf32> to vector<32x128xf32>
    %821 = arith.mulf %819, %820 : vector<32x128xf32>
    %822 = arith.truncf %821 : vector<32x128xf32> to vector<32x128xbf16>
    %c256_519 = arith.constant 256 : index
    %c0_520 = arith.constant 0 : index
    %823 = vector.load %arg11[%c256_519, %c0_520] : memref<288x128xbf16, #tpu.memory_space<vmem>>, vector<32x128xbf16>
    tpu.vector_store %arg11[%c256_519, %c0_520], %822 {strides = array<i32>} : memref<288x128xbf16, #tpu.memory_space<vmem>>, vector<32x128xbf16>,
    %c12 = arith.constant 12 : index
    %c0_521 = arith.constant 0 : index
    %c0_522 = arith.constant 0 : index
    %824 = vector.load %arg1[%c12, %c0_521, %c0_522] : memref<15x32x288xbf16, #tpu.memory_space<vmem>>, vector<1x32x288xbf16>
    %825 = vector.shape_cast %824 : vector<1x32x288xbf16> to vector<32x288xbf16>
    %c0_523 = arith.constant 0 : index
    %c0_524 = arith.constant 0 : index
    %826 = vector.load %arg11[%c0_523, %c0_524] : memref<288x128xbf16, #tpu.memory_space<vmem>>, vector<288x128xbf16>
    %cst_525 = arith.constant dense<0.000000e+00> : vector<32x128xf32>
    %827 = tpu.matmul %825, %826, %cst_525 {dimension_numbers = #tpu.dot_dimension_numbers<[1], [0], [0], [1], [0, 0, 1, 1], [], []>} : vector<32x288xbf16>, vector<288x128xbf16>, vector<32x128xf32> -> vector<32x128xf32>
    %cst_526 = arith.constant dense<0.000000e+00> : vector<32xf32>
    %828 = vector.multi_reduction <add>, %827, %cst_526 [1] : vector<32x128xf32> to vector<32xf32>
    %829 = vector.shape_cast %828 : vector<32xf32> to vector<32x1xf32>
    %cst_527 = arith.constant dense<0.000000e+00> : vector<32x1xf32>
    %830 = tpu.matmul %0, %829, %cst_527 {dimension_numbers = #tpu.dot_dimension_numbers<[1], [0], [0], [1], [0, 0, 1, 1], [], []>} : vector<32x32xf32>, vector<32x1xf32>, vector<32x1xf32> -> vector<32x1xf32>
    %831 = vector.broadcast %830 : vector<32x1xf32> to vector<32x128xf32>
    %832 = arith.subf %827, %831 : vector<32x128xf32>
    %833 = arith.mulf %832, %832 : vector<32x128xf32>
    %cst_528 = arith.constant dense<0.000000e+00> : vector<32xf32>
    %834 = vector.multi_reduction <add>, %833, %cst_528 [1] : vector<32x128xf32> to vector<32xf32>
    %835 = vector.shape_cast %834 : vector<32xf32> to vector<32x1xf32>
    %cst_529 = arith.constant dense<0.000000e+00> : vector<32x1xf32>
    %836 = tpu.matmul %0, %835, %cst_529 {dimension_numbers = #tpu.dot_dimension_numbers<[1], [0], [0], [1], [0, 0, 1, 1], [], []>} : vector<32x32xf32>, vector<32x1xf32>, vector<32x1xf32> -> vector<32x1xf32>
    %cst_530 = arith.constant 9.99999974E-6 : f32
    %837 = vector.broadcast %cst_530 : f32 to vector<32x1xf32>
    %838 = arith.addf %836, %837 : vector<32x1xf32>
    %839 = math.rsqrt %838 : vector<32x1xf32>
    %c8_531 = arith.constant 8 : index
    %c0_532 = arith.constant 0 : index
    %c0_533 = arith.constant 0 : index
    %840 = vector.load %arg4[%c8_531, %c0_532, %c0_533] : memref<10x32x1xf32, #tpu.memory_space<vmem>>, vector<1x32x1xf32>
    %841 = vector.shape_cast %840 : vector<1x32x1xf32> to vector<32x1xf32>
    %842 = arith.mulf %839, %841 : vector<32x1xf32>
    %843 = vector.broadcast %842 : vector<32x1xf32> to vector<32x128xf32>
    %844 = arith.mulf %832, %843 : vector<32x128xf32>
    %c8_534 = arith.constant 8 : index
    %c0_535 = arith.constant 0 : index
    %c0_536 = arith.constant 0 : index
    %845 = vector.load %arg5[%c8_534, %c0_535, %c0_536] : memref<10x32x1xf32, #tpu.memory_space<vmem>>, vector<1x32x1xf32>
    %846 = vector.shape_cast %845 : vector<1x32x1xf32> to vector<32x1xf32>
    %847 = vector.broadcast %846 : vector<32x1xf32> to vector<32x128xf32>
    %848 = arith.addf %844, %847 : vector<32x128xf32>
    %cst_537 = arith.constant 0.000000e+00 : f32
    %849 = vector.broadcast %cst_537 : f32 to vector<32x128xf32>
    %850 = arith.maximumf %848, %849 : vector<32x128xf32>
    %c9_i32_538 = arith.constant 9 : i32
    %851 = tpu.dynamic_rotate %850 by %c9_i32_538 dim 1 : vector<32x128xf32>, i32 -> vector<32x128xf32>
    %852 = vector.broadcast %2 : vector<1x128xf32> to vector<32x128xf32>
    %853 = arith.mulf %851, %852 : vector<32x128xf32>
    %854 = arith.truncf %853 : vector<32x128xf32> to vector<32x128xbf16>
    %c0_539 = arith.constant 0 : index
    %c0_540 = arith.constant 0 : index
    %855 = vector.load %arg11[%c0_539, %c0_540] : memref<288x128xbf16, #tpu.memory_space<vmem>>, vector<32x128xbf16>
    tpu.vector_store %arg11[%c0_539, %c0_540], %854 {strides = array<i32>} : memref<288x128xbf16, #tpu.memory_space<vmem>>, vector<32x128xbf16>,
    %c8_i32_541 = arith.constant 8 : i32
    %856 = tpu.dynamic_rotate %850 by %c8_i32_541 dim 1 : vector<32x128xf32>, i32 -> vector<32x128xf32>
    %857 = vector.broadcast %4 : vector<1x128xf32> to vector<32x128xf32>
    %858 = arith.mulf %856, %857 : vector<32x128xf32>
    %859 = arith.truncf %858 : vector<32x128xf32> to vector<32x128xbf16>
    %c32_542 = arith.constant 32 : index
    %c0_543 = arith.constant 0 : index
    %860 = vector.load %arg11[%c32_542, %c0_543] : memref<288x128xbf16, #tpu.memory_space<vmem>>, vector<32x128xbf16>
    tpu.vector_store %arg11[%c32_542, %c0_543], %859 {strides = array<i32>} : memref<288x128xbf16, #tpu.memory_space<vmem>>, vector<32x128xbf16>,
    %c7_i32_544 = arith.constant 7 : i32
    %861 = tpu.dynamic_rotate %850 by %c7_i32_544 dim 1 : vector<32x128xf32>, i32 -> vector<32x128xf32>
    %862 = vector.broadcast %6 : vector<1x128xf32> to vector<32x128xf32>
    %863 = arith.mulf %861, %862 : vector<32x128xf32>
    %864 = arith.truncf %863 : vector<32x128xf32> to vector<32x128xbf16>
    %c64_545 = arith.constant 64 : index
    %c0_546 = arith.constant 0 : index
    %865 = vector.load %arg11[%c64_545, %c0_546] : memref<288x128xbf16, #tpu.memory_space<vmem>>, vector<32x128xbf16>
    tpu.vector_store %arg11[%c64_545, %c0_546], %864 {strides = array<i32>} : memref<288x128xbf16, #tpu.memory_space<vmem>>, vector<32x128xbf16>,
    %c1_i32_547 = arith.constant 1 : i32
    %866 = tpu.dynamic_rotate %850 by %c1_i32_547 dim 1 : vector<32x128xf32>, i32 -> vector<32x128xf32>
    %867 = vector.broadcast %8 : vector<1x128xf32> to vector<32x128xf32>
    %868 = arith.mulf %866, %867 : vector<32x128xf32>
    %869 = arith.truncf %868 : vector<32x128xf32> to vector<32x128xbf16>
    %c96_548 = arith.constant 96 : index
    %c0_549 = arith.constant 0 : index
    %870 = vector.load %arg11[%c96_548, %c0_549] : memref<288x128xbf16, #tpu.memory_space<vmem>>, vector<32x128xbf16>
    tpu.vector_store %arg11[%c96_548, %c0_549], %869 {strides = array<i32>} : memref<288x128xbf16, #tpu.memory_space<vmem>>, vector<32x128xbf16>,
    %871 = arith.truncf %850 : vector<32x128xf32> to vector<32x128xbf16>
    %c128_550 = arith.constant 128 : index
    %c0_551 = arith.constant 0 : index
    %872 = vector.load %arg11[%c128_550, %c0_551] : memref<288x128xbf16, #tpu.memory_space<vmem>>, vector<32x128xbf16>
    tpu.vector_store %arg11[%c128_550, %c0_551], %871 {strides = array<i32>} : memref<288x128xbf16, #tpu.memory_space<vmem>>, vector<32x128xbf16>,
    %c127_i32_552 = arith.constant 127 : i32
    %873 = tpu.dynamic_rotate %850 by %c127_i32_552 dim 1 : vector<32x128xf32>, i32 -> vector<32x128xf32>
    %874 = vector.broadcast %10 : vector<1x128xf32> to vector<32x128xf32>
    %875 = arith.mulf %873, %874 : vector<32x128xf32>
    %876 = arith.truncf %875 : vector<32x128xf32> to vector<32x128xbf16>
    %c160_553 = arith.constant 160 : index
    %c0_554 = arith.constant 0 : index
    %877 = vector.load %arg11[%c160_553, %c0_554] : memref<288x128xbf16, #tpu.memory_space<vmem>>, vector<32x128xbf16>
    tpu.vector_store %arg11[%c160_553, %c0_554], %876 {strides = array<i32>} : memref<288x128xbf16, #tpu.memory_space<vmem>>, vector<32x128xbf16>,
    %c121_i32_555 = arith.constant 121 : i32
    %878 = tpu.dynamic_rotate %850 by %c121_i32_555 dim 1 : vector<32x128xf32>, i32 -> vector<32x128xf32>
    %879 = vector.broadcast %12 : vector<1x128xf32> to vector<32x128xf32>
    %880 = arith.mulf %878, %879 : vector<32x128xf32>
    %881 = arith.truncf %880 : vector<32x128xf32> to vector<32x128xbf16>
    %c192_556 = arith.constant 192 : index
    %c0_557 = arith.constant 0 : index
    %882 = vector.load %arg11[%c192_556, %c0_557] : memref<288x128xbf16, #tpu.memory_space<vmem>>, vector<32x128xbf16>
    tpu.vector_store %arg11[%c192_556, %c0_557], %881 {strides = array<i32>} : memref<288x128xbf16, #tpu.memory_space<vmem>>, vector<32x128xbf16>,
    %c120_i32_558 = arith.constant 120 : i32
    %883 = tpu.dynamic_rotate %850 by %c120_i32_558 dim 1 : vector<32x128xf32>, i32 -> vector<32x128xf32>
    %884 = vector.broadcast %14 : vector<1x128xf32> to vector<32x128xf32>
    %885 = arith.mulf %883, %884 : vector<32x128xf32>
    %886 = arith.truncf %885 : vector<32x128xf32> to vector<32x128xbf16>
    %c224_559 = arith.constant 224 : index
    %c0_560 = arith.constant 0 : index
    %887 = vector.load %arg11[%c224_559, %c0_560] : memref<288x128xbf16, #tpu.memory_space<vmem>>, vector<32x128xbf16>
    tpu.vector_store %arg11[%c224_559, %c0_560], %886 {strides = array<i32>} : memref<288x128xbf16, #tpu.memory_space<vmem>>, vector<32x128xbf16>,
    %c119_i32_561 = arith.constant 119 : i32
    %888 = tpu.dynamic_rotate %850 by %c119_i32_561 dim 1 : vector<32x128xf32>, i32 -> vector<32x128xf32>
    %889 = vector.broadcast %16 : vector<1x128xf32> to vector<32x128xf32>
    %890 = arith.mulf %888, %889 : vector<32x128xf32>
    %891 = arith.truncf %890 : vector<32x128xf32> to vector<32x128xbf16>
    %c256_562 = arith.constant 256 : index
    %c0_563 = arith.constant 0 : index
    %892 = vector.load %arg11[%c256_562, %c0_563] : memref<288x128xbf16, #tpu.memory_space<vmem>>, vector<32x128xbf16>
    tpu.vector_store %arg11[%c256_562, %c0_563], %891 {strides = array<i32>} : memref<288x128xbf16, #tpu.memory_space<vmem>>, vector<32x128xbf16>,
    %c13 = arith.constant 13 : index
    %c0_564 = arith.constant 0 : index
    %c0_565 = arith.constant 0 : index
    %893 = vector.load %arg1[%c13, %c0_564, %c0_565] : memref<15x32x288xbf16, #tpu.memory_space<vmem>>, vector<1x32x288xbf16>
    %894 = vector.shape_cast %893 : vector<1x32x288xbf16> to vector<32x288xbf16>
    %c0_566 = arith.constant 0 : index
    %c0_567 = arith.constant 0 : index
    %895 = vector.load %arg11[%c0_566, %c0_567] : memref<288x128xbf16, #tpu.memory_space<vmem>>, vector<288x128xbf16>
    %cst_568 = arith.constant dense<0.000000e+00> : vector<32x128xf32>
    %896 = tpu.matmul %894, %895, %cst_568 {dimension_numbers = #tpu.dot_dimension_numbers<[1], [0], [0], [1], [0, 0, 1, 1], [], []>} : vector<32x288xbf16>, vector<288x128xbf16>, vector<32x128xf32> -> vector<32x128xf32>
    %cst_569 = arith.constant dense<0.000000e+00> : vector<32xf32>
    %897 = vector.multi_reduction <add>, %896, %cst_569 [1] : vector<32x128xf32> to vector<32xf32>
    %898 = vector.shape_cast %897 : vector<32xf32> to vector<32x1xf32>
    %cst_570 = arith.constant dense<0.000000e+00> : vector<32x1xf32>
    %899 = tpu.matmul %0, %898, %cst_570 {dimension_numbers = #tpu.dot_dimension_numbers<[1], [0], [0], [1], [0, 0, 1, 1], [], []>} : vector<32x32xf32>, vector<32x1xf32>, vector<32x1xf32> -> vector<32x1xf32>
    %900 = vector.broadcast %899 : vector<32x1xf32> to vector<32x128xf32>
    %901 = arith.subf %896, %900 : vector<32x128xf32>
    %902 = arith.mulf %901, %901 : vector<32x128xf32>
    %cst_571 = arith.constant dense<0.000000e+00> : vector<32xf32>
    %903 = vector.multi_reduction <add>, %902, %cst_571 [1] : vector<32x128xf32> to vector<32xf32>
    %904 = vector.shape_cast %903 : vector<32xf32> to vector<32x1xf32>
    %cst_572 = arith.constant dense<0.000000e+00> : vector<32x1xf32>
    %905 = tpu.matmul %0, %904, %cst_572 {dimension_numbers = #tpu.dot_dimension_numbers<[1], [0], [0], [1], [0, 0, 1, 1], [], []>} : vector<32x32xf32>, vector<32x1xf32>, vector<32x1xf32> -> vector<32x1xf32>
    %cst_573 = arith.constant 9.99999974E-6 : f32
    %906 = vector.broadcast %cst_573 : f32 to vector<32x1xf32>
    %907 = arith.addf %905, %906 : vector<32x1xf32>
    %908 = math.rsqrt %907 : vector<32x1xf32>
    %c9_574 = arith.constant 9 : index
    %c0_575 = arith.constant 0 : index
    %c0_576 = arith.constant 0 : index
    %909 = vector.load %arg4[%c9_574, %c0_575, %c0_576] : memref<10x32x1xf32, #tpu.memory_space<vmem>>, vector<1x32x1xf32>
    %910 = vector.shape_cast %909 : vector<1x32x1xf32> to vector<32x1xf32>
    %911 = arith.mulf %908, %910 : vector<32x1xf32>
    %912 = vector.broadcast %911 : vector<32x1xf32> to vector<32x128xf32>
    %913 = arith.mulf %901, %912 : vector<32x128xf32>
    %c9_577 = arith.constant 9 : index
    %c0_578 = arith.constant 0 : index
    %c0_579 = arith.constant 0 : index
    %914 = vector.load %arg5[%c9_577, %c0_578, %c0_579] : memref<10x32x1xf32, #tpu.memory_space<vmem>>, vector<1x32x1xf32>
    %915 = vector.shape_cast %914 : vector<1x32x1xf32> to vector<32x1xf32>
    %916 = vector.broadcast %915 : vector<32x1xf32> to vector<32x128xf32>
    %917 = arith.addf %913, %916 : vector<32x128xf32>
    %cst_580 = arith.constant 0.000000e+00 : f32
    %918 = vector.broadcast %cst_580 : f32 to vector<32x128xf32>
    %919 = arith.maximumf %917, %918 : vector<32x128xf32>
    %c9_i32_581 = arith.constant 9 : i32
    %920 = tpu.dynamic_rotate %919 by %c9_i32_581 dim 1 : vector<32x128xf32>, i32 -> vector<32x128xf32>
    %921 = vector.broadcast %2 : vector<1x128xf32> to vector<32x128xf32>
    %922 = arith.mulf %920, %921 : vector<32x128xf32>
    %923 = arith.truncf %922 : vector<32x128xf32> to vector<32x128xbf16>
    %c0_582 = arith.constant 0 : index
    %c0_583 = arith.constant 0 : index
    %924 = vector.load %arg11[%c0_582, %c0_583] : memref<288x128xbf16, #tpu.memory_space<vmem>>, vector<32x128xbf16>
    tpu.vector_store %arg11[%c0_582, %c0_583], %923 {strides = array<i32>} : memref<288x128xbf16, #tpu.memory_space<vmem>>, vector<32x128xbf16>,
    %c8_i32_584 = arith.constant 8 : i32
    %925 = tpu.dynamic_rotate %919 by %c8_i32_584 dim 1 : vector<32x128xf32>, i32 -> vector<32x128xf32>
    %926 = vector.broadcast %4 : vector<1x128xf32> to vector<32x128xf32>
    %927 = arith.mulf %925, %926 : vector<32x128xf32>
    %928 = arith.truncf %927 : vector<32x128xf32> to vector<32x128xbf16>
    %c32_585 = arith.constant 32 : index
    %c0_586 = arith.constant 0 : index
    %929 = vector.load %arg11[%c32_585, %c0_586] : memref<288x128xbf16, #tpu.memory_space<vmem>>, vector<32x128xbf16>
    tpu.vector_store %arg11[%c32_585, %c0_586], %928 {strides = array<i32>} : memref<288x128xbf16, #tpu.memory_space<vmem>>, vector<32x128xbf16>,
    %c7_i32_587 = arith.constant 7 : i32
    %930 = tpu.dynamic_rotate %919 by %c7_i32_587 dim 1 : vector<32x128xf32>, i32 -> vector<32x128xf32>
    %931 = vector.broadcast %6 : vector<1x128xf32> to vector<32x128xf32>
    %932 = arith.mulf %930, %931 : vector<32x128xf32>
    %933 = arith.truncf %932 : vector<32x128xf32> to vector<32x128xbf16>
    %c64_588 = arith.constant 64 : index
    %c0_589 = arith.constant 0 : index
    %934 = vector.load %arg11[%c64_588, %c0_589] : memref<288x128xbf16, #tpu.memory_space<vmem>>, vector<32x128xbf16>
    tpu.vector_store %arg11[%c64_588, %c0_589], %933 {strides = array<i32>} : memref<288x128xbf16, #tpu.memory_space<vmem>>, vector<32x128xbf16>,
    %c1_i32_590 = arith.constant 1 : i32
    %935 = tpu.dynamic_rotate %919 by %c1_i32_590 dim 1 : vector<32x128xf32>, i32 -> vector<32x128xf32>
    %936 = vector.broadcast %8 : vector<1x128xf32> to vector<32x128xf32>
    %937 = arith.mulf %935, %936 : vector<32x128xf32>
    %938 = arith.truncf %937 : vector<32x128xf32> to vector<32x128xbf16>
    %c96_591 = arith.constant 96 : index
    %c0_592 = arith.constant 0 : index
    %939 = vector.load %arg11[%c96_591, %c0_592] : memref<288x128xbf16, #tpu.memory_space<vmem>>, vector<32x128xbf16>
    tpu.vector_store %arg11[%c96_591, %c0_592], %938 {strides = array<i32>} : memref<288x128xbf16, #tpu.memory_space<vmem>>, vector<32x128xbf16>,
    %940 = arith.truncf %919 : vector<32x128xf32> to vector<32x128xbf16>
    %c128_593 = arith.constant 128 : index
    %c0_594 = arith.constant 0 : index
    %941 = vector.load %arg11[%c128_593, %c0_594] : memref<288x128xbf16, #tpu.memory_space<vmem>>, vector<32x128xbf16>
    tpu.vector_store %arg11[%c128_593, %c0_594], %940 {strides = array<i32>} : memref<288x128xbf16, #tpu.memory_space<vmem>>, vector<32x128xbf16>,
    %c127_i32_595 = arith.constant 127 : i32
    %942 = tpu.dynamic_rotate %919 by %c127_i32_595 dim 1 : vector<32x128xf32>, i32 -> vector<32x128xf32>
    %943 = vector.broadcast %10 : vector<1x128xf32> to vector<32x128xf32>
    %944 = arith.mulf %942, %943 : vector<32x128xf32>
    %945 = arith.truncf %944 : vector<32x128xf32> to vector<32x128xbf16>
    %c160_596 = arith.constant 160 : index
    %c0_597 = arith.constant 0 : index
    %946 = vector.load %arg11[%c160_596, %c0_597] : memref<288x128xbf16, #tpu.memory_space<vmem>>, vector<32x128xbf16>
    tpu.vector_store %arg11[%c160_596, %c0_597], %945 {strides = array<i32>} : memref<288x128xbf16, #tpu.memory_space<vmem>>, vector<32x128xbf16>,
    %c121_i32_598 = arith.constant 121 : i32
    %947 = tpu.dynamic_rotate %919 by %c121_i32_598 dim 1 : vector<32x128xf32>, i32 -> vector<32x128xf32>
    %948 = vector.broadcast %12 : vector<1x128xf32> to vector<32x128xf32>
    %949 = arith.mulf %947, %948 : vector<32x128xf32>
    %950 = arith.truncf %949 : vector<32x128xf32> to vector<32x128xbf16>
    %c192_599 = arith.constant 192 : index
    %c0_600 = arith.constant 0 : index
    %951 = vector.load %arg11[%c192_599, %c0_600] : memref<288x128xbf16, #tpu.memory_space<vmem>>, vector<32x128xbf16>
    tpu.vector_store %arg11[%c192_599, %c0_600], %950 {strides = array<i32>} : memref<288x128xbf16, #tpu.memory_space<vmem>>, vector<32x128xbf16>,
    %c120_i32_601 = arith.constant 120 : i32
    %952 = tpu.dynamic_rotate %919 by %c120_i32_601 dim 1 : vector<32x128xf32>, i32 -> vector<32x128xf32>
    %953 = vector.broadcast %14 : vector<1x128xf32> to vector<32x128xf32>
    %954 = arith.mulf %952, %953 : vector<32x128xf32>
    %955 = arith.truncf %954 : vector<32x128xf32> to vector<32x128xbf16>
    %c224_602 = arith.constant 224 : index
    %c0_603 = arith.constant 0 : index
    %956 = vector.load %arg11[%c224_602, %c0_603] : memref<288x128xbf16, #tpu.memory_space<vmem>>, vector<32x128xbf16>
    tpu.vector_store %arg11[%c224_602, %c0_603], %955 {strides = array<i32>} : memref<288x128xbf16, #tpu.memory_space<vmem>>, vector<32x128xbf16>,
    %c119_i32_604 = arith.constant 119 : i32
    %957 = tpu.dynamic_rotate %919 by %c119_i32_604 dim 1 : vector<32x128xf32>, i32 -> vector<32x128xf32>
    %958 = vector.broadcast %16 : vector<1x128xf32> to vector<32x128xf32>
    %959 = arith.mulf %957, %958 : vector<32x128xf32>
    %960 = arith.truncf %959 : vector<32x128xf32> to vector<32x128xbf16>
    %c256_605 = arith.constant 256 : index
    %c0_606 = arith.constant 0 : index
    %961 = vector.load %arg11[%c256_605, %c0_606] : memref<288x128xbf16, #tpu.memory_space<vmem>>, vector<32x128xbf16>
    tpu.vector_store %arg11[%c256_605, %c0_606], %960 {strides = array<i32>} : memref<288x128xbf16, #tpu.memory_space<vmem>>, vector<32x128xbf16>,
    %c14 = arith.constant 14 : index
    %c0_607 = arith.constant 0 : index
    %c0_608 = arith.constant 0 : index
    %962 = vector.load %arg1[%c14, %c0_607, %c0_608] : memref<15x32x288xbf16, #tpu.memory_space<vmem>>, vector<1x32x288xbf16>
    %963 = vector.shape_cast %962 : vector<1x32x288xbf16> to vector<32x288xbf16>
    %c0_609 = arith.constant 0 : index
    %c0_610 = arith.constant 0 : index
    %964 = vector.load %arg11[%c0_609, %c0_610] : memref<288x128xbf16, #tpu.memory_space<vmem>>, vector<288x128xbf16>
    %cst_611 = arith.constant dense<0.000000e+00> : vector<32x128xf32>
    %965 = tpu.matmul %963, %964, %cst_611 {dimension_numbers = #tpu.dot_dimension_numbers<[1], [0], [0], [1], [0, 0, 1, 1], [], []>} : vector<32x288xbf16>, vector<288x128xbf16>, vector<32x128xf32> -> vector<32x128xf32>
    %966 = arith.addf %850, %965 : vector<32x128xf32>
    %c4_612 = arith.constant 4 : index
    %c0_613 = arith.constant 0 : index
    %c0_614 = arith.constant 0 : index
    %967 = vector.load %arg6[%c4_612, %c0_613, %c0_614] : memref<5x32x1xf32, #tpu.memory_space<vmem>>, vector<1x32x1xf32>
    %968 = vector.shape_cast %967 : vector<1x32x1xf32> to vector<32x1xf32>
    %969 = vector.broadcast %968 : vector<32x1xf32> to vector<32x128xf32>
    %970 = arith.addf %966, %969 : vector<32x128xf32>
    %cst_615 = arith.constant 0.000000e+00 : f32
    %971 = vector.broadcast %cst_615 : f32 to vector<32x128xf32>
    %972 = arith.maximumf %970, %971 : vector<32x128xf32>
    %c0_616 = arith.constant 0 : index
    %c0_617 = arith.constant 0 : index
    %973 = vector.load %arg7[%c0_616, %c0_617] : memref<32x1xf32, #tpu.memory_space<vmem>>, vector<32x1xf32>
    %974 = vector.broadcast %973 : vector<32x1xf32> to vector<32x128xf32>
    %975 = arith.mulf %972, %974 : vector<32x128xf32>
    %cst_618 = arith.constant dense<0.000000e+00> : vector<128xf32>
    %976 = vector.multi_reduction <add>, %975, %cst_618 [0] : vector<32x128xf32> to vector<128xf32>
    %977 = vector.shape_cast %976 : vector<128xf32> to vector<1x128xf32>
    %c0_619 = arith.constant 0 : index
    %c0_620 = arith.constant 0 : index
    %978 = vector.load %arg8[%c0_619, %c0_620] : memref<2x128xf32, #tpu.memory_space<vmem>>, vector<2x128xf32>
    %979 = vector.broadcast %977 : vector<1x128xf32> to vector<2x128xf32>
    %980 = arith.mulf %978, %979 : vector<2x128xf32>
    %cst_621 = arith.constant dense<0.000000e+00> : vector<2xf32>
    %981 = vector.multi_reduction <add>, %980, %cst_621 [1] : vector<2x128xf32> to vector<2xf32>
    %982 = vector.shape_cast %981 : vector<2xf32> to vector<2x1xf32>
    %c0_622 = arith.constant 0 : index
    %c0_623 = arith.constant 0 : index
    %983 = vector.load %arg9[%c0_622, %c0_623] : memref<1x1xf32, #tpu.memory_space<vmem>>, vector<1x1xf32>
    %984 = vector.broadcast %983 : vector<1x1xf32> to vector<2x1xf32>
    %985 = arith.addf %982, %984 : vector<2x1xf32>
    %c0_624 = arith.constant 0 : index
    %c0_625 = arith.constant 0 : index
    %986 = vector.load %arg10[%c0_624, %c0_625] : memref<2x1xf32, #tpu.memory_space<vmem>>, vector<2x1xf32>
    tpu.vector_store %arg10[%c0_624, %c0_625], %985 {strides = array<i32>} : memref<2x1xf32, #tpu.memory_space<vmem>>, vector<2x1xf32>,
    return
  }
}

</mosaic_0001>

<bundles_post_ra>
// kernel: strutnet_forward.1
= control target key start
LH: loop header
LB: loop body
LE: loop exit
PB: predicated region body
PF: predicated region fallthrough
CT: control target
= control target key end

     0   :  { %s9478_s19 = smov 9   ;;  %s9479_s22 = smov 127   ;;  %vm297_vm0 = vcmask 261120   ;;  %vm7577_vm1 = vcmask 1041408   ;;  %vm7589_vm2 = vcmask 1024   ;;  %s12077_s0 = inlined_call_operand.vmem [shape: f32[32,128], index: 0, kind: input, shape index: {}]   ;;  %s12078_s1 = inlined_call_operand.vmem [shape: bf16[15,32,288], index: 1, kind: input, shape index: {}]   ;;  %s12079_s2 = inlined_call_operand.vmem [shape: f32[9,1,128], index: 2, kind: input, shape index: {}]   ;;  %s12080_s3 = inlined_call_operand.vmem [shape: f32[32,32], index: 3, kind: input, shape index: {}]   ;;  %s12081_s5 = inlined_call_operand.vmem [shape: f32[10,32,1], index: 5, kind: input, shape index: {}]   ;;  %s12082_s4 = inlined_call_operand.vmem [shape: f32[10,32,1], index: 4, kind: input, shape index: {}]   ;;  %s12083_s6 = inlined_call_operand.vmem [shape: f32[5,32,1], index: 6, kind: input, shape index: {}]   ;;  %s12084_s7 = inlined_call_operand.vmem [shape: f32[32,1], index: 7, kind: input, shape index: {}]   ;;  %s12085_s9 = inlined_call_operand.<no memory space> [shape: f32[1,1], index: 9, kind: input, shape index: {}]   ;;  %s12086_s8 = inlined_call_operand.vmem [shape: f32[2,128], index: 8, kind: input, shape index: {}]   ;;  %s12087_s10 = inlined_call_operand.vmem [shape: f32[2,1], index: 10, kind: output, shape index: {}]  }
   0x1   :  { %v9545_v0 = vld [vmem:[%s12077_s0 + $0x10] sm:$0xff]  ;;  %v57_v1 = vld [vmem:[%s12077_s0] sm:$0xff]  ;;  %v9553_v2 = vld [vmem:[%s12077_s0 + $0x18] sm:$0xff]  ;;  %s9480_s23 = smov 8   ;;  %s9482_s24 = smov 7  }
   0x2   :  { %65 = vrot.lane.b32.xlu1 %v9545_v0, %s9478_s19  ;;  %61 = vrot.lane.b32.xlu0 %v57_v1, %s9478_s19  ;;  %v58_v3 = vld [vmem:[%s12077_s0 + $0x8] sm:$0xff]  ;;  %v150_v4 = vpack.c.bf16 %v9553_v2, %v9545_v0  ;;  %s9481_s0 = smov 121   ;;  %s9483_s25 = smov 120   ;;  %v9224_v6 = vld [vmem:[%s12078_s1 + $0x4] ss:$12 sps:$4 sm:$0xff]  }
   0x3   :  { %v149_v5 = vpack.c.bf16 %v58_v3, %v57_v1  ;;  %s9484_s26 = smov 1   ;;  %336 = vmatprep.mubr.bf16.mxu0 %v9224_v6  ;;  %v9228_v7 = vld [vmem:[%s12078_s1 + $0x8] ss:$12 sps:$4 sm:$0xff]   ;;  %s9485_s11 = smov 119   ;;  %v9618_v10 = vld [vmem:[%s12079_s2] ss:$0 sm:$0xff] }
   0x4   :  { %8655 = vmatprep.mubr.msk.bf16.mxu1 %vm297_vm0, %v9228_v7  ;;  %v9625_v15 = vld [vmem:[%s12079_s2 + $0x5] ss:$0 sm:$0xff]  ;;  %v9634_v23 = vld [vmem:[%s12079_s2 + $0x1] ss:$0 sm:$0xff]  ;;  %v9648_v40 = vld [vmem:[%s12079_s2 + $0x6] ss:$0 sm:$0xff] }
   0x5   :  { %8011 = vmatprep.subr.bf16.mxu0 %v149_v5  ;;  %v9655_v46 = vld [vmem:[%s12079_s2 + $0x2] ss:$0 sm:$0xff]  ;;  %v9666_v62 = vld [vmem:[%s12079_s2 + $0x7] ss:$0 sm:$0xff] }
   0x6   :  { %67 = vrot.lane.b32.xlu1 %v9553_v2, %s9478_s19  ;;  %63 = vrot.lane.b32.xlu0 %v58_v3, %s9478_s19 }
   0xa   :  { %155 = vrot.lane.b32.xlu1 %v58_v3, %s9479_s22  ;;  %153 = vrot.lane.b32.xlu0 %v57_v1, %s9479_s22 }
   0xe   :  { %85 = vrot.lane.b32.xlu1 %v58_v3, %s9480_s23  ;;  %83 = vrot.lane.b32.xlu0 %v57_v1, %s9480_s23 }
  0x12   :  { %159 = vrot.lane.b32.xlu1 %v9553_v2, %s9479_s22  ;;  %157 = vrot.lane.b32.xlu0 %v9545_v0, %s9479_s22 }
  0x16   :  { %89 = vrot.lane.b32.xlu1 %v9553_v2, %s9480_s23  ;;  %87 = vrot.lane.b32.xlu0 %v9545_v0, %s9480_s23 }
  0x1a   :  { %177 = vrot.lane.b32.xlu1 %v58_v3, %s9481_s0  ;;  %175 = vrot.lane.b32.xlu0 %v57_v1, %s9481_s0 }
  0x1e   :  { %107 = vrot.lane.b32.xlu1 %v58_v3, %s9482_s24  ;;  %105 = vrot.lane.b32.xlu0 %v57_v1, %s9482_s24 }
  0x22   :  { %181 = vrot.lane.b32.xlu1 %v9553_v2, %s9481_s0  ;;  %179 = vrot.lane.b32.xlu0 %v9545_v0, %s9481_s0 }
  0x26   :  { %111 = vrot.lane.b32.xlu1 %v9553_v2, %s9482_s24  ;;  %109 = vrot.lane.b32.xlu0 %v9545_v0, %s9482_s24 }
  0x2a   :  { %199 = vrot.lane.b32.xlu1 %v58_v3, %s9483_s25  ;;  %197 = vrot.lane.b32.xlu0 %v57_v1, %s9483_s25 }
  0x2e   :  { %129 = vrot.lane.b32.xlu1 %v58_v3, %s9484_s26  ;;  %127 = vrot.lane.b32.xlu0 %v57_v1, %s9484_s26 }
  0x32   :  { %203 = vrot.lane.b32.xlu1 %v9553_v2, %s9483_s25  ;;  %201 = vrot.lane.b32.xlu0 %v9545_v0, %s9483_s25 }
  0x36   :  { %133 = vrot.lane.b32.xlu1 %v9553_v2, %s9484_s26  ;;  %131 = vrot.lane.b32.xlu0 %v9545_v0, %s9484_s26 }
  0x3a   :  { %221 = vrot.lane.b32.xlu1 %v58_v3, %s9485_s11  ;;  %219 = vrot.lane.b32.xlu0 %v57_v1, %s9485_s11 }
  0x3e   :  { %225 = vrot.lane.b32.xlu1 %v9553_v2, %s9485_s11  ;;  %223 = vrot.lane.b32.xlu0 %v9545_v0, %s9485_s11 }
  0x74   :  { %v66_v8 = vpop.permute.xlu1 %65  ;;  %v62_v9 = vpop.permute.xlu0 %61 }
  0x75   :  { %v75_v13 = vmul.f32 %v9618_v10, %v62_v9  ;;  %v77_v20 = vmul.f32 %v9618_v10, %v66_v8 }
  0x78   :  { %v68_v11 = vpop.permute.xlu1 %67  ;;  %v64_v12 = vpop.permute.xlu0 %63 }
  0x79   :  { %v76_v14 = vmul.f32 %v9618_v10, %v64_v12  ;;  %v78_v16 = vmul.f32 %v9618_v10, %v68_v11 }
  0x7b   :  { %v79_v17 = vpack.c.bf16 %v76_v14, %v75_v13  ;;  %v80_v24 = vpack.c.bf16 %v78_v16, %v77_v20 }
  0x7c   :  { %v156_v18 = vpop.permute.xlu1 %155  ;;  %v154_v19 = vpop.permute.xlu0 %153 }
  0x7d   :  { %v168_v21 = vmul.f32 %v9625_v15, %v156_v18  ;;  %v167_v22 = vmul.f32 %v9625_v15, %v154_v19  ;;  %8012 = vmatpush3.bf16.msra.mxu0 %v79_v17 }
  0x7e   :  { %8013 = vmatprep.subr.bf16.mxu0 %v150_v4  ;;  %v9673_v4 = vld [vmem:[%s12079_s2 + $0x3] ss:$0 sm:$0xff] }
  0x7f   :  { %v171_v25 = vpack.c.bf16 %v168_v21, %v167_v22  ;;  %v9684_v22 = vld [vmem:[%s12079_s2 + $0x8] ss:$0 sm:$0xff] }
  0x80   :  { %v86_v26 = vpop.permute.xlu1 %85  ;;  %v84_v27 = vpop.permute.xlu0 %83 }
  0x81   :  { %v98_v28 = vmul.f32 %v9634_v23, %v86_v26  ;;  %v97_v29 = vmul.f32 %v9634_v23, %v84_v27  ;;  %8014 = vmatpush3.bf16.msra.mxu0 %v80_v24  ;;  %v9222_v27 = vld [vmem:[%s12078_s1] ss:$12 sps:$4 sm:$0xff]  }
  0x82   :  { %8015 = vmatprep.subr.bf16.mxu0 %v171_v25 }
  0x83   :  { %v101_v30 = vpack.c.bf16 %v98_v28, %v97_v29 }
  0x84   :  { %v160_v31 = vpop.permute.xlu1 %159  ;;  %v158_v32 = vpop.permute.xlu0 %157 }
  0x85   :  { %v170_v33 = vmul.f32 %v9625_v15, %v160_v31  ;;  %v169_v34 = vmul.f32 %v9625_v15, %v158_v32  ;;  %8016 = vmatpush3.bf16.msra.mxu0 %v101_v30  ;;  %v9225_v30 = vld [vmem:[%s12078_s1 + $0x1c] ss:$12 sps:$4 sm:$0xff]  }
  0x87   :  { %v172_v35 = vpack.c.bf16 %v170_v33, %v169_v34 }
  0x88   :  { %v90_v36 = vpop.permute.xlu1 %89  ;;  %v88_v37 = vpop.permute.xlu0 %87 }
  0x89   :  { %v100_v38 = vmul.f32 %v9634_v23, %v90_v36  ;;  %v99_v39 = vmul.f32 %v9634_v23, %v88_v37  ;;  %8017 = vmatprep.subr.bf16.mxu0 %v172_v35  ;;  %v9227_v37 = vld [vmem:[%s12078_s1 + $0x18] ss:$12 sps:$4 sm:$0xff]  }
  0x8b   :  { %v102_v41 = vpack.c.bf16 %v100_v38, %v99_v39  ;;  %v9229_v38 = vld [vmem:[%s12078_s1 + $0x20] ss:$12 sps:$4 sm:$0xff]  }
  0x8c   :  { %v178_v42 = vpop.permute.xlu1 %177  ;;  %v176_v43 = vpop.permute.xlu0 %175 }
  0x8d   :  { %v190_v44 = vmul.f32 %v9648_v40, %v178_v42  ;;  %v189_v45 = vmul.f32 %v9648_v40, %v176_v43  ;;  %8018 = vmatpush3.bf16.msra.mxu0 %v102_v41 }
  0x8f   :  { %v193_v47 = vpack.c.bf16 %v190_v44, %v189_v45 }
  0x90   :  { %v108_v48 = vpop.permute.xlu1 %107  ;;  %v106_v49 = vpop.permute.xlu0 %105 }
  0x91   :  { %v120_v50 = vmul.f32 %v9655_v46, %v108_v48  ;;  %v119_v51 = vmul.f32 %v9655_v46, %v106_v49  ;;  %8019 = vmatprep.subr.bf16.mxu0 %v193_v47 }
  0x93   :  { %v123_v52 = vpack.c.bf16 %v120_v50, %v119_v51 }
  0x94   :  { %v182_v53 = vpop.permute.xlu1 %181  ;;  %v180_v54 = vpop.permute.xlu0 %179 }
  0x95   :  { %v192_v55 = vmul.f32 %v9648_v40, %v182_v53  ;;  %v191_v56 = vmul.f32 %v9648_v40, %v180_v54  ;;  %8020 = vmatpush3.bf16.msra.mxu0 %v123_v52 }
  0x97   :  { %v194_v57 = vpack.c.bf16 %v192_v55, %v191_v56 }
  0x98   :  { %v112_v58 = vpop.permute.xlu1 %111  ;;  %v110_v59 = vpop.permute.xlu0 %109 }
  0x99   :  { %v122_v60 = vmul.f32 %v9655_v46, %v112_v58  ;;  %v121_v61 = vmul.f32 %v9655_v46, %v110_v59  ;;  %8021 = vmatprep.subr.bf16.mxu0 %v194_v57 }
  0x9b   :  { %v124_v63 = vpack.c.bf16 %v122_v60, %v121_v61  ;;  %v9706_v61 = vld [vmem:[%s12080_s3] sm:$0xff] }
  0x9c   :  { %v200_v0 = vpop.permute.xlu1 %199  ;;  %v198_v1 = vpop.permute.xlu0 %197 }
  0x9d   :  { %v212_v2 = vmul.f32 %v9666_v62, %v200_v0  ;;  %v211_v3 = vmul.f32 %v9666_v62, %v198_v1  ;;  %8022 = vmatpush3.bf16.msra.mxu0 %v124_v63  ;;  %v9486_v63 = vmov 0  }
  0x9e   :  { %9220 = vset.pattern.permute.xlu0 %v9486_v63  ;;  %9221 = vset.pattern.permute.xlu1 %v9486_v63  ;;  %v667_v63 = vld [vmem:[%s12081_s5 + $0x18] sm:$0xff] }
  0x9f   :  { %v215_v5 = vpack.c.bf16 %v212_v2, %v211_v3 }
  0xa0   :  { %v130_v6 = vpop.permute.xlu1 %129  ;;  %v128_v7 = vpop.permute.xlu0 %127 }
  0xa1   :  { %v142_v8 = vmul.f32 %v9673_v4, %v130_v6  ;;  %v141_v9 = vmul.f32 %v9673_v4, %v128_v7  ;;  %8023 = vmatprep.subr.bf16.mxu0 %v215_v5  ;;  %v9713_v7 = vld [vmem:[%s12080_s3 + $0x8] sm:$0xff] }
  0xa3   :  { %v145_v11 = vpack.c.bf16 %v142_v8, %v141_v9  ;;  %v9718_v8 = vld [vmem:[%s12080_s3 + $0x10] sm:$0xff]  ;;  %v9727_v9 = vld [vmem:[%s12080_s3 + $0x18] sm:$0xff] }
  0xa4   :  { %v204_v12 = vpop.permute.xlu1 %203  ;;  %v202_v13 = vpop.permute.xlu0 %201 }
  0xa5   :  { %v214_v14 = vmul.f32 %v9666_v62, %v204_v12  ;;  %v213_v16 = vmul.f32 %v9666_v62, %v202_v13  ;;  %8024 = vmatpush3.bf16.msra.mxu0 %v145_v11 }
  0xa7   :  { %v216_v17 = vpack.c.bf16 %v214_v14, %v213_v16 }
  0xa8   :  { %v134_v18 = vpop.permute.xlu1 %133  ;;  %v132_v19 = vpop.permute.xlu0 %131 }
  0xa9   :  { %v144_v20 = vmul.f32 %v9673_v4, %v134_v18  ;;  %v143_v21 = vmul.f32 %v9673_v4, %v132_v19  ;;  %8025 = vmatprep.subr.bf16.mxu0 %v216_v17 }
  0xab   :  { %v146_v24 = vpack.c.bf16 %v144_v20, %v143_v21 }
  0xac   :  { %v222_v25 = vpop.permute.xlu1 %221  ;;  %v220_v26 = vpop.permute.xlu0 %219 }
  0xad   :  { %v234_v28 = vmul.f32 %v9684_v22, %v222_v25  ;;  %v233_v29 = vmul.f32 %v9684_v22, %v220_v26  ;;  %8026 = vmatpush3.bf16.msra.mxu0 %v146_v24 }
  0xaf   :  { %v237_v31 = vpack.c.bf16 %v234_v28, %v233_v29 }
  0xb0   :  { %v226_v32 = vpop.permute.xlu1 %225  ;;  %v224_v33 = vpop.permute.xlu0 %223  ;;  %337 = vmatmul.mubr.bf16.vlgmr.msra.gmra.mrb[0].mxu0 %v9222_v27 }
  0xb1   :  { %v236_v34 = vmul.f32 %v9684_v22, %v226_v32  ;;  %v235_v35 = vmul.f32 %v9684_v22, %v224_v33  ;;  %8651 = vmatprep.subr.bf16.mxu1 %v237_v31  ;;  %344 = vmatprep.mubr.bf16.mxu0 %v9225_v30  ;;  %v664_v30 = vld [vmem:[%s12081_s5] sm:$0xff] }
  0xb2   :  { %8652 = vmatpush3.bf16.msra.mxu1 %v237_v31  ;;  %v665_v31 = vld [vmem:[%s12081_s5 + $0x8] sm:$0xff] }
  0xb3   :  { %v238_v36 = vpack.c.bf16 %v236_v34, %v235_v35 }
  0xb5   :  { %8653 = vmatprep.subr.bf16.mxu1 %v238_v36 }
  0xb6   :  { %8654 = vmatpush3.bf16.msra.mxu1 %v238_v36 }
  0xb8   :  { %345 = vmatmul.mubr.bf16.gmra.mrb[4].mxu0 %v9227_v37 }
  0xb9   :  { %8656 = vmatmul.mubr.msk.bf16.vlgmr.msra.gmra.mrb[0].mxu1 %vm297_vm0, %v9229_v38 }
  0xba   :  { %8667 = vmatprep.mubr.msk.f32.mxu1 %vm297_vm0, %v9706_v61 }
 0x183   :  { %v8027_v39 = vpop.f32.mrb[0].mxu0 }
 0x184   :  { %v8028_v41 = vpop.f32.mrb[1].mxu0 }
 0x185   :  { %v8029_v42 = vadd.f32 %v8028_v41, %v8027_v39  ;;  %v8030_v43 = vpop.f32.mrb[2].mxu0 }
 0x186   :  { %v8031_v44 = vpop.f32.mrb[3].mxu0 }
 0x187   :  { %v8032_v45 = vadd.f32 %v8031_v44, %v8030_v43 }
 0x18b   :  { %v8033_v47 = vpop.f32.mrb[4].mxu0 }
 0x18c   :  { %v8034_v48 = vpop.f32.mrb[5].mxu0  ;;  %v8657_v49 = vpop.f32.mrb[0].mxu1 }
 0x18d   :  { %v8035_v50 = vadd.f32 %v8034_v48, %v8033_v47  ;;  %v8036_v51 = vpop.f32.mrb[6].mxu0  ;;  %v387_v52 = vpop.f32.mrb[1].mxu1  ;;  %v633_v48 = vld [vmem:[%s12082_s4 + $0x8] sm:$0xff] }
 0x18e   :  { %v388_v53 = vadd.f32 %v8029_v42, %v387_v52  ;;  %v8037_v54 = vpop.f32.mrb[7].mxu0  ;;  %v8658_v55 = vpop.f32.mrb[2].mxu1 }
 0x18f   :  { %v396_v56 = vadd.f32 %v8657_v49, %v8035_v50  ;;  %v8038_v57 = vadd.f32 %v8037_v54, %v8036_v51  ;;  %v390_v58 = vpop.f32.mrb[3].mxu1  ;;  %v632_v49 = vld [vmem:[%s12082_s4] sm:$0xff]  ;;  %v635_v54 = vld [vmem:[%s12082_s4 + $0x18] sm:$0xff] }
 0x190   :  { %v391_v59 = vadd.f32 %v8032_v45, %v390_v58  ;;  %402 = vadd.xlane.f32.xlu0 %v388_v53 }
 0x191   :  { %v399_v60 = vadd.f32 %v8658_v55, %v8038_v57 }
 0x192   :  { %404 = vadd.xlane.f32.xlu1 %v391_v59 }
 0x194   :  { %406 = vadd.xlane.f32.xlu0 %v396_v56 }
 0x198   :  { %408 = vadd.xlane.f32.xlu0 %v399_v60 }
 0x21d   :  { %v403_v0 = vpop.xlane.xlu0 %402 }
 0x21f   :  { %v405_v1 = vpop.xlane.xlu1 %404 }
 0x220   :  { %v9051_v2 = vpack.c.bf16 %v405_v1, %v403_v0 }
 0x221   :  { %v407_v3 = vpop.xlane.xlu0 %406 }
 0x222   :  { %9052 = vmatprep.subr.bf16.mxu1 %v9051_v2 }
 0x223   :  { %9054 = vmatpush3.bf16.msra.mxu1 %v9051_v2 }
 0x225   :  { %v409_v5 = vpop.xlane.xlu0 %408 }
 0x226   :  { %v9055_v6 = vpack.c.bf16 %v409_v5, %v407_v3 }
 0x228   :  { %9056 = vmatprep.subr.bf16.mxu1 %v9055_v6 }
 0x229   :  { %9058 = vmatpush3.bf16.msra.mxu1 %v9055_v6 }
 0x22c   :  { %8668 = vmatmul.mubr.msk.f32.vlgmr.msra.gmra.mrb[4].mxu1 %vm297_vm0, %v9713_v7 }
 0x22d   :  { %8670 = vmatprep.mubr.msk.f32.mxu1 %vm297_vm0, %v9718_v8 }
 0x230   :  { %8671 = vmatmul.mubr.msk.f32.gmra.mrb[6].mxu1 %vm297_vm0, %v9727_v9 }
 0x231   :  { %8681 = vmatprep.mubr.msk.f32.mxu1 %vm297_vm0, %v9706_v61 }
 0x2ff   :  { %v8669_v11 = vpop.f32.mrb[4].mxu1 }
 0x300   :  { %514 = vperm.xlu0 %9220, %v8669_v11   ;;  %v488_v12 = vpop.f32.mrb[5].mxu1 }
 0x301   :  { %509 = vperm.xlu1 %9221, %v488_v12  }
 0x303   :  { %v8672_v13 = vpop.f32.mrb[6].mxu1 }
 0x304   :  { %v498_v14 = vpop.f32.mrb[7].mxu1 }
 0x305   :  { %519 = vperm.xlu1 %9221, %v498_v14  }
 0x309   :  { %524 = vperm.xlu1 %9221, %v8672_v13  }
 0x37f   :  { %v515_v16 = vpop.permute.xlu0 %514 }
 0x380   :  { %v9733_v17 = vsub.f32 %v391_v59, %v515_v16  ;;  %v510_v18 = vpop.permute.xlu1 %509  ;;  %v634_v59 = vld [vmem:[%s12082_s4 + $0x10] sm:$0xff] }
 0x381   :  { %v9735_v19 = vsub.f32 %v388_v53, %v510_v18 }
 0x382   :  { %v532_v20 = vmul.f32 %v9733_v17, %v9733_v17 }
 0x383   :  { %v531_v21 = vmul.f32 %v9735_v19, %v9735_v19 }
 0x384   :  { %537 = vadd.xlane.f32.xlu0 %v532_v20  ;;  %v520_v24 = vpop.permute.xlu1 %519 }
 0x385   :  { %v9741_v25 = vsub.f32 %v396_v56, %v520_v24  ;;  %535 = vadd.xlane.f32.xlu1 %v531_v21  ;;  %v666_v56 = vld [vmem:[%s12081_s5 + $0x10] sm:$0xff] }
 0x387   :  { %v533_v26 = vmul.f32 %v9741_v25, %v9741_v25 }
 0x388   :  { %v525_v27 = vpop.permute.xlu1 %524 }
 0x389   :  { %v9745_v28 = vsub.f32 %v399_v60, %v525_v27  ;;  %539 = vadd.xlane.f32.xlu1 %v533_v26 }
 0x38b   :  { %v534_v29 = vmul.f32 %v9745_v28, %v9745_v28 }
 0x38d   :  { %541 = vadd.xlane.f32.xlu1 %v534_v29 }
 0x39e   :  { %670 = vperm.xlu1 %9221, %v664_v30   ;;  %v9236_v30 = vld [vmem:[%s12078_s1 + $0x38] ss:$12 sps:$4 sm:$0xff]  }
 0x39f   :  { %8691 = vmatprep.mubr.msk.bf16.mxu0 %vm297_vm0, %v9236_v30 }
 0x3a2   :  { %675 = vperm.xlu1 %9221, %v665_v31  }
 0x411   :  { %v538_v32 = vpop.xlane.xlu0 %537 }
 0x412   :  { %v536_v33 = vpop.xlane.xlu1 %535 }
 0x413   :  { %v9059_v34 = vpack.c.bf16 %v538_v32, %v536_v33 }
 0x415   :  { %9060 = vmatprep.subr.bf16.mxu1 %v9059_v34 }
 0x416   :  { %9062 = vmatpush3.bf16.msra.mxu1 %v9059_v34  ;;  %v540_v35 = vpop.xlane.xlu1 %539 }
 0x41a   :  { %v542_v36 = vpop.xlane.xlu1 %541 }
 0x41b   :  { %v9063_v37 = vpack.c.bf16 %v542_v36, %v540_v35 }
 0x41d   :  { %9064 = vmatprep.subr.bf16.mxu1 %v9063_v37 }
 0x41e   :  { %9066 = vmatpush3.bf16.msra.mxu1 %v9063_v37  ;;  %v671_v0 = vpop.permute.xlu1 %670 }
 0x421   :  { %8682 = vmatmul.mubr.msk.f32.vlgmr.msra.gmra.mrb[8].mxu1 %vm297_vm0, %v9713_v7 }
 0x422   :  { %8684 = vmatprep.mubr.msk.f32.mxu1 %vm297_vm0, %v9718_v8  ;;  %v676_v1 = vpop.permute.xlu1 %675 }
 0x425   :  { %8685 = vmatmul.mubr.msk.f32.gmra.mrb[10].mxu1 %vm297_vm0, %v9727_v9 }
 0x4f4   :  { %v8683_v38 = vpop.f32.mrb[8].mxu1 }
 0x4f5   :  { %v615_v39 = vadd.f32 1e-05, %v8683_v38  ;;  %v609_v41 = vpop.f32.mrb[9].mxu1 }
 0x4f6   :  { %v610_v42 = vadd.f32 1e-05, %v609_v41 }
 0x4f7   :  { %9342 = vrsqrt.f32 %v615_v39 }
 0x4f8   :  { %9344 = vrsqrt.f32 %v610_v42  ;;  %v8686_v43 = vpop.f32.mrb[10].mxu1 }
 0x4f9   :  { %v625_v44 = vadd.f32 1e-05, %v8686_v43  ;;  %v619_v45 = vpop.f32.mrb[11].mxu1 }
 0x4fa   :  { %v620_v47 = vadd.f32 1e-05, %v619_v45 }
 0x4fb   :  { %9346 = vrsqrt.f32 %v625_v44 }
 0x4fc   :  { %9348 = vrsqrt.f32 %v620_v47 }
 0x501   :  { %v9343_v50 = vpop.eup %9342 }
 0x502   :  { %v9345_v51 = vpop.eup %9344  ;;  %v637_v52 = vmul.f32 %v9343_v50, %v633_v48 }
 0x503   :  { %v636_v53 = vmul.f32 %v9345_v51, %v632_v49 }
 0x504   :  { %647 = vperm.xlu0 %9220, %v637_v52  }
 0x505   :  { %v9347_v55 = vpop.eup %9346  ;;  %642 = vperm.xlu1 %9221, %v636_v53  }
 0x506   :  { %v9349_v57 = vpop.eup %9348  ;;  %v639_v58 = vmul.f32 %v9347_v55, %v635_v54 }
 0x507   :  { %v638_v60 = vmul.f32 %v9349_v57, %v634_v59 }
 0x508   :  { %680 = vperm.xlu0 %9220, %v666_v56  }
 0x509   :  { %657 = vperm.xlu1 %9221, %v639_v58  }
 0x50d   :  { %652 = vperm.xlu1 %9221, %v638_v60  }
 0x511   :  { %685 = vperm.xlu1 %9221, %v667_v63  }
 0x583   :  { %v648_v2 = vpop.permute.xlu0 %647 }
 0x584   :  { %v661_v3 = vmul.f32 %v648_v2, %v9733_v17  ;;  %v643_v5 = vpop.permute.xlu1 %642 }
 0x585   :  { %v660_v6 = vmul.f32 %v643_v5, %v9735_v19 }
 0x586   :  { %v689_v11 = vadd.f32 %v676_v1, %v661_v3 }
 0x587   :  { %v688_v12 = vadd.f32 %v671_v0, %v660_v6  ;;  %v681_v24 = vpop.permute.xlu0 %680 }
 0x588   :  { %v9781_v13 = vmax.f32 %v689_v11, 0.0  ;;  %v658_v17 = vpop.permute.xlu1 %657 }
 0x589   :  { %v9783_v14 = vmax.f32 %v688_v12, 0.0  ;;  %v663_v21 = vmul.f32 %v658_v17, %v9745_v28  ;;  %v9232_v28 = vld [vmem:[%s12078_s1 + $0x34] ss:$12 sps:$4 sm:$0xff]  }
 0x58a   :  { %698 = vrot.lane.b32.xlu1 %v9781_v13, %s9478_s19  ;;  %923 = vmatprep.mubr.bf16.mxu1 %v9232_v28 }
 0x58b   :  { %696 = vrot.lane.b32.xlu0 %v9783_v14, %s9478_s19  ;;  %v760_v16 = vpack.c.bf16 %v9781_v13, %v9783_v14 }
 0x58c   :  { %v653_v18 = vpop.permute.xlu1 %652 }
 0x58d   :  { %8059 = vmatprep.subr.bf16.mxu1 %v760_v16  ;;  %v662_v19 = vmul.f32 %v653_v18, %v9741_v25 }
 0x58e   :  { %766 = vrot.lane.b32.xlu1 %v9781_v13, %s9479_s22 }
 0x58f   :  { %764 = vrot.lane.b32.xlu0 %v9783_v14, %s9479_s22  ;;  %v690_v27 = vadd.f32 %v681_v24, %v662_v19 }
 0x590   :  { %v686_v20 = vpop.permute.xlu1 %685 }
 0x591   :  { %v691_v26 = vadd.f32 %v686_v20, %v663_v21  ;;  %v9819_v25 = vmax.f32 %v690_v27, 0.0 }
 0x592   :  { %714 = vrot.lane.b32.xlu1 %v9781_v13, %s9480_s23 }
 0x593   :  { %712 = vrot.lane.b32.xlu0 %v9783_v14, %s9480_s23  ;;  %v9817_v29 = vmax.f32 %v691_v26, 0.0 }
 0x595   :  { %v761_v38 = vpack.c.bf16 %v9817_v29, %v9819_v25 }
 0x596   :  { %782 = vrot.lane.b32.xlu1 %v9781_v13, %s9481_s0 }
 0x597   :  { %780 = vrot.lane.b32.xlu0 %v9783_v14, %s9481_s0 }
 0x59a   :  { %730 = vrot.lane.b32.xlu1 %v9781_v13, %s9482_s24 }
 0x59b   :  { %728 = vrot.lane.b32.xlu0 %v9783_v14, %s9482_s24 }
 0x59e   :  { %798 = vrot.lane.b32.xlu1 %v9781_v13, %s9483_s25 }
 0x59f   :  { %796 = vrot.lane.b32.xlu0 %v9783_v14, %s9483_s25 }
 0x5a2   :  { %746 = vrot.lane.b32.xlu1 %v9781_v13, %s9484_s26 }
 0x5a3   :  { %744 = vrot.lane.b32.xlu0 %v9783_v14, %s9484_s26 }
 0x5a6   :  { %702 = vrot.lane.b32.xlu1 %v9817_v29, %s9478_s19 }
 0x5a7   :  { %700 = vrot.lane.b32.xlu0 %v9819_v25, %s9478_s19 }
 0x5aa   :  { %770 = vrot.lane.b32.xlu1 %v9817_v29, %s9479_s22 }
 0x5ab   :  { %768 = vrot.lane.b32.xlu0 %v9819_v25, %s9479_s22 }
 0x5ae   :  { %718 = vrot.lane.b32.xlu1 %v9817_v29, %s9480_s23 }
 0x5af   :  { %716 = vrot.lane.b32.xlu0 %v9819_v25, %s9480_s23 }
 0x5b2   :  { %786 = vrot.lane.b32.xlu1 %v9817_v29, %s9481_s0 }
 0x5b3   :  { %784 = vrot.lane.b32.xlu0 %v9819_v25, %s9481_s0 }
 0x5b6   :  { %734 = vrot.lane.b32.xlu1 %v9817_v29, %s9482_s24 }
 0x5b7   :  { %732 = vrot.lane.b32.xlu0 %v9819_v25, %s9482_s24 }
 0x5ba   :  { %802 = vrot.lane.b32.xlu1 %v9817_v29, %s9483_s25 }
 0x5bb   :  { %800 = vrot.lane.b32.xlu0 %v9819_v25, %s9483_s25 }
 0x5be   :  { %750 = vrot.lane.b32.xlu1 %v9817_v29, %s9484_s26 }
 0x5bf   :  { %748 = vrot.lane.b32.xlu0 %v9819_v25, %s9484_s26 }
 0x5c2   :  { %814 = vrot.lane.b32.xlu1 %v9781_v13, %s9485_s11 }
 0x5c3   :  { %812 = vrot.lane.b32.xlu0 %v9783_v14, %s9485_s11 }
 0x5c6   :  { %818 = vrot.lane.b32.xlu1 %v9817_v29, %s9485_s11 }
 0x5c7   :  { %816 = vrot.lane.b32.xlu0 %v9819_v25, %s9485_s11 }
 0x5fc   :  { %v699_v31 = vpop.permute.xlu1 %698 }
 0x5fd   :  { %v705_v32 = vmul.f32 %v9618_v10, %v699_v31  ;;  %v697_v33 = vpop.permute.xlu0 %696 }
 0x5fe   :  { %v704_v34 = vmul.f32 %v9618_v10, %v697_v33 }
 0x600   :  { %v708_v35 = vpack.c.bf16 %v705_v32, %v704_v34  ;;  %v767_v36 = vpop.permute.xlu1 %766 }
 0x601   :  { %v765_v37 = vpop.permute.xlu0 %764  ;;  %v773_v52 = vmul.f32 %v9625_v15, %v767_v36 }
 0x602   :  { %8060 = vmatpush3.bf16.msra.mxu1 %v708_v35  ;;  %v772_v53 = vmul.f32 %v9625_v15, %v765_v37 }
 0x603   :  { %8061 = vmatprep.subr.bf16.mxu1 %v761_v38 }
 0x604   :  { %v715_v39 = vpop.permute.xlu1 %714  ;;  %v776_v63 = vpack.c.bf16 %v773_v52, %v772_v53 }
 0x605   :  { %v713_v41 = vpop.permute.xlu0 %712  ;;  %v721_v57 = vmul.f32 %v9634_v23, %v715_v39 }
 0x606   :  { %v720_v58 = vmul.f32 %v9634_v23, %v713_v41 }
 0x608   :  { %v783_v42 = vpop.permute.xlu1 %782  ;;  %v724_v3 = vpack.c.bf16 %v721_v57, %v720_v58 }
 0x609   :  { %v781_v43 = vpop.permute.xlu0 %780  ;;  %v789_v11 = vmul.f32 %v9648_v40, %v783_v42 }
 0x60c   :  { %v731_v44 = vpop.permute.xlu1 %730 }
 0x60d   :  { %v729_v45 = vpop.permute.xlu0 %728  ;;  %v737_v18 = vmul.f32 %v9655_v46, %v731_v44 }
 0x610   :  { %v799_v47 = vpop.permute.xlu1 %798 }
 0x611   :  { %v797_v48 = vpop.permute.xlu0 %796 }
 0x612   :  { %v804_v32 = vmul.f32 %v9666_v62, %v797_v48 }
 0x614   :  { %v747_v49 = vpop.permute.xlu1 %746 }
 0x615   :  { %v745_v50 = vpop.permute.xlu0 %744  ;;  %v753_v36 = vmul.f32 %v9673_v4, %v747_v49 }
 0x618   :  { %v703_v51 = vpop.permute.xlu1 %702 }
 0x619   :  { %v707_v54 = vmul.f32 %v9618_v10, %v703_v51  ;;  %v701_v55 = vpop.permute.xlu0 %700 }
 0x61a   :  { %v706_v56 = vmul.f32 %v9618_v10, %v701_v55  ;;  %v788_v10 = vmul.f32 %v9648_v40, %v781_v43  ;;  %v9233_v55 = vld [vmem:[%s12078_s1 + $0x4c] ss:$12 sps:$4 sm:$0xff]  }
 0x61c   :  { %v709_v59 = vpack.c.bf16 %v707_v54, %v706_v56  ;;  %v771_v60 = vpop.permute.xlu1 %770  ;;  %v792_v21 = vpack.c.bf16 %v789_v11, %v788_v10 }
 0x61d   :  { %v775_v0 = vmul.f32 %v9625_v15, %v771_v60  ;;  %v769_v1 = vpop.permute.xlu0 %768 }
 0x61e   :  { %v774_v2 = vmul.f32 %v9625_v15, %v769_v1  ;;  %8062 = vmatpush3.bf16.msra.mxu1 %v709_v59  ;;  %v736_v15 = vmul.f32 %v9655_v46, %v729_v45 }
 0x61f   :  { %8063 = vmatprep.subr.bf16.mxu1 %v776_v63  ;;  %v9235_v63 = vld [vmem:[%s12078_s1 + $0x48] ss:$12 sps:$4 sm:$0xff]  }
 0x620   :  { %v777_v5 = vpack.c.bf16 %v775_v0, %v774_v2  ;;  %v719_v6 = vpop.permute.xlu1 %718  ;;  %v740_v28 = vpack.c.bf16 %v737_v18, %v736_v15  ;;  %v9237_v0 = vld [vmem:[%s12078_s1 + $0x50] ss:$12 sps:$4 sm:$0xff]  }
 0x621   :  { %v723_v12 = vmul.f32 %v9634_v23, %v719_v6  ;;  %v717_v16 = vpop.permute.xlu0 %716 }
 0x622   :  { %v722_v17 = vmul.f32 %v9634_v23, %v717_v16  ;;  %8064 = vmatpush3.bf16.msra.mxu1 %v724_v3  ;;  %v805_v23 = vmul.f32 %v9666_v62, %v799_v47 }
 0x623   :  { %8065 = vmatprep.subr.bf16.mxu1 %v777_v5 }
 0x624   :  { %v725_v19 = vpack.c.bf16 %v723_v12, %v722_v17  ;;  %v787_v20 = vpop.permute.xlu1 %786  ;;  %v808_v39 = vpack.c.bf16 %v805_v23, %v804_v32 }
 0x625   :  { %v791_v24 = vmul.f32 %v9648_v40, %v787_v20  ;;  %v785_v26 = vpop.permute.xlu0 %784 }
 0x626   :  { %v790_v27 = vmul.f32 %v9648_v40, %v785_v26  ;;  %8066 = vmatpush3.bf16.msra.mxu1 %v725_v19  ;;  %v752_v40 = vmul.f32 %v9673_v4, %v745_v50 }
 0x627   :  { %8067 = vmatprep.subr.bf16.mxu1 %v792_v21 }
 0x628   :  { %v793_v30 = vpack.c.bf16 %v791_v24, %v790_v27  ;;  %v735_v31 = vpop.permute.xlu1 %734  ;;  %v756_v44 = vpack.c.bf16 %v753_v36, %v752_v40 }
 0x629   :  { %v739_v33 = vmul.f32 %v9655_v46, %v735_v31  ;;  %v733_v34 = vpop.permute.xlu0 %732 }
 0x62a   :  { %v738_v35 = vmul.f32 %v9655_v46, %v733_v34  ;;  %8068 = vmatpush3.bf16.msra.mxu1 %v740_v28 }
 0x62b   :  { %8069 = vmatprep.subr.bf16.mxu1 %v793_v30 }
 0x62c   :  { %v741_v37 = vpack.c.bf16 %v739_v33, %v738_v35  ;;  %v803_v38 = vpop.permute.xlu1 %802 }
 0x62d   :  { %v807_v41 = vmul.f32 %v9666_v62, %v803_v38  ;;  %v801_v42 = vpop.permute.xlu0 %800 }
 0x62e   :  { %v806_v43 = vmul.f32 %v9666_v62, %v801_v42  ;;  %8070 = vmatpush3.bf16.msra.mxu1 %v741_v37  ;;  %v9230_v62 = vld [vmem:[%s12078_s1 + $0x30] ss:$12 sps:$4 sm:$0xff]  }
 0x62f   :  { %8071 = vmatprep.subr.bf16.mxu1 %v808_v39 }
 0x630   :  { %v809_v45 = vpack.c.bf16 %v807_v41, %v806_v43  ;;  %v751_v47 = vpop.permute.xlu1 %750 }
 0x631   :  { %v755_v46 = vmul.f32 %v9673_v4, %v751_v47  ;;  %v749_v48 = vpop.permute.xlu0 %748 }
 0x632   :  { %v754_v49 = vmul.f32 %v9673_v4, %v749_v48  ;;  %8072 = vmatpush3.bf16.msra.mxu1 %v756_v44 }
 0x633   :  { %8073 = vmatprep.subr.bf16.mxu1 %v809_v45 }
 0x634   :  { %v757_v50 = vpack.c.bf16 %v755_v46, %v754_v49  ;;  %v815_v51 = vpop.permute.xlu1 %814 }
 0x635   :  { %v821_v52 = vmul.f32 %v9684_v22, %v815_v51  ;;  %v813_v53 = vpop.permute.xlu0 %812  ;;  %v7655_v51 = vld [vmem:[%s12081_s5 + $0x28] sm:$0xff] }
 0x636   :  { %v820_v54 = vmul.f32 %v9684_v22, %v813_v53  ;;  %8074 = vmatpush3.bf16.msra.mxu1 %v757_v50  ;;  %v7654_v50 = vld [vmem:[%s12081_s5 + $0x20] sm:$0xff] }
 0x638   :  { %v824_v56 = vpack.c.bf16 %v821_v52, %v820_v54  ;;  %v819_v4 = vpop.permute.xlu1 %818 }
 0x639   :  { %v823_v57 = vmul.f32 %v9684_v22, %v819_v4  ;;  %v817_v58 = vpop.permute.xlu0 %816  ;;  %924 = vmatmul.mubr.bf16.vlgmr.msra.gmra.mrb[12].mxu1 %v9230_v62 }
 0x63a   :  { %v822_v59 = vmul.f32 %v9684_v22, %v817_v58  ;;  %8687 = vmatprep.subr.bf16.mxu0 %v824_v56  ;;  %931 = vmatprep.mubr.bf16.mxu1 %v9233_v55 }
 0x63b   :  { %8688 = vmatpush3.bf16.msra.mxu0 %v824_v56 }
 0x63c   :  { %v825_v60 = vpack.c.bf16 %v823_v57, %v822_v59 }
 0x63e   :  { %8689 = vmatprep.subr.bf16.mxu0 %v825_v60 }
 0x63f   :  { %8690 = vmatpush3.bf16.msra.mxu0 %v825_v60 }
 0x641   :  { %932 = vmatmul.mubr.bf16.gmra.mrb[16].mxu1 %v9235_v63 }
 0x642   :  { %8692 = vmatmul.mubr.msk.bf16.vlgmr.msra.gmra.mrb[8].mxu0 %vm297_vm0, %v9237_v0 }
 0x643   :  { %8703 = vmatprep.mubr.msk.f32.mxu0 %vm297_vm0, %v9706_v61 }
 0x70c   :  { %v8075_v22 = vpop.f32.mrb[12].mxu1 }
 0x70d   :  { %v8076_v1 = vpop.f32.mrb[13].mxu1 }
 0x70e   :  { %v8077_v2 = vadd.f32 %v8076_v1, %v8075_v22  ;;  %v8078_v3 = vpop.f32.mrb[14].mxu1 }
 0x70f   :  { %v8079_v5 = vpop.f32.mrb[15].mxu1 }
 0x710   :  { %v8080_v6 = vadd.f32 %v8079_v5, %v8078_v3  ;;  %v7653_v5 = vld [vmem:[%s12082_s4 + $0x38] sm:$0xff] }
 0x714   :  { %v8081_v11 = vpop.f32.mrb[16].mxu1 }
 0x715   :  { %v8082_v10 = vpop.f32.mrb[17].mxu1  ;;  %v8693_v12 = vpop.f32.mrb[8].mxu0 }
 0x716   :  { %v8083_v16 = vadd.f32 %v8082_v10, %v8081_v11  ;;  %v8084_v17 = vpop.f32.mrb[18].mxu1  ;;  %v974_v18 = vpop.f32.mrb[9].mxu0 }
 0x717   :  { %v975_v15 = vadd.f32 %v8077_v2, %v974_v18  ;;  %v8085_v19 = vpop.f32.mrb[19].mxu1  ;;  %v8694_v20 = vpop.f32.mrb[10].mxu0  ;;  %v7657_v18 = vld [vmem:[%s12081_s5 + $0x38] sm:$0xff] }
 0x718   :  { %v983_v21 = vadd.f32 %v8693_v12, %v8083_v16  ;;  %v8086_v24 = vadd.f32 %v8085_v19, %v8084_v17  ;;  %v977_v26 = vpop.f32.mrb[11].mxu0  ;;  %v7656_v17 = vld [vmem:[%s12081_s5 + $0x30] sm:$0xff] }
 0x719   :  { %v978_v27 = vadd.f32 %v8080_v6, %v977_v26  ;;  %989 = vadd.xlane.f32.xlu0 %v975_v15  ;;  %v7652_v6 = vld [vmem:[%s12082_s4 + $0x30] sm:$0xff] }
 0x71a   :  { %v986_v28 = vadd.f32 %v8694_v20, %v8086_v24 }
 0x71b   :  { %991 = vadd.xlane.f32.xlu1 %v978_v27 }
 0x71d   :  { %993 = vadd.xlane.f32.xlu0 %v983_v21 }
 0x721   :  { %995 = vadd.xlane.f32.xlu0 %v986_v28 }
 0x7a6   :  { %v990_v30 = vpop.xlane.xlu0 %989 }
 0x7a8   :  { %v992_v31 = vpop.xlane.xlu1 %991 }
 0x7a9   :  { %v9067_v23 = vpack.c.bf16 %v992_v31, %v990_v30 }
 0x7aa   :  { %v994_v32 = vpop.xlane.xlu0 %993 }
 0x7ab   :  { %9068 = vmatprep.subr.bf16.mxu0 %v9067_v23 }
 0x7ac   :  { %9070 = vmatpush3.bf16.msra.mxu0 %v9067_v23 }
 0x7ae   :  { %v996_v33 = vpop.xlane.xlu0 %995 }
 0x7af   :  { %v9071_v34 = vpack.c.bf16 %v996_v33, %v994_v32 }
 0x7b1   :  { %9072 = vmatprep.subr.bf16.mxu0 %v9071_v34 }
 0x7b2   :  { %9074 = vmatpush3.bf16.msra.mxu0 %v9071_v34 }
 0x7b5   :  { %8704 = vmatmul.mubr.msk.f32.vlgmr.msra.gmra.mrb[12].mxu0 %vm297_vm0, %v9713_v7 }
 0x7b6   :  { %8706 = vmatprep.mubr.msk.f32.mxu0 %vm297_vm0, %v9718_v8 }
 0x7b9   :  { %8707 = vmatmul.mubr.msk.f32.gmra.mrb[14].mxu0 %vm297_vm0, %v9727_v9 }
 0x7ba   :  { %8717 = vmatprep.mubr.msk.f32.mxu0 %vm297_vm0, %v9706_v61 }
 0x888   :  { %v8705_v35 = vpop.f32.mrb[12].mxu0 }
 0x889   :  { %1089 = vperm.xlu0 %9220, %v8705_v35   ;;  %v1063_v36 = vpop.f32.mrb[13].mxu0 }
 0x88a   :  { %1084 = vperm.xlu1 %9221, %v1063_v36  }
 0x88c   :  { %v8708_v40 = vpop.f32.mrb[14].mxu0 }
 0x88d   :  { %v1073_v37 = vpop.f32.mrb[15].mxu0 }
 0x88e   :  { %1094 = vperm.xlu1 %9221, %v1073_v37  }
 0x892   :  { %1099 = vperm.xlu1 %9221, %v8708_v40  }
 0x908   :  { %v1090_v38 = vpop.permute.xlu0 %1089 }
 0x909   :  { %v9921_v39 = vsub.f32 %v978_v27, %v1090_v38  ;;  %v1085_v41 = vpop.permute.xlu1 %1084 }
 0x90a   :  { %v9923_v42 = vsub.f32 %v975_v15, %v1085_v41 }
 0x90b   :  { %v1107_v43 = vmul.f32 %v9921_v39, %v9921_v39 }
 0x90c   :  { %v1106_v61 = vmul.f32 %v9923_v42, %v9923_v42 }
 0x90d   :  { %1112 = vadd.xlane.f32.xlu1 %v1107_v43  ;;  %v1095_v44 = vpop.permute.xlu1 %1094  ;;  %v9240_v43 = vld [vmem:[%s12078_s1 + $0x64] ss:$12 sps:$4 sm:$0xff]  }
 0x90e   :  { %v9929_v45 = vsub.f32 %v983_v21, %v1095_v44  ;;  %1110 = vadd.xlane.f32.xlu0 %v1106_v61  ;;  %1500 = vmatprep.mubr.bf16.mxu1 %v9240_v43  ;;  %v9244_v61 = vld [vmem:[%s12078_s1 + $0x68] ss:$12 sps:$4 sm:$0xff]  }
 0x90f   :  { %v1571_v44 = vld [vmem:[%s12083_s6 + $0x8] sm:$0xff] }
 0x910   :  { %v1108_v47 = vmul.f32 %v9929_v45, %v9929_v45 }
 0x911   :  { %v1100_v46 = vpop.permute.xlu1 %1099 }
 0x912   :  { %v9933_v48 = vsub.f32 %v986_v28, %v1100_v46  ;;  %1114 = vadd.xlane.f32.xlu0 %v1108_v47  ;;  %v1573_v47 = vld [vmem:[%s12083_s6 + $0x18] sm:$0xff]  ;;  %v1572_v46 = vld [vmem:[%s12083_s6 + $0x10] sm:$0xff] }
 0x914   :  { %v1109_v49 = vmul.f32 %v9933_v48, %v9933_v48 }
 0x916   :  { %1116 = vadd.xlane.f32.xlu0 %v1109_v49  ;;  %v10025_v49 = vld [vmem:[%s12079_s2] ss:$0 sm:$0xff] }
 0x91e   :  { %1247 = vperm.xlu1 %9221, %v7654_v50  }
 0x922   :  { %1252 = vperm.xlu1 %9221, %v7655_v51  }
 0x99a   :  { %v1113_v52 = vpop.xlane.xlu1 %1112 }
 0x99b   :  { %v1111_v53 = vpop.xlane.xlu0 %1110 }
 0x99c   :  { %v9075_v62 = vpack.c.bf16 %v1113_v52, %v1111_v53 }
 0x99e   :  { %9076 = vmatprep.subr.bf16.mxu0 %v9075_v62  ;;  %v1248_v15 = vpop.permute.xlu1 %1247 }
 0x99f   :  { %v1115_v54 = vpop.xlane.xlu0 %1114  ;;  %9078 = vmatpush3.bf16.msra.mxu0 %v9075_v62 }
 0x9a2   :  { %v1253_v19 = vpop.permute.xlu1 %1252 }
 0x9a3   :  { %v1117_v55 = vpop.xlane.xlu0 %1116 }
 0x9a4   :  { %v9079_v56 = vpack.c.bf16 %v1117_v55, %v1115_v54 }
 0x9a6   :  { %9080 = vmatprep.subr.bf16.mxu0 %v9079_v56 }
 0x9a7   :  { %9082 = vmatpush3.bf16.msra.mxu0 %v9079_v56 }
 0x9aa   :  { %8718 = vmatmul.mubr.msk.f32.vlgmr.msra.gmra.mrb[16].mxu0 %vm297_vm0, %v9713_v7  ;;  %v7651_v7 = vld [vmem:[%s12082_s4 + $0x28] sm:$0xff] }
 0x9ab   :  { %8720 = vmatprep.mubr.msk.f32.mxu0 %vm297_vm0, %v9718_v8  ;;  %v7650_v8 = vld [vmem:[%s12082_s4 + $0x20] sm:$0xff] }
 0x9ae   :  { %8721 = vmatmul.mubr.msk.f32.gmra.mrb[18].mxu0 %vm297_vm0, %v9727_v9 }
 0x9af   :  { %8727 = vmatprep.mubr.msk.bf16.mxu0 %vm297_vm0, %v9244_v61  ;;  %v10068_v61 = vld [vmem:[%s12079_s2 + $0x7] ss:$0 sm:$0xff] }
 0xa7d   :  { %v8719_v4 = vpop.f32.mrb[16].mxu0 }
 0xa7e   :  { %v1190_v57 = vadd.f32 1e-05, %v8719_v4  ;;  %v1184_v58 = vpop.f32.mrb[17].mxu0 }
 0xa7f   :  { %v1185_v59 = vadd.f32 1e-05, %v1184_v58 }
 0xa80   :  { %9350 = vrsqrt.f32 %v1190_v57 }
 0xa81   :  { %9352 = vrsqrt.f32 %v1185_v59  ;;  %v8722_v60 = vpop.f32.mrb[18].mxu0 }
 0xa82   :  { %v1200_v63 = vadd.f32 1e-05, %v8722_v60  ;;  %v1194_v0 = vpop.f32.mrb[19].mxu0 }
 0xa83   :  { %v1195_v22 = vadd.f32 1e-05, %v1194_v0 }
 0xa84   :  { %9354 = vrsqrt.f32 %v1200_v63 }
 0xa85   :  { %9356 = vrsqrt.f32 %v1195_v22 }
 0xa8a   :  { %v9351_v9 = vpop.eup %9350 }
 0xa8b   :  { %v9353_v1 = vpop.eup %9352  ;;  %v1213_v2 = vmul.f32 %v9351_v9, %v7651_v7 }
 0xa8c   :  { %v1212_v3 = vmul.f32 %v9353_v1, %v7650_v8  ;;  %v10032_v8 = vld [vmem:[%s12079_s2 + $0x5] ss:$0 sm:$0xff] }
 0xa8d   :  { %1223 = vperm.xlu0 %9220, %v1213_v2  }
 0xa8e   :  { %v9355_v11 = vpop.eup %9354  ;;  %1218 = vperm.xlu1 %9221, %v1212_v3  }
 0xa8f   :  { %v9357_v10 = vpop.eup %9356  ;;  %v1215_v12 = vmul.f32 %v9355_v11, %v7653_v5 }
 0xa90   :  { %v1214_v16 = vmul.f32 %v9357_v10, %v7652_v6  ;;  %v10041_v6 = vld [vmem:[%s12079_s2 + $0x1] ss:$0 sm:$0xff] }
 0xa92   :  { %1228 = vperm.xlu0 %9220, %v1214_v16   ;;  %1233 = vperm.xlu1 %9221, %v1215_v12  }
 0xa96   :  { %1257 = vperm.xlu0 %9220, %v7656_v17   ;;  %1262 = vperm.xlu1 %9221, %v7657_v18  }
 0xb0c   :  { %v1224_v20 = vpop.permute.xlu0 %1223 }
 0xb0d   :  { %v1237_v21 = vmul.f32 %v1224_v20, %v9921_v39  ;;  %v1219_v24 = vpop.permute.xlu1 %1218 }
 0xb0e   :  { %v1236_v26 = vmul.f32 %v1219_v24, %v9923_v42 }
 0xb0f   :  { %v1266_v27 = vadd.f32 %v1253_v19, %v1237_v21 }
 0xb10   :  { %v1265_v28 = vadd.f32 %v1248_v15, %v1236_v26  ;;  %v10050_v26 = vld [vmem:[%s12079_s2 + $0x6] ss:$0 sm:$0xff] }
 0xb11   :  { %v1270_v30 = vmax.f32 %v1266_v27, 0.0  ;;  %v1229_v31 = vpop.permute.xlu0 %1228  ;;  %v1234_v23 = vpop.permute.xlu1 %1233 }
 0xb12   :  { %v1269_v32 = vmax.f32 %v1265_v28, 0.0  ;;  %v1238_v33 = vmul.f32 %v1229_v31, %v9929_v45  ;;  %v1239_v34 = vmul.f32 %v1234_v23, %v9933_v48  ;;  %v1570_v45 = vld [vmem:[%s12083_s6] sm:$0xff] }
 0xb13   :  { %1275 = vrot.lane.b32.xlu1 %v1270_v30, %s9478_s19 }
 0xb14   :  { %1273 = vrot.lane.b32.xlu0 %v1269_v32, %s9478_s19  ;;  %v1337_v35 = vpack.c.bf16 %v1270_v30, %v1269_v32 }
 0xb15   :  { %v1258_v36 = vpop.permute.xlu0 %1257  ;;  %v1263_v40 = vpop.permute.xlu1 %1262 }
 0xb16   :  { %v1267_v37 = vadd.f32 %v1258_v36, %v1238_v33  ;;  %v1268_v38 = vadd.f32 %v1263_v40, %v1239_v34  ;;  %8107 = vmatprep.subr.bf16.mxu1 %v1337_v35 }
 0xb17   :  { %1343 = vrot.lane.b32.xlu1 %v1270_v30, %s9479_s22 }
 0xb18   :  { %v1271_v39 = vmax.f32 %v1267_v37, 0.0  ;;  %v1272_v41 = vmax.f32 %v1268_v38, 0.0  ;;  %1341 = vrot.lane.b32.xlu0 %v1269_v32, %s9479_s22 }
 0xb1a   :  { %v1338_v42 = vpack.c.bf16 %v1272_v41, %v1271_v39 }
 0xb1b   :  { %1291 = vrot.lane.b32.xlu1 %v1270_v30, %s9480_s23 }
 0xb1c   :  { %1289 = vrot.lane.b32.xlu0 %v1269_v32, %s9480_s23 }
 0xb1f   :  { %1359 = vrot.lane.b32.xlu1 %v1270_v30, %s9481_s0 }
 0xb20   :  { %1357 = vrot.lane.b32.xlu0 %v1269_v32, %s9481_s0 }
 0xb23   :  { %1307 = vrot.lane.b32.xlu1 %v1270_v30, %s9482_s24 }
 0xb24   :  { %1305 = vrot.lane.b32.xlu0 %v1269_v32, %s9482_s24 }
 0xb27   :  { %1375 = vrot.lane.b32.xlu1 %v1270_v30, %s9483_s25 }
 0xb28   :  { %1373 = vrot.lane.b32.xlu0 %v1269_v32, %s9483_s25 }
 0xb2b   :  { %1323 = vrot.lane.b32.xlu1 %v1270_v30, %s9484_s26 }
 0xb2c   :  { %1321 = vrot.lane.b32.xlu0 %v1269_v32, %s9484_s26 }
 0xb2f   :  { %1279 = vrot.lane.b32.xlu1 %v1272_v41, %s9478_s19 }
 0xb30   :  { %1277 = vrot.lane.b32.xlu0 %v1271_v39, %s9478_s19 }
 0xb33   :  { %1347 = vrot.lane.b32.xlu1 %v1272_v41, %s9479_s22 }
 0xb34   :  { %1345 = vrot.lane.b32.xlu0 %v1271_v39, %s9479_s22 }
 0xb37   :  { %1295 = vrot.lane.b32.xlu1 %v1272_v41, %s9480_s23 }
 0xb38   :  { %1293 = vrot.lane.b32.xlu0 %v1271_v39, %s9480_s23 }
 0xb3b   :  { %1363 = vrot.lane.b32.xlu1 %v1272_v41, %s9481_s0 }
 0xb3c   :  { %1361 = vrot.lane.b32.xlu0 %v1271_v39, %s9481_s0 }
 0xb3f   :  { %1311 = vrot.lane.b32.xlu1 %v1272_v41, %s9482_s24 }
 0xb40   :  { %1309 = vrot.lane.b32.xlu0 %v1271_v39, %s9482_s24 }
 0xb43   :  { %1379 = vrot.lane.b32.xlu1 %v1272_v41, %s9483_s25 }
 0xb44   :  { %1377 = vrot.lane.b32.xlu0 %v1271_v39, %s9483_s25 }
 0xb47   :  { %1327 = vrot.lane.b32.xlu1 %v1272_v41, %s9484_s26 }
 0xb48   :  { %1325 = vrot.lane.b32.xlu0 %v1271_v39, %s9484_s26 }
 0xb4b   :  { %1391 = vrot.lane.b32.xlu1 %v1270_v30, %s9485_s11 }
 0xb4c   :  { %1389 = vrot.lane.b32.xlu0 %v1269_v32, %s9485_s11  ;;  %v10059_v32 = vld [vmem:[%s12079_s2 + $0x2] ss:$0 sm:$0xff] }
 0xb4f   :  { %1395 = vrot.lane.b32.xlu1 %v1272_v41, %s9485_s11 }
 0xb50   :  { %1393 = vrot.lane.b32.xlu0 %v1271_v39, %s9485_s11 }
 0xb53   :  { %1581 = vperm.xlu1 %9221, %v1571_v44  }
 0xb54   :  { %1576 = vperm.xlu0 %9220, %v1570_v45  }
 0xb57   :  { %1591 = vperm.xlu1 %9221, %v1573_v47  }
 0xb58   :  { %1586 = vperm.xlu0 %9220, %v1572_v46  }
 0xb85   :  { %v1276_v48 = vpop.permute.xlu1 %1275 }
 0xb86   :  { %v1282_v50 = vmul.f32 %v10025_v49, %v1276_v48  ;;  %v1274_v51 = vpop.permute.xlu0 %1273 }
 0xb87   :  { %v1281_v52 = vmul.f32 %v10025_v49, %v1274_v51 }
 0xb89   :  { %v1285_v53 = vpack.c.bf16 %v1282_v50, %v1281_v52  ;;  %v1344_v62 = vpop.permute.xlu1 %1343  ;;  %v10077_v50 = vld [vmem:[%s12079_s2 + $0x3] ss:$0 sm:$0xff] }
 0xb8a   :  { %v1342_v54 = vpop.permute.xlu0 %1341  ;;  %v1350_v9 = vmul.f32 %v10032_v8, %v1344_v62 }
 0xb8b   :  { %8108 = vmatpush3.bf16.msra.mxu1 %v1285_v53  ;;  %v1349_v1 = vmul.f32 %v10032_v8, %v1342_v54 }
 0xb8c   :  { %8109 = vmatprep.subr.bf16.mxu1 %v1338_v42 }
 0xb8d   :  { %v1292_v55 = vpop.permute.xlu1 %1291  ;;  %v1353_v17 = vpack.c.bf16 %v1350_v9, %v1349_v1  ;;  %v10088_v9 = vld [vmem:[%s12079_s2 + $0x8] ss:$0 sm:$0xff] }
 0xb8e   :  { %v1290_v56 = vpop.permute.xlu0 %1289  ;;  %v1298_v11 = vmul.f32 %v10041_v6, %v1292_v55 }
 0xb8f   :  { %v1297_v10 = vmul.f32 %v10041_v6, %v1290_v56 }
 0xb91   :  { %v1360_v4 = vpop.permute.xlu1 %1359  ;;  %v1301_v20 = vpack.c.bf16 %v1298_v11, %v1297_v10  ;;  %v9241_v11 = vld [vmem:[%s12078_s1 + $0x7c] ss:$12 sps:$4 sm:$0xff]  }
 0xb92   :  { %v1358_v57 = vpop.permute.xlu0 %1357  ;;  %v1366_v27 = vmul.f32 %v10050_v26, %v1360_v4 }
 0xb93   :  { %v1365_v28 = vmul.f32 %v10050_v26, %v1358_v57 }
 0xb95   :  { %v1308_v58 = vpop.permute.xlu1 %1307  ;;  %v1369_v40 = vpack.c.bf16 %v1366_v27, %v1365_v28 }
 0xb96   :  { %v1306_v59 = vpop.permute.xlu0 %1305  ;;  %v1314_v33 = vmul.f32 %v10059_v32, %v1308_v58 }
 0xb97   :  { %v1313_v34 = vmul.f32 %v10059_v32, %v1306_v59 }
 0xb99   :  { %v1376_v60 = vpop.permute.xlu1 %1375  ;;  %v1317_v41 = vpack.c.bf16 %v1314_v33, %v1313_v34 }
 0xb9a   :  { %v1374_v63 = vpop.permute.xlu0 %1373  ;;  %v1382_v44 = vmul.f32 %v10068_v61, %v1376_v60 }
 0xb9b   :  { %v1381_v45 = vmul.f32 %v10068_v61, %v1374_v63 }
 0xb9d   :  { %v1324_v0 = vpop.permute.xlu1 %1323  ;;  %v1385_v54 = vpack.c.bf16 %v1382_v44, %v1381_v45 }
 0xb9e   :  { %v1322_v22 = vpop.permute.xlu0 %1321  ;;  %v1330_v51 = vmul.f32 %v10077_v50, %v1324_v0 }
 0xb9f   :  { %v1329_v52 = vmul.f32 %v10077_v50, %v1322_v22 }
 0xba1   :  { %v1280_v7 = vpop.permute.xlu1 %1279  ;;  %v1333_v57 = vpack.c.bf16 %v1330_v51, %v1329_v52 }
 0xba2   :  { %v1284_v2 = vmul.f32 %v10025_v49, %v1280_v7  ;;  %v1278_v3 = vpop.permute.xlu0 %1277 }
 0xba3   :  { %v1283_v5 = vmul.f32 %v10025_v49, %v1278_v3  ;;  %v9238_v3 = vld [vmem:[%s12078_s1 + $0x60] ss:$12 sps:$4 sm:$0xff]  }
 0xba5   :  { %v1286_v12 = vpack.c.bf16 %v1284_v2, %v1283_v5  ;;  %v1348_v16 = vpop.permute.xlu1 %1347 }
 0xba6   :  { %v1352_v18 = vmul.f32 %v10032_v8, %v1348_v16  ;;  %v1346_v15 = vpop.permute.xlu0 %1345 }
 0xba7   :  { %v1351_v19 = vmul.f32 %v10032_v8, %v1346_v15  ;;  %8110 = vmatpush3.bf16.msra.mxu1 %v1286_v12 }
 0xba8   :  { %8111 = vmatprep.subr.bf16.mxu1 %v1353_v17 }
 0xba9   :  { %v1354_v21 = vpack.c.bf16 %v1352_v18, %v1351_v19  ;;  %v1296_v24 = vpop.permute.xlu1 %1295  ;;  %v9243_v19 = vld [vmem:[%s12078_s1 + $0x78] ss:$12 sps:$4 sm:$0xff]  }
 0xbaa   :  { %v1300_v30 = vmul.f32 %v10041_v6, %v1296_v24  ;;  %v1294_v31 = vpop.permute.xlu0 %1293 }
 0xbab   :  { %v1299_v23 = vmul.f32 %v10041_v6, %v1294_v31  ;;  %8112 = vmatpush3.bf16.msra.mxu1 %v1301_v20  ;;  %v9245_v20 = vld [vmem:[%s12078_s1 + $0x80] ss:$12 sps:$4 sm:$0xff]  }
 0xbac   :  { %8113 = vmatprep.subr.bf16.mxu1 %v1354_v21 }
 0xbad   :  { %v1302_v35 = vpack.c.bf16 %v1300_v30, %v1299_v23  ;;  %v1364_v36 = vpop.permute.xlu1 %1363 }
 0xbae   :  { %v1368_v37 = vmul.f32 %v10050_v26, %v1364_v36  ;;  %v1362_v38 = vpop.permute.xlu0 %1361 }
 0xbaf   :  { %v1367_v39 = vmul.f32 %v10050_v26, %v1362_v38  ;;  %8114 = vmatpush3.bf16.msra.mxu1 %v1302_v35 }
 0xbb0   :  { %8115 = vmatprep.subr.bf16.mxu1 %v1369_v40 }
 0xbb1   :  { %v1370_v42 = vpack.c.bf16 %v1368_v37, %v1367_v39  ;;  %v1312_v43 = vpop.permute.xlu1 %1311 }
 0xbb2   :  { %v1316_v47 = vmul.f32 %v10059_v32, %v1312_v43  ;;  %v1310_v46 = vpop.permute.xlu0 %1309 }
 0xbb3   :  { %v1315_v48 = vmul.f32 %v10059_v32, %v1310_v46  ;;  %8116 = vmatpush3.bf16.msra.mxu1 %v1317_v41 }
 0xbb4   :  { %8117 = vmatprep.subr.bf16.mxu1 %v1370_v42 }
 0xbb5   :  { %v1318_v53 = vpack.c.bf16 %v1316_v47, %v1315_v48  ;;  %v1380_v62 = vpop.permute.xlu1 %1379 }
 0xbb6   :  { %v1384_v55 = vmul.f32 %v10068_v61, %v1380_v62  ;;  %v1378_v56 = vpop.permute.xlu0 %1377 }
 0xbb7   :  { %v1383_v4 = vmul.f32 %v10068_v61, %v1378_v56  ;;  %8118 = vmatpush3.bf16.msra.mxu1 %v1318_v53 }
 0xbb8   :  { %8119 = vmatprep.subr.bf16.mxu1 %v1385_v54 }
 0xbb9   :  { %v1386_v58 = vpack.c.bf16 %v1384_v55, %v1383_v4  ;;  %v1328_v59 = vpop.permute.xlu1 %1327 }
 0xbba   :  { %v1332_v60 = vmul.f32 %v10077_v50, %v1328_v59  ;;  %v1326_v63 = vpop.permute.xlu0 %1325 }
 0xbbb   :  { %v1331_v0 = vmul.f32 %v10077_v50, %v1326_v63  ;;  %8120 = vmatpush3.bf16.msra.mxu1 %v1333_v57 }
 0xbbc   :  { %8121 = vmatprep.subr.bf16.mxu1 %v1386_v58 }
 0xbbd   :  { %v1334_v22 = vpack.c.bf16 %v1332_v60, %v1331_v0  ;;  %v1392_v7 = vpop.permute.xlu1 %1391 }
 0xbbe   :  { %v1398_v1 = vmul.f32 %v10088_v9, %v1392_v7  ;;  %v1390_v2 = vpop.permute.xlu0 %1389 }
 0xbbf   :  { %v1397_v5 = vmul.f32 %v10088_v9, %v1390_v2  ;;  %8122 = vmatpush3.bf16.msra.mxu1 %v1334_v22 }
 0xbc1   :  { %v1401_v10 = vpack.c.bf16 %v1398_v1, %v1397_v5  ;;  %v1396_v12 = vpop.permute.xlu1 %1395 }
 0xbc2   :  { %v1400_v16 = vmul.f32 %v10088_v9, %v1396_v12  ;;  %v1394_v17 = vpop.permute.xlu0 %1393  ;;  %1501 = vmatmul.mubr.bf16.vlgmr.msra.gmra.mrb[20].mxu1 %v9238_v3 }
 0xbc3   :  { %v1399_v18 = vmul.f32 %v10088_v9, %v1394_v17  ;;  %8723 = vmatprep.subr.bf16.mxu0 %v1401_v10  ;;  %1508 = vmatprep.mubr.bf16.mxu1 %v9241_v11 }
 0xbc4   :  { %8724 = vmatpush3.bf16.msra.mxu0 %v1401_v10 }
 0xbc5   :  { %v1402_v15 = vpack.c.bf16 %v1400_v16, %v1399_v18 }
 0xbc7   :  { %8725 = vmatprep.subr.bf16.mxu0 %v1402_v15 }
 0xbc8   :  { %8726 = vmatpush3.bf16.msra.mxu0 %v1402_v15 }
 0xbca   :  { %1509 = vmatmul.mubr.bf16.gmra.mrb[24].mxu1 %v9243_v19 }
 0xbcb   :  { %8728 = vmatmul.mubr.msk.bf16.vlgmr.msra.gmra.mrb[20].mxu0 %vm297_vm0, %v9245_v20 }
 0xbd2   :  { %v1582_v23 = vpop.permute.xlu1 %1581 }
 0xbd3   :  { %v1577_v33 = vpop.permute.xlu0 %1576 }
 0xbd6   :  { %v1592_v56 = vpop.permute.xlu1 %1591 }
 0xbd7   :  { %v1587_v52 = vpop.permute.xlu0 %1586 }
 0xc95   :  { %v8123_v21 = vpop.f32.mrb[20].mxu1 }
 0xc96   :  { %v8124_v24 = vpop.f32.mrb[21].mxu1 }
 0xc97   :  { %v8125_v27 = vadd.f32 %v8124_v24, %v8123_v21  ;;  %v8126_v28 = vpop.f32.mrb[22].mxu1 }
 0xc98   :  { %v8127_v30 = vpop.f32.mrb[23].mxu1 }
 0xc99   :  { %v8128_v31 = vadd.f32 %v8127_v30, %v8126_v28 }
 0xc9d   :  { %v8129_v34 = vpop.f32.mrb[24].mxu1 }
 0xc9e   :  { %v8130_v35 = vpop.f32.mrb[25].mxu1  ;;  %v8729_v36 = vpop.f32.mrb[20].mxu0 }
 0xc9f   :  { %v8131_v40 = vadd.f32 %v8130_v35, %v8129_v34  ;;  %v8132_v37 = vpop.f32.mrb[26].mxu1  ;;  %v1551_v38 = vpop.f32.mrb[21].mxu0 }
 0xca0   :  { %v1552_v39 = vadd.f32 %v8125_v27, %v1551_v38  ;;  %v8133_v41 = vpop.f32.mrb[27].mxu1  ;;  %v8730_v42 = vpop.f32.mrb[22].mxu0 }
 0xca1   :  { %v1560_v43 = vadd.f32 %v8729_v36, %v8131_v40  ;;  %v8134_v44 = vadd.f32 %v8133_v41, %v8132_v37  ;;  %v1554_v45 = vpop.f32.mrb[23].mxu0 }
 0xca2   :  { %v1566_v47 = vadd.f32 %v1552_v39, %v9783_v14  ;;  %v1555_v46 = vadd.f32 %v8128_v31, %v1554_v45 }
 0xca3   :  { %v1568_v48 = vadd.f32 %v1560_v43, %v9819_v25  ;;  %v1563_v51 = vadd.f32 %v8730_v42, %v8134_v44 }
 0xca4   :  { %v1594_v53 = vadd.f32 %v1577_v33, %v1566_v47  ;;  %v1567_v62 = vadd.f32 %v1555_v46, %v9781_v13  ;;  %v9248_v13 = vld [vmem:[%s12078_s1 + $0x94] ss:$12 sps:$4 sm:$0xff]  }
 0xca5   :  { %v1596_v54 = vadd.f32 %v1587_v52, %v1568_v48  ;;  %v1569_v55 = vadd.f32 %v1563_v51, %v9817_v29  ;;  %1829 = vmatprep.mubr.bf16.mxu0 %v9248_v13  ;;  %v9252_v29 = vld [vmem:[%s12078_s1 + $0x98] ss:$12 sps:$4 sm:$0xff]  }
 0xca6   :  { %v1598_v4 = vmax.f32 %v1594_v53, 0.0  ;;  %v1595_v57 = vadd.f32 %v1582_v23, %v1567_v62  ;;  %8735 = vmatprep.mubr.msk.bf16.mxu1 %vm297_vm0, %v9252_v29 }
 0xca7   :  { %v1597_v58 = vadd.f32 %v1592_v56, %v1569_v55  ;;  %v1600_v60 = vmax.f32 %v1596_v54, 0.0 }
 0xca8   :  { %v1599_v59 = vmax.f32 %v1595_v57, 0.0  ;;  %1602 = vrot.lane.b32.xlu0 %v1598_v4, %s9478_s19 }
 0xca9   :  { %v1601_v14 = vmax.f32 %v1597_v58, 0.0 }
 0xcaa   :  { %1604 = vrot.lane.b32.xlu1 %v1599_v59, %s9478_s19  ;;  %v1666_v25 = vpack.c.bf16 %v1599_v59, %v1598_v4 }
 0xcab   :  { %v1667_v63 = vpack.c.bf16 %v1601_v14, %v1600_v60 }
 0xcac   :  { %1670 = vrot.lane.b32.xlu0 %v1598_v4, %s9479_s22  ;;  %8139 = vmatprep.subr.bf16.mxu0 %v1666_v25 }
 0xcae   :  { %1672 = vrot.lane.b32.xlu1 %v1599_v59, %s9479_s22 }
 0xcb0   :  { %1618 = vrot.lane.b32.xlu0 %v1598_v4, %s9480_s23 }
 0xcb2   :  { %1620 = vrot.lane.b32.xlu1 %v1599_v59, %s9480_s23 }
 0xcb4   :  { %1686 = vrot.lane.b32.xlu0 %v1598_v4, %s9481_s0 }
 0xcb6   :  { %1688 = vrot.lane.b32.xlu1 %v1599_v59, %s9481_s0 }
 0xcb8   :  { %1634 = vrot.lane.b32.xlu0 %v1598_v4, %s9482_s24 }
 0xcba   :  { %1636 = vrot.lane.b32.xlu1 %v1599_v59, %s9482_s24 }
 0xcbc   :  { %1702 = vrot.lane.b32.xlu0 %v1598_v4, %s9483_s25 }
 0xcbe   :  { %1704 = vrot.lane.b32.xlu1 %v1599_v59, %s9483_s25 }
 0xcc0   :  { %1650 = vrot.lane.b32.xlu0 %v1598_v4, %s9484_s26 }
 0xcc2   :  { %1652 = vrot.lane.b32.xlu1 %v1599_v59, %s9484_s26 }
 0xcc4   :  { %1606 = vrot.lane.b32.xlu0 %v1600_v60, %s9478_s19 }
 0xcc6   :  { %1608 = vrot.lane.b32.xlu1 %v1601_v14, %s9478_s19 }
 0xcc8   :  { %1674 = vrot.lane.b32.xlu0 %v1600_v60, %s9479_s22 }
 0xcca   :  { %1676 = vrot.lane.b32.xlu1 %v1601_v14, %s9479_s22 }
 0xccc   :  { %1622 = vrot.lane.b32.xlu0 %v1600_v60, %s9480_s23 }
 0xcce   :  { %1624 = vrot.lane.b32.xlu1 %v1601_v14, %s9480_s23 }
 0xcd0   :  { %1690 = vrot.lane.b32.xlu0 %v1600_v60, %s9481_s0 }
 0xcd2   :  { %1692 = vrot.lane.b32.xlu1 %v1601_v14, %s9481_s0 }
 0xcd4   :  { %1638 = vrot.lane.b32.xlu0 %v1600_v60, %s9482_s24 }
 0xcd6   :  { %1640 = vrot.lane.b32.xlu1 %v1601_v14, %s9482_s24 }
 0xcd8   :  { %1706 = vrot.lane.b32.xlu0 %v1600_v60, %s9483_s25 }
 0xcda   :  { %1708 = vrot.lane.b32.xlu1 %v1601_v14, %s9483_s25 }
 0xcdc   :  { %1654 = vrot.lane.b32.xlu0 %v1600_v60, %s9484_s26 }
 0xcde   :  { %1656 = vrot.lane.b32.xlu1 %v1601_v14, %s9484_s26 }
 0xce0   :  { %1718 = vrot.lane.b32.xlu0 %v1598_v4, %s9485_s11 }
 0xce2   :  { %1720 = vrot.lane.b32.xlu1 %v1599_v59, %s9485_s11 }
 0xce4   :  { %1722 = vrot.lane.b32.xlu0 %v1600_v60, %s9485_s11 }
 0xce6   :  { %1724 = vrot.lane.b32.xlu1 %v1601_v14, %s9485_s11 }
 0xd1a   :  { %v1603_v0 = vpop.permute.xlu0 %1602 }
 0xd1b   :  { %v1610_v7 = vmul.f32 %v10025_v49, %v1603_v0 }
 0xd1c   :  { %v1605_v22 = vpop.permute.xlu1 %1604 }
 0xd1d   :  { %v1611_v1 = vmul.f32 %v10025_v49, %v1605_v22 }
 0xd1e   :  { %v1671_v2 = vpop.permute.xlu0 %1670 }
 0xd1f   :  { %v1614_v3 = vpack.c.bf16 %v1611_v1, %v1610_v7  ;;  %v1678_v23 = vmul.f32 %v10032_v8, %v1671_v2 }
 0xd20   :  { %v1673_v5 = vpop.permute.xlu1 %1672 }
 0xd21   :  { %8140 = vmatpush3.bf16.msra.mxu0 %v1614_v3  ;;  %v1679_v27 = vmul.f32 %v10032_v8, %v1673_v5 }
 0xd22   :  { %v1619_v11 = vpop.permute.xlu0 %1618  ;;  %8141 = vmatprep.subr.bf16.mxu0 %v1667_v63 }
 0xd23   :  { %v1682_v36 = vpack.c.bf16 %v1679_v27, %v1678_v23  ;;  %v1626_v37 = vmul.f32 %v10041_v6, %v1619_v11 }
 0xd24   :  { %v1621_v10 = vpop.permute.xlu1 %1620 }
 0xd25   :  { %v1627_v34 = vmul.f32 %v10041_v6, %v1621_v10 }
 0xd26   :  { %v1687_v12 = vpop.permute.xlu0 %1686 }
 0xd27   :  { %v1630_v42 = vpack.c.bf16 %v1627_v34, %v1626_v37  ;;  %v1694_v48 = vmul.f32 %v10050_v26, %v1687_v12  ;;  %v10198_v37 = vld [vmem:[%s12080_s3] sm:$0xff] }
 0xd28   :  { %v1689_v16 = vpop.permute.xlu1 %1688 }
 0xd29   :  { %v1695_v44 = vmul.f32 %v10050_v26, %v1689_v16 }
 0xd2a   :  { %v1635_v17 = vpop.permute.xlu0 %1634 }
 0xd2b   :  { %v1698_v62 = vpack.c.bf16 %v1695_v44, %v1694_v48  ;;  %v1642_v55 = vmul.f32 %v10059_v32, %v1635_v17 }
 0xd2c   :  { %v1637_v18 = vpop.permute.xlu1 %1636 }
 0xd2d   :  { %v1643_v52 = vmul.f32 %v10059_v32, %v1637_v18 }
 0xd2e   :  { %v1703_v15 = vpop.permute.xlu0 %1702 }
 0xd2f   :  { %v1646_v58 = vpack.c.bf16 %v1643_v52, %v1642_v55  ;;  %v1710_v13 = vmul.f32 %v10068_v61, %v1703_v15 }
 0xd30   :  { %v1705_v19 = vpop.permute.xlu1 %1704 }
 0xd31   :  { %v1711_v60 = vmul.f32 %v10068_v61, %v1705_v19 }
 0xd32   :  { %v1651_v20 = vpop.permute.xlu0 %1650 }
 0xd33   :  { %v1714_v7 = vpack.c.bf16 %v1711_v60, %v1710_v13  ;;  %v1658_v2 = vmul.f32 %v10077_v50, %v1651_v20  ;;  %v9246_v20 = vld [vmem:[%s12078_s1 + $0x90] ss:$12 sps:$4 sm:$0xff]  }
 0xd34   :  { %v1653_v21 = vpop.permute.xlu1 %1652 }
 0xd35   :  { %v1659_v0 = vmul.f32 %v10077_v50, %v1653_v21 }
 0xd36   :  { %v1607_v24 = vpop.permute.xlu0 %1606 }
 0xd37   :  { %v1612_v30 = vmul.f32 %v10025_v49, %v1607_v24  ;;  %v1662_v10 = vpack.c.bf16 %v1659_v0, %v1658_v2  ;;  %v10214_v0 = vld [vmem:[%s12080_s3 + $0x10] sm:$0xff] }
 0xd38   :  { %v1609_v28 = vpop.permute.xlu1 %1608 }
 0xd39   :  { %v1613_v31 = vmul.f32 %v10025_v49, %v1609_v28  ;;  %v9249_v28 = vld [vmem:[%s12078_s1 + $0xac] ss:$12 sps:$4 sm:$0xff]  }
 0xd3a   :  { %v1675_v33 = vpop.permute.xlu0 %1674 }
 0xd3b   :  { %v1615_v35 = vpack.c.bf16 %v1613_v31, %v1612_v30  ;;  %v1680_v38 = vmul.f32 %v10032_v8, %v1675_v33 }
 0xd3c   :  { %v1677_v40 = vpop.permute.xlu1 %1676 }
 0xd3d   :  { %v1681_v39 = vmul.f32 %v10032_v8, %v1677_v40  ;;  %8142 = vmatpush3.bf16.msra.mxu0 %v1615_v35  ;;  %v9253_v40 = vld [vmem:[%s12078_s1 + $0xb0] ss:$12 sps:$4 sm:$0xff]  }
 0xd3e   :  { %v1623_v41 = vpop.permute.xlu0 %1622  ;;  %8143 = vmatprep.subr.bf16.mxu0 %v1682_v36  ;;  %v9251_v36 = vld [vmem:[%s12078_s1 + $0xa8] ss:$12 sps:$4 sm:$0xff]  }
 0xd3f   :  { %v1683_v43 = vpack.c.bf16 %v1681_v39, %v1680_v38  ;;  %v1628_v47 = vmul.f32 %v10041_v6, %v1623_v41 }
 0xd40   :  { %v1625_v45 = vpop.permute.xlu1 %1624 }
 0xd41   :  { %v1629_v46 = vmul.f32 %v10041_v6, %v1625_v45  ;;  %8144 = vmatpush3.bf16.msra.mxu0 %v1630_v42 }
 0xd42   :  { %v1691_v51 = vpop.permute.xlu0 %1690  ;;  %8145 = vmatprep.subr.bf16.mxu0 %v1683_v43 }
 0xd43   :  { %v1631_v53 = vpack.c.bf16 %v1629_v46, %v1628_v47  ;;  %v1696_v56 = vmul.f32 %v10050_v26, %v1691_v51 }
 0xd44   :  { %v1693_v54 = vpop.permute.xlu1 %1692 }
 0xd45   :  { %v1697_v4 = vmul.f32 %v10050_v26, %v1693_v54  ;;  %8146 = vmatpush3.bf16.msra.mxu0 %v1631_v53 }
 0xd46   :  { %v1639_v57 = vpop.permute.xlu0 %1638  ;;  %8147 = vmatprep.subr.bf16.mxu0 %v1698_v62 }
 0xd47   :  { %v1699_v59 = vpack.c.bf16 %v1697_v4, %v1696_v56  ;;  %v1644_v25 = vmul.f32 %v10059_v32, %v1639_v57 }
 0xd48   :  { %v1641_v14 = vpop.permute.xlu1 %1640 }
 0xd49   :  { %v1645_v63 = vmul.f32 %v10059_v32, %v1641_v14  ;;  %8148 = vmatpush3.bf16.msra.mxu0 %v1646_v58 }
 0xd4a   :  { %v1707_v29 = vpop.permute.xlu0 %1706  ;;  %8149 = vmatprep.subr.bf16.mxu0 %v1699_v59 }
 0xd4b   :  { %v1647_v22 = vpack.c.bf16 %v1645_v63, %v1644_v25  ;;  %v1712_v3 = vmul.f32 %v10068_v61, %v1707_v29  ;;  %v10207_v29 = vld [vmem:[%s12080_s3 + $0x8] sm:$0xff] }
 0xd4c   :  { %v1709_v1 = vpop.permute.xlu1 %1708 }
 0xd4d   :  { %v1713_v5 = vmul.f32 %v10068_v61, %v1709_v1  ;;  %8150 = vmatpush3.bf16.msra.mxu0 %v1647_v22  ;;  %v10221_v22 = vld [vmem:[%s12080_s3 + $0x18] sm:$0xff] }
 0xd4e   :  { %v1655_v11 = vpop.permute.xlu0 %1654  ;;  %8151 = vmatprep.subr.bf16.mxu0 %v1714_v7 }
 0xd4f   :  { %v1715_v12 = vpack.c.bf16 %v1713_v5, %v1712_v3  ;;  %v1660_v17 = vmul.f32 %v10077_v50, %v1655_v11 }
 0xd50   :  { %v1657_v16 = vpop.permute.xlu1 %1656 }
 0xd51   :  { %v1661_v18 = vmul.f32 %v10077_v50, %v1657_v16  ;;  %8152 = vmatpush3.bf16.msra.mxu0 %v1662_v10 }
 0xd52   :  { %v1719_v15 = vpop.permute.xlu0 %1718  ;;  %8153 = vmatprep.subr.bf16.mxu0 %v1715_v12 }
 0xd53   :  { %v1663_v19 = vpack.c.bf16 %v1661_v18, %v1660_v17  ;;  %v1726_v24 = vmul.f32 %v10088_v9, %v1719_v15 }
 0xd54   :  { %v1721_v21 = vpop.permute.xlu1 %1720 }
 0xd55   :  { %v1727_v27 = vmul.f32 %v10088_v9, %v1721_v21  ;;  %8154 = vmatpush3.bf16.msra.mxu0 %v1663_v19 }
 0xd56   :  { %v1723_v30 = vpop.permute.xlu0 %1722 }
 0xd57   :  { %v1730_v31 = vpack.c.bf16 %v1727_v27, %v1726_v24  ;;  %v1728_v33 = vmul.f32 %v10088_v9, %v1723_v30  ;;  %v7702_v27 = vld [vmem:[%s12081_s5 + $0x40] sm:$0xff] }
 0xd58   :  { %1830 = vmatmul.mubr.bf16.vlgmr.msra.gmra.mrb[24].mxu0 %v9246_v20  ;;  %v1725_v23 = vpop.permute.xlu1 %1724 }
 0xd59   :  { %v1729_v34 = vmul.f32 %v10088_v9, %v1725_v23  ;;  %8731 = vmatprep.subr.bf16.mxu1 %v1730_v31  ;;  %1837 = vmatprep.mubr.bf16.mxu0 %v9249_v28  ;;  %v7703_v28 = vld [vmem:[%s12081_s5 + $0x48] sm:$0xff] }
 0xd5a   :  { %8732 = vmatpush3.bf16.msra.mxu1 %v1730_v31 }
 0xd5b   :  { %v1731_v35 = vpack.c.bf16 %v1729_v34, %v1728_v33 }
 0xd5d   :  { %8733 = vmatprep.subr.bf16.mxu1 %v1731_v35 }
 0xd5e   :  { %8734 = vmatpush3.bf16.msra.mxu1 %v1731_v35 }
 0xd60   :  { %1838 = vmatmul.mubr.bf16.gmra.mrb[28].mxu0 %v9251_v36 }
 0xd61   :  { %8736 = vmatmul.mubr.msk.bf16.vlgmr.msra.gmra.mrb[28].mxu1 %vm297_vm0, %v9253_v40  ;;  %8761 = vmatprep.mubr.msk.f32.mxu0 %vm297_vm0, %v10198_v37 }
 0xd62   :  { %8747 = vmatprep.mubr.msk.f32.mxu1 %vm297_vm0, %v10198_v37 }
 0xe2b   :  { %v8155_v38 = vpop.f32.mrb[24].mxu0 }
 0xe2c   :  { %v8156_v39 = vpop.f32.mrb[25].mxu0 }
 0xe2d   :  { %v8157_v41 = vadd.f32 %v8156_v39, %v8155_v38  ;;  %v8158_v42 = vpop.f32.mrb[26].mxu0 }
 0xe2e   :  { %v8159_v43 = vpop.f32.mrb[27].mxu0 }
 0xe2f   :  { %v8160_v44 = vadd.f32 %v8159_v43, %v8158_v42 }
 0xe33   :  { %v8161_v45 = vpop.f32.mrb[28].mxu0 }
 0xe34   :  { %v8162_v47 = vpop.f32.mrb[29].mxu0  ;;  %v8737_v46 = vpop.f32.mrb[28].mxu1 }
 0xe35   :  { %v8163_v48 = vadd.f32 %v8162_v47, %v8161_v45  ;;  %v8164_v51 = vpop.f32.mrb[30].mxu0  ;;  %v1880_v52 = vpop.f32.mrb[29].mxu1  ;;  %v7699_v45 = vld [vmem:[%s12082_s4 + $0x48] sm:$0xff]  ;;  %v7698_v47 = vld [vmem:[%s12082_s4 + $0x40] sm:$0xff] }
 0xe36   :  { %v1881_v53 = vadd.f32 %v8157_v41, %v1880_v52  ;;  %v8165_v62 = vpop.f32.mrb[31].mxu0  ;;  %v8738_v54 = vpop.f32.mrb[30].mxu1 }
 0xe37   :  { %v1889_v55 = vadd.f32 %v8737_v46, %v8163_v48  ;;  %v8166_v56 = vadd.f32 %v8165_v62, %v8164_v51  ;;  %v1883_v4 = vpop.f32.mrb[31].mxu1  ;;  %v7700_v62 = vld [vmem:[%s12082_s4 + $0x50] sm:$0xff] }
 0xe38   :  { %v1884_v57 = vadd.f32 %v8160_v44, %v1883_v4  ;;  %1895 = vadd.xlane.f32.xlu0 %v1881_v53 }
 0xe39   :  { %v1892_v58 = vadd.f32 %v8738_v54, %v8166_v56 }
 0xe3a   :  { %1897 = vadd.xlane.f32.xlu1 %v1884_v57 }
 0xe3c   :  { %1899 = vadd.xlane.f32.xlu0 %v1889_v55 }
 0xe40   :  { %1901 = vadd.xlane.f32.xlu0 %v1892_v58 }
 0xec5   :  { %v1896_v59 = vpop.xlane.xlu0 %1895 }
 0xec7   :  { %v1898_v60 = vpop.xlane.xlu1 %1897 }
 0xec8   :  { %v9083_v14 = vpack.c.bf16 %v1898_v60, %v1896_v59 }
 0xec9   :  { %v1900_v25 = vpop.xlane.xlu0 %1899 }
 0xeca   :  { %9084 = vmatprep.subr.bf16.mxu1 %v9083_v14 }
 0xecb   :  { %9086 = vmatpush3.bf16.msra.mxu1 %v9083_v14 }
 0xecd   :  { %v1902_v63 = vpop.xlane.xlu0 %1901 }
 0xece   :  { %v9087_v13 = vpack.c.bf16 %v1902_v63, %v1900_v25 }
 0xed0   :  { %9088 = vmatprep.subr.bf16.mxu1 %v9087_v13 }
 0xed1   :  { %9090 = vmatpush3.bf16.msra.mxu1 %v9087_v13 }
 0xed4   :  { %8748 = vmatmul.mubr.msk.f32.vlgmr.msra.gmra.mrb[32].mxu1 %vm297_vm0, %v10207_v29 }
 0xed5   :  { %8750 = vmatprep.mubr.msk.f32.mxu1 %vm297_vm0, %v10214_v0 }
 0xed8   :  { %8751 = vmatmul.mubr.msk.f32.gmra.mrb[34].mxu1 %vm297_vm0, %v10221_v22 }
 0xfa7   :  { %v8749_v7 = vpop.f32.mrb[32].mxu1 }
 0xfa8   :  { %1995 = vperm.xlu0 %9220, %v8749_v7   ;;  %v1969_v1 = vpop.f32.mrb[33].mxu1 }
 0xfa9   :  { %1990 = vperm.xlu1 %9221, %v1969_v1  }
 0xfab   :  { %v8752_v2 = vpop.f32.mrb[34].mxu1 }
 0xfac   :  { %v1979_v3 = vpop.f32.mrb[35].mxu1 }
 0xfad   :  { %2000 = vperm.xlu1 %9221, %v1979_v3  }
 0xfb1   :  { %2005 = vperm.xlu1 %9221, %v8752_v2  }
0x1027   :  { %v1996_v5 = vpop.permute.xlu0 %1995 }
0x1028   :  { %v10225_v11 = vsub.f32 %v1884_v57, %v1996_v5  ;;  %v1991_v10 = vpop.permute.xlu1 %1990  ;;  %v7704_v57 = vld [vmem:[%s12081_s5 + $0x50] sm:$0xff] }
0x1029   :  { %v10227_v12 = vsub.f32 %v1881_v53, %v1991_v10  ;;  %v7701_v53 = vld [vmem:[%s12082_s4 + $0x58] sm:$0xff] }
0x102a   :  { %v2013_v16 = vmul.f32 %v10225_v11, %v10225_v11 }
0x102b   :  { %v2012_v17 = vmul.f32 %v10227_v12, %v10227_v12 }
0x102c   :  { %2018 = vadd.xlane.f32.xlu1 %v2013_v16  ;;  %v2001_v18 = vpop.permute.xlu1 %2000 }
0x102d   :  { %v10233_v15 = vsub.f32 %v1889_v55, %v2001_v18  ;;  %2016 = vadd.xlane.f32.xlu0 %v2012_v17 }
0x102f   :  { %v2014_v19 = vmul.f32 %v10233_v15, %v10233_v15 }
0x1030   :  { %v2006_v21 = vpop.permute.xlu1 %2005 }
0x1031   :  { %v10237_v20 = vsub.f32 %v1892_v58, %v2006_v21  ;;  %2020 = vadd.xlane.f32.xlu0 %v2014_v19  ;;  %v7705_v58 = vld [vmem:[%s12081_s5 + $0x58] sm:$0xff] }
0x1033   :  { %v2015_v24 = vmul.f32 %v10237_v20, %v10237_v20 }
0x1035   :  { %2022 = vadd.xlane.f32.xlu0 %v2015_v24 }
0x103d   :  { %2153 = vperm.xlu1 %9221, %v7702_v27   ;;  %v9260_v27 = vld [vmem:[%s12078_s1 + $0xc8] ss:$12 sps:$4 sm:$0xff]  }
0x1041   :  { %2158 = vperm.xlu1 %9221, %v7703_v28  }
0x10b9   :  { %v2019_v30 = vpop.xlane.xlu1 %2018 }
0x10ba   :  { %v2017_v31 = vpop.xlane.xlu0 %2016 }
0x10bb   :  { %v9091_v23 = vpack.c.bf16 %v2019_v30, %v2017_v31 }
0x10bd   :  { %9092 = vmatprep.subr.bf16.mxu0 %v9091_v23  ;;  %v2154_v59 = vpop.permute.xlu1 %2153 }
0x10be   :  { %v2021_v33 = vpop.xlane.xlu0 %2020  ;;  %9094 = vmatpush3.bf16.msra.mxu0 %v9091_v23 }
0x10c1   :  { %v2159_v60 = vpop.permute.xlu1 %2158 }
0x10c2   :  { %v2023_v34 = vpop.xlane.xlu0 %2022 }
0x10c3   :  { %v9095_v35 = vpack.c.bf16 %v2023_v34, %v2021_v33 }
0x10c5   :  { %9096 = vmatprep.subr.bf16.mxu0 %v9095_v35 }
0x10c6   :  { %9098 = vmatpush3.bf16.msra.mxu0 %v9095_v35 }
0x10c9   :  { %8762 = vmatmul.mubr.msk.f32.vlgmr.msra.gmra.mrb[32].mxu0 %vm297_vm0, %v10207_v29 }
0x10ca   :  { %8764 = vmatprep.mubr.msk.f32.mxu0 %vm297_vm0, %v10214_v0 }
0x10cd   :  { %8765 = vmatmul.mubr.msk.f32.gmra.mrb[34].mxu0 %vm297_vm0, %v10221_v22 }
0x10ce   :  { %8771 = vmatprep.mubr.msk.bf16.mxu0 %vm297_vm0, %v9260_v27 }
0x119c   :  { %v8763_v36 = vpop.f32.mrb[32].mxu0 }
0x119d   :  { %v2096_v40 = vadd.f32 1e-05, %v8763_v36  ;;  %v2090_v38 = vpop.f32.mrb[33].mxu0 }
0x119e   :  { %v2091_v39 = vadd.f32 1e-05, %v2090_v38 }
0x119f   :  { %9358 = vrsqrt.f32 %v2096_v40 }
0x11a0   :  { %9360 = vrsqrt.f32 %v2091_v39  ;;  %v8766_v41 = vpop.f32.mrb[34].mxu0 }
0x11a1   :  { %v2106_v42 = vadd.f32 1e-05, %v8766_v41  ;;  %v2100_v43 = vpop.f32.mrb[35].mxu0 }
0x11a2   :  { %v2101_v44 = vadd.f32 1e-05, %v2100_v43 }
0x11a3   :  { %9362 = vrsqrt.f32 %v2106_v42 }
0x11a4   :  { %9364 = vrsqrt.f32 %v2101_v44 }
0x11a9   :  { %v9359_v46 = vpop.eup %9358 }
0x11aa   :  { %v9361_v48 = vpop.eup %9360  ;;  %v2119_v51 = vmul.f32 %v9359_v46, %v7699_v45 }
0x11ab   :  { %v2118_v52 = vmul.f32 %v9361_v48, %v7698_v47 }
0x11ac   :  { %2129 = vperm.xlu0 %9220, %v2119_v51  }
0x11ad   :  { %v9363_v54 = vpop.eup %9362  ;;  %2124 = vperm.xlu1 %9221, %v2118_v52  }
0x11ae   :  { %v9365_v55 = vpop.eup %9364  ;;  %v2121_v56 = vmul.f32 %v9363_v54, %v7701_v53 }
0x11af   :  { %v2120_v4 = vmul.f32 %v9365_v55, %v7700_v62 }
0x11b1   :  { %2134 = vperm.xlu0 %9220, %v2120_v4   ;;  %2139 = vperm.xlu1 %9221, %v2121_v56  }
0x11b5   :  { %2163 = vperm.xlu0 %9220, %v7704_v57   ;;  %2168 = vperm.xlu1 %9221, %v7705_v58  }
0x122b   :  { %v2130_v14 = vpop.permute.xlu0 %2129 }
0x122c   :  { %v2143_v25 = vmul.f32 %v2130_v14, %v10225_v11  ;;  %v2125_v63 = vpop.permute.xlu1 %2124 }
0x122d   :  { %v2142_v13 = vmul.f32 %v2125_v63, %v10227_v12 }
0x122e   :  { %v2172_v7 = vadd.f32 %v2159_v60, %v2143_v25 }
0x122f   :  { %v2171_v1 = vadd.f32 %v2154_v59, %v2142_v13 }
0x1230   :  { %v10273_v2 = vmax.f32 %v2172_v7, 0.0  ;;  %v2140_v11 = vpop.permute.xlu1 %2139  ;;  %v2135_v10 = vpop.permute.xlu0 %2134 }
0x1231   :  { %v10275_v3 = vmax.f32 %v2171_v1, 0.0  ;;  %v2145_v16 = vmul.f32 %v2140_v11, %v10237_v20  ;;  %v2144_v18 = vmul.f32 %v2135_v10, %v10233_v15  ;;  %v9256_v15 = vld [vmem:[%s12078_s1 + $0xc4] ss:$12 sps:$4 sm:$0xff]  }
0x1232   :  { %2181 = vrot.lane.b32.xlu1 %v10273_v2, %s9478_s19  ;;  %2406 = vmatprep.mubr.bf16.mxu1 %v9256_v15 }
0x1233   :  { %2179 = vrot.lane.b32.xlu0 %v10275_v3, %s9478_s19  ;;  %v2243_v5 = vpack.c.bf16 %v10273_v2, %v10275_v3 }
0x1234   :  { %v2169_v12 = vpop.permute.xlu1 %2168  ;;  %v2164_v17 = vpop.permute.xlu0 %2163 }
0x1235   :  { %8187 = vmatprep.subr.bf16.mxu1 %v2243_v5  ;;  %v2174_v19 = vadd.f32 %v2169_v12, %v2145_v16  ;;  %v2173_v21 = vadd.f32 %v2164_v17, %v2144_v18 }
0x1236   :  { %2249 = vrot.lane.b32.xlu1 %v10273_v2, %s9479_s22 }
0x1237   :  { %2247 = vrot.lane.b32.xlu0 %v10275_v3, %s9479_s22  ;;  %v10309_v24 = vmax.f32 %v2174_v19, 0.0  ;;  %v10311_v20 = vmax.f32 %v2173_v21, 0.0 }
0x1239   :  { %v2244_v36 = vpack.c.bf16 %v10309_v24, %v10311_v20 }
0x123a   :  { %2197 = vrot.lane.b32.xlu1 %v10273_v2, %s9480_s23 }
0x123b   :  { %2195 = vrot.lane.b32.xlu0 %v10275_v3, %s9480_s23 }
0x123e   :  { %2265 = vrot.lane.b32.xlu1 %v10273_v2, %s9481_s0 }
0x123f   :  { %2263 = vrot.lane.b32.xlu0 %v10275_v3, %s9481_s0 }
0x1242   :  { %2213 = vrot.lane.b32.xlu1 %v10273_v2, %s9482_s24 }
0x1243   :  { %2211 = vrot.lane.b32.xlu0 %v10275_v3, %s9482_s24 }
0x1246   :  { %2281 = vrot.lane.b32.xlu1 %v10273_v2, %s9483_s25 }
0x1247   :  { %2279 = vrot.lane.b32.xlu0 %v10275_v3, %s9483_s25 }
0x124a   :  { %2229 = vrot.lane.b32.xlu1 %v10273_v2, %s9484_s26 }
0x124b   :  { %2227 = vrot.lane.b32.xlu0 %v10275_v3, %s9484_s26 }
0x124e   :  { %2185 = vrot.lane.b32.xlu1 %v10309_v24, %s9478_s19 }
0x124f   :  { %2183 = vrot.lane.b32.xlu0 %v10311_v20, %s9478_s19 }
0x1252   :  { %2253 = vrot.lane.b32.xlu1 %v10309_v24, %s9479_s22 }
0x1253   :  { %2251 = vrot.lane.b32.xlu0 %v10311_v20, %s9479_s22 }
0x1256   :  { %2201 = vrot.lane.b32.xlu1 %v10309_v24, %s9480_s23 }
0x1257   :  { %2199 = vrot.lane.b32.xlu0 %v10311_v20, %s9480_s23 }
0x125a   :  { %2269 = vrot.lane.b32.xlu1 %v10309_v24, %s9481_s0 }
0x125b   :  { %2267 = vrot.lane.b32.xlu0 %v10311_v20, %s9481_s0 }
0x125e   :  { %2217 = vrot.lane.b32.xlu1 %v10309_v24, %s9482_s24 }
0x125f   :  { %2215 = vrot.lane.b32.xlu0 %v10311_v20, %s9482_s24 }
0x1262   :  { %2285 = vrot.lane.b32.xlu1 %v10309_v24, %s9483_s25 }
0x1263   :  { %2283 = vrot.lane.b32.xlu0 %v10311_v20, %s9483_s25 }
0x1266   :  { %2233 = vrot.lane.b32.xlu1 %v10309_v24, %s9484_s26 }
0x1267   :  { %2231 = vrot.lane.b32.xlu0 %v10311_v20, %s9484_s26 }
0x126a   :  { %2297 = vrot.lane.b32.xlu1 %v10273_v2, %s9485_s11 }
0x126b   :  { %2295 = vrot.lane.b32.xlu0 %v10275_v3, %s9485_s11 }
0x126e   :  { %2301 = vrot.lane.b32.xlu1 %v10309_v24, %s9485_s11 }
0x126f   :  { %2299 = vrot.lane.b32.xlu0 %v10311_v20, %s9485_s11 }
0x12a4   :  { %v2182_v28 = vpop.permute.xlu1 %2181 }
0x12a5   :  { %v2188_v30 = vmul.f32 %v10025_v49, %v2182_v28  ;;  %v2180_v31 = vpop.permute.xlu0 %2179 }
0x12a6   :  { %v2187_v23 = vmul.f32 %v10025_v49, %v2180_v31 }
0x12a8   :  { %v2191_v33 = vpack.c.bf16 %v2188_v30, %v2187_v23  ;;  %v2250_v34 = vpop.permute.xlu1 %2249 }
0x12a9   :  { %v2248_v35 = vpop.permute.xlu0 %2247  ;;  %v2256_v51 = vmul.f32 %v10032_v8, %v2250_v34 }
0x12aa   :  { %8188 = vmatpush3.bf16.msra.mxu1 %v2191_v33  ;;  %v2255_v52 = vmul.f32 %v10032_v8, %v2248_v35 }
0x12ab   :  { %8189 = vmatprep.subr.bf16.mxu1 %v2244_v36 }
0x12ac   :  { %v2198_v40 = vpop.permute.xlu1 %2197  ;;  %v2259_v58 = vpack.c.bf16 %v2256_v51, %v2255_v52 }
0x12ad   :  { %v2196_v38 = vpop.permute.xlu0 %2195  ;;  %v2204_v55 = vmul.f32 %v10041_v6, %v2198_v40 }
0x12ae   :  { %v2203_v56 = vmul.f32 %v10041_v6, %v2196_v38 }
0x12b0   :  { %v2266_v39 = vpop.permute.xlu1 %2265  ;;  %v2207_v25 = vpack.c.bf16 %v2204_v55, %v2203_v56 }
0x12b1   :  { %v2264_v41 = vpop.permute.xlu0 %2263  ;;  %v2272_v7 = vmul.f32 %v10050_v26, %v2266_v39 }
0x12b4   :  { %v2214_v42 = vpop.permute.xlu1 %2213 }
0x12b5   :  { %v2212_v43 = vpop.permute.xlu0 %2211  ;;  %v2220_v10 = vmul.f32 %v10059_v32, %v2214_v42 }
0x12b8   :  { %v2282_v44 = vpop.permute.xlu1 %2281 }
0x12b9   :  { %v2280_v45 = vpop.permute.xlu0 %2279 }
0x12ba   :  { %v2287_v30 = vmul.f32 %v10068_v61, %v2280_v45 }
0x12bc   :  { %v2230_v47 = vpop.permute.xlu1 %2229 }
0x12bd   :  { %v2228_v46 = vpop.permute.xlu0 %2227  ;;  %v2236_v34 = vmul.f32 %v10077_v50, %v2230_v47 }
0x12c0   :  { %v2186_v48 = vpop.permute.xlu1 %2185 }
0x12c1   :  { %v2190_v53 = vmul.f32 %v10025_v49, %v2186_v48  ;;  %v2184_v62 = vpop.permute.xlu0 %2183 }
0x12c2   :  { %v2189_v54 = vmul.f32 %v10025_v49, %v2184_v62  ;;  %v2271_v49 = vmul.f32 %v10050_v26, %v2264_v41  ;;  %v9257_v62 = vld [vmem:[%s12078_s1 + $0xdc] ss:$12 sps:$4 sm:$0xff]  }
0x12c4   :  { %v2192_v4 = vpack.c.bf16 %v2190_v53, %v2189_v54  ;;  %v2254_v57 = vpop.permute.xlu1 %2253  ;;  %v2275_v17 = vpack.c.bf16 %v2272_v7, %v2271_v49 }
0x12c5   :  { %v2258_v59 = vmul.f32 %v10032_v8, %v2254_v57  ;;  %v2252_v60 = vpop.permute.xlu0 %2251 }
0x12c6   :  { %v2257_v14 = vmul.f32 %v10032_v8, %v2252_v60  ;;  %8190 = vmatpush3.bf16.msra.mxu1 %v2192_v4  ;;  %v2219_v8 = vmul.f32 %v10059_v32, %v2212_v43 }
0x12c7   :  { %8191 = vmatprep.subr.bf16.mxu1 %v2259_v58  ;;  %v9259_v58 = vld [vmem:[%s12078_s1 + $0xd8] ss:$12 sps:$4 sm:$0xff]  }
0x12c8   :  { %v2260_v63 = vpack.c.bf16 %v2258_v59, %v2257_v14  ;;  %v2202_v13 = vpop.permute.xlu1 %2201  ;;  %v2223_v15 = vpack.c.bf16 %v2220_v10, %v2219_v8  ;;  %v9261_v59 = vld [vmem:[%s12078_s1 + $0xe0] ss:$12 sps:$4 sm:$0xff]  }
0x12c9   :  { %v2206_v1 = vmul.f32 %v10041_v6, %v2202_v13  ;;  %v2200_v5 = vpop.permute.xlu0 %2199 }
0x12ca   :  { %v2205_v11 = vmul.f32 %v10041_v6, %v2200_v5  ;;  %8192 = vmatpush3.bf16.msra.mxu1 %v2207_v25  ;;  %v2288_v6 = vmul.f32 %v10068_v61, %v2282_v44 }
0x12cb   :  { %8193 = vmatprep.subr.bf16.mxu1 %v2260_v63 }
0x12cc   :  { %v2208_v12 = vpack.c.bf16 %v2206_v1, %v2205_v11  ;;  %v2270_v16 = vpop.permute.xlu1 %2269  ;;  %v2291_v40 = vpack.c.bf16 %v2288_v6, %v2287_v30 }
0x12cd   :  { %v2274_v18 = vmul.f32 %v10050_v26, %v2270_v16  ;;  %v2268_v19 = vpop.permute.xlu0 %2267 }
0x12ce   :  { %v2273_v21 = vmul.f32 %v10050_v26, %v2268_v19  ;;  %8194 = vmatpush3.bf16.msra.mxu1 %v2208_v12  ;;  %v2235_v26 = vmul.f32 %v10077_v50, %v2228_v46 }
0x12cf   :  { %8195 = vmatprep.subr.bf16.mxu1 %v2275_v17 }
0x12d0   :  { %v2276_v27 = vpack.c.bf16 %v2274_v18, %v2273_v21  ;;  %v2218_v28 = vpop.permute.xlu1 %2217  ;;  %v2239_v42 = vpack.c.bf16 %v2236_v34, %v2235_v26 }
0x12d1   :  { %v2222_v31 = vmul.f32 %v10059_v32, %v2218_v28  ;;  %v2216_v23 = vpop.permute.xlu0 %2215 }
0x12d2   :  { %v2221_v33 = vmul.f32 %v10059_v32, %v2216_v23  ;;  %8196 = vmatpush3.bf16.msra.mxu1 %v2223_v15 }
0x12d3   :  { %8197 = vmatprep.subr.bf16.mxu1 %v2276_v27 }
0x12d4   :  { %v2224_v35 = vpack.c.bf16 %v2222_v31, %v2221_v33  ;;  %v2286_v36 = vpop.permute.xlu1 %2285 }
0x12d5   :  { %v2290_v38 = vmul.f32 %v10068_v61, %v2286_v36  ;;  %v2284_v39 = vpop.permute.xlu0 %2283 }
0x12d6   :  { %v2289_v41 = vmul.f32 %v10068_v61, %v2284_v39  ;;  %8198 = vmatpush3.bf16.msra.mxu1 %v2224_v35  ;;  %v9254_v61 = vld [vmem:[%s12078_s1 + $0xc0] ss:$12 sps:$4 sm:$0xff]  }
0x12d7   :  { %8199 = vmatprep.subr.bf16.mxu1 %v2291_v40 }
0x12d8   :  { %v2292_v43 = vpack.c.bf16 %v2290_v38, %v2289_v41  ;;  %v2234_v44 = vpop.permute.xlu1 %2233 }
0x12d9   :  { %v2238_v32 = vmul.f32 %v10077_v50, %v2234_v44  ;;  %v2232_v45 = vpop.permute.xlu0 %2231 }
0x12da   :  { %v2237_v47 = vmul.f32 %v10077_v50, %v2232_v45  ;;  %8200 = vmatpush3.bf16.msra.mxu1 %v2239_v42 }
0x12db   :  { %8201 = vmatprep.subr.bf16.mxu1 %v2292_v43 }
0x12dc   :  { %v2240_v46 = vpack.c.bf16 %v2238_v32, %v2237_v47  ;;  %v2298_v48 = vpop.permute.xlu1 %2297 }
0x12dd   :  { %v2304_v51 = vmul.f32 %v10088_v9, %v2298_v48  ;;  %v2296_v52 = vpop.permute.xlu0 %2295  ;;  %v7735_v48 = vld [vmem:[%s12081_s5 + $0x68] sm:$0xff] }
0x12de   :  { %v2303_v53 = vmul.f32 %v10088_v9, %v2296_v52  ;;  %8202 = vmatpush3.bf16.msra.mxu1 %v2240_v46  ;;  %v7734_v46 = vld [vmem:[%s12081_s5 + $0x60] sm:$0xff] }
0x12e0   :  { %v2307_v54 = vpack.c.bf16 %v2304_v51, %v2303_v53  ;;  %v2302_v50 = vpop.permute.xlu1 %2301 }
0x12e1   :  { %v2306_v55 = vmul.f32 %v10088_v9, %v2302_v50  ;;  %v2300_v56 = vpop.permute.xlu0 %2299  ;;  %2407 = vmatmul.mubr.bf16.vlgmr.msra.gmra.mrb[36].mxu1 %v9254_v61 }
0x12e2   :  { %v2305_v4 = vmul.f32 %v10088_v9, %v2300_v56  ;;  %8767 = vmatprep.subr.bf16.mxu0 %v2307_v54  ;;  %2414 = vmatprep.mubr.bf16.mxu1 %v9257_v62 }
0x12e3   :  { %8768 = vmatpush3.bf16.msra.mxu0 %v2307_v54 }
0x12e4   :  { %v2308_v57 = vpack.c.bf16 %v2306_v55, %v2305_v4 }
0x12e6   :  { %8769 = vmatprep.subr.bf16.mxu0 %v2308_v57 }
0x12e7   :  { %8770 = vmatpush3.bf16.msra.mxu0 %v2308_v57 }
0x12e9   :  { %2415 = vmatmul.mubr.bf16.gmra.mrb[40].mxu1 %v9259_v58 }
0x12ea   :  { %8772 = vmatmul.mubr.msk.bf16.vlgmr.msra.gmra.mrb[36].mxu0 %vm297_vm0, %v9261_v59 }
0x12eb   :  { %8783 = vmatprep.mubr.msk.f32.mxu0 %vm297_vm0, %v10198_v37 }
0x13b4   :  { %v8203_v9 = vpop.f32.mrb[36].mxu1 }
0x13b5   :  { %v8204_v60 = vpop.f32.mrb[37].mxu1 }
0x13b6   :  { %v8205_v14 = vadd.f32 %v8204_v60, %v8203_v9  ;;  %v8206_v25 = vpop.f32.mrb[38].mxu1 }
0x13b7   :  { %v8207_v63 = vpop.f32.mrb[39].mxu1 }
0x13b8   :  { %v8208_v13 = vadd.f32 %v8207_v63, %v8206_v25  ;;  %v7733_v63 = vld [vmem:[%s12082_s4 + $0x78] sm:$0xff] }
0x13bc   :  { %v8209_v7 = vpop.f32.mrb[40].mxu1 }
0x13bd   :  { %v8210_v49 = vpop.f32.mrb[41].mxu1  ;;  %v8773_v1 = vpop.f32.mrb[36].mxu0 }
0x13be   :  { %v8211_v5 = vadd.f32 %v8210_v49, %v8209_v7  ;;  %v8212_v11 = vpop.f32.mrb[42].mxu1  ;;  %v2457_v10 = vpop.f32.mrb[37].mxu0 }
0x13bf   :  { %v2458_v8 = vadd.f32 %v8205_v14, %v2457_v10  ;;  %v8213_v12 = vpop.f32.mrb[43].mxu1  ;;  %v8774_v16 = vpop.f32.mrb[38].mxu0  ;;  %v7737_v10 = vld [vmem:[%s12081_s5 + $0x78] sm:$0xff] }
0x13c0   :  { %v2466_v17 = vadd.f32 %v8773_v1, %v8211_v5  ;;  %v8214_v18 = vadd.f32 %v8213_v12, %v8212_v11  ;;  %v2460_v19 = vpop.f32.mrb[39].mxu0  ;;  %v7736_v11 = vld [vmem:[%s12081_s5 + $0x70] sm:$0xff] }
0x13c1   :  { %v2461_v21 = vadd.f32 %v8208_v13, %v2460_v19  ;;  %2472 = vadd.xlane.f32.xlu0 %v2458_v8  ;;  %v7732_v13 = vld [vmem:[%s12082_s4 + $0x70] sm:$0xff] }
0x13c2   :  { %v2469_v15 = vadd.f32 %v8774_v16, %v8214_v18 }
0x13c3   :  { %2474 = vadd.xlane.f32.xlu1 %v2461_v21 }
0x13c5   :  { %2476 = vadd.xlane.f32.xlu0 %v2466_v17 }
0x13c9   :  { %2478 = vadd.xlane.f32.xlu0 %v2469_v15 }
0x144e   :  { %v2473_v27 = vpop.xlane.xlu0 %2472 }
0x1450   :  { %v2475_v28 = vpop.xlane.xlu1 %2474 }
0x1451   :  { %v9099_v6 = vpack.c.bf16 %v2475_v28, %v2473_v27 }
0x1452   :  { %v2477_v30 = vpop.xlane.xlu0 %2476 }
0x1453   :  { %9100 = vmatprep.subr.bf16.mxu0 %v9099_v6 }
0x1454   :  { %9102 = vmatpush3.bf16.msra.mxu0 %v9099_v6 }
0x1456   :  { %v2479_v31 = vpop.xlane.xlu0 %2478 }
0x1457   :  { %v9103_v23 = vpack.c.bf16 %v2479_v31, %v2477_v30 }
0x1459   :  { %9104 = vmatprep.subr.bf16.mxu0 %v9103_v23 }
0x145a   :  { %9106 = vmatpush3.bf16.msra.mxu0 %v9103_v23 }
0x145d   :  { %8784 = vmatmul.mubr.msk.f32.vlgmr.msra.gmra.mrb[40].mxu0 %vm297_vm0, %v10207_v29 }
0x145e   :  { %8786 = vmatprep.mubr.msk.f32.mxu0 %vm297_vm0, %v10214_v0 }
0x1461   :  { %8787 = vmatmul.mubr.msk.f32.gmra.mrb[42].mxu0 %vm297_vm0, %v10221_v22 }
0x1462   :  { %8797 = vmatprep.mubr.msk.f32.mxu0 %vm297_vm0, %v10198_v37 }
0x1530   :  { %v8785_v33 = vpop.f32.mrb[40].mxu0 }
0x1531   :  { %2572 = vperm.xlu0 %9220, %v8785_v33   ;;  %v2546_v34 = vpop.f32.mrb[41].mxu0 }
0x1532   :  { %2567 = vperm.xlu1 %9221, %v2546_v34  }
0x1534   :  { %v8788_v26 = vpop.f32.mrb[42].mxu0 }
0x1535   :  { %v2556_v35 = vpop.f32.mrb[43].mxu0 }
0x1536   :  { %2577 = vperm.xlu1 %9221, %v2556_v35  }
0x153a   :  { %2582 = vperm.xlu1 %9221, %v8788_v26  }
0x15b0   :  { %v2573_v36 = vpop.permute.xlu0 %2572 }
0x15b1   :  { %v10413_v40 = vsub.f32 %v2461_v21, %v2573_v36  ;;  %v2568_v38 = vpop.permute.xlu1 %2567 }
0x15b2   :  { %v10415_v39 = vsub.f32 %v2458_v8, %v2568_v38 }
0x15b3   :  { %v2590_v41 = vmul.f32 %v10413_v40, %v10413_v40 }
0x15b4   :  { %v2589_v37 = vmul.f32 %v10415_v39, %v10415_v39 }
0x15b5   :  { %2595 = vadd.xlane.f32.xlu1 %v2590_v41  ;;  %v2578_v42 = vpop.permute.xlu1 %2577  ;;  %v9264_v41 = vld [vmem:[%s12078_s1 + $0xf4] ss:$12 sps:$4 sm:$0xff]  }
0x15b6   :  { %v10421_v43 = vsub.f32 %v2466_v17, %v2578_v42  ;;  %2593 = vadd.xlane.f32.xlu0 %v2589_v37  ;;  %v7755_v37 = vld [vmem:[%s12083_s6 + $0x28] sm:$0xff]  ;;  %v7754_v42 = vld [vmem:[%s12083_s6 + $0x20] sm:$0xff] }
0x15b8   :  { %v2591_v44 = vmul.f32 %v10421_v43, %v10421_v43 }
0x15b9   :  { %v2583_v32 = vpop.permute.xlu1 %2582 }
0x15ba   :  { %v10425_v45 = vsub.f32 %v2469_v15, %v2583_v32  ;;  %2597 = vadd.xlane.f32.xlu0 %v2591_v44  ;;  %v7756_v44 = vld [vmem:[%s12083_s6 + $0x30] sm:$0xff] }
0x15bc   :  { %v2592_v47 = vmul.f32 %v10425_v45, %v10425_v45 }
0x15be   :  { %2599 = vadd.xlane.f32.xlu0 %v2592_v47 }
0x15c6   :  { %2730 = vperm.xlu1 %9221, %v7734_v46  }
0x15ca   :  { %2735 = vperm.xlu1 %9221, %v7735_v48  }
0x1642   :  { %v2596_v51 = vpop.xlane.xlu1 %2595 }
0x1643   :  { %v2594_v52 = vpop.xlane.xlu0 %2593 }
0x1644   :  { %v9107_v61 = vpack.c.bf16 %v2596_v51, %v2594_v52 }
0x1646   :  { %9108 = vmatprep.subr.bf16.mxu0 %v9107_v61  ;;  %v2731_v8 = vpop.permute.xlu1 %2730 }
0x1647   :  { %v2598_v53 = vpop.xlane.xlu0 %2597  ;;  %9110 = vmatpush3.bf16.msra.mxu0 %v9107_v61 }
0x164a   :  { %v2736_v12 = vpop.permute.xlu1 %2735 }
0x164b   :  { %v2600_v62 = vpop.xlane.xlu0 %2599 }
0x164c   :  { %v9111_v54 = vpack.c.bf16 %v2600_v62, %v2598_v53 }
0x164e   :  { %9112 = vmatprep.subr.bf16.mxu0 %v9111_v54 }
0x164f   :  { %9114 = vmatpush3.bf16.msra.mxu0 %v9111_v54 }
0x1652   :  { %8798 = vmatmul.mubr.msk.f32.vlgmr.msra.gmra.mrb[44].mxu0 %vm297_vm0, %v10207_v29  ;;  %v7731_v29 = vld [vmem:[%s12082_s4 + $0x68] sm:$0xff] }
0x1653   :  { %8800 = vmatprep.mubr.msk.f32.mxu0 %vm297_vm0, %v10214_v0  ;;  %v7730_v0 = vld [vmem:[%s12082_s4 + $0x60] sm:$0xff] }
0x1656   :  { %8801 = vmatmul.mubr.msk.f32.gmra.mrb[46].mxu0 %vm297_vm0, %v10221_v22 }
0x1657   :  { %2983 = vmatprep.mubr.bf16.mxu0 %v9264_v41  ;;  %v10556_v41 = vld [vmem:[%s12079_s2 + $0x7] ss:$0 sm:$0xff] }
0x1725   :  { %v8799_v50 = vpop.f32.mrb[44].mxu0 }
0x1726   :  { %v2673_v55 = vadd.f32 1e-05, %v8799_v50  ;;  %v2667_v56 = vpop.f32.mrb[45].mxu0 }
0x1727   :  { %v2668_v4 = vadd.f32 1e-05, %v2667_v56 }
0x1728   :  { %9366 = vrsqrt.f32 %v2673_v55 }
0x1729   :  { %9368 = vrsqrt.f32 %v2668_v4  ;;  %v8802_v57 = vpop.f32.mrb[46].mxu0 }
0x172a   :  { %v2683_v58 = vadd.f32 1e-05, %v8802_v57  ;;  %v2677_v59 = vpop.f32.mrb[47].mxu0 }
0x172b   :  { %v2678_v9 = vadd.f32 1e-05, %v2677_v59 }
0x172c   :  { %9370 = vrsqrt.f32 %v2683_v58 }
0x172d   :  { %9372 = vrsqrt.f32 %v2678_v9 }
0x1732   :  { %v9367_v22 = vpop.eup %9366 }
0x1733   :  { %v9369_v60 = vpop.eup %9368  ;;  %v2696_v14 = vmul.f32 %v9367_v22, %v7731_v29  ;;  %v10520_v29 = vld [vmem:[%s12079_s2 + $0x5] ss:$0 sm:$0xff] }
0x1734   :  { %v2695_v25 = vmul.f32 %v9369_v60, %v7730_v0 }
0x1735   :  { %2706 = vperm.xlu0 %9220, %v2696_v14  }
0x1736   :  { %v9371_v7 = vpop.eup %9370  ;;  %2701 = vperm.xlu1 %9221, %v2695_v25  }
0x1737   :  { %v9373_v49 = vpop.eup %9372  ;;  %v2698_v1 = vmul.f32 %v9371_v7, %v7733_v63  ;;  %v10529_v63 = vld [vmem:[%s12079_s2 + $0x1] ss:$0 sm:$0xff] }
0x1738   :  { %v2697_v5 = vmul.f32 %v9373_v49, %v7732_v13 }
0x173a   :  { %2711 = vperm.xlu0 %9220, %v2697_v5   ;;  %2716 = vperm.xlu1 %9221, %v2698_v1  }
0x173e   :  { %2740 = vperm.xlu0 %9220, %v7736_v11   ;;  %2745 = vperm.xlu1 %9221, %v7737_v10  }
0x17b4   :  { %v2707_v16 = vpop.permute.xlu0 %2706 }
0x17b5   :  { %v2720_v17 = vmul.f32 %v2707_v16, %v10413_v40  ;;  %v2702_v18 = vpop.permute.xlu1 %2701 }
0x17b6   :  { %v2719_v19 = vmul.f32 %v2702_v18, %v10415_v39  ;;  %v10538_v18 = vld [vmem:[%s12079_s2 + $0x6] ss:$0 sm:$0xff] }
0x17b7   :  { %v2749_v21 = vadd.f32 %v2736_v12, %v2720_v17 }
0x17b8   :  { %v2748_v15 = vadd.f32 %v2731_v8, %v2719_v19 }
0x17b9   :  { %v2753_v27 = vmax.f32 %v2749_v21, 0.0  ;;  %v2712_v28 = vpop.permute.xlu0 %2711  ;;  %v2717_v6 = vpop.permute.xlu1 %2716 }
0x17ba   :  { %v2752_v30 = vmax.f32 %v2748_v15, 0.0  ;;  %v2721_v31 = vmul.f32 %v2712_v28, %v10421_v43  ;;  %v2722_v23 = vmul.f32 %v2717_v6, %v10425_v45  ;;  %v7757_v43 = vld [vmem:[%s12083_s6 + $0x38] sm:$0xff]  ;;  %v10513_v45 = vld [vmem:[%s12079_s2] ss:$0 sm:$0xff]  ;;  %v10547_v6 = vld [vmem:[%s12079_s2 + $0x2] ss:$0 sm:$0xff] }
0x17bb   :  { %2758 = vrot.lane.b32.xlu1 %v2753_v27, %s9478_s19 }
0x17bc   :  { %2756 = vrot.lane.b32.xlu0 %v2752_v30, %s9478_s19  ;;  %v2820_v33 = vpack.c.bf16 %v2753_v27, %v2752_v30 }
0x17bd   :  { %v2741_v34 = vpop.permute.xlu0 %2740  ;;  %v2746_v26 = vpop.permute.xlu1 %2745 }
0x17be   :  { %v2750_v35 = vadd.f32 %v2741_v34, %v2721_v31  ;;  %v2751_v36 = vadd.f32 %v2746_v26, %v2722_v23  ;;  %8235 = vmatprep.subr.bf16.mxu0 %v2820_v33 }
0x17bf   :  { %2826 = vrot.lane.b32.xlu1 %v2753_v27, %s9479_s22 }
0x17c0   :  { %v2754_v40 = vmax.f32 %v2750_v35, 0.0  ;;  %v2755_v38 = vmax.f32 %v2751_v36, 0.0  ;;  %2824 = vrot.lane.b32.xlu0 %v2752_v30, %s9479_s22 }
0x17c2   :  { %v2821_v39 = vpack.c.bf16 %v2755_v38, %v2754_v40 }
0x17c3   :  { %2774 = vrot.lane.b32.xlu1 %v2753_v27, %s9480_s23 }
0x17c4   :  { %2772 = vrot.lane.b32.xlu0 %v2752_v30, %s9480_s23 }
0x17c7   :  { %2842 = vrot.lane.b32.xlu1 %v2753_v27, %s9481_s0 }
0x17c8   :  { %2840 = vrot.lane.b32.xlu0 %v2752_v30, %s9481_s0 }
0x17cb   :  { %2790 = vrot.lane.b32.xlu1 %v2753_v27, %s9482_s24 }
0x17cc   :  { %2788 = vrot.lane.b32.xlu0 %v2752_v30, %s9482_s24 }
0x17cf   :  { %2858 = vrot.lane.b32.xlu1 %v2753_v27, %s9483_s25 }
0x17d0   :  { %2856 = vrot.lane.b32.xlu0 %v2752_v30, %s9483_s25 }
0x17d3   :  { %2806 = vrot.lane.b32.xlu1 %v2753_v27, %s9484_s26 }
0x17d4   :  { %2804 = vrot.lane.b32.xlu0 %v2752_v30, %s9484_s26 }
0x17d7   :  { %2762 = vrot.lane.b32.xlu1 %v2755_v38, %s9478_s19 }
0x17d8   :  { %2760 = vrot.lane.b32.xlu0 %v2754_v40, %s9478_s19 }
0x17db   :  { %2830 = vrot.lane.b32.xlu1 %v2755_v38, %s9479_s22 }
0x17dc   :  { %2828 = vrot.lane.b32.xlu0 %v2754_v40, %s9479_s22 }
0x17df   :  { %2778 = vrot.lane.b32.xlu1 %v2755_v38, %s9480_s23 }
0x17e0   :  { %2776 = vrot.lane.b32.xlu0 %v2754_v40, %s9480_s23 }
0x17e3   :  { %2846 = vrot.lane.b32.xlu1 %v2755_v38, %s9481_s0 }
0x17e4   :  { %2844 = vrot.lane.b32.xlu0 %v2754_v40, %s9481_s0 }
0x17e7   :  { %2794 = vrot.lane.b32.xlu1 %v2755_v38, %s9482_s24 }
0x17e8   :  { %2792 = vrot.lane.b32.xlu0 %v2754_v40, %s9482_s24 }
0x17eb   :  { %2862 = vrot.lane.b32.xlu1 %v2755_v38, %s9483_s25 }
0x17ec   :  { %2860 = vrot.lane.b32.xlu0 %v2754_v40, %s9483_s25 }
0x17ef   :  { %2810 = vrot.lane.b32.xlu1 %v2755_v38, %s9484_s26 }
0x17f0   :  { %2808 = vrot.lane.b32.xlu0 %v2754_v40, %s9484_s26 }
0x17f3   :  { %2874 = vrot.lane.b32.xlu1 %v2753_v27, %s9485_s11 }
0x17f4   :  { %2872 = vrot.lane.b32.xlu0 %v2752_v30, %s9485_s11 }
0x17f7   :  { %2878 = vrot.lane.b32.xlu1 %v2755_v38, %s9485_s11 }
0x17f8   :  { %2876 = vrot.lane.b32.xlu0 %v2754_v40, %s9485_s11 }
0x17fb   :  { %3065 = vperm.xlu1 %9221, %v7755_v37  }
0x17fc   :  { %3060 = vperm.xlu0 %9220, %v7754_v42  }
0x17ff   :  { %3075 = vperm.xlu1 %9221, %v7757_v43  }
0x1800   :  { %3070 = vperm.xlu0 %9220, %v7756_v44  }
0x182d   :  { %v2759_v32 = vpop.permute.xlu1 %2758 }
0x182e   :  { %v2765_v47 = vmul.f32 %v10513_v45, %v2759_v32  ;;  %v2757_v46 = vpop.permute.xlu0 %2756 }
0x182f   :  { %v2764_v48 = vmul.f32 %v10513_v45, %v2757_v46 }
0x1831   :  { %v2768_v51 = vpack.c.bf16 %v2765_v47, %v2764_v48  ;;  %v2827_v52 = vpop.permute.xlu1 %2826  ;;  %v10565_v47 = vld [vmem:[%s12079_s2 + $0x3] ss:$0 sm:$0xff] }
0x1832   :  { %v2825_v61 = vpop.permute.xlu0 %2824  ;;  %v2833_v0 = vmul.f32 %v10520_v29, %v2827_v52 }
0x1833   :  { %8236 = vmatpush3.bf16.msra.mxu0 %v2768_v51  ;;  %v2832_v22 = vmul.f32 %v10520_v29, %v2825_v61 }
0x1834   :  { %8237 = vmatprep.subr.bf16.mxu0 %v2821_v39 }
0x1835   :  { %v2775_v53 = vpop.permute.xlu1 %2774  ;;  %v2836_v5 = vpack.c.bf16 %v2833_v0, %v2832_v22  ;;  %v10576_v0 = vld [vmem:[%s12079_s2 + $0x8] ss:$0 sm:$0xff] }
0x1836   :  { %v2773_v62 = vpop.permute.xlu0 %2772  ;;  %v2781_v13 = vmul.f32 %v10529_v63, %v2775_v53 }
0x1837   :  { %v2780_v7 = vmul.f32 %v10529_v63, %v2773_v62 }
0x1839   :  { %v2843_v54 = vpop.permute.xlu1 %2842  ;;  %v2784_v12 = vpack.c.bf16 %v2781_v13, %v2780_v7  ;;  %v9265_v13 = vld [vmem:[%s12078_s1 + $0x10c] ss:$12 sps:$4 sm:$0xff]  }
0x183a   :  { %v2841_v50 = vpop.permute.xlu0 %2840  ;;  %v2849_v19 = vmul.f32 %v10538_v18, %v2843_v54 }
0x183b   :  { %v2848_v21 = vmul.f32 %v10538_v18, %v2841_v50 }
0x183d   :  { %v2791_v55 = vpop.permute.xlu1 %2790  ;;  %v2852_v34 = vpack.c.bf16 %v2849_v19, %v2848_v21 }
0x183e   :  { %v2789_v56 = vpop.permute.xlu0 %2788  ;;  %v2797_v30 = vmul.f32 %v10547_v6, %v2791_v55 }
0x183f   :  { %v2796_v31 = vmul.f32 %v10547_v6, %v2789_v56 }
0x1841   :  { %v2859_v4 = vpop.permute.xlu1 %2858  ;;  %v2800_v40 = vpack.c.bf16 %v2797_v30, %v2796_v31 }
0x1842   :  { %v2857_v57 = vpop.permute.xlu0 %2856  ;;  %v2865_v37 = vmul.f32 %v10556_v41, %v2859_v4 }
0x1843   :  { %v2864_v42 = vmul.f32 %v10556_v41, %v2857_v57 }
0x1845   :  { %v2807_v58 = vpop.permute.xlu1 %2806  ;;  %v2868_v61 = vpack.c.bf16 %v2865_v37, %v2864_v42 }
0x1846   :  { %v2805_v59 = vpop.permute.xlu0 %2804  ;;  %v2813_v46 = vmul.f32 %v10565_v47, %v2807_v58 }
0x1847   :  { %v2812_v48 = vmul.f32 %v10565_v47, %v2805_v59 }
0x1849   :  { %v2763_v9 = vpop.permute.xlu1 %2762  ;;  %v2816_v50 = vpack.c.bf16 %v2813_v46, %v2812_v48 }
0x184a   :  { %v2767_v60 = vmul.f32 %v10513_v45, %v2763_v9  ;;  %v2761_v14 = vpop.permute.xlu0 %2760 }
0x184b   :  { %v2766_v25 = vmul.f32 %v10513_v45, %v2761_v14  ;;  %v9262_v14 = vld [vmem:[%s12078_s1 + $0xf0] ss:$12 sps:$4 sm:$0xff]  }
0x184d   :  { %v2769_v49 = vpack.c.bf16 %v2767_v60, %v2766_v25  ;;  %v2831_v1 = vpop.permute.xlu1 %2830 }
0x184e   :  { %v2835_v11 = vmul.f32 %v10520_v29, %v2831_v1  ;;  %v2829_v10 = vpop.permute.xlu0 %2828 }
0x184f   :  { %v2834_v8 = vmul.f32 %v10520_v29, %v2829_v10  ;;  %8238 = vmatpush3.bf16.msra.mxu0 %v2769_v49 }
0x1850   :  { %8239 = vmatprep.subr.bf16.mxu0 %v2836_v5 }
0x1851   :  { %v2837_v16 = vpack.c.bf16 %v2835_v11, %v2834_v8  ;;  %v2779_v17 = vpop.permute.xlu1 %2778  ;;  %v9267_v8 = vld [vmem:[%s12078_s1 + $0x108] ss:$12 sps:$4 sm:$0xff]  }
0x1852   :  { %v2783_v15 = vmul.f32 %v10529_v63, %v2779_v17  ;;  %v2777_v27 = vpop.permute.xlu0 %2776 }
0x1853   :  { %v2782_v28 = vmul.f32 %v10529_v63, %v2777_v27  ;;  %8240 = vmatpush3.bf16.msra.mxu0 %v2784_v12  ;;  %v9268_v12 = vld [vmem:[%s12078_s1 + $0xf8] ss:$12 sps:$4 sm:$0xff]  }
0x1854   :  { %8241 = vmatprep.subr.bf16.mxu0 %v2837_v16  ;;  %v9269_v16 = vld [vmem:[%s12078_s1 + $0x110] ss:$12 sps:$4 sm:$0xff]  }
0x1855   :  { %v2785_v23 = vpack.c.bf16 %v2783_v15, %v2782_v28  ;;  %v2847_v33 = vpop.permute.xlu1 %2846 }
0x1856   :  { %v2851_v26 = vmul.f32 %v10538_v18, %v2847_v33  ;;  %v2845_v35 = vpop.permute.xlu0 %2844 }
0x1857   :  { %v2850_v36 = vmul.f32 %v10538_v18, %v2845_v35  ;;  %8242 = vmatpush3.bf16.msra.mxu0 %v2785_v23 }
0x1858   :  { %8243 = vmatprep.subr.bf16.mxu0 %v2852_v34 }
0x1859   :  { %v2853_v38 = vpack.c.bf16 %v2851_v26, %v2850_v36  ;;  %v2795_v39 = vpop.permute.xlu1 %2794 }
0x185a   :  { %v2799_v43 = vmul.f32 %v10547_v6, %v2795_v39  ;;  %v2793_v44 = vpop.permute.xlu0 %2792 }
0x185b   :  { %v2798_v32 = vmul.f32 %v10547_v6, %v2793_v44  ;;  %8244 = vmatpush3.bf16.msra.mxu0 %v2800_v40 }
0x185c   :  { %8245 = vmatprep.subr.bf16.mxu0 %v2853_v38 }
0x185d   :  { %v2801_v51 = vpack.c.bf16 %v2799_v43, %v2798_v32  ;;  %v2863_v52 = vpop.permute.xlu1 %2862 }
0x185e   :  { %v2867_v53 = vmul.f32 %v10556_v41, %v2863_v52  ;;  %v2861_v62 = vpop.permute.xlu0 %2860 }
0x185f   :  { %v2866_v54 = vmul.f32 %v10556_v41, %v2861_v62  ;;  %8246 = vmatpush3.bf16.msra.mxu0 %v2801_v51 }
0x1860   :  { %8247 = vmatprep.subr.bf16.mxu0 %v2868_v61 }
0x1861   :  { %v2869_v55 = vpack.c.bf16 %v2867_v53, %v2866_v54  ;;  %v2811_v56 = vpop.permute.xlu1 %2810 }
0x1862   :  { %v2815_v4 = vmul.f32 %v10565_v47, %v2811_v56  ;;  %v2809_v57 = vpop.permute.xlu0 %2808 }
0x1863   :  { %v2814_v58 = vmul.f32 %v10565_v47, %v2809_v57  ;;  %8248 = vmatpush3.bf16.msra.mxu0 %v2816_v50 }
0x1864   :  { %8249 = vmatprep.subr.bf16.mxu0 %v2869_v55 }
0x1865   :  { %v2817_v59 = vpack.c.bf16 %v2815_v4, %v2814_v58  ;;  %v2875_v9 = vpop.permute.xlu1 %2874  ;;  %v9276_v58 = vld [vmem:[%s12078_s1 + $0x128] ss:$12 sps:$4 sm:$0xff]  }
0x1866   :  { %v2881_v22 = vmul.f32 %v10576_v0, %v2875_v9  ;;  %v2873_v60 = vpop.permute.xlu0 %2872 }
0x1867   :  { %v2880_v25 = vmul.f32 %v10576_v0, %v2873_v60  ;;  %8250 = vmatpush3.bf16.msra.mxu0 %v2817_v59 }
0x1869   :  { %v2884_v7 = vpack.c.bf16 %v2881_v22, %v2880_v25  ;;  %v2879_v49 = vpop.permute.xlu1 %2878 }
0x186a   :  { %v2883_v1 = vmul.f32 %v10576_v0, %v2879_v49  ;;  %v2877_v5 = vpop.permute.xlu0 %2876  ;;  %2984 = vmatmul.mubr.bf16.vlgmr.msra.gmra.mrb[48].mxu0 %v9262_v14 }
0x186b   :  { %v2882_v11 = vmul.f32 %v10576_v0, %v2877_v5  ;;  %8803 = vmatprep.subr.bf16.mxu0 %v2884_v7  ;;  %2991 = vmatprep.mubr.bf16.mxu0 %v9265_v13 }
0x186c   :  { %8804 = vmatpush3.bf16.msra.mxu0 %v2884_v7 }
0x186d   :  { %v2885_v10 = vpack.c.bf16 %v2883_v1, %v2882_v11 }
0x186f   :  { %8805 = vmatprep.subr.bf16.mxu0 %v2885_v10 }
0x1870   :  { %8806 = vmatpush3.bf16.msra.mxu0 %v2885_v10 }
0x1872   :  { %2992 = vmatmul.mubr.bf16.gmra.mrb[52].mxu0 %v9267_v8 }
0x1873   :  { %8807 = vmatprep.mubr.msk.bf16.mxu0 %vm297_vm0, %v9268_v12 }
0x187a   :  { %8808 = vmatmul.mubr.msk.bf16.vlgmr.msra.gmra.mrb[56].mxu0 %vm297_vm0, %v9269_v16  ;;  %v3066_v36 = vpop.permute.xlu1 %3065 }
0x187b   :  { %v3061_v35 = vpop.permute.xlu0 %3060  ;;  %8815 = vmatprep.mubr.msk.bf16.mxu0 %vm297_vm0, %v9276_v58 }
0x187e   :  { %v3076_v53 = vpop.permute.xlu1 %3075 }
0x187f   :  { %v3071_v46 = vpop.permute.xlu0 %3070 }
0x193d   :  { %v8251_v17 = vpop.f32.mrb[48].mxu0 }
0x193e   :  { %v8252_v19 = vpop.f32.mrb[49].mxu0 }
0x193f   :  { %v8253_v21 = vadd.f32 %v8252_v19, %v8251_v17  ;;  %v8254_v15 = vpop.f32.mrb[50].mxu0 }
0x1940   :  { %v8255_v27 = vpop.f32.mrb[51].mxu0 }
0x1941   :  { %v8256_v28 = vadd.f32 %v8255_v27, %v8254_v15 }
0x1945   :  { %v8257_v30 = vpop.f32.mrb[52].mxu0 }
0x1946   :  { %v8258_v31 = vpop.f32.mrb[53].mxu0 }
0x1947   :  { %v8259_v23 = vadd.f32 %v8258_v31, %v8257_v30  ;;  %v8260_v33 = vpop.f32.mrb[54].mxu0 }
0x1948   :  { %v8261_v34 = vpop.f32.mrb[55].mxu0 }
0x1949   :  { %v8262_v26 = vadd.f32 %v8261_v34, %v8260_v33 }
0x194d   :  { %v8809_v40 = vpop.f32.mrb[56].mxu0 }
0x194e   :  { %v3043_v38 = vadd.f32 %v8809_v40, %v8259_v23  ;;  %v3034_v39 = vpop.f32.mrb[57].mxu0 }
0x194f   :  { %v3035_v37 = vadd.f32 %v8253_v21, %v3034_v39  ;;  %v8810_v42 = vpop.f32.mrb[58].mxu0 }
0x1950   :  { %v3051_v43 = vadd.f32 %v3043_v38, %v10311_v20  ;;  %v3046_v44 = vadd.f32 %v8810_v42, %v8262_v26  ;;  %v3037_v32 = vpop.f32.mrb[59].mxu0 }
0x1951   :  { %v3049_v48 = vadd.f32 %v3035_v37, %v10275_v3  ;;  %v3038_v51 = vadd.f32 %v8256_v28, %v3037_v32 }
0x1952   :  { %v3080_v52 = vadd.f32 %v3071_v46, %v3051_v43  ;;  %v3052_v61 = vadd.f32 %v3046_v44, %v10309_v24 }
0x1953   :  { %v3078_v62 = vadd.f32 %v3061_v35, %v3049_v48  ;;  %v3050_v54 = vadd.f32 %v3038_v51, %v10273_v2  ;;  %v9272_v2 = vld [vmem:[%s12078_s1 + $0x124] ss:$12 sps:$4 sm:$0xff]  }
0x1954   :  { %v10603_v50 = vmax.f32 %v3080_v52, 0.0  ;;  %v3081_v55 = vadd.f32 %v3076_v53, %v3052_v61  ;;  %3313 = vmatprep.mubr.bf16.mxu1 %v9272_v2 }
0x1955   :  { %v3079_v56 = vadd.f32 %v3066_v36, %v3050_v54  ;;  %v3082_v20 = vmax.f32 %v3078_v62, 0.0 }
0x1956   :  { %v10605_v4 = vmax.f32 %v3081_v55, 0.0  ;;  %3090 = vrot.lane.b32.xlu0 %v10603_v50, %s9478_s19 }
0x1957   :  { %v3083_v57 = vmax.f32 %v3079_v56, 0.0 }
0x1958   :  { %3092 = vrot.lane.b32.xlu1 %v10605_v4, %s9478_s19  ;;  %v3151_v3 = vpack.c.bf16 %v10605_v4, %v10603_v50 }
0x1959   :  { %v3150_v24 = vpack.c.bf16 %v3083_v57, %v3082_v20 }
0x195a   :  { %3158 = vrot.lane.b32.xlu0 %v10603_v50, %s9479_s22 }
0x195b   :  { %8267 = vmatprep.subr.bf16.mxu1 %v3150_v24 }
0x195c   :  { %3160 = vrot.lane.b32.xlu1 %v10605_v4, %s9479_s22 }
0x195e   :  { %3106 = vrot.lane.b32.xlu0 %v10603_v50, %s9480_s23 }
0x1960   :  { %3108 = vrot.lane.b32.xlu1 %v10605_v4, %s9480_s23 }
0x1962   :  { %3174 = vrot.lane.b32.xlu0 %v10603_v50, %s9481_s0 }
0x1964   :  { %3176 = vrot.lane.b32.xlu1 %v10605_v4, %s9481_s0 }
0x1966   :  { %3122 = vrot.lane.b32.xlu0 %v10603_v50, %s9482_s24 }
0x1968   :  { %3124 = vrot.lane.b32.xlu1 %v10605_v4, %s9482_s24 }
0x196a   :  { %3190 = vrot.lane.b32.xlu0 %v10603_v50, %s9483_s25 }
0x196c   :  { %3192 = vrot.lane.b32.xlu1 %v10605_v4, %s9483_s25 }
0x196e   :  { %3086 = vrot.lane.b32.xlu0 %v3082_v20, %s9478_s19 }
0x1970   :  { %3088 = vrot.lane.b32.xlu1 %v3083_v57, %s9478_s19 }
0x1972   :  { %3154 = vrot.lane.b32.xlu0 %v3082_v20, %s9479_s22 }
0x1974   :  { %3156 = vrot.lane.b32.xlu1 %v3083_v57, %s9479_s22 }
0x1976   :  { %3102 = vrot.lane.b32.xlu0 %v3082_v20, %s9480_s23 }
0x1978   :  { %3104 = vrot.lane.b32.xlu1 %v3083_v57, %s9480_s23 }
0x197a   :  { %3170 = vrot.lane.b32.xlu0 %v3082_v20, %s9481_s0 }
0x197c   :  { %3172 = vrot.lane.b32.xlu1 %v3083_v57, %s9481_s0 }
0x197e   :  { %3118 = vrot.lane.b32.xlu0 %v3082_v20, %s9482_s24 }
0x1980   :  { %3120 = vrot.lane.b32.xlu1 %v3083_v57, %s9482_s24 }
0x1982   :  { %3186 = vrot.lane.b32.xlu0 %v3082_v20, %s9483_s25 }
0x1984   :  { %3188 = vrot.lane.b32.xlu1 %v3083_v57, %s9483_s25 }
0x1986   :  { %3134 = vrot.lane.b32.xlu0 %v3082_v20, %s9484_s26 }
0x1988   :  { %3136 = vrot.lane.b32.xlu1 %v3083_v57, %s9484_s26 }
0x198a   :  { %3138 = vrot.lane.b32.xlu0 %v10603_v50, %s9484_s26 }
0x198c   :  { %3140 = vrot.lane.b32.xlu1 %v10605_v4, %s9484_s26 }
0x198e   :  { %3202 = vrot.lane.b32.xlu0 %v3082_v20, %s9485_s11 }
0x1990   :  { %3204 = vrot.lane.b32.xlu1 %v3083_v57, %s9485_s11 }
0x1992   :  { %3206 = vrot.lane.b32.xlu0 %v10603_v50, %s9485_s11 }
0x1994   :  { %3208 = vrot.lane.b32.xlu1 %v10605_v4, %s9485_s11 }
0x19c8   :  { %v3091_v59 = vpop.permute.xlu0 %3090 }
0x19c9   :  { %v3096_v27 = vmul.f32 %v10513_v45, %v3091_v59 }
0x19ca   :  { %v3093_v9 = vpop.permute.xlu1 %3092 }
0x19cb   :  { %v3097_v19 = vmul.f32 %v10513_v45, %v3093_v9 }
0x19cc   :  { %v3159_v22 = vpop.permute.xlu0 %3158 }
0x19cd   :  { %v3099_v23 = vpack.c.bf16 %v3097_v19, %v3096_v27  ;;  %v3164_v40 = vmul.f32 %v10520_v29, %v3159_v22  ;;  %v9270_v19 = vld [vmem:[%s12078_s1 + $0x120] ss:$12 sps:$4 sm:$0xff]  }
0x19ce   :  { %v3161_v60 = vpop.permute.xlu1 %3160 }
0x19cf   :  { %v3165_v34 = vmul.f32 %v10520_v29, %v3161_v60 }
0x19d0   :  { %v3107_v14 = vpop.permute.xlu0 %3106 }
0x19d1   :  { %v3167_v42 = vpack.c.bf16 %v3165_v34, %v3164_v40  ;;  %v3112_v44 = vmul.f32 %v10529_v63, %v3107_v14  ;;  %v9275_v34 = vld [vmem:[%s12078_s1 + $0x138] ss:$12 sps:$4 sm:$0xff]  }
0x19d2   :  { %v3109_v25 = vpop.permute.xlu1 %3108 }
0x19d3   :  { %v3113_v39 = vmul.f32 %v10529_v63, %v3109_v25 }
0x19d4   :  { %v3175_v13 = vpop.permute.xlu0 %3174 }
0x19d5   :  { %v3115_v51 = vpack.c.bf16 %v3113_v39, %v3112_v44  ;;  %v3180_v50 = vmul.f32 %v10538_v18, %v3175_v13 }
0x19d6   :  { %v3177_v7 = vpop.permute.xlu1 %3176 }
0x19d7   :  { %v3181_v61 = vmul.f32 %v10538_v18, %v3177_v7 }
0x19d8   :  { %v3123_v49 = vpop.permute.xlu0 %3122 }
0x19d9   :  { %v3183_v20 = vpack.c.bf16 %v3181_v61, %v3180_v50 }
0x19da   :  { %v3125_v1 = vpop.permute.xlu1 %3124 }
0x19db   :  { %v3129_v56 = vmul.f32 %v10547_v6, %v3125_v1 }
0x19dc   :  { %v10664_v5 = vpop.permute.xlu0 %3190 }
0x19dd   :  { %v3196_v13 = vmul.f32 %v10556_v41, %v10664_v5 }
0x19de   :  { %v3193_v11 = vpop.permute.xlu1 %3192 }
0x19df   :  { %v3197_v22 = vmul.f32 %v10556_v41, %v3193_v11 }
0x19e0   :  { %v3087_v10 = vpop.permute.xlu0 %3086 }
0x19e1   :  { %v3094_v12 = vmul.f32 %v10513_v45, %v3087_v10  ;;  %v3199_v1 = vpack.c.bf16 %v3197_v22, %v3196_v13 }
0x19e2   :  { %v3089_v8 = vpop.permute.xlu1 %3088 }
0x19e3   :  { %v3095_v16 = vmul.f32 %v10513_v45, %v3089_v8 }
0x19e4   :  { %v3155_v17 = vpop.permute.xlu0 %3154 }
0x19e5   :  { %v3098_v21 = vpack.c.bf16 %v3095_v16, %v3094_v12  ;;  %v3162_v28 = vmul.f32 %v10520_v29, %v3155_v17 }
0x19e6   :  { %v3157_v15 = vpop.permute.xlu1 %3156 }
0x19e7   :  { %v3163_v30 = vmul.f32 %v10520_v29, %v3157_v15  ;;  %8268 = vmatpush3.bf16.msra.mxu1 %v3098_v21  ;;  %v9273_v15 = vld [vmem:[%s12078_s1 + $0x13c] ss:$12 sps:$4 sm:$0xff]  }
0x19e8   :  { %v3103_v31 = vpop.permute.xlu0 %3102  ;;  %8269 = vmatprep.subr.bf16.mxu1 %v3151_v3  ;;  %v3128_v3 = vmul.f32 %v10547_v6, %v3123_v49 }
0x19e9   :  { %v3166_v33 = vpack.c.bf16 %v3163_v30, %v3162_v28  ;;  %v3110_v35 = vmul.f32 %v10529_v63, %v3103_v31 }
0x19ea   :  { %v3105_v26 = vpop.permute.xlu1 %3104  ;;  %v3131_v59 = vpack.c.bf16 %v3129_v56, %v3128_v3 }
0x19eb   :  { %v3111_v36 = vmul.f32 %v10529_v63, %v3105_v26  ;;  %8270 = vmatpush3.bf16.msra.mxu1 %v3099_v23  ;;  %v9277_v26 = vld [vmem:[%s12078_s1 + $0x140] ss:$12 sps:$4 sm:$0xff]  }
0x19ec   :  { %v3171_v38 = vpop.permute.xlu0 %3170  ;;  %8271 = vmatprep.subr.bf16.mxu1 %v3166_v33 }
0x19ed   :  { %v3114_v37 = vpack.c.bf16 %v3111_v36, %v3110_v35  ;;  %v3178_v32 = vmul.f32 %v10538_v18, %v3171_v38  ;;  %v10715_v35 = vld [vmem:[%s12080_s3] sm:$0xff] }
0x19ee   :  { %v3173_v43 = vpop.permute.xlu1 %3172 }
0x19ef   :  { %v3179_v46 = vmul.f32 %v10538_v18, %v3173_v43  ;;  %8272 = vmatpush3.bf16.msra.mxu1 %v3114_v37 }
0x19f0   :  { %v3119_v48 = vpop.permute.xlu0 %3118  ;;  %8273 = vmatprep.subr.bf16.mxu1 %v3167_v42 }
0x19f1   :  { %v3182_v52 = vpack.c.bf16 %v3179_v46, %v3178_v32  ;;  %v3126_v62 = vmul.f32 %v10547_v6, %v3119_v48 }
0x19f2   :  { %v3121_v53 = vpop.permute.xlu1 %3120 }
0x19f3   :  { %v3127_v54 = vmul.f32 %v10547_v6, %v3121_v53  ;;  %8274 = vmatpush3.bf16.msra.mxu1 %v3115_v51 }
0x19f4   :  { %v3187_v55 = vpop.permute.xlu0 %3186  ;;  %8275 = vmatprep.subr.bf16.mxu1 %v3182_v52 }
0x19f5   :  { %v3130_v4 = vpack.c.bf16 %v3127_v54, %v3126_v62  ;;  %v3194_v24 = vmul.f32 %v10556_v41, %v3187_v55 }
0x19f6   :  { %v3189_v57 = vpop.permute.xlu1 %3188 }
0x19f7   :  { %v3195_v2 = vmul.f32 %v10556_v41, %v3189_v57  ;;  %8276 = vmatpush3.bf16.msra.mxu1 %v3130_v4 }
0x19f8   :  { %v3135_v58 = vpop.permute.xlu0 %3134  ;;  %8277 = vmatprep.subr.bf16.mxu1 %v3183_v20 }
0x19f9   :  { %v3198_v9 = vpack.c.bf16 %v3195_v2, %v3194_v24  ;;  %v3142_v14 = vmul.f32 %v10565_v47, %v3135_v58  ;;  %v10722_v58 = vld [vmem:[%s12080_s3 + $0x8] sm:$0xff] }
0x19fa   :  { %v3137_v60 = vpop.permute.xlu1 %3136 }
0x19fb   :  { %v3143_v25 = vmul.f32 %v10565_v47, %v3137_v60  ;;  %8278 = vmatpush3.bf16.msra.mxu1 %v3131_v59  ;;  %v10729_v59 = vld [vmem:[%s12080_s3 + $0x10] sm:$0xff] }
0x19fc   :  { %v3139_v7 = vpop.permute.xlu0 %3138  ;;  %8279 = vmatprep.subr.bf16.mxu1 %v3198_v9  ;;  %v10736_v9 = vld [vmem:[%s12080_s3 + $0x18] sm:$0xff] }
0x19fd   :  { %v3146_v49 = vpack.c.bf16 %v3143_v25, %v3142_v14  ;;  %v3144_v8 = vmul.f32 %v10565_v47, %v3139_v7 }
0x19fe   :  { %v3141_v10 = vpop.permute.xlu1 %3140 }
0x19ff   :  { %v3145_v12 = vmul.f32 %v10565_v47, %v3141_v10  ;;  %8280 = vmatpush3.bf16.msra.mxu1 %v3146_v49 }
0x1a00   :  { %v3203_v11 = vpop.permute.xlu0 %3202  ;;  %8281 = vmatprep.subr.bf16.mxu1 %v3199_v1 }
0x1a01   :  { %v3147_v16 = vpack.c.bf16 %v3145_v12, %v3144_v8  ;;  %v3210_v5 = vmul.f32 %v10576_v0, %v3203_v11 }
0x1a02   :  { %v3205_v17 = vpop.permute.xlu1 %3204 }
0x1a03   :  { %v3211_v21 = vmul.f32 %v10576_v0, %v3205_v17  ;;  %8282 = vmatpush3.bf16.msra.mxu1 %v3147_v16 }
0x1a04   :  { %v3207_v27 = vpop.permute.xlu0 %3206 }
0x1a05   :  { %v3214_v28 = vpack.c.bf16 %v3211_v21, %v3210_v5  ;;  %v3212_v31 = vmul.f32 %v10576_v0, %v3207_v27  ;;  %v7786_v21 = vld [vmem:[%s12081_s5 + $0x80] sm:$0xff] }
0x1a06   :  { %v3209_v30 = vpop.permute.xlu1 %3208  ;;  %3314 = vmatmul.mubr.bf16.vlgmr.msra.gmra.mrb[44].mxu1 %v9270_v19 }
0x1a07   :  { %v3213_v23 = vmul.f32 %v10576_v0, %v3209_v30  ;;  %8811 = vmatprep.subr.bf16.mxu0 %v3214_v28  ;;  %3321 = vmatprep.mubr.bf16.mxu1 %v9273_v15  ;;  %v7787_v15 = vld [vmem:[%s12081_s5 + $0x88] sm:$0xff] }
0x1a08   :  { %8812 = vmatpush3.bf16.msra.mxu0 %v3214_v28 }
0x1a09   :  { %v3215_v33 = vpack.c.bf16 %v3213_v23, %v3212_v31 }
0x1a0b   :  { %8813 = vmatprep.subr.bf16.mxu0 %v3215_v33 }
0x1a0c   :  { %8814 = vmatpush3.bf16.msra.mxu0 %v3215_v33 }
0x1a0e   :  { %3322 = vmatmul.mubr.bf16.gmra.mrb[48].mxu1 %v9275_v34 }
0x1a0f   :  { %8816 = vmatmul.mubr.msk.bf16.vlgmr.msra.gmra.mrb[60].mxu0 %vm297_vm0, %v9277_v26 }
0x1a10   :  { %8827 = vmatprep.mubr.msk.f32.mxu0 %vm297_vm0, %v10715_v35 }
0x1ad9   :  { %v8283_v36 = vpop.f32.mrb[44].mxu1 }
0x1ada   :  { %v8284_v40 = vpop.f32.mrb[45].mxu1 }
0x1adb   :  { %v8285_v38 = vadd.f32 %v8284_v40, %v8283_v36  ;;  %v8286_v39 = vpop.f32.mrb[46].mxu1 }
0x1adc   :  { %v8287_v37 = vpop.f32.mrb[47].mxu1 }
0x1add   :  { %v8288_v42 = vadd.f32 %v8287_v37, %v8286_v39 }
0x1ae1   :  { %v8289_v43 = vpop.f32.mrb[48].mxu1 }
0x1ae2   :  { %v8290_v44 = vpop.f32.mrb[49].mxu1  ;;  %v8817_v32 = vpop.f32.mrb[60].mxu0 }
0x1ae3   :  { %v8291_v46 = vadd.f32 %v8290_v44, %v8289_v43  ;;  %v8292_v48 = vpop.f32.mrb[50].mxu1  ;;  %v3364_v51 = vpop.f32.mrb[61].mxu0  ;;  %v7783_v43 = vld [vmem:[%s12082_s4 + $0x88] sm:$0xff]  ;;  %v7782_v44 = vld [vmem:[%s12082_s4 + $0x80] sm:$0xff] }
0x1ae4   :  { %v3365_v52 = vadd.f32 %v8285_v38, %v3364_v51  ;;  %v8293_v61 = vpop.f32.mrb[51].mxu1  ;;  %v8818_v53 = vpop.f32.mrb[62].mxu0 }
0x1ae5   :  { %v3373_v62 = vadd.f32 %v8817_v32, %v8291_v46  ;;  %v8294_v54 = vadd.f32 %v8293_v61, %v8292_v48  ;;  %v3367_v50 = vpop.f32.mrb[63].mxu0  ;;  %v7784_v61 = vld [vmem:[%s12082_s4 + $0x90] sm:$0xff] }
0x1ae6   :  { %v3368_v55 = vadd.f32 %v8288_v42, %v3367_v50  ;;  %3379 = vadd.xlane.f32.xlu0 %v3365_v52 }
0x1ae7   :  { %v3376_v56 = vadd.f32 %v8818_v53, %v8294_v54 }
0x1ae8   :  { %3381 = vadd.xlane.f32.xlu1 %v3368_v55 }
0x1aea   :  { %3383 = vadd.xlane.f32.xlu0 %v3373_v62 }
0x1aee   :  { %3385 = vadd.xlane.f32.xlu0 %v3376_v56 }
0x1b73   :  { %v3380_v4 = vpop.xlane.xlu0 %3379 }
0x1b75   :  { %v3382_v20 = vpop.xlane.xlu1 %3381 }
0x1b76   :  { %v9115_v57 = vpack.c.bf16 %v3382_v20, %v3380_v4 }
0x1b77   :  { %v3384_v3 = vpop.xlane.xlu0 %3383 }
0x1b78   :  { %9116 = vmatprep.subr.bf16.mxu0 %v9115_v57 }
0x1b79   :  { %9118 = vmatpush3.bf16.msra.mxu0 %v9115_v57 }
0x1b7b   :  { %v3386_v24 = vpop.xlane.xlu0 %3385 }
0x1b7c   :  { %v9119_v2 = vpack.c.bf16 %v3386_v24, %v3384_v3 }
0x1b7e   :  { %9120 = vmatprep.subr.bf16.mxu0 %v9119_v2 }
0x1b7f   :  { %9122 = vmatpush3.bf16.msra.mxu0 %v9119_v2 }
0x1b82   :  { %8828 = vmatmul.mubr.msk.f32.vlgmr.msra.gmra.mrb[64].mxu0 %vm297_vm0, %v10722_v58 }
0x1b83   :  { %8830 = vmatprep.mubr.msk.f32.mxu0 %vm297_vm0, %v10729_v59 }
0x1b86   :  { %8831 = vmatmul.mubr.msk.f32.gmra.mrb[66].mxu0 %vm297_vm0, %v10736_v9 }
0x1b87   :  { %8841 = vmatprep.mubr.msk.f32.mxu0 %vm297_vm0, %v10715_v35 }
0x1c55   :  { %v8829_v22 = vpop.f32.mrb[64].mxu0 }
0x1c56   :  { %3479 = vperm.xlu0 %9220, %v8829_v22   ;;  %v3453_v60 = vpop.f32.mrb[65].mxu0 }
0x1c57   :  { %3474 = vperm.xlu1 %9221, %v3453_v60  }
0x1c59   :  { %v8832_v14 = vpop.f32.mrb[66].mxu0 }
0x1c5a   :  { %v3463_v25 = vpop.f32.mrb[67].mxu0 }
0x1c5b   :  { %3484 = vperm.xlu1 %9221, %v3463_v25  }
0x1c5f   :  { %3489 = vperm.xlu1 %9221, %v8832_v14  }
0x1cd5   :  { %v3480_v13 = vpop.permute.xlu0 %3479 }
0x1cd6   :  { %v10742_v7 = vsub.f32 %v3368_v55, %v3480_v13  ;;  %v3475_v49 = vpop.permute.xlu1 %3474  ;;  %v7788_v55 = vld [vmem:[%s12081_s5 + $0x90] sm:$0xff] }
0x1cd7   :  { %v10744_v1 = vsub.f32 %v3365_v52, %v3475_v49  ;;  %v7785_v52 = vld [vmem:[%s12082_s4 + $0x98] sm:$0xff] }
0x1cd8   :  { %v3497_v10 = vmul.f32 %v10742_v7, %v10742_v7 }
0x1cd9   :  { %v3496_v8 = vmul.f32 %v10744_v1, %v10744_v1 }
0x1cda   :  { %3502 = vadd.xlane.f32.xlu1 %v3497_v10  ;;  %v3485_v12 = vpop.permute.xlu1 %3484 }
0x1cdb   :  { %v10750_v11 = vsub.f32 %v3373_v62, %v3485_v12  ;;  %3500 = vadd.xlane.f32.xlu0 %v3496_v8 }
0x1cdd   :  { %v3498_v16 = vmul.f32 %v10750_v11, %v10750_v11 }
0x1cde   :  { %v3490_v17 = vpop.permute.xlu1 %3489 }
0x1cdf   :  { %v10754_v19 = vsub.f32 %v3376_v56, %v3490_v17  ;;  %3504 = vadd.xlane.f32.xlu0 %v3498_v16  ;;  %v7789_v56 = vld [vmem:[%s12081_s5 + $0x98] sm:$0xff] }
0x1ce1   :  { %v3499_v5 = vmul.f32 %v10754_v19, %v10754_v19 }
0x1ce3   :  { %3506 = vadd.xlane.f32.xlu0 %v3499_v5 }
0x1ceb   :  { %3637 = vperm.xlu1 %9221, %v7786_v21   ;;  %v9284_v21 = vld [vmem:[%s12078_s1 + $0x158] ss:$12 sps:$4 sm:$0xff]  }
0x1cef   :  { %3642 = vperm.xlu1 %9221, %v7787_v15  }
0x1d67   :  { %v3503_v27 = vpop.xlane.xlu1 %3502 }
0x1d68   :  { %v3501_v28 = vpop.xlane.xlu0 %3500 }
0x1d69   :  { %v9123_v30 = vpack.c.bf16 %v3503_v27, %v3501_v28 }
0x1d6b   :  { %9124 = vmatprep.subr.bf16.mxu0 %v9123_v30  ;;  %v3638_v4 = vpop.permute.xlu1 %3637 }
0x1d6c   :  { %v3505_v31 = vpop.xlane.xlu0 %3504  ;;  %9126 = vmatpush3.bf16.msra.mxu0 %v9123_v30 }
0x1d6f   :  { %v3643_v20 = vpop.permute.xlu1 %3642 }
0x1d70   :  { %v3507_v23 = vpop.xlane.xlu0 %3506 }
0x1d71   :  { %v9127_v33 = vpack.c.bf16 %v3507_v23, %v3505_v31 }
0x1d73   :  { %9128 = vmatprep.subr.bf16.mxu0 %v9127_v33 }
0x1d74   :  { %9130 = vmatpush3.bf16.msra.mxu0 %v9127_v33 }
0x1d77   :  { %8842 = vmatmul.mubr.msk.f32.vlgmr.msra.gmra.mrb[68].mxu0 %vm297_vm0, %v10722_v58 }
0x1d78   :  { %8844 = vmatprep.mubr.msk.f32.mxu0 %vm297_vm0, %v10729_v59 }
0x1d7b   :  { %8845 = vmatmul.mubr.msk.f32.gmra.mrb[70].mxu0 %vm297_vm0, %v10736_v9 }
0x1d7c   :  { %8851 = vmatprep.mubr.msk.bf16.mxu0 %vm297_vm0, %v9284_v21 }
0x1e4a   :  { %v8843_v34 = vpop.f32.mrb[68].mxu0 }
0x1e4b   :  { %v3580_v26 = vadd.f32 1e-05, %v8843_v34  ;;  %v3574_v36 = vpop.f32.mrb[69].mxu0 }
0x1e4c   :  { %v3575_v40 = vadd.f32 1e-05, %v3574_v36 }
0x1e4d   :  { %9374 = vrsqrt.f32 %v3580_v26 }
0x1e4e   :  { %9376 = vrsqrt.f32 %v3575_v40  ;;  %v8846_v38 = vpop.f32.mrb[70].mxu0 }
0x1e4f   :  { %v3590_v39 = vadd.f32 1e-05, %v8846_v38  ;;  %v3584_v37 = vpop.f32.mrb[71].mxu0 }
0x1e50   :  { %v3585_v42 = vadd.f32 1e-05, %v3584_v37 }
0x1e51   :  { %9378 = vrsqrt.f32 %v3590_v39 }
0x1e52   :  { %9380 = vrsqrt.f32 %v3585_v42 }
0x1e57   :  { %v9375_v32 = vpop.eup %9374 }
0x1e58   :  { %v9377_v46 = vpop.eup %9376  ;;  %v3603_v48 = vmul.f32 %v9375_v32, %v7783_v43 }
0x1e59   :  { %v3602_v51 = vmul.f32 %v9377_v46, %v7782_v44 }
0x1e5a   :  { %3613 = vperm.xlu0 %9220, %v3603_v48  }
0x1e5b   :  { %v9379_v53 = vpop.eup %9378  ;;  %3608 = vperm.xlu1 %9221, %v3602_v51  }
0x1e5c   :  { %v9381_v62 = vpop.eup %9380  ;;  %v3605_v54 = vmul.f32 %v9379_v53, %v7785_v52 }
0x1e5d   :  { %v3604_v50 = vmul.f32 %v9381_v62, %v7784_v61 }
0x1e5f   :  { %3618 = vperm.xlu0 %9220, %v3604_v50   ;;  %3623 = vperm.xlu1 %9221, %v3605_v54  }
0x1e63   :  { %3647 = vperm.xlu0 %9220, %v7788_v55   ;;  %3652 = vperm.xlu1 %9221, %v7789_v56  }
0x1ed9   :  { %v3614_v57 = vpop.permute.xlu0 %3613 }
0x1eda   :  { %v3627_v3 = vmul.f32 %v3614_v57, %v10742_v7  ;;  %v3609_v24 = vpop.permute.xlu1 %3608 }
0x1edb   :  { %v3626_v2 = vmul.f32 %v3609_v24, %v10744_v1 }
0x1edc   :  { %v3656_v22 = vadd.f32 %v3643_v20, %v3627_v3 }
0x1edd   :  { %v3655_v60 = vadd.f32 %v3638_v4, %v3626_v2 }
0x1ede   :  { %v10790_v14 = vmax.f32 %v3656_v22, 0.0  ;;  %v3624_v7 = vpop.permute.xlu1 %3623  ;;  %v3619_v49 = vpop.permute.xlu0 %3618 }
0x1edf   :  { %v10792_v25 = vmax.f32 %v3655_v60, 0.0  ;;  %v3629_v10 = vmul.f32 %v3624_v7, %v10754_v19  ;;  %v3628_v12 = vmul.f32 %v3619_v49, %v10750_v11  ;;  %v9280_v11 = vld [vmem:[%s12078_s1 + $0x154] ss:$12 sps:$4 sm:$0xff]  }
0x1ee0   :  { %3665 = vrot.lane.b32.xlu1 %v10790_v14, %s9478_s19  ;;  %3890 = vmatprep.mubr.bf16.mxu1 %v9280_v11 }
0x1ee1   :  { %3663 = vrot.lane.b32.xlu0 %v10792_v25, %s9478_s19  ;;  %v3727_v13 = vpack.c.bf16 %v10790_v14, %v10792_v25 }
0x1ee2   :  { %v3653_v1 = vpop.permute.xlu1 %3652  ;;  %v3648_v8 = vpop.permute.xlu0 %3647 }
0x1ee3   :  { %8315 = vmatprep.subr.bf16.mxu1 %v3727_v13  ;;  %v3658_v16 = vadd.f32 %v3653_v1, %v3629_v10  ;;  %v3657_v17 = vadd.f32 %v3648_v8, %v3628_v12 }
0x1ee4   :  { %3733 = vrot.lane.b32.xlu1 %v10790_v14, %s9479_s22 }
0x1ee5   :  { %3731 = vrot.lane.b32.xlu0 %v10792_v25, %s9479_s22  ;;  %v10826_v5 = vmax.f32 %v3658_v16, 0.0  ;;  %v10828_v19 = vmax.f32 %v3657_v17, 0.0 }
0x1ee7   :  { %v3728_v34 = vpack.c.bf16 %v10826_v5, %v10828_v19 }
0x1ee8   :  { %3681 = vrot.lane.b32.xlu1 %v10790_v14, %s9480_s23 }
0x1ee9   :  { %3679 = vrot.lane.b32.xlu0 %v10792_v25, %s9480_s23 }
0x1eec   :  { %3749 = vrot.lane.b32.xlu1 %v10790_v14, %s9481_s0 }
0x1eed   :  { %3747 = vrot.lane.b32.xlu0 %v10792_v25, %s9481_s0 }
0x1ef0   :  { %3697 = vrot.lane.b32.xlu1 %v10790_v14, %s9482_s24 }
0x1ef1   :  { %3695 = vrot.lane.b32.xlu0 %v10792_v25, %s9482_s24 }
0x1ef4   :  { %3765 = vrot.lane.b32.xlu1 %v10790_v14, %s9483_s25 }
0x1ef5   :  { %3763 = vrot.lane.b32.xlu0 %v10792_v25, %s9483_s25 }
0x1ef8   :  { %3713 = vrot.lane.b32.xlu1 %v10790_v14, %s9484_s26 }
0x1ef9   :  { %3711 = vrot.lane.b32.xlu0 %v10792_v25, %s9484_s26 }
0x1efc   :  { %3669 = vrot.lane.b32.xlu1 %v10826_v5, %s9478_s19 }
0x1efd   :  { %3667 = vrot.lane.b32.xlu0 %v10828_v19, %s9478_s19 }
0x1f00   :  { %3737 = vrot.lane.b32.xlu1 %v10826_v5, %s9479_s22 }
0x1f01   :  { %3735 = vrot.lane.b32.xlu0 %v10828_v19, %s9479_s22 }
0x1f04   :  { %3685 = vrot.lane.b32.xlu1 %v10826_v5, %s9480_s23 }
0x1f05   :  { %3683 = vrot.lane.b32.xlu0 %v10828_v19, %s9480_s23 }
0x1f08   :  { %3753 = vrot.lane.b32.xlu1 %v10826_v5, %s9481_s0 }
0x1f09   :  { %3751 = vrot.lane.b32.xlu0 %v10828_v19, %s9481_s0 }
0x1f0c   :  { %3701 = vrot.lane.b32.xlu1 %v10826_v5, %s9482_s24 }
0x1f0d   :  { %3699 = vrot.lane.b32.xlu0 %v10828_v19, %s9482_s24 }
0x1f10   :  { %3769 = vrot.lane.b32.xlu1 %v10826_v5, %s9483_s25 }
0x1f11   :  { %3767 = vrot.lane.b32.xlu0 %v10828_v19, %s9483_s25 }
0x1f14   :  { %3717 = vrot.lane.b32.xlu1 %v10826_v5, %s9484_s26 }
0x1f15   :  { %3715 = vrot.lane.b32.xlu0 %v10828_v19, %s9484_s26 }
0x1f18   :  { %3781 = vrot.lane.b32.xlu1 %v10790_v14, %s9485_s11 }
0x1f19   :  { %3779 = vrot.lane.b32.xlu0 %v10792_v25, %s9485_s11 }
0x1f1c   :  { %3785 = vrot.lane.b32.xlu1 %v10826_v5, %s9485_s11 }
0x1f1d   :  { %3783 = vrot.lane.b32.xlu0 %v10828_v19, %s9485_s11 }
0x1f52   :  { %v3666_v15 = vpop.permute.xlu1 %3665 }
0x1f53   :  { %v3672_v27 = vmul.f32 %v10513_v45, %v3666_v15  ;;  %v3664_v28 = vpop.permute.xlu0 %3663 }
0x1f54   :  { %v3671_v30 = vmul.f32 %v10513_v45, %v3664_v28 }
0x1f56   :  { %v3675_v31 = vpack.c.bf16 %v3672_v27, %v3671_v30  ;;  %v3734_v23 = vpop.permute.xlu1 %3733 }
0x1f57   :  { %v3732_v33 = vpop.permute.xlu0 %3731  ;;  %v3740_v48 = vmul.f32 %v10520_v29, %v3734_v23 }
0x1f58   :  { %8316 = vmatpush3.bf16.msra.mxu1 %v3675_v31  ;;  %v3739_v51 = vmul.f32 %v10520_v29, %v3732_v33 }
0x1f59   :  { %8317 = vmatprep.subr.bf16.mxu1 %v3728_v34 }
0x1f5a   :  { %v3682_v26 = vpop.permute.xlu1 %3681  ;;  %v3743_v56 = vpack.c.bf16 %v3740_v48, %v3739_v51 }
0x1f5b   :  { %v3680_v36 = vpop.permute.xlu0 %3679  ;;  %v3688_v62 = vmul.f32 %v10529_v63, %v3682_v26 }
0x1f5c   :  { %v3687_v54 = vmul.f32 %v10529_v63, %v3680_v36 }
0x1f5e   :  { %v3750_v40 = vpop.permute.xlu1 %3749  ;;  %v3691_v3 = vpack.c.bf16 %v3688_v62, %v3687_v54 }
0x1f5f   :  { %v3748_v38 = vpop.permute.xlu0 %3747  ;;  %v3756_v22 = vmul.f32 %v10538_v18, %v3750_v40 }
0x1f62   :  { %v3698_v39 = vpop.permute.xlu1 %3697 }
0x1f63   :  { %v3696_v37 = vpop.permute.xlu0 %3695  ;;  %v3704_v49 = vmul.f32 %v10547_v6, %v3698_v39 }
0x1f66   :  { %v3766_v42 = vpop.permute.xlu1 %3765 }
0x1f67   :  { %v3764_v43 = vpop.permute.xlu0 %3763 }
0x1f68   :  { %v3771_v27 = vmul.f32 %v10556_v41, %v3764_v43 }
0x1f6a   :  { %v3714_v44 = vpop.permute.xlu1 %3713 }
0x1f6b   :  { %v3712_v32 = vpop.permute.xlu0 %3711  ;;  %v3720_v23 = vmul.f32 %v10565_v47, %v3714_v44 }
0x1f6e   :  { %v3670_v46 = vpop.permute.xlu1 %3669 }
0x1f6f   :  { %v3674_v52 = vmul.f32 %v10513_v45, %v3670_v46  ;;  %v3668_v61 = vpop.permute.xlu0 %3667 }
0x1f70   :  { %v3673_v53 = vmul.f32 %v10513_v45, %v3668_v61  ;;  %v3755_v45 = vmul.f32 %v10538_v18, %v3748_v38  ;;  %v9281_v61 = vld [vmem:[%s12078_s1 + $0x16c] ss:$12 sps:$4 sm:$0xff]  }
0x1f72   :  { %v3676_v50 = vpack.c.bf16 %v3674_v52, %v3673_v53  ;;  %v3738_v55 = vpop.permute.xlu1 %3737  ;;  %v3759_v8 = vpack.c.bf16 %v3756_v22, %v3755_v45 }
0x1f73   :  { %v3742_v4 = vmul.f32 %v10520_v29, %v3738_v55  ;;  %v3736_v20 = vpop.permute.xlu0 %3735 }
0x1f74   :  { %v3741_v57 = vmul.f32 %v10520_v29, %v3736_v20  ;;  %8318 = vmatpush3.bf16.msra.mxu1 %v3676_v50  ;;  %v3703_v29 = vmul.f32 %v10547_v6, %v3696_v37 }
0x1f75   :  { %8319 = vmatprep.subr.bf16.mxu1 %v3743_v56  ;;  %v9283_v56 = vld [vmem:[%s12078_s1 + $0x168] ss:$12 sps:$4 sm:$0xff]  }
0x1f76   :  { %v3744_v24 = vpack.c.bf16 %v3742_v4, %v3741_v57  ;;  %v3686_v2 = vpop.permute.xlu1 %3685  ;;  %v3707_v11 = vpack.c.bf16 %v3704_v49, %v3703_v29  ;;  %v9285_v4 = vld [vmem:[%s12078_s1 + $0x170] ss:$12 sps:$4 sm:$0xff]  }
0x1f77   :  { %v3690_v60 = vmul.f32 %v10529_v63, %v3686_v2  ;;  %v3684_v13 = vpop.permute.xlu0 %3683 }
0x1f78   :  { %v3689_v7 = vmul.f32 %v10529_v63, %v3684_v13  ;;  %8320 = vmatpush3.bf16.msra.mxu1 %v3691_v3  ;;  %v3772_v63 = vmul.f32 %v10556_v41, %v3766_v42 }
0x1f79   :  { %8321 = vmatprep.subr.bf16.mxu1 %v3744_v24 }
0x1f7a   :  { %v3692_v1 = vpack.c.bf16 %v3690_v60, %v3689_v7  ;;  %v3754_v10 = vpop.permute.xlu1 %3753  ;;  %v3775_v26 = vpack.c.bf16 %v3772_v63, %v3771_v27 }
0x1f7b   :  { %v3758_v12 = vmul.f32 %v10538_v18, %v3754_v10  ;;  %v3752_v16 = vpop.permute.xlu0 %3751 }
0x1f7c   :  { %v3757_v17 = vmul.f32 %v10538_v18, %v3752_v16  ;;  %8322 = vmatpush3.bf16.msra.mxu1 %v3692_v1  ;;  %v3719_v18 = vmul.f32 %v10565_v47, %v3712_v32 }
0x1f7d   :  { %8323 = vmatprep.subr.bf16.mxu1 %v3759_v8 }
0x1f7e   :  { %v3760_v21 = vpack.c.bf16 %v3758_v12, %v3757_v17  ;;  %v3702_v15 = vpop.permute.xlu1 %3701  ;;  %v3723_v39 = vpack.c.bf16 %v3720_v23, %v3719_v18 }
0x1f7f   :  { %v3706_v28 = vmul.f32 %v10547_v6, %v3702_v15  ;;  %v3700_v30 = vpop.permute.xlu0 %3699 }
0x1f80   :  { %v3705_v31 = vmul.f32 %v10547_v6, %v3700_v30  ;;  %8324 = vmatpush3.bf16.msra.mxu1 %v3707_v11 }
0x1f81   :  { %8325 = vmatprep.subr.bf16.mxu1 %v3760_v21 }
0x1f82   :  { %v3708_v33 = vpack.c.bf16 %v3706_v28, %v3705_v31  ;;  %v3770_v34 = vpop.permute.xlu1 %3769 }
0x1f83   :  { %v3774_v36 = vmul.f32 %v10556_v41, %v3770_v34  ;;  %v3768_v40 = vpop.permute.xlu0 %3767 }
0x1f84   :  { %v3773_v38 = vmul.f32 %v10556_v41, %v3768_v40  ;;  %8326 = vmatpush3.bf16.msra.mxu1 %v3708_v33  ;;  %v9278_v41 = vld [vmem:[%s12078_s1 + $0x150] ss:$12 sps:$4 sm:$0xff]  }
0x1f85   :  { %8327 = vmatprep.subr.bf16.mxu1 %v3775_v26 }
0x1f86   :  { %v3776_v37 = vpack.c.bf16 %v3774_v36, %v3773_v38  ;;  %v3718_v42 = vpop.permute.xlu1 %3717 }
0x1f87   :  { %v3722_v6 = vmul.f32 %v10565_v47, %v3718_v42  ;;  %v3716_v43 = vpop.permute.xlu0 %3715 }
0x1f88   :  { %v3721_v44 = vmul.f32 %v10565_v47, %v3716_v43  ;;  %8328 = vmatpush3.bf16.msra.mxu1 %v3723_v39 }
0x1f89   :  { %8329 = vmatprep.subr.bf16.mxu1 %v3776_v37 }
0x1f8a   :  { %v3724_v32 = vpack.c.bf16 %v3722_v6, %v3721_v44  ;;  %v3782_v46 = vpop.permute.xlu1 %3781 }
0x1f8b   :  { %v3788_v48 = vmul.f32 %v10576_v0, %v3782_v46  ;;  %v3780_v51 = vpop.permute.xlu0 %3779  ;;  %v7819_v46 = vld [vmem:[%s12081_s5 + $0xa8] sm:$0xff] }
0x1f8c   :  { %v3787_v52 = vmul.f32 %v10576_v0, %v3780_v51  ;;  %8330 = vmatpush3.bf16.msra.mxu1 %v3724_v32  ;;  %v7818_v32 = vld [vmem:[%s12081_s5 + $0xa0] sm:$0xff] }
0x1f8e   :  { %v3791_v53 = vpack.c.bf16 %v3788_v48, %v3787_v52  ;;  %v3786_v47 = vpop.permute.xlu1 %3785 }
0x1f8f   :  { %v3790_v62 = vmul.f32 %v10576_v0, %v3786_v47  ;;  %v3784_v54 = vpop.permute.xlu0 %3783  ;;  %3891 = vmatmul.mubr.bf16.vlgmr.msra.gmra.mrb[52].mxu1 %v9278_v41 }
0x1f90   :  { %v3789_v50 = vmul.f32 %v10576_v0, %v3784_v54  ;;  %8847 = vmatprep.subr.bf16.mxu0 %v3791_v53  ;;  %3898 = vmatprep.mubr.bf16.mxu1 %v9281_v61 }
0x1f91   :  { %8848 = vmatpush3.bf16.msra.mxu0 %v3791_v53 }
0x1f92   :  { %v3792_v55 = vpack.c.bf16 %v3790_v62, %v3789_v50 }
0x1f94   :  { %8849 = vmatprep.subr.bf16.mxu0 %v3792_v55 }
0x1f95   :  { %8850 = vmatpush3.bf16.msra.mxu0 %v3792_v55 }
0x1f97   :  { %3899 = vmatmul.mubr.bf16.gmra.mrb[56].mxu1 %v9283_v56 }
0x1f98   :  { %8852 = vmatmul.mubr.msk.bf16.vlgmr.msra.gmra.mrb[72].mxu0 %vm297_vm0, %v9285_v4 }
0x1f99   :  { %8863 = vmatprep.mubr.msk.f32.mxu0 %vm297_vm0, %v10715_v35 }
0x2062   :  { %v8331_v0 = vpop.f32.mrb[52].mxu1 }
0x2063   :  { %v8332_v20 = vpop.f32.mrb[53].mxu1 }
0x2064   :  { %v8333_v57 = vadd.f32 %v8332_v20, %v8331_v0  ;;  %v8334_v3 = vpop.f32.mrb[54].mxu1 }
0x2065   :  { %v8335_v24 = vpop.f32.mrb[55].mxu1 }
0x2066   :  { %v8336_v2 = vadd.f32 %v8335_v24, %v8334_v3  ;;  %v7817_v24 = vld [vmem:[%s12082_s4 + $0xb8] sm:$0xff] }
0x206a   :  { %v8337_v22 = vpop.f32.mrb[56].mxu1 }
0x206b   :  { %v8338_v45 = vpop.f32.mrb[57].mxu1  ;;  %v8853_v60 = vpop.f32.mrb[72].mxu0 }
0x206c   :  { %v8339_v13 = vadd.f32 %v8338_v45, %v8337_v22  ;;  %v8340_v7 = vpop.f32.mrb[58].mxu1  ;;  %v3941_v49 = vpop.f32.mrb[73].mxu0 }
0x206d   :  { %v3942_v29 = vadd.f32 %v8333_v57, %v3941_v49  ;;  %v8341_v1 = vpop.f32.mrb[59].mxu1  ;;  %v8854_v10 = vpop.f32.mrb[74].mxu0  ;;  %v7821_v49 = vld [vmem:[%s12081_s5 + $0xb8] sm:$0xff] }
0x206e   :  { %v3950_v8 = vadd.f32 %v8853_v60, %v8339_v13  ;;  %v8342_v12 = vadd.f32 %v8341_v1, %v8340_v7  ;;  %v3944_v16 = vpop.f32.mrb[75].mxu0  ;;  %v7820_v7 = vld [vmem:[%s12081_s5 + $0xb0] sm:$0xff] }
0x206f   :  { %v3945_v17 = vadd.f32 %v8336_v2, %v3944_v16  ;;  %3956 = vadd.xlane.f32.xlu0 %v3942_v29  ;;  %v7816_v2 = vld [vmem:[%s12082_s4 + $0xb0] sm:$0xff] }
0x2070   :  { %v3953_v11 = vadd.f32 %v8854_v10, %v8342_v12 }
0x2071   :  { %3958 = vadd.xlane.f32.xlu1 %v3945_v17 }
0x2073   :  { %3960 = vadd.xlane.f32.xlu0 %v3950_v8 }
0x2077   :  { %3962 = vadd.xlane.f32.xlu0 %v3953_v11 }
0x20fc   :  { %v3957_v21 = vpop.xlane.xlu0 %3956 }
0x20fe   :  { %v3959_v15 = vpop.xlane.xlu1 %3958 }
0x20ff   :  { %v9131_v63 = vpack.c.bf16 %v3959_v15, %v3957_v21 }
0x2100   :  { %v3961_v27 = vpop.xlane.xlu0 %3960 }
0x2101   :  { %9132 = vmatprep.subr.bf16.mxu0 %v9131_v63 }
0x2102   :  { %9134 = vmatpush3.bf16.msra.mxu0 %v9131_v63 }
0x2104   :  { %v3963_v28 = vpop.xlane.xlu0 %3962 }
0x2105   :  { %v9135_v30 = vpack.c.bf16 %v3963_v28, %v3961_v27 }
0x2107   :  { %9136 = vmatprep.subr.bf16.mxu0 %v9135_v30 }
0x2108   :  { %9138 = vmatpush3.bf16.msra.mxu0 %v9135_v30 }
0x210b   :  { %8864 = vmatmul.mubr.msk.f32.vlgmr.msra.gmra.mrb[76].mxu0 %vm297_vm0, %v10722_v58 }
0x210c   :  { %8866 = vmatprep.mubr.msk.f32.mxu0 %vm297_vm0, %v10729_v59 }
0x210f   :  { %8867 = vmatmul.mubr.msk.f32.gmra.mrb[78].mxu0 %vm297_vm0, %v10736_v9 }
0x2110   :  { %8877 = vmatprep.mubr.msk.f32.mxu0 %vm297_vm0, %v10715_v35 }
0x21de   :  { %v8865_v31 = vpop.f32.mrb[76].mxu0 }
0x21df   :  { %4056 = vperm.xlu0 %9220, %v8865_v31   ;;  %v4030_v23 = vpop.f32.mrb[77].mxu0 }
0x21e0   :  { %4051 = vperm.xlu1 %9221, %v4030_v23  }
0x21e2   :  { %v8868_v18 = vpop.f32.mrb[78].mxu0 }
0x21e3   :  { %v4040_v33 = vpop.f32.mrb[79].mxu0 }
0x21e4   :  { %4061 = vperm.xlu1 %9221, %v4040_v33  }
0x21e8   :  { %4066 = vperm.xlu1 %9221, %v8868_v18  }
0x225e   :  { %v4057_v34 = vpop.permute.xlu0 %4056 }
0x225f   :  { %v10930_v26 = vsub.f32 %v3945_v17, %v4057_v34  ;;  %v4052_v36 = vpop.permute.xlu1 %4051 }
0x2260   :  { %v10932_v40 = vsub.f32 %v3942_v29, %v4052_v36 }
0x2261   :  { %v4074_v38 = vmul.f32 %v10930_v26, %v10930_v26 }
0x2262   :  { %v4073_v35 = vmul.f32 %v10932_v40, %v10932_v40 }
0x2263   :  { %4079 = vadd.xlane.f32.xlu1 %v4074_v38  ;;  %v4062_v39 = vpop.permute.xlu1 %4061  ;;  %v9288_v38 = vld [vmem:[%s12078_s1 + $0x184] ss:$12 sps:$4 sm:$0xff]  }
0x2264   :  { %v10938_v37 = vsub.f32 %v3950_v8, %v4062_v39  ;;  %4077 = vadd.xlane.f32.xlu0 %v4073_v35  ;;  %4467 = vmatprep.mubr.bf16.mxu1 %v9288_v38  ;;  %v9292_v35 = vld [vmem:[%s12078_s1 + $0x188] ss:$12 sps:$4 sm:$0xff]  }
0x2265   :  { %v7839_v39 = vld [vmem:[%s12083_s6 + $0x48] sm:$0xff] }
0x2266   :  { %v4075_v42 = vmul.f32 %v10938_v37, %v10938_v37 }
0x2267   :  { %v4067_v6 = vpop.permute.xlu1 %4066 }
0x2268   :  { %v10942_v43 = vsub.f32 %v3953_v11, %v4067_v6  ;;  %4081 = vadd.xlane.f32.xlu0 %v4075_v42  ;;  %v7841_v42 = vld [vmem:[%s12083_s6 + $0x58] sm:$0xff]  ;;  %v7840_v6 = vld [vmem:[%s12083_s6 + $0x50] sm:$0xff] }
0x226a   :  { %v4076_v44 = vmul.f32 %v10942_v43, %v10942_v43 }
0x226c   :  { %4083 = vadd.xlane.f32.xlu0 %v4076_v44  ;;  %v11034_v44 = vld [vmem:[%s12079_s2] ss:$0 sm:$0xff] }
0x2274   :  { %4214 = vperm.xlu1 %9221, %v7818_v32  }
0x2278   :  { %4219 = vperm.xlu1 %9221, %v7819_v46  }
0x22f0   :  { %v4080_v48 = vpop.xlane.xlu1 %4079 }
0x22f1   :  { %v4078_v51 = vpop.xlane.xlu0 %4077 }
0x22f2   :  { %v9139_v41 = vpack.c.bf16 %v4080_v48, %v4078_v51 }
0x22f4   :  { %9140 = vmatprep.subr.bf16.mxu0 %v9139_v41  ;;  %v4215_v29 = vpop.permute.xlu1 %4214 }
0x22f5   :  { %v4082_v52 = vpop.xlane.xlu0 %4081  ;;  %9142 = vmatpush3.bf16.msra.mxu0 %v9139_v41 }
0x22f8   :  { %v4220_v1 = vpop.permute.xlu1 %4219 }
0x22f9   :  { %v4084_v61 = vpop.xlane.xlu0 %4083 }
0x22fa   :  { %v9143_v53 = vpack.c.bf16 %v4084_v61, %v4082_v52 }
0x22fc   :  { %9144 = vmatprep.subr.bf16.mxu0 %v9143_v53 }
0x22fd   :  { %9146 = vmatpush3.bf16.msra.mxu0 %v9143_v53 }
0x2300   :  { %8878 = vmatmul.mubr.msk.f32.vlgmr.msra.gmra.mrb[80].mxu0 %vm297_vm0, %v10722_v58  ;;  %v7815_v58 = vld [vmem:[%s12082_s4 + $0xa8] sm:$0xff] }
0x2301   :  { %8880 = vmatprep.mubr.msk.f32.mxu0 %vm297_vm0, %v10729_v59  ;;  %v7814_v59 = vld [vmem:[%s12082_s4 + $0xa0] sm:$0xff] }
0x2304   :  { %8881 = vmatmul.mubr.msk.f32.gmra.mrb[82].mxu0 %vm297_vm0, %v10736_v9 }
0x2305   :  { %8887 = vmatprep.mubr.msk.bf16.mxu0 %vm297_vm0, %v9292_v35  ;;  %v11077_v35 = vld [vmem:[%s12079_s2 + $0x7] ss:$0 sm:$0xff] }
0x23d3   :  { %v8879_v47 = vpop.f32.mrb[80].mxu0 }
0x23d4   :  { %v4157_v62 = vadd.f32 1e-05, %v8879_v47  ;;  %v4151_v54 = vpop.f32.mrb[81].mxu0 }
0x23d5   :  { %v4152_v50 = vadd.f32 1e-05, %v4151_v54 }
0x23d6   :  { %9382 = vrsqrt.f32 %v4157_v62 }
0x23d7   :  { %9384 = vrsqrt.f32 %v4152_v50  ;;  %v8882_v55 = vpop.f32.mrb[82].mxu0 }
0x23d8   :  { %v4167_v56 = vadd.f32 1e-05, %v8882_v55  ;;  %v4161_v4 = vpop.f32.mrb[83].mxu0 }
0x23d9   :  { %v4162_v0 = vadd.f32 1e-05, %v4161_v4 }
0x23da   :  { %9386 = vrsqrt.f32 %v4167_v56 }
0x23db   :  { %9388 = vrsqrt.f32 %v4162_v0 }
0x23e0   :  { %v9383_v9 = vpop.eup %9382 }
0x23e1   :  { %v9385_v20 = vpop.eup %9384  ;;  %v4180_v57 = vmul.f32 %v9383_v9, %v7815_v58 }
0x23e2   :  { %v4179_v3 = vmul.f32 %v9385_v20, %v7814_v59  ;;  %v11041_v59 = vld [vmem:[%s12079_s2 + $0x5] ss:$0 sm:$0xff] }
0x23e3   :  { %4190 = vperm.xlu0 %9220, %v4180_v57  }
0x23e4   :  { %v9387_v22 = vpop.eup %9386  ;;  %4185 = vperm.xlu1 %9221, %v4179_v3  }
0x23e5   :  { %v9389_v45 = vpop.eup %9388  ;;  %v4182_v60 = vmul.f32 %v9387_v22, %v7817_v24 }
0x23e6   :  { %v4181_v13 = vmul.f32 %v9389_v45, %v7816_v2  ;;  %v11050_v2 = vld [vmem:[%s12079_s2 + $0x1] ss:$0 sm:$0xff] }
0x23e8   :  { %4195 = vperm.xlu0 %9220, %v4181_v13   ;;  %4200 = vperm.xlu1 %9221, %v4182_v60  }
0x23ec   :  { %4224 = vperm.xlu0 %9220, %v7820_v7   ;;  %4229 = vperm.xlu1 %9221, %v7821_v49  }
0x2462   :  { %v4191_v10 = vpop.permute.xlu0 %4190 }
0x2463   :  { %v4204_v8 = vmul.f32 %v4191_v10, %v10930_v26  ;;  %v4186_v12 = vpop.permute.xlu1 %4185 }
0x2464   :  { %v4203_v16 = vmul.f32 %v4186_v12, %v10932_v40 }
0x2465   :  { %v4233_v17 = vadd.f32 %v4220_v1, %v4204_v8 }
0x2466   :  { %v4232_v11 = vadd.f32 %v4215_v29, %v4203_v16  ;;  %v11059_v16 = vld [vmem:[%s12079_s2 + $0x6] ss:$0 sm:$0xff] }
0x2467   :  { %v4237_v21 = vmax.f32 %v4233_v17, 0.0  ;;  %v4196_v15 = vpop.permute.xlu0 %4195  ;;  %v4201_v63 = vpop.permute.xlu1 %4200 }
0x2468   :  { %v4236_v27 = vmax.f32 %v4232_v11, 0.0  ;;  %v4205_v28 = vmul.f32 %v4196_v15, %v10938_v37  ;;  %v4206_v30 = vmul.f32 %v4201_v63, %v10942_v43  ;;  %v7838_v37 = vld [vmem:[%s12083_s6 + $0x40] sm:$0xff] }
0x2469   :  { %4242 = vrot.lane.b32.xlu1 %v4237_v21, %s9478_s19 }
0x246a   :  { %4240 = vrot.lane.b32.xlu0 %v4236_v27, %s9478_s19  ;;  %v4304_v31 = vpack.c.bf16 %v4237_v21, %v4236_v27 }
0x246b   :  { %v4225_v23 = vpop.permute.xlu0 %4224  ;;  %v4230_v18 = vpop.permute.xlu1 %4229 }
0x246c   :  { %v4234_v33 = vadd.f32 %v4225_v23, %v4205_v28  ;;  %v4235_v34 = vadd.f32 %v4230_v18, %v4206_v30  ;;  %8363 = vmatprep.subr.bf16.mxu1 %v4304_v31 }
0x246d   :  { %4310 = vrot.lane.b32.xlu1 %v4237_v21, %s9479_s22 }
0x246e   :  { %v4238_v26 = vmax.f32 %v4234_v33, 0.0  ;;  %v4239_v36 = vmax.f32 %v4235_v34, 0.0  ;;  %4308 = vrot.lane.b32.xlu0 %v4236_v27, %s9479_s22 }
0x2470   :  { %v4305_v40 = vpack.c.bf16 %v4239_v36, %v4238_v26 }
0x2471   :  { %4258 = vrot.lane.b32.xlu1 %v4237_v21, %s9480_s23 }
0x2472   :  { %4256 = vrot.lane.b32.xlu0 %v4236_v27, %s9480_s23 }
0x2475   :  { %4326 = vrot.lane.b32.xlu1 %v4237_v21, %s9481_s0 }
0x2476   :  { %4324 = vrot.lane.b32.xlu0 %v4236_v27, %s9481_s0 }
0x2479   :  { %4274 = vrot.lane.b32.xlu1 %v4237_v21, %s9482_s24 }
0x247a   :  { %4272 = vrot.lane.b32.xlu0 %v4236_v27, %s9482_s24 }
0x247d   :  { %4342 = vrot.lane.b32.xlu1 %v4237_v21, %s9483_s25 }
0x247e   :  { %4340 = vrot.lane.b32.xlu0 %v4236_v27, %s9483_s25 }
0x2481   :  { %4290 = vrot.lane.b32.xlu1 %v4237_v21, %s9484_s26 }
0x2482   :  { %4288 = vrot.lane.b32.xlu0 %v4236_v27, %s9484_s26 }
0x2485   :  { %4246 = vrot.lane.b32.xlu1 %v4239_v36, %s9478_s19 }
0x2486   :  { %4244 = vrot.lane.b32.xlu0 %v4238_v26, %s9478_s19 }
0x2489   :  { %4314 = vrot.lane.b32.xlu1 %v4239_v36, %s9479_s22 }
0x248a   :  { %4312 = vrot.lane.b32.xlu0 %v4238_v26, %s9479_s22 }
0x248d   :  { %4262 = vrot.lane.b32.xlu1 %v4239_v36, %s9480_s23 }
0x248e   :  { %4260 = vrot.lane.b32.xlu0 %v4238_v26, %s9480_s23 }
0x2491   :  { %4330 = vrot.lane.b32.xlu1 %v4239_v36, %s9481_s0 }
0x2492   :  { %4328 = vrot.lane.b32.xlu0 %v4238_v26, %s9481_s0 }
0x2495   :  { %4278 = vrot.lane.b32.xlu1 %v4239_v36, %s9482_s24 }
0x2496   :  { %4276 = vrot.lane.b32.xlu0 %v4238_v26, %s9482_s24 }
0x2499   :  { %4346 = vrot.lane.b32.xlu1 %v4239_v36, %s9483_s25 }
0x249a   :  { %4344 = vrot.lane.b32.xlu0 %v4238_v26, %s9483_s25 }
0x249d   :  { %4294 = vrot.lane.b32.xlu1 %v4239_v36, %s9484_s26 }
0x249e   :  { %4292 = vrot.lane.b32.xlu0 %v4238_v26, %s9484_s26 }
0x24a1   :  { %4358 = vrot.lane.b32.xlu1 %v4237_v21, %s9485_s11 }
0x24a2   :  { %4356 = vrot.lane.b32.xlu0 %v4236_v27, %s9485_s11  ;;  %v11068_v27 = vld [vmem:[%s12079_s2 + $0x2] ss:$0 sm:$0xff] }
0x24a5   :  { %4362 = vrot.lane.b32.xlu1 %v4239_v36, %s9485_s11 }
0x24a6   :  { %4360 = vrot.lane.b32.xlu0 %v4238_v26, %s9485_s11 }
0x24a9   :  { %4549 = vperm.xlu1 %9221, %v7839_v39  }
0x24aa   :  { %4544 = vperm.xlu0 %9220, %v7838_v37  }
0x24ad   :  { %4559 = vperm.xlu1 %9221, %v7841_v42  }
0x24ae   :  { %4554 = vperm.xlu0 %9220, %v7840_v6  }
0x24db   :  { %v4243_v43 = vpop.permute.xlu1 %4242 }
0x24dc   :  { %v4249_v32 = vmul.f32 %v11034_v44, %v4243_v43  ;;  %v4241_v46 = vpop.permute.xlu0 %4240 }
0x24dd   :  { %v4248_v48 = vmul.f32 %v11034_v44, %v4241_v46 }
0x24df   :  { %v4252_v51 = vpack.c.bf16 %v4249_v32, %v4248_v48  ;;  %v4311_v41 = vpop.permute.xlu1 %4310  ;;  %v11086_v32 = vld [vmem:[%s12079_s2 + $0x3] ss:$0 sm:$0xff] }
0x24e0   :  { %v4309_v52 = vpop.permute.xlu0 %4308  ;;  %v4317_v9 = vmul.f32 %v11041_v59, %v4311_v41 }
0x24e1   :  { %8364 = vmatpush3.bf16.msra.mxu1 %v4252_v51  ;;  %v4316_v20 = vmul.f32 %v11041_v59, %v4309_v52 }
0x24e2   :  { %8365 = vmatprep.subr.bf16.mxu1 %v4305_v40 }
0x24e3   :  { %v4259_v61 = vpop.permute.xlu1 %4258  ;;  %v4320_v7 = vpack.c.bf16 %v4317_v9, %v4316_v20  ;;  %v11097_v9 = vld [vmem:[%s12079_s2 + $0x8] ss:$0 sm:$0xff] }
0x24e4   :  { %v4257_v53 = vpop.permute.xlu0 %4256  ;;  %v4265_v22 = vmul.f32 %v11050_v2, %v4259_v61 }
0x24e5   :  { %v4264_v45 = vmul.f32 %v11050_v2, %v4257_v53 }
0x24e7   :  { %v4327_v47 = vpop.permute.xlu1 %4326  ;;  %v4268_v10 = vpack.c.bf16 %v4265_v22, %v4264_v45  ;;  %v9289_v22 = vld [vmem:[%s12078_s1 + $0x19c] ss:$12 sps:$4 sm:$0xff]  }
0x24e8   :  { %v4325_v62 = vpop.permute.xlu0 %4324  ;;  %v4333_v17 = vmul.f32 %v11059_v16, %v4327_v47 }
0x24e9   :  { %v4332_v11 = vmul.f32 %v11059_v16, %v4325_v62 }
0x24eb   :  { %v4275_v54 = vpop.permute.xlu1 %4274  ;;  %v4336_v18 = vpack.c.bf16 %v4333_v17, %v4332_v11 }
0x24ec   :  { %v4273_v50 = vpop.permute.xlu0 %4272  ;;  %v4281_v28 = vmul.f32 %v11068_v27, %v4275_v54 }
0x24ed   :  { %v4280_v30 = vmul.f32 %v11068_v27, %v4273_v50 }
0x24ef   :  { %v4343_v55 = vpop.permute.xlu1 %4342  ;;  %v4284_v36 = vpack.c.bf16 %v4281_v28, %v4280_v30 }
0x24f0   :  { %v4341_v56 = vpop.permute.xlu0 %4340  ;;  %v4349_v39 = vmul.f32 %v11077_v35, %v4343_v55 }
0x24f1   :  { %v4348_v37 = vmul.f32 %v11077_v35, %v4341_v56 }
0x24f3   :  { %v4291_v4 = vpop.permute.xlu1 %4290  ;;  %v4352_v52 = vpack.c.bf16 %v4349_v39, %v4348_v37 }
0x24f4   :  { %v4289_v0 = vpop.permute.xlu0 %4288  ;;  %v4297_v46 = vmul.f32 %v11086_v32, %v4291_v4 }
0x24f5   :  { %v4296_v48 = vmul.f32 %v11086_v32, %v4289_v0 }
0x24f7   :  { %v4247_v58 = vpop.permute.xlu1 %4246  ;;  %v4300_v62 = vpack.c.bf16 %v4297_v46, %v4296_v48 }
0x24f8   :  { %v4251_v57 = vmul.f32 %v11034_v44, %v4247_v58  ;;  %v4245_v3 = vpop.permute.xlu0 %4244 }
0x24f9   :  { %v4250_v24 = vmul.f32 %v11034_v44, %v4245_v3  ;;  %v9286_v3 = vld [vmem:[%s12078_s1 + $0x180] ss:$12 sps:$4 sm:$0xff]  }
0x24fb   :  { %v4253_v60 = vpack.c.bf16 %v4251_v57, %v4250_v24  ;;  %v4315_v13 = vpop.permute.xlu1 %4314 }
0x24fc   :  { %v4319_v49 = vmul.f32 %v11041_v59, %v4315_v13  ;;  %v4313_v29 = vpop.permute.xlu0 %4312 }
0x24fd   :  { %v4318_v1 = vmul.f32 %v11041_v59, %v4313_v29  ;;  %8366 = vmatpush3.bf16.msra.mxu1 %v4253_v60 }
0x24fe   :  { %8367 = vmatprep.subr.bf16.mxu1 %v4320_v7 }
0x24ff   :  { %v4321_v8 = vpack.c.bf16 %v4319_v49, %v4318_v1  ;;  %v4263_v12 = vpop.permute.xlu1 %4262  ;;  %v9291_v1 = vld [vmem:[%s12078_s1 + $0x198] ss:$12 sps:$4 sm:$0xff]  }
0x2500   :  { %v4267_v21 = vmul.f32 %v11050_v2, %v4263_v12  ;;  %v4261_v15 = vpop.permute.xlu0 %4260 }
0x2501   :  { %v4266_v63 = vmul.f32 %v11050_v2, %v4261_v15  ;;  %8368 = vmatpush3.bf16.msra.mxu1 %v4268_v10  ;;  %v9293_v10 = vld [vmem:[%s12078_s1 + $0x1a0] ss:$12 sps:$4 sm:$0xff]  }
0x2502   :  { %8369 = vmatprep.subr.bf16.mxu1 %v4321_v8 }
0x2503   :  { %v4269_v31 = vpack.c.bf16 %v4267_v21, %v4266_v63  ;;  %v4331_v23 = vpop.permute.xlu1 %4330 }
0x2504   :  { %v4335_v33 = vmul.f32 %v11059_v16, %v4331_v23  ;;  %v4329_v34 = vpop.permute.xlu0 %4328 }
0x2505   :  { %v4334_v26 = vmul.f32 %v11059_v16, %v4329_v34  ;;  %8370 = vmatpush3.bf16.msra.mxu1 %v4269_v31 }
0x2506   :  { %8371 = vmatprep.subr.bf16.mxu1 %v4336_v18 }
0x2507   :  { %v4337_v40 = vpack.c.bf16 %v4335_v33, %v4334_v26  ;;  %v4279_v38 = vpop.permute.xlu1 %4278 }
0x2508   :  { %v4283_v42 = vmul.f32 %v11068_v27, %v4279_v38  ;;  %v4277_v6 = vpop.permute.xlu0 %4276 }
0x2509   :  { %v4282_v43 = vmul.f32 %v11068_v27, %v4277_v6  ;;  %8372 = vmatpush3.bf16.msra.mxu1 %v4284_v36 }
0x250a   :  { %8373 = vmatprep.subr.bf16.mxu1 %v4337_v40 }
0x250b   :  { %v4285_v51 = vpack.c.bf16 %v4283_v42, %v4282_v43  ;;  %v4347_v41 = vpop.permute.xlu1 %4346 }
0x250c   :  { %v4351_v61 = vmul.f32 %v11077_v35, %v4347_v41  ;;  %v4345_v53 = vpop.permute.xlu0 %4344 }
0x250d   :  { %v4350_v47 = vmul.f32 %v11077_v35, %v4345_v53  ;;  %8374 = vmatpush3.bf16.msra.mxu1 %v4285_v51 }
0x250e   :  { %8375 = vmatprep.subr.bf16.mxu1 %v4352_v52 }
0x250f   :  { %v4353_v54 = vpack.c.bf16 %v4351_v61, %v4350_v47  ;;  %v4295_v50 = vpop.permute.xlu1 %4294 }
0x2510   :  { %v4299_v55 = vmul.f32 %v11086_v32, %v4295_v50  ;;  %v4293_v56 = vpop.permute.xlu0 %4292 }
0x2511   :  { %v4298_v4 = vmul.f32 %v11086_v32, %v4293_v56  ;;  %8376 = vmatpush3.bf16.msra.mxu1 %v4300_v62 }
0x2512   :  { %8377 = vmatprep.subr.bf16.mxu1 %v4353_v54 }
0x2513   :  { %v4301_v0 = vpack.c.bf16 %v4299_v55, %v4298_v4  ;;  %v4359_v58 = vpop.permute.xlu1 %4358 }
0x2514   :  { %v4365_v20 = vmul.f32 %v11097_v9, %v4359_v58  ;;  %v4357_v57 = vpop.permute.xlu0 %4356 }
0x2515   :  { %v4364_v24 = vmul.f32 %v11097_v9, %v4357_v57  ;;  %8378 = vmatpush3.bf16.msra.mxu1 %v4301_v0 }
0x2517   :  { %v4368_v45 = vpack.c.bf16 %v4365_v20, %v4364_v24  ;;  %v4363_v60 = vpop.permute.xlu1 %4362 }
0x2518   :  { %v4367_v13 = vmul.f32 %v11097_v9, %v4363_v60  ;;  %v4361_v7 = vpop.permute.xlu0 %4360  ;;  %4468 = vmatmul.mubr.bf16.vlgmr.msra.gmra.mrb[60].mxu1 %v9286_v3 }
0x2519   :  { %v4366_v49 = vmul.f32 %v11097_v9, %v4361_v7  ;;  %8883 = vmatprep.subr.bf16.mxu0 %v4368_v45  ;;  %4475 = vmatprep.mubr.bf16.mxu1 %v9289_v22 }
0x251a   :  { %8884 = vmatpush3.bf16.msra.mxu0 %v4368_v45 }
0x251b   :  { %v4369_v29 = vpack.c.bf16 %v4367_v13, %v4366_v49 }
0x251d   :  { %8885 = vmatprep.subr.bf16.mxu0 %v4369_v29 }
0x251e   :  { %8886 = vmatpush3.bf16.msra.mxu0 %v4369_v29 }
0x2520   :  { %4476 = vmatmul.mubr.bf16.gmra.mrb[64].mxu1 %v9291_v1 }
0x2521   :  { %8888 = vmatmul.mubr.msk.bf16.vlgmr.msra.gmra.mrb[84].mxu0 %vm297_vm0, %v9293_v10 }
0x2528   :  { %v4550_v63 = vpop.permute.xlu1 %4549 }
0x2529   :  { %v4545_v28 = vpop.permute.xlu0 %4544 }
0x252c   :  { %v4560_v53 = vpop.permute.xlu1 %4559 }
0x252d   :  { %v4555_v48 = vpop.permute.xlu0 %4554 }
0x25eb   :  { %v8379_v8 = vpop.f32.mrb[60].mxu1 }
0x25ec   :  { %v8380_v12 = vpop.f32.mrb[61].mxu1 }
0x25ed   :  { %v8381_v17 = vadd.f32 %v8380_v12, %v8379_v8  ;;  %v8382_v11 = vpop.f32.mrb[62].mxu1 }
0x25ee   :  { %v8383_v21 = vpop.f32.mrb[63].mxu1 }
0x25ef   :  { %v8384_v15 = vadd.f32 %v8383_v21, %v8382_v11 }
0x25f3   :  { %v8385_v30 = vpop.f32.mrb[64].mxu1 }
0x25f4   :  { %v8386_v31 = vpop.f32.mrb[65].mxu1  ;;  %v8889_v23 = vpop.f32.mrb[84].mxu0 }
0x25f5   :  { %v8387_v18 = vadd.f32 %v8386_v31, %v8385_v30  ;;  %v8388_v33 = vpop.f32.mrb[66].mxu1  ;;  %v4518_v34 = vpop.f32.mrb[85].mxu0 }
0x25f6   :  { %v4519_v26 = vadd.f32 %v8381_v17, %v4518_v34  ;;  %v8389_v36 = vpop.f32.mrb[67].mxu1  ;;  %v8890_v40 = vpop.f32.mrb[86].mxu0 }
0x25f7   :  { %v4527_v38 = vadd.f32 %v8889_v23, %v8387_v18  ;;  %v8390_v39 = vadd.f32 %v8389_v36, %v8388_v33  ;;  %v4521_v37 = vpop.f32.mrb[87].mxu0 }
0x25f8   :  { %v4533_v42 = vadd.f32 %v4519_v26, %v10792_v25  ;;  %v4522_v6 = vadd.f32 %v8384_v15, %v4521_v37 }
0x25f9   :  { %v4535_v43 = vadd.f32 %v4527_v38, %v10828_v19  ;;  %v4530_v46 = vadd.f32 %v8890_v40, %v8390_v39 }
0x25fa   :  { %v4562_v51 = vadd.f32 %v4545_v28, %v4533_v42  ;;  %v4534_v41 = vadd.f32 %v4522_v6, %v10790_v14  ;;  %v9296_v14 = vld [vmem:[%s12078_s1 + $0x1b4] ss:$12 sps:$4 sm:$0xff]  }
0x25fb   :  { %v4564_v52 = vadd.f32 %v4555_v48, %v4535_v43  ;;  %v4536_v61 = vadd.f32 %v4530_v46, %v10826_v5  ;;  %4797 = vmatprep.mubr.bf16.mxu0 %v9296_v14  ;;  %v9300_v5 = vld [vmem:[%s12078_s1 + $0x1b8] ss:$12 sps:$4 sm:$0xff]  }
0x25fc   :  { %v4566_v47 = vmax.f32 %v4562_v51, 0.0  ;;  %v4563_v62 = vadd.f32 %v4550_v63, %v4534_v41  ;;  %8895 = vmatprep.mubr.msk.bf16.mxu1 %vm297_vm0, %v9300_v5 }
0x25fd   :  { %v4565_v54 = vadd.f32 %v4560_v53, %v4536_v61  ;;  %v4568_v55 = vmax.f32 %v4564_v52, 0.0 }
0x25fe   :  { %v4567_v50 = vmax.f32 %v4563_v62, 0.0  ;;  %4570 = vrot.lane.b32.xlu0 %v4566_v47, %s9478_s19 }
0x25ff   :  { %v4569_v25 = vmax.f32 %v4565_v54, 0.0 }
0x2600   :  { %4572 = vrot.lane.b32.xlu1 %v4567_v50, %s9478_s19  ;;  %v4634_v19 = vpack.c.bf16 %v4567_v50, %v4566_v47 }
0x2601   :  { %v4635_v56 = vpack.c.bf16 %v4569_v25, %v4568_v55 }
0x2602   :  { %4638 = vrot.lane.b32.xlu0 %v4566_v47, %s9479_s22  ;;  %8395 = vmatprep.subr.bf16.mxu0 %v4634_v19 }
0x2604   :  { %4640 = vrot.lane.b32.xlu1 %v4567_v50, %s9479_s22 }
0x2606   :  { %4586 = vrot.lane.b32.xlu0 %v4566_v47, %s9480_s23 }
0x2608   :  { %4588 = vrot.lane.b32.xlu1 %v4567_v50, %s9480_s23 }
0x260a   :  { %4654 = vrot.lane.b32.xlu0 %v4566_v47, %s9481_s0 }
0x260c   :  { %4656 = vrot.lane.b32.xlu1 %v4567_v50, %s9481_s0 }
0x260e   :  { %4602 = vrot.lane.b32.xlu0 %v4566_v47, %s9482_s24 }
0x2610   :  { %4604 = vrot.lane.b32.xlu1 %v4567_v50, %s9482_s24 }
0x2612   :  { %4670 = vrot.lane.b32.xlu0 %v4566_v47, %s9483_s25 }
0x2614   :  { %4672 = vrot.lane.b32.xlu1 %v4567_v50, %s9483_s25 }
0x2616   :  { %4618 = vrot.lane.b32.xlu0 %v4566_v47, %s9484_s26 }
0x2618   :  { %4620 = vrot.lane.b32.xlu1 %v4567_v50, %s9484_s26 }
0x261a   :  { %4574 = vrot.lane.b32.xlu0 %v4568_v55, %s9478_s19 }
0x261c   :  { %4576 = vrot.lane.b32.xlu1 %v4569_v25, %s9478_s19 }
0x261e   :  { %4642 = vrot.lane.b32.xlu0 %v4568_v55, %s9479_s22 }
0x2620   :  { %4644 = vrot.lane.b32.xlu1 %v4569_v25, %s9479_s22 }
0x2622   :  { %4590 = vrot.lane.b32.xlu0 %v4568_v55, %s9480_s23 }
0x2624   :  { %4592 = vrot.lane.b32.xlu1 %v4569_v25, %s9480_s23 }
0x2626   :  { %4658 = vrot.lane.b32.xlu0 %v4568_v55, %s9481_s0 }
0x2628   :  { %4660 = vrot.lane.b32.xlu1 %v4569_v25, %s9481_s0 }
0x262a   :  { %4606 = vrot.lane.b32.xlu0 %v4568_v55, %s9482_s24 }
0x262c   :  { %4608 = vrot.lane.b32.xlu1 %v4569_v25, %s9482_s24 }
0x262e   :  { %4674 = vrot.lane.b32.xlu0 %v4568_v55, %s9483_s25 }
0x2630   :  { %4676 = vrot.lane.b32.xlu1 %v4569_v25, %s9483_s25 }
0x2632   :  { %4622 = vrot.lane.b32.xlu0 %v4568_v55, %s9484_s26 }
0x2634   :  { %4624 = vrot.lane.b32.xlu1 %v4569_v25, %s9484_s26 }
0x2636   :  { %4686 = vrot.lane.b32.xlu0 %v4566_v47, %s9485_s11 }
0x2638   :  { %4688 = vrot.lane.b32.xlu1 %v4567_v50, %s9485_s11 }
0x263a   :  { %4690 = vrot.lane.b32.xlu0 %v4568_v55, %s9485_s11 }
0x263c   :  { %4692 = vrot.lane.b32.xlu1 %v4569_v25, %s9485_s11 }
0x2670   :  { %v4571_v4 = vpop.permute.xlu0 %4570 }
0x2671   :  { %v4578_v58 = vmul.f32 %v11034_v44, %v4571_v4 }
0x2672   :  { %v4573_v0 = vpop.permute.xlu1 %4572 }
0x2673   :  { %v4579_v20 = vmul.f32 %v11034_v44, %v4573_v0 }
0x2674   :  { %v4639_v57 = vpop.permute.xlu0 %4638 }
0x2675   :  { %v4582_v3 = vpack.c.bf16 %v4579_v20, %v4578_v58  ;;  %v4646_v63 = vmul.f32 %v11041_v59, %v4639_v57 }
0x2676   :  { %v4641_v24 = vpop.permute.xlu1 %4640 }
0x2677   :  { %8396 = vmatpush3.bf16.msra.mxu0 %v4582_v3  ;;  %v4647_v17 = vmul.f32 %v11041_v59, %v4641_v24 }
0x2678   :  { %v4587_v22 = vpop.permute.xlu0 %4586  ;;  %8397 = vmatprep.subr.bf16.mxu0 %v4635_v56 }
0x2679   :  { %v4650_v23 = vpack.c.bf16 %v4647_v17, %v4646_v63  ;;  %v4594_v33 = vmul.f32 %v11050_v2, %v4587_v22 }
0x267a   :  { %v4589_v45 = vpop.permute.xlu1 %4588 }
0x267b   :  { %v4595_v30 = vmul.f32 %v11050_v2, %v4589_v45 }
0x267c   :  { %v4655_v60 = vpop.permute.xlu0 %4654 }
0x267d   :  { %v4598_v40 = vpack.c.bf16 %v4595_v30, %v4594_v33  ;;  %v4662_v43 = vmul.f32 %v11059_v16, %v4655_v60  ;;  %v11207_v33 = vld [vmem:[%s12080_s3] sm:$0xff] }
0x267e   :  { %v4657_v13 = vpop.permute.xlu1 %4656 }
0x267f   :  { %v4663_v39 = vmul.f32 %v11059_v16, %v4657_v13 }
0x2680   :  { %v4603_v7 = vpop.permute.xlu0 %4602 }
0x2681   :  { %v4666_v41 = vpack.c.bf16 %v4663_v39, %v4662_v43  ;;  %v4610_v61 = vmul.f32 %v11068_v27, %v4603_v7 }
0x2682   :  { %v4605_v49 = vpop.permute.xlu1 %4604 }
0x2683   :  { %v4611_v48 = vmul.f32 %v11068_v27, %v4605_v49 }
0x2684   :  { %v4671_v29 = vpop.permute.xlu0 %4670 }
0x2685   :  { %v4614_v54 = vpack.c.bf16 %v4611_v48, %v4610_v61  ;;  %v4678_v14 = vmul.f32 %v11077_v35, %v4671_v29 }
0x2686   :  { %v4673_v1 = vpop.permute.xlu1 %4672 }
0x2687   :  { %v4679_v55 = vmul.f32 %v11077_v35, %v4673_v1 }
0x2688   :  { %v4619_v10 = vpop.permute.xlu0 %4618 }
0x2689   :  { %v4682_v58 = vpack.c.bf16 %v4679_v55, %v4678_v14  ;;  %v4626_v57 = vmul.f32 %v11086_v32, %v4619_v10  ;;  %v9294_v10 = vld [vmem:[%s12078_s1 + $0x1b0] ss:$12 sps:$4 sm:$0xff]  }
0x268a   :  { %v4621_v8 = vpop.permute.xlu1 %4620 }
0x268b   :  { %v4627_v4 = vmul.f32 %v11086_v32, %v4621_v8 }
0x268c   :  { %v4575_v12 = vpop.permute.xlu0 %4574 }
0x268d   :  { %v4580_v21 = vmul.f32 %v11034_v44, %v4575_v12  ;;  %v4630_v45 = vpack.c.bf16 %v4627_v4, %v4626_v57  ;;  %v11223_v4 = vld [vmem:[%s12080_s3 + $0x10] sm:$0xff] }
0x268e   :  { %v4577_v11 = vpop.permute.xlu1 %4576 }
0x268f   :  { %v4581_v15 = vmul.f32 %v11034_v44, %v4577_v11  ;;  %v9297_v11 = vld [vmem:[%s12078_s1 + $0x1cc] ss:$12 sps:$4 sm:$0xff]  }
0x2690   :  { %v4643_v28 = vpop.permute.xlu0 %4642 }
0x2691   :  { %v4583_v31 = vpack.c.bf16 %v4581_v15, %v4580_v21  ;;  %v4648_v34 = vmul.f32 %v11041_v59, %v4643_v28 }
0x2692   :  { %v4645_v18 = vpop.permute.xlu1 %4644 }
0x2693   :  { %v4649_v26 = vmul.f32 %v11041_v59, %v4645_v18  ;;  %8398 = vmatpush3.bf16.msra.mxu0 %v4583_v31  ;;  %v9301_v18 = vld [vmem:[%s12078_s1 + $0x1d0] ss:$12 sps:$4 sm:$0xff]  }
0x2694   :  { %v4591_v36 = vpop.permute.xlu0 %4590  ;;  %8399 = vmatprep.subr.bf16.mxu0 %v4650_v23  ;;  %v9299_v23 = vld [vmem:[%s12078_s1 + $0x1c8] ss:$12 sps:$4 sm:$0xff]  }
0x2695   :  { %v4651_v38 = vpack.c.bf16 %v4649_v26, %v4648_v34  ;;  %v4596_v42 = vmul.f32 %v11050_v2, %v4591_v36 }
0x2696   :  { %v4593_v37 = vpop.permute.xlu1 %4592 }
0x2697   :  { %v4597_v6 = vmul.f32 %v11050_v2, %v4593_v37  ;;  %8400 = vmatpush3.bf16.msra.mxu0 %v4598_v40 }
0x2698   :  { %v4659_v46 = vpop.permute.xlu0 %4658  ;;  %8401 = vmatprep.subr.bf16.mxu0 %v4651_v38 }
0x2699   :  { %v4599_v51 = vpack.c.bf16 %v4597_v6, %v4596_v42  ;;  %v4664_v53 = vmul.f32 %v11059_v16, %v4659_v46 }
0x269a   :  { %v4661_v52 = vpop.permute.xlu1 %4660 }
0x269b   :  { %v4665_v47 = vmul.f32 %v11059_v16, %v4661_v52  ;;  %8402 = vmatpush3.bf16.msra.mxu0 %v4599_v51 }
0x269c   :  { %v4607_v62 = vpop.permute.xlu0 %4606  ;;  %8403 = vmatprep.subr.bf16.mxu0 %v4666_v41 }
0x269d   :  { %v4667_v50 = vpack.c.bf16 %v4665_v47, %v4664_v53  ;;  %v4612_v19 = vmul.f32 %v11068_v27, %v4607_v62 }
0x269e   :  { %v4609_v25 = vpop.permute.xlu1 %4608 }
0x269f   :  { %v4613_v56 = vmul.f32 %v11068_v27, %v4609_v25  ;;  %8404 = vmatpush3.bf16.msra.mxu0 %v4614_v54 }
0x26a0   :  { %v4675_v5 = vpop.permute.xlu0 %4674  ;;  %8405 = vmatprep.subr.bf16.mxu0 %v4667_v50 }
0x26a1   :  { %v4615_v0 = vpack.c.bf16 %v4613_v56, %v4612_v19  ;;  %v4680_v3 = vmul.f32 %v11077_v35, %v4675_v5  ;;  %v11216_v5 = vld [vmem:[%s12080_s3 + $0x8] sm:$0xff] }
0x26a2   :  { %v4677_v20 = vpop.permute.xlu1 %4676 }
0x26a3   :  { %v4681_v24 = vmul.f32 %v11077_v35, %v4677_v20  ;;  %8406 = vmatpush3.bf16.msra.mxu0 %v4615_v0  ;;  %v11230_v0 = vld [vmem:[%s12080_s3 + $0x18] sm:$0xff] }
0x26a4   :  { %v4623_v22 = vpop.permute.xlu0 %4622  ;;  %8407 = vmatprep.subr.bf16.mxu0 %v4682_v58 }
0x26a5   :  { %v4683_v60 = vpack.c.bf16 %v4681_v24, %v4680_v3  ;;  %v4628_v7 = vmul.f32 %v11086_v32, %v4623_v22 }
0x26a6   :  { %v4625_v13 = vpop.permute.xlu1 %4624 }
0x26a7   :  { %v4629_v49 = vmul.f32 %v11086_v32, %v4625_v13  ;;  %8408 = vmatpush3.bf16.msra.mxu0 %v4630_v45 }
0x26a8   :  { %v4687_v29 = vpop.permute.xlu0 %4686  ;;  %8409 = vmatprep.subr.bf16.mxu0 %v4683_v60 }
0x26a9   :  { %v4631_v1 = vpack.c.bf16 %v4629_v49, %v4628_v7  ;;  %v4694_v12 = vmul.f32 %v11097_v9, %v4687_v29 }
0x26aa   :  { %v4689_v8 = vpop.permute.xlu1 %4688 }
0x26ab   :  { %v4695_v17 = vmul.f32 %v11097_v9, %v4689_v8  ;;  %8410 = vmatpush3.bf16.msra.mxu0 %v4631_v1 }
0x26ac   :  { %v4691_v21 = vpop.permute.xlu0 %4690 }
0x26ad   :  { %v4698_v15 = vpack.c.bf16 %v4695_v17, %v4694_v12  ;;  %v4696_v28 = vmul.f32 %v11097_v9, %v4691_v21  ;;  %v7870_v17 = vld [vmem:[%s12081_s5 + $0xc0] sm:$0xff] }
0x26ae   :  { %4798 = vmatmul.mubr.bf16.vlgmr.msra.gmra.mrb[88].mxu0 %v9294_v10  ;;  %v4693_v63 = vpop.permute.xlu1 %4692 }
0x26af   :  { %v4697_v30 = vmul.f32 %v11097_v9, %v4693_v63  ;;  %8891 = vmatprep.subr.bf16.mxu1 %v4698_v15  ;;  %4805 = vmatprep.mubr.bf16.mxu0 %v9297_v11  ;;  %v7871_v11 = vld [vmem:[%s12081_s5 + $0xc8] sm:$0xff] }
0x26b0   :  { %8892 = vmatpush3.bf16.msra.mxu1 %v4698_v15 }
0x26b1   :  { %v4699_v31 = vpack.c.bf16 %v4697_v30, %v4696_v28 }
0x26b3   :  { %8893 = vmatprep.subr.bf16.mxu1 %v4699_v31 }
0x26b4   :  { %8894 = vmatpush3.bf16.msra.mxu1 %v4699_v31 }
0x26b6   :  { %4806 = vmatmul.mubr.bf16.gmra.mrb[92].mxu0 %v9299_v23 }
0x26b7   :  { %8896 = vmatmul.mubr.msk.bf16.vlgmr.msra.gmra.mrb[68].mxu1 %vm297_vm0, %v9301_v18  ;;  %8921 = vmatprep.mubr.msk.f32.mxu0 %vm297_vm0, %v11207_v33 }
0x26b8   :  { %8907 = vmatprep.mubr.msk.f32.mxu1 %vm297_vm0, %v11207_v33 }
0x2781   :  { %v8411_v34 = vpop.f32.mrb[88].mxu0 }
0x2782   :  { %v8412_v26 = vpop.f32.mrb[89].mxu0 }
0x2783   :  { %v8413_v36 = vadd.f32 %v8412_v26, %v8411_v34  ;;  %v8414_v40 = vpop.f32.mrb[90].mxu0 }
0x2784   :  { %v8415_v38 = vpop.f32.mrb[91].mxu0 }
0x2785   :  { %v8416_v39 = vadd.f32 %v8415_v38, %v8414_v40 }
0x2789   :  { %v8417_v37 = vpop.f32.mrb[92].mxu0 }
0x278a   :  { %v8418_v42 = vpop.f32.mrb[93].mxu0  ;;  %v8897_v6 = vpop.f32.mrb[68].mxu1 }
0x278b   :  { %v8419_v43 = vadd.f32 %v8418_v42, %v8417_v37  ;;  %v8420_v46 = vpop.f32.mrb[94].mxu0  ;;  %v4848_v48 = vpop.f32.mrb[69].mxu1  ;;  %v7867_v37 = vld [vmem:[%s12082_s4 + $0xc8] sm:$0xff]  ;;  %v7866_v42 = vld [vmem:[%s12082_s4 + $0xc0] sm:$0xff] }
0x278c   :  { %v4849_v51 = vadd.f32 %v8413_v36, %v4848_v48  ;;  %v8421_v41 = vpop.f32.mrb[95].mxu0  ;;  %v8898_v52 = vpop.f32.mrb[70].mxu1 }
0x278d   :  { %v4857_v61 = vadd.f32 %v8897_v6, %v8419_v43  ;;  %v8422_v53 = vadd.f32 %v8421_v41, %v8420_v46  ;;  %v4851_v47 = vpop.f32.mrb[71].mxu1  ;;  %v7868_v41 = vld [vmem:[%s12082_s4 + $0xd0] sm:$0xff] }
0x278e   :  { %v4852_v62 = vadd.f32 %v8416_v39, %v4851_v47  ;;  %4863 = vadd.xlane.f32.xlu0 %v4849_v51 }
0x278f   :  { %v4860_v54 = vadd.f32 %v8898_v52, %v8422_v53 }
0x2790   :  { %4865 = vadd.xlane.f32.xlu1 %v4852_v62 }
0x2792   :  { %4867 = vadd.xlane.f32.xlu0 %v4857_v61 }
0x2796   :  { %4869 = vadd.xlane.f32.xlu0 %v4860_v54 }
0x281b   :  { %v4864_v50 = vpop.xlane.xlu0 %4863 }
0x281d   :  { %v4866_v55 = vpop.xlane.xlu1 %4865 }
0x281e   :  { %v9147_v25 = vpack.c.bf16 %v4866_v55, %v4864_v50 }
0x281f   :  { %v4868_v19 = vpop.xlane.xlu0 %4867 }
0x2820   :  { %9148 = vmatprep.subr.bf16.mxu1 %v9147_v25 }
0x2821   :  { %9150 = vmatpush3.bf16.msra.mxu1 %v9147_v25 }
0x2823   :  { %v4870_v56 = vpop.xlane.xlu0 %4869 }
0x2824   :  { %v9151_v14 = vpack.c.bf16 %v4870_v56, %v4868_v19 }
0x2826   :  { %9152 = vmatprep.subr.bf16.mxu1 %v9151_v14 }
0x2827   :  { %9154 = vmatpush3.bf16.msra.mxu1 %v9151_v14 }
0x282a   :  { %8908 = vmatmul.mubr.msk.f32.vlgmr.msra.gmra.mrb[72].mxu1 %vm297_vm0, %v11216_v5 }
0x282b   :  { %8910 = vmatprep.mubr.msk.f32.mxu1 %vm297_vm0, %v11223_v4 }
0x282e   :  { %8911 = vmatmul.mubr.msk.f32.gmra.mrb[74].mxu1 %vm297_vm0, %v11230_v0 }
0x28fd   :  { %v8909_v58 = vpop.f32.mrb[72].mxu1 }
0x28fe   :  { %4963 = vperm.xlu0 %9220, %v8909_v58   ;;  %v4937_v20 = vpop.f32.mrb[73].mxu1 }
0x28ff   :  { %4958 = vperm.xlu1 %9221, %v4937_v20  }
0x2901   :  { %v8912_v57 = vpop.f32.mrb[74].mxu1 }
0x2902   :  { %v4947_v3 = vpop.f32.mrb[75].mxu1 }
0x2903   :  { %4968 = vperm.xlu1 %9221, %v4947_v3  }
0x2907   :  { %4973 = vperm.xlu1 %9221, %v8912_v57  }
0x297d   :  { %v4964_v24 = vpop.permute.xlu0 %4963 }
0x297e   :  { %v11234_v22 = vsub.f32 %v4852_v62, %v4964_v24  ;;  %v4959_v45 = vpop.permute.xlu1 %4958  ;;  %v7872_v62 = vld [vmem:[%s12081_s5 + $0xd0] sm:$0xff] }
0x297f   :  { %v11236_v60 = vsub.f32 %v4849_v51, %v4959_v45  ;;  %v7869_v51 = vld [vmem:[%s12082_s4 + $0xd8] sm:$0xff] }
0x2980   :  { %v4981_v13 = vmul.f32 %v11234_v22, %v11234_v22 }
0x2981   :  { %v4980_v7 = vmul.f32 %v11236_v60, %v11236_v60 }
0x2982   :  { %4986 = vadd.xlane.f32.xlu1 %v4981_v13  ;;  %v4969_v49 = vpop.permute.xlu1 %4968 }
0x2983   :  { %v11242_v29 = vsub.f32 %v4857_v61, %v4969_v49  ;;  %4984 = vadd.xlane.f32.xlu0 %v4980_v7 }
0x2985   :  { %v4982_v1 = vmul.f32 %v11242_v29, %v11242_v29 }
0x2986   :  { %v4974_v8 = vpop.permute.xlu1 %4973 }
0x2987   :  { %v11246_v10 = vsub.f32 %v4860_v54, %v4974_v8  ;;  %4988 = vadd.xlane.f32.xlu0 %v4982_v1  ;;  %v7873_v54 = vld [vmem:[%s12081_s5 + $0xd8] sm:$0xff] }
0x2989   :  { %v4983_v12 = vmul.f32 %v11246_v10, %v11246_v10 }
0x298b   :  { %4990 = vadd.xlane.f32.xlu0 %v4983_v12 }
0x2993   :  { %5121 = vperm.xlu1 %9221, %v7870_v17   ;;  %v9308_v17 = vld [vmem:[%s12078_s1 + $0x1e8] ss:$12 sps:$4 sm:$0xff]  }
0x2997   :  { %5126 = vperm.xlu1 %9221, %v7871_v11  }
0x2a0f   :  { %v4987_v21 = vpop.xlane.xlu1 %4986 }
0x2a10   :  { %v4985_v15 = vpop.xlane.xlu0 %4984 }
0x2a11   :  { %v9155_v63 = vpack.c.bf16 %v4987_v21, %v4985_v15 }
0x2a13   :  { %9156 = vmatprep.subr.bf16.mxu0 %v9155_v63  ;;  %v5122_v50 = vpop.permute.xlu1 %5121 }
0x2a14   :  { %v4989_v28 = vpop.xlane.xlu0 %4988  ;;  %9158 = vmatpush3.bf16.msra.mxu0 %v9155_v63 }
0x2a17   :  { %v5127_v55 = vpop.permute.xlu1 %5126 }
0x2a18   :  { %v4991_v30 = vpop.xlane.xlu0 %4990 }
0x2a19   :  { %v9159_v31 = vpack.c.bf16 %v4991_v30, %v4989_v28 }
0x2a1b   :  { %9160 = vmatprep.subr.bf16.mxu0 %v9159_v31 }
0x2a1c   :  { %9162 = vmatpush3.bf16.msra.mxu0 %v9159_v31 }
0x2a1f   :  { %8922 = vmatmul.mubr.msk.f32.vlgmr.msra.gmra.mrb[96].mxu0 %vm297_vm0, %v11216_v5 }
0x2a20   :  { %8924 = vmatprep.mubr.msk.f32.mxu0 %vm297_vm0, %v11223_v4 }
0x2a23   :  { %8925 = vmatmul.mubr.msk.f32.gmra.mrb[98].mxu0 %vm297_vm0, %v11230_v0 }
0x2a24   :  { %8931 = vmatprep.mubr.msk.bf16.mxu0 %vm297_vm0, %v9308_v17 }
0x2af2   :  { %v8923_v23 = vpop.f32.mrb[96].mxu0 }
0x2af3   :  { %v5064_v18 = vadd.f32 1e-05, %v8923_v23  ;;  %v5058_v34 = vpop.f32.mrb[97].mxu0 }
0x2af4   :  { %v5059_v26 = vadd.f32 1e-05, %v5058_v34 }
0x2af5   :  { %9390 = vrsqrt.f32 %v5064_v18 }
0x2af6   :  { %9392 = vrsqrt.f32 %v5059_v26  ;;  %v8926_v36 = vpop.f32.mrb[98].mxu0 }
0x2af7   :  { %v5074_v40 = vadd.f32 1e-05, %v8926_v36  ;;  %v5068_v38 = vpop.f32.mrb[99].mxu0 }
0x2af8   :  { %v5069_v39 = vadd.f32 1e-05, %v5068_v38 }
0x2af9   :  { %9394 = vrsqrt.f32 %v5074_v40 }
0x2afa   :  { %9396 = vrsqrt.f32 %v5069_v39 }
0x2aff   :  { %v9391_v6 = vpop.eup %9390 }
0x2b00   :  { %v9393_v43 = vpop.eup %9392  ;;  %v5087_v46 = vmul.f32 %v9391_v6, %v7867_v37 }
0x2b01   :  { %v5086_v48 = vmul.f32 %v9393_v43, %v7866_v42 }
0x2b02   :  { %5097 = vperm.xlu0 %9220, %v5087_v46  }
0x2b03   :  { %v9395_v52 = vpop.eup %9394  ;;  %5092 = vperm.xlu1 %9221, %v5086_v48  }
0x2b04   :  { %v9397_v61 = vpop.eup %9396  ;;  %v5089_v53 = vmul.f32 %v9395_v52, %v7869_v51 }
0x2b05   :  { %v5088_v47 = vmul.f32 %v9397_v61, %v7868_v41 }
0x2b07   :  { %5102 = vperm.xlu0 %9220, %v5088_v47   ;;  %5107 = vperm.xlu1 %9221, %v5089_v53  }
0x2b0b   :  { %5131 = vperm.xlu0 %9220, %v7872_v62   ;;  %5136 = vperm.xlu1 %9221, %v7873_v54  }
0x2b81   :  { %v5098_v25 = vpop.permute.xlu0 %5097 }
0x2b82   :  { %v5111_v19 = vmul.f32 %v5098_v25, %v11234_v22  ;;  %v5093_v56 = vpop.permute.xlu1 %5092 }
0x2b83   :  { %v5110_v14 = vmul.f32 %v5093_v56, %v11236_v60 }
0x2b84   :  { %v5140_v58 = vadd.f32 %v5127_v55, %v5111_v19 }
0x2b85   :  { %v5139_v20 = vadd.f32 %v5122_v50, %v5110_v14 }
0x2b86   :  { %v11282_v57 = vmax.f32 %v5140_v58, 0.0  ;;  %v5108_v22 = vpop.permute.xlu1 %5107  ;;  %v5103_v45 = vpop.permute.xlu0 %5102 }
0x2b87   :  { %v11284_v3 = vmax.f32 %v5139_v20, 0.0  ;;  %v5113_v13 = vmul.f32 %v5108_v22, %v11246_v10  ;;  %v5112_v49 = vmul.f32 %v5103_v45, %v11242_v29  ;;  %v9304_v29 = vld [vmem:[%s12078_s1 + $0x1e4] ss:$12 sps:$4 sm:$0xff]  }
0x2b88   :  { %5149 = vrot.lane.b32.xlu1 %v11282_v57, %s9478_s19  ;;  %5374 = vmatprep.mubr.bf16.mxu1 %v9304_v29 }
0x2b89   :  { %5147 = vrot.lane.b32.xlu0 %v11284_v3, %s9478_s19  ;;  %v5211_v24 = vpack.c.bf16 %v11282_v57, %v11284_v3 }
0x2b8a   :  { %v5137_v60 = vpop.permute.xlu1 %5136  ;;  %v5132_v7 = vpop.permute.xlu0 %5131 }
0x2b8b   :  { %8443 = vmatprep.subr.bf16.mxu1 %v5211_v24  ;;  %v5142_v1 = vadd.f32 %v5137_v60, %v5113_v13  ;;  %v5141_v8 = vadd.f32 %v5132_v7, %v5112_v49 }
0x2b8c   :  { %5217 = vrot.lane.b32.xlu1 %v11282_v57, %s9479_s22 }
0x2b8d   :  { %5215 = vrot.lane.b32.xlu0 %v11284_v3, %s9479_s22  ;;  %v11318_v12 = vmax.f32 %v5142_v1, 0.0  ;;  %v11320_v10 = vmax.f32 %v5141_v8, 0.0 }
0x2b8f   :  { %v5212_v23 = vpack.c.bf16 %v11318_v12, %v11320_v10 }
0x2b90   :  { %5165 = vrot.lane.b32.xlu1 %v11282_v57, %s9480_s23 }
0x2b91   :  { %5163 = vrot.lane.b32.xlu0 %v11284_v3, %s9480_s23 }
0x2b94   :  { %5233 = vrot.lane.b32.xlu1 %v11282_v57, %s9481_s0 }
0x2b95   :  { %5231 = vrot.lane.b32.xlu0 %v11284_v3, %s9481_s0 }
0x2b98   :  { %5181 = vrot.lane.b32.xlu1 %v11282_v57, %s9482_s24 }
0x2b99   :  { %5179 = vrot.lane.b32.xlu0 %v11284_v3, %s9482_s24 }
0x2b9c   :  { %5249 = vrot.lane.b32.xlu1 %v11282_v57, %s9483_s25 }
0x2b9d   :  { %5247 = vrot.lane.b32.xlu0 %v11284_v3, %s9483_s25 }
0x2ba0   :  { %5197 = vrot.lane.b32.xlu1 %v11282_v57, %s9484_s26 }
0x2ba1   :  { %5195 = vrot.lane.b32.xlu0 %v11284_v3, %s9484_s26 }
0x2ba4   :  { %5153 = vrot.lane.b32.xlu1 %v11318_v12, %s9478_s19 }
0x2ba5   :  { %5151 = vrot.lane.b32.xlu0 %v11320_v10, %s9478_s19 }
0x2ba8   :  { %5221 = vrot.lane.b32.xlu1 %v11318_v12, %s9479_s22 }
0x2ba9   :  { %5219 = vrot.lane.b32.xlu0 %v11320_v10, %s9479_s22 }
0x2bac   :  { %5169 = vrot.lane.b32.xlu1 %v11318_v12, %s9480_s23 }
0x2bad   :  { %5167 = vrot.lane.b32.xlu0 %v11320_v10, %s9480_s23 }
0x2bb0   :  { %5237 = vrot.lane.b32.xlu1 %v11318_v12, %s9481_s0 }
0x2bb1   :  { %5235 = vrot.lane.b32.xlu0 %v11320_v10, %s9481_s0 }
0x2bb4   :  { %5185 = vrot.lane.b32.xlu1 %v11318_v12, %s9482_s24 }
0x2bb5   :  { %5183 = vrot.lane.b32.xlu0 %v11320_v10, %s9482_s24 }
0x2bb8   :  { %5253 = vrot.lane.b32.xlu1 %v11318_v12, %s9483_s25 }
0x2bb9   :  { %5251 = vrot.lane.b32.xlu0 %v11320_v10, %s9483_s25 }
0x2bbc   :  { %5201 = vrot.lane.b32.xlu1 %v11318_v12, %s9484_s26 }
0x2bbd   :  { %5199 = vrot.lane.b32.xlu0 %v11320_v10, %s9484_s26 }
0x2bc0   :  { %5265 = vrot.lane.b32.xlu1 %v11282_v57, %s9485_s11 }
0x2bc1   :  { %5263 = vrot.lane.b32.xlu0 %v11284_v3, %s9485_s11 }
0x2bc4   :  { %5269 = vrot.lane.b32.xlu1 %v11318_v12, %s9485_s11 }
0x2bc5   :  { %5267 = vrot.lane.b32.xlu0 %v11320_v10, %s9485_s11 }
0x2bfa   :  { %v5150_v11 = vpop.permute.xlu1 %5149 }
0x2bfb   :  { %v5156_v21 = vmul.f32 %v11034_v44, %v5150_v11  ;;  %v5148_v15 = vpop.permute.xlu0 %5147 }
0x2bfc   :  { %v5155_v63 = vmul.f32 %v11034_v44, %v5148_v15 }
0x2bfe   :  { %v5159_v28 = vpack.c.bf16 %v5156_v21, %v5155_v63  ;;  %v5218_v30 = vpop.permute.xlu1 %5217 }
0x2bff   :  { %v5216_v31 = vpop.permute.xlu0 %5215  ;;  %v5224_v46 = vmul.f32 %v11041_v59, %v5218_v30 }
0x2c00   :  { %8444 = vmatpush3.bf16.msra.mxu1 %v5159_v28  ;;  %v5223_v48 = vmul.f32 %v11041_v59, %v5216_v31 }
0x2c01   :  { %8445 = vmatprep.subr.bf16.mxu1 %v5212_v23 }
0x2c02   :  { %v5166_v18 = vpop.permute.xlu1 %5165  ;;  %v5227_v54 = vpack.c.bf16 %v5224_v46, %v5223_v48 }
0x2c03   :  { %v5164_v34 = vpop.permute.xlu0 %5163  ;;  %v5172_v61 = vmul.f32 %v11050_v2, %v5166_v18 }
0x2c04   :  { %v5171_v53 = vmul.f32 %v11050_v2, %v5164_v34 }
0x2c06   :  { %v5234_v26 = vpop.permute.xlu1 %5233  ;;  %v5175_v19 = vpack.c.bf16 %v5172_v61, %v5171_v53 }
0x2c07   :  { %v5232_v36 = vpop.permute.xlu0 %5231  ;;  %v5240_v58 = vmul.f32 %v11059_v16, %v5234_v26 }
0x2c0a   :  { %v5182_v40 = vpop.permute.xlu1 %5181 }
0x2c0b   :  { %v5180_v38 = vpop.permute.xlu0 %5179  ;;  %v5188_v45 = vmul.f32 %v11068_v27, %v5182_v40 }
0x2c0e   :  { %v5250_v39 = vpop.permute.xlu1 %5249 }
0x2c0f   :  { %v5248_v37 = vpop.permute.xlu0 %5247 }
0x2c10   :  { %v5255_v21 = vmul.f32 %v11077_v35, %v5248_v37 }
0x2c12   :  { %v5198_v42 = vpop.permute.xlu1 %5197 }
0x2c13   :  { %v5196_v6 = vpop.permute.xlu0 %5195  ;;  %v5204_v30 = vmul.f32 %v11086_v32, %v5198_v42 }
0x2c16   :  { %v5154_v43 = vpop.permute.xlu1 %5153 }
0x2c17   :  { %v5158_v51 = vmul.f32 %v11034_v44, %v5154_v43  ;;  %v5152_v41 = vpop.permute.xlu0 %5151 }
0x2c18   :  { %v5157_v52 = vmul.f32 %v11034_v44, %v5152_v41  ;;  %v5239_v44 = vmul.f32 %v11059_v16, %v5232_v36  ;;  %v9305_v41 = vld [vmem:[%s12078_s1 + $0x1fc] ss:$12 sps:$4 sm:$0xff]  }
0x2c1a   :  { %v5160_v47 = vpack.c.bf16 %v5158_v51, %v5157_v52  ;;  %v5222_v62 = vpop.permute.xlu1 %5221  ;;  %v5243_v7 = vpack.c.bf16 %v5240_v58, %v5239_v44 }
0x2c1b   :  { %v5226_v50 = vmul.f32 %v11041_v59, %v5222_v62  ;;  %v5220_v55 = vpop.permute.xlu0 %5219 }
0x2c1c   :  { %v5225_v25 = vmul.f32 %v11041_v59, %v5220_v55  ;;  %8446 = vmatpush3.bf16.msra.mxu1 %v5160_v47  ;;  %v5187_v59 = vmul.f32 %v11068_v27, %v5180_v38 }
0x2c1d   :  { %8447 = vmatprep.subr.bf16.mxu1 %v5227_v54  ;;  %v9307_v54 = vld [vmem:[%s12078_s1 + $0x1f8] ss:$12 sps:$4 sm:$0xff]  }
0x2c1e   :  { %v5228_v56 = vpack.c.bf16 %v5226_v50, %v5225_v25  ;;  %v5170_v14 = vpop.permute.xlu1 %5169  ;;  %v5191_v29 = vpack.c.bf16 %v5188_v45, %v5187_v59  ;;  %v9309_v50 = vld [vmem:[%s12078_s1 + $0x200] ss:$12 sps:$4 sm:$0xff]  }
0x2c1f   :  { %v5174_v20 = vmul.f32 %v11050_v2, %v5170_v14  ;;  %v5168_v24 = vpop.permute.xlu0 %5167 }
0x2c20   :  { %v5173_v22 = vmul.f32 %v11050_v2, %v5168_v24  ;;  %8448 = vmatpush3.bf16.msra.mxu1 %v5175_v19  ;;  %v5256_v2 = vmul.f32 %v11077_v35, %v5250_v39 }
0x2c21   :  { %8449 = vmatprep.subr.bf16.mxu1 %v5228_v56 }
0x2c22   :  { %v5176_v60 = vpack.c.bf16 %v5174_v20, %v5173_v22  ;;  %v5238_v13 = vpop.permute.xlu1 %5237  ;;  %v5259_v18 = vpack.c.bf16 %v5256_v2, %v5255_v21 }
0x2c23   :  { %v5242_v49 = vmul.f32 %v11059_v16, %v5238_v13  ;;  %v5236_v1 = vpop.permute.xlu0 %5235 }
0x2c24   :  { %v5241_v8 = vmul.f32 %v11059_v16, %v5236_v1  ;;  %8450 = vmatpush3.bf16.msra.mxu1 %v5176_v60  ;;  %v5203_v16 = vmul.f32 %v11086_v32, %v5196_v6 }
0x2c25   :  { %8451 = vmatprep.subr.bf16.mxu1 %v5243_v7 }
0x2c26   :  { %v5244_v17 = vpack.c.bf16 %v5242_v49, %v5241_v8  ;;  %v5186_v11 = vpop.permute.xlu1 %5185  ;;  %v5207_v40 = vpack.c.bf16 %v5204_v30, %v5203_v16 }
0x2c27   :  { %v5190_v15 = vmul.f32 %v11068_v27, %v5186_v11  ;;  %v5184_v63 = vpop.permute.xlu0 %5183 }
0x2c28   :  { %v5189_v28 = vmul.f32 %v11068_v27, %v5184_v63  ;;  %8452 = vmatpush3.bf16.msra.mxu1 %v5191_v29 }
0x2c29   :  { %8453 = vmatprep.subr.bf16.mxu1 %v5244_v17 }
0x2c2a   :  { %v5192_v31 = vpack.c.bf16 %v5190_v15, %v5189_v28  ;;  %v5254_v23 = vpop.permute.xlu1 %5253 }
0x2c2b   :  { %v5258_v34 = vmul.f32 %v11077_v35, %v5254_v23  ;;  %v5252_v26 = vpop.permute.xlu0 %5251 }
0x2c2c   :  { %v5257_v36 = vmul.f32 %v11077_v35, %v5252_v26  ;;  %8454 = vmatpush3.bf16.msra.mxu1 %v5192_v31  ;;  %v9302_v35 = vld [vmem:[%s12078_s1 + $0x1e0] ss:$12 sps:$4 sm:$0xff]  }
0x2c2d   :  { %8455 = vmatprep.subr.bf16.mxu1 %v5259_v18 }
0x2c2e   :  { %v5260_v38 = vpack.c.bf16 %v5258_v34, %v5257_v36  ;;  %v5202_v39 = vpop.permute.xlu1 %5201 }
0x2c2f   :  { %v5206_v27 = vmul.f32 %v11086_v32, %v5202_v39  ;;  %v5200_v37 = vpop.permute.xlu0 %5199 }
0x2c30   :  { %v5205_v42 = vmul.f32 %v11086_v32, %v5200_v37  ;;  %8456 = vmatpush3.bf16.msra.mxu1 %v5207_v40 }
0x2c31   :  { %8457 = vmatprep.subr.bf16.mxu1 %v5260_v38 }
0x2c32   :  { %v5208_v6 = vpack.c.bf16 %v5206_v27, %v5205_v42  ;;  %v5266_v43 = vpop.permute.xlu1 %5265 }
0x2c33   :  { %v5272_v46 = vmul.f32 %v11097_v9, %v5266_v43  ;;  %v5264_v48 = vpop.permute.xlu0 %5263  ;;  %v7903_v43 = vld [vmem:[%s12081_s5 + $0xe8] sm:$0xff] }
0x2c34   :  { %v5271_v51 = vmul.f32 %v11097_v9, %v5264_v48  ;;  %8458 = vmatpush3.bf16.msra.mxu1 %v5208_v6  ;;  %v7902_v6 = vld [vmem:[%s12081_s5 + $0xe0] sm:$0xff] }
0x2c36   :  { %v5275_v52 = vpack.c.bf16 %v5272_v46, %v5271_v51  ;;  %v5270_v32 = vpop.permute.xlu1 %5269 }
0x2c37   :  { %v5274_v61 = vmul.f32 %v11097_v9, %v5270_v32  ;;  %v5268_v53 = vpop.permute.xlu0 %5267  ;;  %5375 = vmatmul.mubr.bf16.vlgmr.msra.gmra.mrb[76].mxu1 %v9302_v35 }
0x2c38   :  { %v5273_v47 = vmul.f32 %v11097_v9, %v5268_v53  ;;  %8927 = vmatprep.subr.bf16.mxu0 %v5275_v52  ;;  %5382 = vmatprep.mubr.bf16.mxu1 %v9305_v41 }
0x2c39   :  { %8928 = vmatpush3.bf16.msra.mxu0 %v5275_v52 }
0x2c3a   :  { %v5276_v62 = vpack.c.bf16 %v5274_v61, %v5273_v47 }
0x2c3c   :  { %8929 = vmatprep.subr.bf16.mxu0 %v5276_v62 }
0x2c3d   :  { %8930 = vmatpush3.bf16.msra.mxu0 %v5276_v62 }
0x2c3f   :  { %5383 = vmatmul.mubr.bf16.gmra.mrb[80].mxu1 %v9307_v54 }
0x2c40   :  { %8932 = vmatmul.mubr.msk.bf16.vlgmr.msra.gmra.mrb[100].mxu0 %vm297_vm0, %v9309_v50 }
0x2c41   :  { %8943 = vmatprep.mubr.msk.f32.mxu0 %vm297_vm0, %v11207_v33 }
0x2d0a   :  { %v8459_v9 = vpop.f32.mrb[76].mxu1 }
0x2d0b   :  { %v8460_v55 = vpop.f32.mrb[77].mxu1 }
0x2d0c   :  { %v8461_v25 = vadd.f32 %v8460_v55, %v8459_v9  ;;  %v8462_v19 = vpop.f32.mrb[78].mxu1 }
0x2d0d   :  { %v8463_v56 = vpop.f32.mrb[79].mxu1 }
0x2d0e   :  { %v8464_v14 = vadd.f32 %v8463_v56, %v8462_v19  ;;  %v7901_v56 = vld [vmem:[%s12082_s4 + $0xf8] sm:$0xff] }
0x2d12   :  { %v8465_v58 = vpop.f32.mrb[80].mxu1 }
0x2d13   :  { %v8466_v44 = vpop.f32.mrb[81].mxu1  ;;  %v8933_v20 = vpop.f32.mrb[100].mxu0 }
0x2d14   :  { %v8467_v24 = vadd.f32 %v8466_v44, %v8465_v58  ;;  %v8468_v22 = vpop.f32.mrb[82].mxu1  ;;  %v5425_v45 = vpop.f32.mrb[101].mxu0 }
0x2d15   :  { %v5426_v59 = vadd.f32 %v8461_v25, %v5425_v45  ;;  %v8469_v60 = vpop.f32.mrb[83].mxu1  ;;  %v8934_v13 = vpop.f32.mrb[102].mxu0  ;;  %v7905_v45 = vld [vmem:[%s12081_s5 + $0xf8] sm:$0xff] }
0x2d16   :  { %v5434_v7 = vadd.f32 %v8933_v20, %v8467_v24  ;;  %v8470_v49 = vadd.f32 %v8469_v60, %v8468_v22  ;;  %v5428_v1 = vpop.f32.mrb[103].mxu0  ;;  %v7904_v22 = vld [vmem:[%s12081_s5 + $0xf0] sm:$0xff] }
0x2d17   :  { %v5429_v8 = vadd.f32 %v8464_v14, %v5428_v1  ;;  %5440 = vadd.xlane.f32.xlu0 %v5426_v59  ;;  %v7900_v14 = vld [vmem:[%s12082_s4 + $0xf0] sm:$0xff] }
0x2d18   :  { %v5437_v29 = vadd.f32 %v8934_v13, %v8470_v49 }
0x2d19   :  { %5442 = vadd.xlane.f32.xlu1 %v5429_v8 }
0x2d1b   :  { %5444 = vadd.xlane.f32.xlu0 %v5434_v7 }
0x2d1f   :  { %5446 = vadd.xlane.f32.xlu0 %v5437_v29 }
0x2da4   :  { %v5441_v17 = vpop.xlane.xlu0 %5440 }
0x2da6   :  { %v5443_v11 = vpop.xlane.xlu1 %5442 }
0x2da7   :  { %v9163_v2 = vpack.c.bf16 %v5443_v11, %v5441_v17 }
0x2da8   :  { %v5445_v21 = vpop.xlane.xlu0 %5444 }
0x2da9   :  { %9164 = vmatprep.subr.bf16.mxu0 %v9163_v2 }
0x2daa   :  { %9166 = vmatpush3.bf16.msra.mxu0 %v9163_v2 }
0x2dac   :  { %v5447_v15 = vpop.xlane.xlu0 %5446 }
0x2dad   :  { %v9167_v63 = vpack.c.bf16 %v5447_v15, %v5445_v21 }
0x2daf   :  { %9168 = vmatprep.subr.bf16.mxu0 %v9167_v63 }
0x2db0   :  { %9170 = vmatpush3.bf16.msra.mxu0 %v9167_v63 }
0x2db3   :  { %8944 = vmatmul.mubr.msk.f32.vlgmr.msra.gmra.mrb[104].mxu0 %vm297_vm0, %v11216_v5 }
0x2db4   :  { %8946 = vmatprep.mubr.msk.f32.mxu0 %vm297_vm0, %v11223_v4 }
0x2db7   :  { %8947 = vmatmul.mubr.msk.f32.gmra.mrb[106].mxu0 %vm297_vm0, %v11230_v0 }
0x2db8   :  { %8957 = vmatprep.mubr.msk.f32.mxu0 %vm297_vm0, %v11207_v33 }
0x2e86   :  { %v8945_v28 = vpop.f32.mrb[104].mxu0 }
0x2e87   :  { %5540 = vperm.xlu0 %9220, %v8945_v28   ;;  %v5514_v30 = vpop.f32.mrb[105].mxu0 }
0x2e88   :  { %5535 = vperm.xlu1 %9221, %v5514_v30  }
0x2e8a   :  { %v8948_v16 = vpop.f32.mrb[106].mxu0 }
0x2e8b   :  { %v5524_v31 = vpop.f32.mrb[107].mxu0 }
0x2e8c   :  { %5545 = vperm.xlu1 %9221, %v5524_v31  }
0x2e90   :  { %5550 = vperm.xlu1 %9221, %v8948_v16  }
0x2f06   :  { %v5541_v23 = vpop.permute.xlu0 %5540 }
0x2f07   :  { %v11422_v18 = vsub.f32 %v5429_v8, %v5541_v23  ;;  %v5536_v34 = vpop.permute.xlu1 %5535 }
0x2f08   :  { %v11424_v26 = vsub.f32 %v5426_v59, %v5536_v34 }
0x2f09   :  { %v5558_v36 = vmul.f32 %v11422_v18, %v11422_v18 }
0x2f0a   :  { %v5557_v33 = vmul.f32 %v11424_v26, %v11424_v26 }
0x2f0b   :  { %5563 = vadd.xlane.f32.xlu1 %v5558_v36  ;;  %v5546_v40 = vpop.permute.xlu1 %5545  ;;  %v9312_v36 = vld [vmem:[%s12078_s1 + $0x214] ss:$12 sps:$4 sm:$0xff]  }
0x2f0c   :  { %v11430_v38 = vsub.f32 %v5434_v7, %v5546_v40  ;;  %5561 = vadd.xlane.f32.xlu0 %v5557_v33  ;;  %v9316_v33 = vld [vmem:[%s12078_s1 + $0x218] ss:$12 sps:$4 sm:$0xff]   ;;  %v7923_v40 = vld [vmem:[%s12083_s6 + $0x68] sm:$0xff] }
0x2f0d   :  { %8967 = vmatprep.mubr.msk.bf16.mxu1 %vm297_vm0, %v9316_v33  ;;  %v11569_v33 = vld [vmem:[%s12079_s2 + $0x7] ss:$0 sm:$0xff] }
0x2f0e   :  { %v5559_v39 = vmul.f32 %v11430_v38, %v11430_v38 }
0x2f0f   :  { %v5551_v27 = vpop.permute.xlu1 %5550 }
0x2f10   :  { %v11434_v37 = vsub.f32 %v5437_v29, %v5551_v27  ;;  %5565 = vadd.xlane.f32.xlu0 %v5559_v39  ;;  %v7925_v39 = vld [vmem:[%s12083_s6 + $0x78] sm:$0xff]  ;;  %v7924_v27 = vld [vmem:[%s12083_s6 + $0x70] sm:$0xff] }
0x2f12   :  { %v5560_v42 = vmul.f32 %v11434_v37, %v11434_v37 }
0x2f14   :  { %5567 = vadd.xlane.f32.xlu0 %v5560_v42  ;;  %v11526_v42 = vld [vmem:[%s12079_s2] ss:$0 sm:$0xff] }
0x2f1c   :  { %5698 = vperm.xlu1 %9221, %v7902_v6  }
0x2f20   :  { %5703 = vperm.xlu1 %9221, %v7903_v43  }
0x2f98   :  { %v5564_v46 = vpop.xlane.xlu1 %5563 }
0x2f99   :  { %v5562_v48 = vpop.xlane.xlu0 %5561 }
0x2f9a   :  { %v9171_v35 = vpack.c.bf16 %v5564_v46, %v5562_v48 }
0x2f9c   :  { %9172 = vmatprep.subr.bf16.mxu0 %v9171_v35  ;;  %v5699_v59 = vpop.permute.xlu1 %5698 }
0x2f9d   :  { %v5566_v51 = vpop.xlane.xlu0 %5565  ;;  %9174 = vmatpush3.bf16.msra.mxu0 %v9171_v35 }
0x2fa0   :  { %v5704_v60 = vpop.permute.xlu1 %5703 }
0x2fa1   :  { %v5568_v41 = vpop.xlane.xlu0 %5567 }
0x2fa2   :  { %v9175_v52 = vpack.c.bf16 %v5568_v41, %v5566_v51 }
0x2fa4   :  { %9176 = vmatprep.subr.bf16.mxu0 %v9175_v52 }
0x2fa5   :  { %9178 = vmatpush3.bf16.msra.mxu0 %v9175_v52 }
0x2fa8   :  { %8958 = vmatmul.mubr.msk.f32.vlgmr.msra.gmra.mrb[108].mxu0 %vm297_vm0, %v11216_v5  ;;  %v7899_v5 = vld [vmem:[%s12082_s4 + $0xe8] sm:$0xff] }
0x2fa9   :  { %8960 = vmatprep.mubr.msk.f32.mxu0 %vm297_vm0, %v11223_v4  ;;  %v7898_v4 = vld [vmem:[%s12082_s4 + $0xe0] sm:$0xff] }
0x2fac   :  { %8961 = vmatmul.mubr.msk.f32.gmra.mrb[110].mxu0 %vm297_vm0, %v11230_v0 }
0x2fad   :  { %5951 = vmatprep.mubr.bf16.mxu0 %v9312_v36 }
0x307b   :  { %v8959_v32 = vpop.f32.mrb[108].mxu0 }
0x307c   :  { %v5641_v61 = vadd.f32 1e-05, %v8959_v32  ;;  %v5635_v53 = vpop.f32.mrb[109].mxu0 }
0x307d   :  { %v5636_v47 = vadd.f32 1e-05, %v5635_v53 }
0x307e   :  { %9398 = vrsqrt.f32 %v5641_v61 }
0x307f   :  { %9400 = vrsqrt.f32 %v5636_v47  ;;  %v8962_v62 = vpop.f32.mrb[110].mxu0 }
0x3080   :  { %v5651_v54 = vadd.f32 1e-05, %v8962_v62  ;;  %v5645_v50 = vpop.f32.mrb[111].mxu0 }
0x3081   :  { %v5646_v9 = vadd.f32 1e-05, %v5645_v50 }
0x3082   :  { %9402 = vrsqrt.f32 %v5651_v54 }
0x3083   :  { %9404 = vrsqrt.f32 %v5646_v9 }
0x3088   :  { %v9399_v0 = vpop.eup %9398 }
0x3089   :  { %v9401_v55 = vpop.eup %9400  ;;  %v5664_v25 = vmul.f32 %v9399_v0, %v7899_v5 }
0x308a   :  { %v5663_v19 = vmul.f32 %v9401_v55, %v7898_v4  ;;  %v11533_v4 = vld [vmem:[%s12079_s2 + $0x5] ss:$0 sm:$0xff] }
0x308b   :  { %5674 = vperm.xlu0 %9220, %v5664_v25  }
0x308c   :  { %v9403_v58 = vpop.eup %9402  ;;  %5669 = vperm.xlu1 %9221, %v5663_v19  }
0x308d   :  { %v9405_v44 = vpop.eup %9404  ;;  %v5666_v20 = vmul.f32 %v9403_v58, %v7901_v56 }
0x308e   :  { %v5665_v24 = vmul.f32 %v9405_v44, %v7900_v14  ;;  %v11542_v14 = vld [vmem:[%s12079_s2 + $0x1] ss:$0 sm:$0xff] }
0x3090   :  { %5679 = vperm.xlu0 %9220, %v5665_v24   ;;  %5684 = vperm.xlu1 %9221, %v5666_v20  }
0x3094   :  { %5708 = vperm.xlu0 %9220, %v7904_v22   ;;  %5713 = vperm.xlu1 %9221, %v7905_v45  }
0x310a   :  { %v5675_v13 = vpop.permute.xlu0 %5674 }
0x310b   :  { %v5688_v7 = vmul.f32 %v5675_v13, %v11422_v18  ;;  %v5670_v49 = vpop.permute.xlu1 %5669 }
0x310c   :  { %v5687_v1 = vmul.f32 %v5670_v49, %v11424_v26 }
0x310d   :  { %v5717_v8 = vadd.f32 %v5704_v60, %v5688_v7 }
0x310e   :  { %v5716_v29 = vadd.f32 %v5699_v59, %v5687_v1  ;;  %v11551_v1 = vld [vmem:[%s12079_s2 + $0x6] ss:$0 sm:$0xff] }
0x310f   :  { %v5721_v17 = vmax.f32 %v5717_v8, 0.0  ;;  %v5680_v11 = vpop.permute.xlu0 %5679  ;;  %v5685_v2 = vpop.permute.xlu1 %5684 }
0x3110   :  { %v5720_v21 = vmax.f32 %v5716_v29, 0.0  ;;  %v5689_v15 = vmul.f32 %v5680_v11, %v11430_v38  ;;  %v5690_v63 = vmul.f32 %v5685_v2, %v11434_v37  ;;  %v7922_v38 = vld [vmem:[%s12083_s6 + $0x60] sm:$0xff] }
0x3111   :  { %5726 = vrot.lane.b32.xlu1 %v5721_v17, %s9478_s19 }
0x3112   :  { %5724 = vrot.lane.b32.xlu0 %v5720_v21, %s9478_s19  ;;  %v5788_v28 = vpack.c.bf16 %v5721_v17, %v5720_v21 }
0x3113   :  { %v5709_v30 = vpop.permute.xlu0 %5708  ;;  %v5714_v16 = vpop.permute.xlu1 %5713 }
0x3114   :  { %v5718_v31 = vadd.f32 %v5709_v30, %v5689_v15  ;;  %v5719_v23 = vadd.f32 %v5714_v16, %v5690_v63  ;;  %8491 = vmatprep.subr.bf16.mxu0 %v5788_v28 }
0x3115   :  { %5794 = vrot.lane.b32.xlu1 %v5721_v17, %s9479_s22 }
0x3116   :  { %v5722_v18 = vmax.f32 %v5718_v31, 0.0  ;;  %v5723_v34 = vmax.f32 %v5719_v23, 0.0  ;;  %5792 = vrot.lane.b32.xlu0 %v5720_v21, %s9479_s22 }
0x3118   :  { %v5789_v26 = vpack.c.bf16 %v5723_v34, %v5722_v18 }
0x3119   :  { %5742 = vrot.lane.b32.xlu1 %v5721_v17, %s9480_s23 }
0x311a   :  { %5740 = vrot.lane.b32.xlu0 %v5720_v21, %s9480_s23 }
0x311d   :  { %5810 = vrot.lane.b32.xlu1 %v5721_v17, %s9481_s0 }
0x311e   :  { %5808 = vrot.lane.b32.xlu0 %v5720_v21, %s9481_s0 }
0x3121   :  { %5758 = vrot.lane.b32.xlu1 %v5721_v17, %s9482_s24 }
0x3122   :  { %5756 = vrot.lane.b32.xlu0 %v5720_v21, %s9482_s24 }
0x3125   :  { %5826 = vrot.lane.b32.xlu1 %v5721_v17, %s9483_s25 }
0x3126   :  { %5824 = vrot.lane.b32.xlu0 %v5720_v21, %s9483_s25 }
0x3129   :  { %5774 = vrot.lane.b32.xlu1 %v5721_v17, %s9484_s26 }
0x312a   :  { %5772 = vrot.lane.b32.xlu0 %v5720_v21, %s9484_s26 }
0x312d   :  { %5730 = vrot.lane.b32.xlu1 %v5723_v34, %s9478_s19 }
0x312e   :  { %5728 = vrot.lane.b32.xlu0 %v5722_v18, %s9478_s19 }
0x3131   :  { %5798 = vrot.lane.b32.xlu1 %v5723_v34, %s9479_s22 }
0x3132   :  { %5796 = vrot.lane.b32.xlu0 %v5722_v18, %s9479_s22 }
0x3135   :  { %5746 = vrot.lane.b32.xlu1 %v5723_v34, %s9480_s23 }
0x3136   :  { %5744 = vrot.lane.b32.xlu0 %v5722_v18, %s9480_s23 }
0x3139   :  { %5814 = vrot.lane.b32.xlu1 %v5723_v34, %s9481_s0 }
0x313a   :  { %5812 = vrot.lane.b32.xlu0 %v5722_v18, %s9481_s0 }
0x313d   :  { %5762 = vrot.lane.b32.xlu1 %v5723_v34, %s9482_s24 }
0x313e   :  { %5760 = vrot.lane.b32.xlu0 %v5722_v18, %s9482_s24 }
0x3141   :  { %5830 = vrot.lane.b32.xlu1 %v5723_v34, %s9483_s25 }
0x3142   :  { %5828 = vrot.lane.b32.xlu0 %v5722_v18, %s9483_s25 }
0x3145   :  { %5778 = vrot.lane.b32.xlu1 %v5723_v34, %s9484_s26 }
0x3146   :  { %5776 = vrot.lane.b32.xlu0 %v5722_v18, %s9484_s26 }
0x3149   :  { %5842 = vrot.lane.b32.xlu1 %v5721_v17, %s9485_s11 }
0x314a   :  { %5840 = vrot.lane.b32.xlu0 %v5720_v21, %s9485_s11  ;;  %v11560_v21 = vld [vmem:[%s12079_s2 + $0x2] ss:$0 sm:$0xff] }
0x314d   :  { %5846 = vrot.lane.b32.xlu1 %v5723_v34, %s9485_s11 }
0x314e   :  { %5844 = vrot.lane.b32.xlu0 %v5722_v18, %s9485_s11 }
0x3151   :  { %6033 = vperm.xlu1 %9221, %v7923_v40  }
0x3152   :  { %6028 = vperm.xlu0 %9220, %v7922_v38  }
0x3155   :  { %6043 = vperm.xlu1 %9221, %v7925_v39  }
0x3156   :  { %6038 = vperm.xlu0 %9220, %v7924_v27  }
0x3183   :  { %v5727_v37 = vpop.permute.xlu1 %5726 }
0x3184   :  { %v5733_v6 = vmul.f32 %v11526_v42, %v5727_v37  ;;  %v5725_v43 = vpop.permute.xlu0 %5724 }
0x3185   :  { %v5732_v46 = vmul.f32 %v11526_v42, %v5725_v43 }
0x3187   :  { %v5736_v48 = vpack.c.bf16 %v5733_v6, %v5732_v46  ;;  %v5795_v35 = vpop.permute.xlu1 %5794  ;;  %v11578_v6 = vld [vmem:[%s12079_s2 + $0x3] ss:$0 sm:$0xff] }
0x3188   :  { %v5793_v51 = vpop.permute.xlu0 %5792  ;;  %v5801_v0 = vmul.f32 %v11533_v4, %v5795_v35 }
0x3189   :  { %8492 = vmatpush3.bf16.msra.mxu0 %v5736_v48  ;;  %v5800_v55 = vmul.f32 %v11533_v4, %v5793_v51 }
0x318a   :  { %8493 = vmatprep.subr.bf16.mxu0 %v5789_v26 }
0x318b   :  { %v5743_v41 = vpop.permute.xlu1 %5742  ;;  %v5804_v22 = vpack.c.bf16 %v5801_v0, %v5800_v55  ;;  %v11589_v0 = vld [vmem:[%s12079_s2 + $0x8] ss:$0 sm:$0xff] }
0x318c   :  { %v5741_v52 = vpop.permute.xlu0 %5740  ;;  %v5749_v58 = vmul.f32 %v11542_v14, %v5743_v41 }
0x318d   :  { %v5748_v44 = vmul.f32 %v11542_v14, %v5741_v52 }
0x318f   :  { %v5811_v32 = vpop.permute.xlu1 %5810  ;;  %v5752_v13 = vpack.c.bf16 %v5749_v58, %v5748_v44  ;;  %v9313_v58 = vld [vmem:[%s12078_s1 + $0x22c] ss:$12 sps:$4 sm:$0xff]  }
0x3190   :  { %v5809_v61 = vpop.permute.xlu0 %5808  ;;  %v5817_v8 = vmul.f32 %v11551_v1, %v5811_v32 }
0x3191   :  { %v5816_v29 = vmul.f32 %v11551_v1, %v5809_v61 }
0x3193   :  { %v5759_v53 = vpop.permute.xlu1 %5758  ;;  %v5820_v16 = vpack.c.bf16 %v5817_v8, %v5816_v29 }
0x3194   :  { %v5757_v47 = vpop.permute.xlu0 %5756  ;;  %v5765_v15 = vmul.f32 %v11560_v21, %v5759_v53 }
0x3195   :  { %v5764_v63 = vmul.f32 %v11560_v21, %v5757_v47 }
0x3197   :  { %v5827_v62 = vpop.permute.xlu1 %5826  ;;  %v5768_v34 = vpack.c.bf16 %v5765_v15, %v5764_v63 }
0x3198   :  { %v5825_v54 = vpop.permute.xlu0 %5824  ;;  %v5833_v40 = vmul.f32 %v11569_v33, %v5827_v62 }
0x3199   :  { %v5832_v38 = vmul.f32 %v11569_v33, %v5825_v54 }
0x319b   :  { %v5775_v50 = vpop.permute.xlu1 %5774  ;;  %v5836_v51 = vpack.c.bf16 %v5833_v40, %v5832_v38 }
0x319c   :  { %v5773_v9 = vpop.permute.xlu0 %5772  ;;  %v5781_v43 = vmul.f32 %v11578_v6, %v5775_v50 }
0x319d   :  { %v5780_v46 = vmul.f32 %v11578_v6, %v5773_v9 }
0x319f   :  { %v5731_v5 = vpop.permute.xlu1 %5730  ;;  %v5784_v61 = vpack.c.bf16 %v5781_v43, %v5780_v46 }
0x31a0   :  { %v5735_v25 = vmul.f32 %v11526_v42, %v5731_v5  ;;  %v5729_v19 = vpop.permute.xlu0 %5728 }
0x31a1   :  { %v5734_v56 = vmul.f32 %v11526_v42, %v5729_v19  ;;  %v9310_v19 = vld [vmem:[%s12078_s1 + $0x210] ss:$12 sps:$4 sm:$0xff]  }
0x31a3   :  { %v5737_v20 = vpack.c.bf16 %v5735_v25, %v5734_v56  ;;  %v5799_v24 = vpop.permute.xlu1 %5798 }
0x31a4   :  { %v5803_v45 = vmul.f32 %v11533_v4, %v5799_v24  ;;  %v5797_v59 = vpop.permute.xlu0 %5796 }
0x31a5   :  { %v5802_v60 = vmul.f32 %v11533_v4, %v5797_v59  ;;  %8494 = vmatpush3.bf16.msra.mxu0 %v5737_v20 }
0x31a6   :  { %8495 = vmatprep.subr.bf16.mxu0 %v5804_v22 }
0x31a7   :  { %v5805_v7 = vpack.c.bf16 %v5803_v45, %v5802_v60  ;;  %v5747_v49 = vpop.permute.xlu1 %5746  ;;  %v9315_v60 = vld [vmem:[%s12078_s1 + $0x228] ss:$12 sps:$4 sm:$0xff]  }
0x31a8   :  { %v5751_v17 = vmul.f32 %v11542_v14, %v5747_v49  ;;  %v5745_v11 = vpop.permute.xlu0 %5744 }
0x31a9   :  { %v5750_v2 = vmul.f32 %v11542_v14, %v5745_v11  ;;  %8496 = vmatpush3.bf16.msra.mxu0 %v5752_v13  ;;  %v9317_v13 = vld [vmem:[%s12078_s1 + $0x230] ss:$12 sps:$4 sm:$0xff]  }
0x31aa   :  { %8497 = vmatprep.subr.bf16.mxu0 %v5805_v7 }
0x31ab   :  { %v5753_v28 = vpack.c.bf16 %v5751_v17, %v5750_v2  ;;  %v5815_v30 = vpop.permute.xlu1 %5814 }
0x31ac   :  { %v5819_v31 = vmul.f32 %v11551_v1, %v5815_v30  ;;  %v5813_v23 = vpop.permute.xlu0 %5812 }
0x31ad   :  { %v5818_v18 = vmul.f32 %v11551_v1, %v5813_v23  ;;  %8498 = vmatpush3.bf16.msra.mxu0 %v5753_v28 }
0x31ae   :  { %8499 = vmatprep.subr.bf16.mxu0 %v5820_v16 }
0x31af   :  { %v5821_v26 = vpack.c.bf16 %v5819_v31, %v5818_v18  ;;  %v5763_v36 = vpop.permute.xlu1 %5762 }
0x31b0   :  { %v5767_v39 = vmul.f32 %v11560_v21, %v5763_v36  ;;  %v5761_v27 = vpop.permute.xlu0 %5760 }
0x31b1   :  { %v5766_v37 = vmul.f32 %v11560_v21, %v5761_v27  ;;  %8500 = vmatpush3.bf16.msra.mxu0 %v5768_v34 }
0x31b2   :  { %8501 = vmatprep.subr.bf16.mxu0 %v5821_v26 }
0x31b3   :  { %v5769_v48 = vpack.c.bf16 %v5767_v39, %v5766_v37  ;;  %v5831_v35 = vpop.permute.xlu1 %5830 }
0x31b4   :  { %v5835_v41 = vmul.f32 %v11569_v33, %v5831_v35  ;;  %v5829_v52 = vpop.permute.xlu0 %5828 }
0x31b5   :  { %v5834_v32 = vmul.f32 %v11569_v33, %v5829_v52  ;;  %8502 = vmatpush3.bf16.msra.mxu0 %v5769_v48 }
0x31b6   :  { %8503 = vmatprep.subr.bf16.mxu0 %v5836_v51 }
0x31b7   :  { %v5837_v53 = vpack.c.bf16 %v5835_v41, %v5834_v32  ;;  %v5779_v47 = vpop.permute.xlu1 %5778 }
0x31b8   :  { %v5783_v62 = vmul.f32 %v11578_v6, %v5779_v47  ;;  %v5777_v54 = vpop.permute.xlu0 %5776 }
0x31b9   :  { %v5782_v50 = vmul.f32 %v11578_v6, %v5777_v54  ;;  %8504 = vmatpush3.bf16.msra.mxu0 %v5784_v61 }
0x31ba   :  { %8505 = vmatprep.subr.bf16.mxu0 %v5837_v53 }
0x31bb   :  { %v5785_v9 = vpack.c.bf16 %v5783_v62, %v5782_v50  ;;  %v5843_v5 = vpop.permute.xlu1 %5842 }
0x31bc   :  { %v5849_v55 = vmul.f32 %v11589_v0, %v5843_v5  ;;  %v5841_v25 = vpop.permute.xlu0 %5840 }
0x31bd   :  { %v5848_v56 = vmul.f32 %v11589_v0, %v5841_v25  ;;  %8506 = vmatpush3.bf16.msra.mxu0 %v5785_v9 }
0x31bf   :  { %v5852_v44 = vpack.c.bf16 %v5849_v55, %v5848_v56  ;;  %v5847_v20 = vpop.permute.xlu1 %5846 }
0x31c0   :  { %v5851_v24 = vmul.f32 %v11589_v0, %v5847_v20  ;;  %v5845_v22 = vpop.permute.xlu0 %5844  ;;  %5952 = vmatmul.mubr.bf16.vlgmr.msra.gmra.mrb[112].mxu0 %v9310_v19 }
0x31c1   :  { %v5850_v45 = vmul.f32 %v11589_v0, %v5845_v22  ;;  %8963 = vmatprep.subr.bf16.mxu1 %v5852_v44  ;;  %5959 = vmatprep.mubr.bf16.mxu0 %v9313_v58 }
0x31c2   :  { %8964 = vmatpush3.bf16.msra.mxu1 %v5852_v44 }
0x31c3   :  { %v5853_v59 = vpack.c.bf16 %v5851_v24, %v5850_v45 }
0x31c5   :  { %8965 = vmatprep.subr.bf16.mxu1 %v5853_v59 }
0x31c6   :  { %8966 = vmatpush3.bf16.msra.mxu1 %v5853_v59 }
0x31c8   :  { %5960 = vmatmul.mubr.bf16.gmra.mrb[116].mxu0 %v9315_v60 }
0x31c9   :  { %8968 = vmatmul.mubr.msk.bf16.vlgmr.msra.gmra.mrb[84].mxu1 %vm297_vm0, %v9317_v13 }
0x31d0   :  { %v6034_v2 = vpop.permute.xlu1 %6033 }
0x31d1   :  { %v6029_v15 = vpop.permute.xlu0 %6028 }
0x31d4   :  { %v6044_v52 = vpop.permute.xlu1 %6043 }
0x31d5   :  { %v6039_v46 = vpop.permute.xlu0 %6038 }
0x3293   :  { %v8507_v7 = vpop.f32.mrb[112].mxu0 }
0x3294   :  { %v8508_v49 = vpop.f32.mrb[113].mxu0 }
0x3295   :  { %v8509_v8 = vadd.f32 %v8508_v49, %v8507_v7  ;;  %v8510_v29 = vpop.f32.mrb[114].mxu0 }
0x3296   :  { %v8511_v17 = vpop.f32.mrb[115].mxu0 }
0x3297   :  { %v8512_v11 = vadd.f32 %v8511_v17, %v8510_v29 }
0x329b   :  { %v8513_v63 = vpop.f32.mrb[116].mxu0 }
0x329c   :  { %v8514_v28 = vpop.f32.mrb[117].mxu0  ;;  %v8969_v30 = vpop.f32.mrb[84].mxu1 }
0x329d   :  { %v8515_v16 = vadd.f32 %v8514_v28, %v8513_v63  ;;  %v8516_v31 = vpop.f32.mrb[118].mxu0  ;;  %v6002_v23 = vpop.f32.mrb[85].mxu1 }
0x329e   :  { %v6003_v18 = vadd.f32 %v8509_v8, %v6002_v23  ;;  %v8517_v34 = vpop.f32.mrb[119].mxu0  ;;  %v8970_v26 = vpop.f32.mrb[86].mxu1 }
0x329f   :  { %v6011_v36 = vadd.f32 %v8969_v30, %v8515_v16  ;;  %v8518_v40 = vadd.f32 %v8517_v34, %v8516_v31  ;;  %v6005_v38 = vpop.f32.mrb[87].mxu1 }
0x32a0   :  { %v6017_v39 = vadd.f32 %v6003_v18, %v11284_v3  ;;  %v6006_v27 = vadd.f32 %v8512_v11, %v6005_v38 }
0x32a1   :  { %v6019_v37 = vadd.f32 %v6011_v36, %v11320_v10  ;;  %v6014_v43 = vadd.f32 %v8970_v26, %v8518_v40 }
0x32a2   :  { %v6046_v48 = vadd.f32 %v6029_v15, %v6017_v39  ;;  %v6018_v35 = vadd.f32 %v6006_v27, %v11282_v57  ;;  %v9320_v57 = vld [vmem:[%s12078_s1 + $0x244] ss:$12 sps:$4 sm:$0xff]  }
0x32a3   :  { %v6048_v51 = vadd.f32 %v6039_v46, %v6019_v37  ;;  %v6020_v41 = vadd.f32 %v6014_v43, %v11318_v12  ;;  %6281 = vmatprep.mubr.bf16.mxu1 %v9320_v57  ;;  %v9321_v12 = vld [vmem:[%s12078_s1 + $0x248] ss:$12 sps:$4 sm:$0xff]  }
0x32a4   :  { %v6050_v32 = vmax.f32 %v6046_v48, 0.0  ;;  %v6047_v61 = vadd.f32 %v6034_v2, %v6018_v35  ;;  %8975 = vmatprep.mubr.msk.bf16.mxu0 %vm297_vm0, %v9321_v12 }
0x32a5   :  { %v6049_v53 = vadd.f32 %v6044_v52, %v6020_v41  ;;  %v6052_v62 = vmax.f32 %v6048_v51, 0.0 }
0x32a6   :  { %v6051_v47 = vmax.f32 %v6047_v61, 0.0  ;;  %6054 = vrot.lane.b32.xlu0 %v6050_v32, %s9478_s19 }
0x32a7   :  { %v6053_v3 = vmax.f32 %v6049_v53, 0.0 }
0x32a8   :  { %6056 = vrot.lane.b32.xlu1 %v6051_v47, %s9478_s19  ;;  %v6118_v10 = vpack.c.bf16 %v6051_v47, %v6050_v32 }
0x32a9   :  { %v6119_v54 = vpack.c.bf16 %v6053_v3, %v6052_v62 }
0x32aa   :  { %6122 = vrot.lane.b32.xlu0 %v6050_v32, %s9479_s22  ;;  %8523 = vmatprep.subr.bf16.mxu1 %v6118_v10 }
0x32ac   :  { %6124 = vrot.lane.b32.xlu1 %v6051_v47, %s9479_s22 }
0x32ae   :  { %6070 = vrot.lane.b32.xlu0 %v6050_v32, %s9480_s23 }
0x32b0   :  { %6072 = vrot.lane.b32.xlu1 %v6051_v47, %s9480_s23 }
0x32b2   :  { %6138 = vrot.lane.b32.xlu0 %v6050_v32, %s9481_s0 }
0x32b4   :  { %6140 = vrot.lane.b32.xlu1 %v6051_v47, %s9481_s0 }
0x32b6   :  { %6086 = vrot.lane.b32.xlu0 %v6050_v32, %s9482_s24 }
0x32b8   :  { %6088 = vrot.lane.b32.xlu1 %v6051_v47, %s9482_s24 }
0x32ba   :  { %6154 = vrot.lane.b32.xlu0 %v6050_v32, %s9483_s25 }
0x32bc   :  { %6156 = vrot.lane.b32.xlu1 %v6051_v47, %s9483_s25 }
0x32be   :  { %6102 = vrot.lane.b32.xlu0 %v6050_v32, %s9484_s26 }
0x32c0   :  { %6104 = vrot.lane.b32.xlu1 %v6051_v47, %s9484_s26 }
0x32c2   :  { %6058 = vrot.lane.b32.xlu0 %v6052_v62, %s9478_s19 }
0x32c4   :  { %6060 = vrot.lane.b32.xlu1 %v6053_v3, %s9478_s19 }
0x32c6   :  { %6126 = vrot.lane.b32.xlu0 %v6052_v62, %s9479_s22 }
0x32c8   :  { %6128 = vrot.lane.b32.xlu1 %v6053_v3, %s9479_s22 }
0x32ca   :  { %6074 = vrot.lane.b32.xlu0 %v6052_v62, %s9480_s23 }
0x32cc   :  { %6076 = vrot.lane.b32.xlu1 %v6053_v3, %s9480_s23 }
0x32ce   :  { %6142 = vrot.lane.b32.xlu0 %v6052_v62, %s9481_s0 }
0x32d0   :  { %6144 = vrot.lane.b32.xlu1 %v6053_v3, %s9481_s0 }
0x32d2   :  { %6090 = vrot.lane.b32.xlu0 %v6052_v62, %s9482_s24 }
0x32d4   :  { %6092 = vrot.lane.b32.xlu1 %v6053_v3, %s9482_s24 }
0x32d6   :  { %6158 = vrot.lane.b32.xlu0 %v6052_v62, %s9483_s25 }
0x32d8   :  { %6160 = vrot.lane.b32.xlu1 %v6053_v3, %s9483_s25 }
0x32da   :  { %6106 = vrot.lane.b32.xlu0 %v6052_v62, %s9484_s26 }
0x32dc   :  { %6108 = vrot.lane.b32.xlu1 %v6053_v3, %s9484_s26 }
0x32de   :  { %6170 = vrot.lane.b32.xlu0 %v6050_v32, %s9485_s11 }
0x32e0   :  { %6172 = vrot.lane.b32.xlu1 %v6051_v47, %s9485_s11 }
0x32e2   :  { %6174 = vrot.lane.b32.xlu0 %v6052_v62, %s9485_s11 }
0x32e4   :  { %6176 = vrot.lane.b32.xlu1 %v6053_v3, %s9485_s11 }
0x3318   :  { %v6055_v50 = vpop.permute.xlu0 %6054 }
0x3319   :  { %v6062_v5 = vmul.f32 %v11526_v42, %v6055_v50 }
0x331a   :  { %v6057_v9 = vpop.permute.xlu1 %6056 }
0x331b   :  { %v6063_v55 = vmul.f32 %v11526_v42, %v6057_v9 }
0x331c   :  { %v6123_v25 = vpop.permute.xlu0 %6122 }
0x331d   :  { %v6066_v19 = vpack.c.bf16 %v6063_v55, %v6062_v5  ;;  %v6130_v2 = vmul.f32 %v11533_v4, %v6123_v25 }
0x331e   :  { %v6125_v56 = vpop.permute.xlu1 %6124 }
0x331f   :  { %8524 = vmatpush3.bf16.msra.mxu1 %v6066_v19  ;;  %v6131_v8 = vmul.f32 %v11533_v4, %v6125_v56 }
0x3320   :  { %v6071_v58 = vpop.permute.xlu0 %6070  ;;  %8525 = vmatprep.subr.bf16.mxu1 %v6119_v54 }
0x3321   :  { %v6134_v30 = vpack.c.bf16 %v6131_v8, %v6130_v2  ;;  %v6078_v31 = vmul.f32 %v11542_v14, %v6071_v58 }
0x3322   :  { %v6073_v44 = vpop.permute.xlu1 %6072 }
0x3323   :  { %v6079_v63 = vmul.f32 %v11542_v14, %v6073_v44 }
0x3324   :  { %v6139_v20 = vpop.permute.xlu0 %6138 }
0x3325   :  { %v6082_v26 = vpack.c.bf16 %v6079_v63, %v6078_v31  ;;  %v6146_v37 = vmul.f32 %v11551_v1, %v6139_v20  ;;  %v11699_v31 = vld [vmem:[%s12080_s3] sm:$0xff] }
0x3326   :  { %v6141_v24 = vpop.permute.xlu1 %6140 }
0x3327   :  { %v6147_v40 = vmul.f32 %v11551_v1, %v6141_v24 }
0x3328   :  { %v6087_v22 = vpop.permute.xlu0 %6086 }
0x3329   :  { %v6150_v35 = vpack.c.bf16 %v6147_v40, %v6146_v37  ;;  %v6094_v41 = vmul.f32 %v11560_v21, %v6087_v22 }
0x332a   :  { %v6089_v45 = vpop.permute.xlu1 %6088 }
0x332b   :  { %v6095_v46 = vmul.f32 %v11560_v21, %v6089_v45 }
0x332c   :  { %v6155_v59 = vpop.permute.xlu0 %6154 }
0x332d   :  { %v6098_v53 = vpack.c.bf16 %v6095_v46, %v6094_v41  ;;  %v6162_v57 = vmul.f32 %v11569_v33, %v6155_v59 }
0x332e   :  { %v6157_v60 = vpop.permute.xlu1 %6156 }
0x332f   :  { %v6163_v62 = vmul.f32 %v11569_v33, %v6157_v60 }
0x3330   :  { %v6103_v13 = vpop.permute.xlu0 %6102 }
0x3331   :  { %v6166_v5 = vpack.c.bf16 %v6163_v62, %v6162_v57  ;;  %v6110_v25 = vmul.f32 %v11578_v6, %v6103_v13  ;;  %v9318_v13 = vld [vmem:[%s12078_s1 + $0x240] ss:$12 sps:$4 sm:$0xff]  }
0x3332   :  { %v6105_v7 = vpop.permute.xlu1 %6104 }
0x3333   :  { %v6111_v50 = vmul.f32 %v11578_v6, %v6105_v7 }
0x3334   :  { %v6059_v49 = vpop.permute.xlu0 %6058 }
0x3335   :  { %v6064_v17 = vmul.f32 %v11526_v42, %v6059_v49  ;;  %v6114_v44 = vpack.c.bf16 %v6111_v50, %v6110_v25  ;;  %v11713_v50 = vld [vmem:[%s12080_s3 + $0x10] sm:$0xff] }
0x3336   :  { %v6061_v29 = vpop.permute.xlu1 %6060 }
0x3337   :  { %v6065_v11 = vmul.f32 %v11526_v42, %v6061_v29  ;;  %v9323_v29 = vld [vmem:[%s12078_s1 + $0x25c] ss:$12 sps:$4 sm:$0xff]  }
0x3338   :  { %v6127_v15 = vpop.permute.xlu0 %6126 }
0x3339   :  { %v6067_v28 = vpack.c.bf16 %v6065_v11, %v6064_v17  ;;  %v6132_v23 = vmul.f32 %v11533_v4, %v6127_v15 }
0x333a   :  { %v6129_v16 = vpop.permute.xlu1 %6128 }
0x333b   :  { %v6133_v18 = vmul.f32 %v11533_v4, %v6129_v16  ;;  %8526 = vmatpush3.bf16.msra.mxu1 %v6067_v28  ;;  %v9322_v16 = vld [vmem:[%s12078_s1 + $0x260] ss:$12 sps:$4 sm:$0xff]  }
0x333c   :  { %v6075_v34 = vpop.permute.xlu0 %6074  ;;  %8527 = vmatprep.subr.bf16.mxu1 %v6134_v30  ;;  %v9325_v30 = vld [vmem:[%s12078_s1 + $0x258] ss:$12 sps:$4 sm:$0xff]  }
0x333d   :  { %v6135_v36 = vpack.c.bf16 %v6133_v18, %v6132_v23  ;;  %v6080_v39 = vmul.f32 %v11542_v14, %v6075_v34 }
0x333e   :  { %v6077_v38 = vpop.permute.xlu1 %6076 }
0x333f   :  { %v6081_v27 = vmul.f32 %v11542_v14, %v6077_v38  ;;  %8528 = vmatpush3.bf16.msra.mxu1 %v6082_v26 }
0x3340   :  { %v6143_v43 = vpop.permute.xlu0 %6142  ;;  %8529 = vmatprep.subr.bf16.mxu1 %v6135_v36 }
0x3341   :  { %v6083_v48 = vpack.c.bf16 %v6081_v27, %v6080_v39  ;;  %v6148_v52 = vmul.f32 %v11551_v1, %v6143_v43 }
0x3342   :  { %v6145_v51 = vpop.permute.xlu1 %6144 }
0x3343   :  { %v6149_v32 = vmul.f32 %v11551_v1, %v6145_v51  ;;  %8530 = vmatpush3.bf16.msra.mxu1 %v6083_v48 }
0x3344   :  { %v6091_v61 = vpop.permute.xlu0 %6090  ;;  %8531 = vmatprep.subr.bf16.mxu1 %v6150_v35 }
0x3345   :  { %v6151_v47 = vpack.c.bf16 %v6149_v32, %v6148_v52  ;;  %v6096_v10 = vmul.f32 %v11560_v21, %v6091_v61 }
0x3346   :  { %v6093_v3 = vpop.permute.xlu1 %6092 }
0x3347   :  { %v6097_v54 = vmul.f32 %v11560_v21, %v6093_v3  ;;  %8532 = vmatpush3.bf16.msra.mxu1 %v6098_v53 }
0x3348   :  { %v6159_v12 = vpop.permute.xlu0 %6158  ;;  %8533 = vmatprep.subr.bf16.mxu1 %v6151_v47 }
0x3349   :  { %v6099_v9 = vpack.c.bf16 %v6097_v54, %v6096_v10  ;;  %v6164_v19 = vmul.f32 %v11569_v33, %v6159_v12  ;;  %v11706_v12 = vld [vmem:[%s12080_s3 + $0x8] sm:$0xff] }
0x334a   :  { %v6161_v55 = vpop.permute.xlu1 %6160 }
0x334b   :  { %v6165_v56 = vmul.f32 %v11569_v33, %v6161_v55  ;;  %8534 = vmatpush3.bf16.msra.mxu1 %v6099_v9  ;;  %v11720_v9 = vld [vmem:[%s12080_s3 + $0x18] sm:$0xff] }
0x334c   :  { %v6107_v58 = vpop.permute.xlu0 %6106  ;;  %8535 = vmatprep.subr.bf16.mxu1 %v6166_v5 }
0x334d   :  { %v6167_v20 = vpack.c.bf16 %v6165_v56, %v6164_v19  ;;  %v6112_v22 = vmul.f32 %v11578_v6, %v6107_v58 }
0x334e   :  { %v6109_v24 = vpop.permute.xlu1 %6108 }
0x334f   :  { %v6113_v45 = vmul.f32 %v11578_v6, %v6109_v24  ;;  %8536 = vmatpush3.bf16.msra.mxu1 %v6114_v44 }
0x3350   :  { %v6171_v59 = vpop.permute.xlu0 %6170  ;;  %8537 = vmatprep.subr.bf16.mxu1 %v6167_v20 }
0x3351   :  { %v6115_v60 = vpack.c.bf16 %v6113_v45, %v6112_v22  ;;  %v6178_v49 = vmul.f32 %v11589_v0, %v6171_v59 }
0x3352   :  { %v6173_v7 = vpop.permute.xlu1 %6172 }
0x3353   :  { %v6179_v8 = vmul.f32 %v11589_v0, %v6173_v7  ;;  %8538 = vmatpush3.bf16.msra.mxu1 %v6115_v60 }
0x3354   :  { %v6175_v17 = vpop.permute.xlu0 %6174 }
0x3355   :  { %v6182_v11 = vpack.c.bf16 %v6179_v8, %v6178_v49  ;;  %v6180_v15 = vmul.f32 %v11589_v0, %v6175_v17  ;;  %v7954_v8 = vld [vmem:[%s12081_s5 + $0x100] sm:$0xff] }
0x3356   :  { %v6177_v2 = vpop.permute.xlu1 %6176  ;;  %6282 = vmatmul.mubr.bf16.vlgmr.msra.gmra.mrb[88].mxu1 %v9318_v13 }
0x3357   :  { %v6181_v63 = vmul.f32 %v11589_v0, %v6177_v2  ;;  %8971 = vmatprep.subr.bf16.mxu0 %v6182_v11  ;;  %6289 = vmatprep.mubr.bf16.mxu1 %v9323_v29  ;;  %v7955_v29 = vld [vmem:[%s12081_s5 + $0x108] sm:$0xff] }
0x3358   :  { %8972 = vmatpush3.bf16.msra.mxu0 %v6182_v11 }
0x3359   :  { %v6183_v28 = vpack.c.bf16 %v6181_v63, %v6180_v15 }
0x335b   :  { %8973 = vmatprep.subr.bf16.mxu0 %v6183_v28 }
0x335c   :  { %8974 = vmatpush3.bf16.msra.mxu0 %v6183_v28 }
0x335e   :  { %6290 = vmatmul.mubr.bf16.gmra.mrb[92].mxu1 %v9325_v30 }
0x335f   :  { %8976 = vmatmul.mubr.msk.bf16.vlgmr.msra.gmra.mrb[120].mxu0 %vm297_vm0, %v9322_v16 }
0x3360   :  { %8987 = vmatprep.mubr.msk.f32.mxu0 %vm297_vm0, %v11699_v31 }
0x3429   :  { %v8539_v23 = vpop.f32.mrb[88].mxu1 }
0x342a   :  { %v8540_v18 = vpop.f32.mrb[89].mxu1 }
0x342b   :  { %v8541_v34 = vadd.f32 %v8540_v18, %v8539_v23  ;;  %v8542_v26 = vpop.f32.mrb[90].mxu1 }
0x342c   :  { %v8543_v36 = vpop.f32.mrb[91].mxu1 }
0x342d   :  { %v8544_v40 = vadd.f32 %v8543_v36, %v8542_v26 }
0x3431   :  { %v8545_v38 = vpop.f32.mrb[92].mxu1 }
0x3432   :  { %v8977_v39 = vpop.f32.mrb[120].mxu0  ;;  %v8546_v27 = vpop.f32.mrb[93].mxu1 }
0x3433   :  { %v6332_v37 = vpop.f32.mrb[121].mxu0  ;;  %v8547_v43 = vadd.f32 %v8546_v27, %v8545_v38  ;;  %v8548_v46 = vpop.f32.mrb[94].mxu1  ;;  %v7951_v38 = vld [vmem:[%s12082_s4 + $0x108] sm:$0xff] }
0x3434   :  { %v6333_v48 = vadd.f32 %v8541_v34, %v6332_v37  ;;  %v8978_v35 = vpop.f32.mrb[122].mxu0  ;;  %v8549_v51 = vpop.f32.mrb[95].mxu1 }
0x3435   :  { %v6341_v41 = vadd.f32 %v8977_v39, %v8547_v43  ;;  %v6335_v52 = vpop.f32.mrb[123].mxu0  ;;  %v8550_v32 = vadd.f32 %v8549_v51, %v8548_v46  ;;  %v7950_v39 = vld [vmem:[%s12082_s4 + $0x100] sm:$0xff] }
0x3436   :  { %v6336_v61 = vadd.f32 %v8544_v40, %v6335_v52  ;;  %6347 = vadd.xlane.f32.xlu0 %v6333_v48 }
0x3437   :  { %v6344_v53 = vadd.f32 %v8978_v35, %v8550_v32  ;;  %v7952_v35 = vld [vmem:[%s12082_s4 + $0x110] sm:$0xff] }
0x3438   :  { %6349 = vadd.xlane.f32.xlu1 %v6336_v61 }
0x343a   :  { %6351 = vadd.xlane.f32.xlu0 %v6341_v41 }
0x343e   :  { %6353 = vadd.xlane.f32.xlu0 %v6344_v53 }
0x34c3   :  { %v6348_v47 = vpop.xlane.xlu0 %6347 }
0x34c5   :  { %v6350_v62 = vpop.xlane.xlu1 %6349 }
0x34c6   :  { %v9179_v3 = vpack.c.bf16 %v6350_v62, %v6348_v47 }
0x34c7   :  { %v6352_v10 = vpop.xlane.xlu0 %6351 }
0x34c8   :  { %9180 = vmatprep.subr.bf16.mxu0 %v9179_v3 }
0x34c9   :  { %9182 = vmatpush3.bf16.msra.mxu0 %v9179_v3 }
0x34cb   :  { %v6354_v54 = vpop.xlane.xlu0 %6353 }
0x34cc   :  { %v9183_v57 = vpack.c.bf16 %v6354_v54, %v6352_v10 }
0x34ce   :  { %9184 = vmatprep.subr.bf16.mxu0 %v9183_v57 }
0x34cf   :  { %9186 = vmatpush3.bf16.msra.mxu0 %v9183_v57 }
0x34d2   :  { %8988 = vmatmul.mubr.msk.f32.vlgmr.msra.gmra.mrb[124].mxu0 %vm297_vm0, %v11706_v12 }
0x34d3   :  { %8990 = vmatprep.mubr.msk.f32.mxu0 %vm297_vm0, %v11713_v50 }
0x34d6   :  { %8991 = vmatmul.mubr.msk.f32.gmra.mrb[126].mxu0 %vm297_vm0, %v11720_v9 }
0x34d7   :  { %9001 = vmatprep.mubr.msk.f32.mxu0 %vm297_vm0, %v11699_v31 }
0x35a5   :  { %v8989_v5 = vpop.f32.mrb[124].mxu0 }
0x35a6   :  { %6447 = vperm.xlu0 %9220, %v8989_v5   ;;  %v6421_v55 = vpop.f32.mrb[125].mxu0 }
0x35a7   :  { %6442 = vperm.xlu1 %9221, %v6421_v55  }
0x35a9   :  { %v8992_v25 = vpop.f32.mrb[126].mxu0 }
0x35aa   :  { %v6431_v19 = vpop.f32.mrb[127].mxu0 }
0x35ab   :  { %6452 = vperm.xlu1 %9221, %v6431_v19  }
0x35af   :  { %6457 = vperm.xlu1 %9221, %v8992_v25  }
0x3625   :  { %v6448_v56 = vpop.permute.xlu0 %6447 }
0x3626   :  { %v11726_v58 = vsub.f32 %v6336_v61, %v6448_v56  ;;  %v6443_v44 = vpop.permute.xlu1 %6442  ;;  %v7956_v61 = vld [vmem:[%s12081_s5 + $0x110] sm:$0xff] }
0x3627   :  { %v11728_v20 = vsub.f32 %v6333_v48, %v6443_v44  ;;  %v7953_v48 = vld [vmem:[%s12082_s4 + $0x118] sm:$0xff] }
0x3628   :  { %v6465_v24 = vmul.f32 %v11726_v58, %v11726_v58 }
0x3629   :  { %v6464_v22 = vmul.f32 %v11728_v20, %v11728_v20 }
0x362a   :  { %6470 = vadd.xlane.f32.xlu1 %v6465_v24  ;;  %v6453_v45 = vpop.permute.xlu1 %6452 }
0x362b   :  { %v11734_v59 = vsub.f32 %v6341_v41, %v6453_v45  ;;  %6468 = vadd.xlane.f32.xlu0 %v6464_v22 }
0x362d   :  { %v6466_v60 = vmul.f32 %v11734_v59, %v11734_v59 }
0x362e   :  { %v6458_v7 = vpop.permute.xlu1 %6457 }
0x362f   :  { %v11738_v13 = vsub.f32 %v6344_v53, %v6458_v7  ;;  %6472 = vadd.xlane.f32.xlu0 %v6466_v60  ;;  %v7957_v53 = vld [vmem:[%s12081_s5 + $0x118] sm:$0xff] }
0x3631   :  { %v6467_v49 = vmul.f32 %v11738_v13, %v11738_v13 }
0x3633   :  { %6474 = vadd.xlane.f32.xlu0 %v6467_v49 }
0x363b   :  { %6605 = vperm.xlu1 %9221, %v7954_v8   ;;  %v9329_v8 = vld [vmem:[%s12078_s1 + $0x278] ss:$12 sps:$4 sm:$0xff]  }
0x363f   :  { %6610 = vperm.xlu1 %9221, %v7955_v29  }
0x36b7   :  { %v6471_v17 = vpop.xlane.xlu1 %6470 }
0x36b8   :  { %v6469_v11 = vpop.xlane.xlu0 %6468 }
0x36b9   :  { %v9187_v2 = vpack.c.bf16 %v6471_v17, %v6469_v11 }
0x36bb   :  { %9188 = vmatprep.subr.bf16.mxu0 %v9187_v2  ;;  %v6606_v47 = vpop.permute.xlu1 %6605 }
0x36bc   :  { %v6473_v15 = vpop.xlane.xlu0 %6472  ;;  %9190 = vmatpush3.bf16.msra.mxu0 %v9187_v2 }
0x36bf   :  { %v6611_v62 = vpop.permute.xlu1 %6610 }
0x36c0   :  { %v6475_v63 = vpop.xlane.xlu0 %6474 }
0x36c1   :  { %v9191_v28 = vpack.c.bf16 %v6475_v63, %v6473_v15 }
0x36c3   :  { %9192 = vmatprep.subr.bf16.mxu0 %v9191_v28 }
0x36c4   :  { %9194 = vmatpush3.bf16.msra.mxu0 %v9191_v28 }
0x36c7   :  { %9002 = vmatmul.mubr.msk.f32.vlgmr.msra.gmra.mrb[128].mxu0 %vm297_vm0, %v11706_v12 }
0x36c8   :  { %9004 = vmatprep.mubr.msk.f32.mxu0 %vm297_vm0, %v11713_v50 }
0x36cb   :  { %9005 = vmatmul.mubr.msk.f32.gmra.mrb[130].mxu0 %vm297_vm0, %v11720_v9 }
0x36cc   :  { %9011 = vmatprep.mubr.msk.bf16.mxu0 %vm297_vm0, %v9329_v8 }
0x379a   :  { %v9003_v30 = vpop.f32.mrb[128].mxu0 }
0x379b   :  { %v6548_v16 = vadd.f32 1e-05, %v9003_v30  ;;  %v6542_v23 = vpop.f32.mrb[129].mxu0 }
0x379c   :  { %v6543_v18 = vadd.f32 1e-05, %v6542_v23 }
0x379d   :  { %9406 = vrsqrt.f32 %v6548_v16 }
0x379e   :  { %9408 = vrsqrt.f32 %v6543_v18  ;;  %v9006_v34 = vpop.f32.mrb[130].mxu0 }
0x379f   :  { %v6558_v26 = vadd.f32 1e-05, %v9006_v34  ;;  %v6552_v36 = vpop.f32.mrb[131].mxu0 }
0x37a0   :  { %v6553_v40 = vadd.f32 1e-05, %v6552_v36 }
0x37a1   :  { %9410 = vrsqrt.f32 %v6558_v26 }
0x37a2   :  { %9412 = vrsqrt.f32 %v6553_v40 }
0x37a7   :  { %v9407_v27 = vpop.eup %9406 }
0x37a8   :  { %v9409_v37 = vpop.eup %9408  ;;  %v6571_v43 = vmul.f32 %v9407_v27, %v7951_v38 }
0x37a9   :  { %v6570_v46 = vmul.f32 %v9409_v37, %v7950_v39 }
0x37aa   :  { %6581 = vperm.xlu0 %9220, %v6571_v43  }
0x37ab   :  { %v9411_v51 = vpop.eup %9410  ;;  %6576 = vperm.xlu1 %9221, %v6570_v46  }
0x37ac   :  { %v9413_v41 = vpop.eup %9412  ;;  %v6573_v52 = vmul.f32 %v9411_v51, %v7953_v48 }
0x37ad   :  { %v6572_v32 = vmul.f32 %v9413_v41, %v7952_v35 }
0x37af   :  { %6586 = vperm.xlu0 %9220, %v6572_v32   ;;  %6591 = vperm.xlu1 %9221, %v6573_v52  }
0x37b3   :  { %6615 = vperm.xlu0 %9220, %v7956_v61   ;;  %6620 = vperm.xlu1 %9221, %v7957_v53  }
0x3829   :  { %v6582_v3 = vpop.permute.xlu0 %6581 }
0x382a   :  { %v6595_v10 = vmul.f32 %v6582_v3, %v11726_v58  ;;  %v6577_v54 = vpop.permute.xlu1 %6576 }
0x382b   :  { %v6594_v57 = vmul.f32 %v6577_v54, %v11728_v20 }
0x382c   :  { %v6624_v5 = vadd.f32 %v6611_v62, %v6595_v10 }
0x382d   :  { %v6623_v55 = vadd.f32 %v6606_v47, %v6594_v57 }
0x382e   :  { %v11774_v25 = vmax.f32 %v6624_v5, 0.0  ;;  %v6592_v58 = vpop.permute.xlu1 %6591  ;;  %v6587_v44 = vpop.permute.xlu0 %6586 }
0x382f   :  { %v11776_v19 = vmax.f32 %v6623_v55, 0.0  ;;  %v6597_v24 = vmul.f32 %v6592_v58, %v11738_v13  ;;  %v6596_v45 = vmul.f32 %v6587_v44, %v11734_v59  ;;  %v9328_v59 = vld [vmem:[%s12078_s1 + $0x274] ss:$12 sps:$4 sm:$0xff]  }
0x3830   :  { %6633 = vrot.lane.b32.xlu1 %v11774_v25, %s9478_s19  ;;  %6858 = vmatprep.mubr.bf16.mxu1 %v9328_v59 }
0x3831   :  { %6631 = vrot.lane.b32.xlu0 %v11776_v19, %s9478_s19  ;;  %v6695_v56 = vpack.c.bf16 %v11774_v25, %v11776_v19 }
0x3832   :  { %v6621_v20 = vpop.permute.xlu1 %6620  ;;  %v6616_v22 = vpop.permute.xlu0 %6615 }
0x3833   :  { %8571 = vmatprep.subr.bf16.mxu1 %v6695_v56  ;;  %v6626_v60 = vadd.f32 %v6621_v20, %v6597_v24  ;;  %v6625_v7 = vadd.f32 %v6616_v22, %v6596_v45 }
0x3834   :  { %6701 = vrot.lane.b32.xlu1 %v11774_v25, %s9479_s22 }
0x3835   :  { %6699 = vrot.lane.b32.xlu0 %v11776_v19, %s9479_s22  ;;  %v11810_v49 = vmax.f32 %v6626_v60, 0.0  ;;  %v11812_v13 = vmax.f32 %v6625_v7, 0.0 }
0x3837   :  { %v6696_v30 = vpack.c.bf16 %v11810_v49, %v11812_v13 }
0x3838   :  { %6649 = vrot.lane.b32.xlu1 %v11774_v25, %s9480_s23 }
0x3839   :  { %6647 = vrot.lane.b32.xlu0 %v11776_v19, %s9480_s23 }
0x383c   :  { %6717 = vrot.lane.b32.xlu1 %v11774_v25, %s9481_s0 }
0x383d   :  { %6715 = vrot.lane.b32.xlu0 %v11776_v19, %s9481_s0 }
0x3840   :  { %6665 = vrot.lane.b32.xlu1 %v11774_v25, %s9482_s24 }
0x3841   :  { %6663 = vrot.lane.b32.xlu0 %v11776_v19, %s9482_s24 }
0x3844   :  { %6733 = vrot.lane.b32.xlu1 %v11774_v25, %s9483_s25 }
0x3845   :  { %6731 = vrot.lane.b32.xlu0 %v11776_v19, %s9483_s25 }
0x3848   :  { %6681 = vrot.lane.b32.xlu1 %v11774_v25, %s9484_s26 }
0x3849   :  { %6679 = vrot.lane.b32.xlu0 %v11776_v19, %s9484_s26 }
0x384c   :  { %6637 = vrot.lane.b32.xlu1 %v11810_v49, %s9478_s19 }
0x384d   :  { %6635 = vrot.lane.b32.xlu0 %v11812_v13, %s9478_s19 }
0x3850   :  { %6705 = vrot.lane.b32.xlu1 %v11810_v49, %s9479_s22 }
0x3851   :  { %6703 = vrot.lane.b32.xlu0 %v11812_v13, %s9479_s22 }
0x3854   :  { %6653 = vrot.lane.b32.xlu1 %v11810_v49, %s9480_s23 }
0x3855   :  { %6651 = vrot.lane.b32.xlu0 %v11812_v13, %s9480_s23 }
0x3858   :  { %6721 = vrot.lane.b32.xlu1 %v11810_v49, %s9481_s0 }
0x3859   :  { %6719 = vrot.lane.b32.xlu0 %v11812_v13, %s9481_s0 }
0x385c   :  { %6669 = vrot.lane.b32.xlu1 %v11810_v49, %s9482_s24 }
0x385d   :  { %6667 = vrot.lane.b32.xlu0 %v11812_v13, %s9482_s24 }
0x3860   :  { %6737 = vrot.lane.b32.xlu1 %v11810_v49, %s9483_s25 }
0x3861   :  { %6735 = vrot.lane.b32.xlu0 %v11812_v13, %s9483_s25 }
0x3864   :  { %6685 = vrot.lane.b32.xlu1 %v11810_v49, %s9484_s26 }
0x3865   :  { %6683 = vrot.lane.b32.xlu0 %v11812_v13, %s9484_s26 }
0x3868   :  { %6749 = vrot.lane.b32.xlu1 %v11774_v25, %s9485_s11 }
0x3869   :  { %6747 = vrot.lane.b32.xlu0 %v11776_v19, %s9485_s11 }
0x386c   :  { %6753 = vrot.lane.b32.xlu1 %v11810_v49, %s9485_s11 }
0x386d   :  { %6751 = vrot.lane.b32.xlu0 %v11812_v13, %s9485_s11 }
0x38a2   :  { %v6634_v29 = vpop.permute.xlu1 %6633 }
0x38a3   :  { %v6640_v17 = vmul.f32 %v11526_v42, %v6634_v29  ;;  %v6632_v11 = vpop.permute.xlu0 %6631 }
0x38a4   :  { %v6639_v2 = vmul.f32 %v11526_v42, %v6632_v11 }
0x38a6   :  { %v6643_v15 = vpack.c.bf16 %v6640_v17, %v6639_v2  ;;  %v6702_v63 = vpop.permute.xlu1 %6701 }
0x38a7   :  { %v6700_v28 = vpop.permute.xlu0 %6699  ;;  %v6708_v43 = vmul.f32 %v11533_v4, %v6702_v63 }
0x38a8   :  { %8572 = vmatpush3.bf16.msra.mxu1 %v6643_v15  ;;  %v6707_v46 = vmul.f32 %v11533_v4, %v6700_v28 }
0x38a9   :  { %8573 = vmatprep.subr.bf16.mxu1 %v6696_v30 }
0x38aa   :  { %v6650_v16 = vpop.permute.xlu1 %6649  ;;  %v6711_v53 = vpack.c.bf16 %v6708_v43, %v6707_v46 }
0x38ab   :  { %v6648_v23 = vpop.permute.xlu0 %6647  ;;  %v6656_v41 = vmul.f32 %v11542_v14, %v6650_v16 }
0x38ac   :  { %v6655_v52 = vmul.f32 %v11542_v14, %v6648_v23 }
0x38ae   :  { %v6718_v18 = vpop.permute.xlu1 %6717  ;;  %v6659_v10 = vpack.c.bf16 %v6656_v41, %v6655_v52 }
0x38af   :  { %v6716_v34 = vpop.permute.xlu0 %6715  ;;  %v6724_v5 = vmul.f32 %v11551_v1, %v6718_v18 }
0x38b2   :  { %v6666_v26 = vpop.permute.xlu1 %6665 }
0x38b3   :  { %v6664_v36 = vpop.permute.xlu0 %6663  ;;  %v6672_v44 = vmul.f32 %v11560_v21, %v6666_v26 }
0x38b6   :  { %v6734_v40 = vpop.permute.xlu1 %6733 }
0x38b7   :  { %v6732_v38 = vpop.permute.xlu0 %6731 }
0x38b8   :  { %v6739_v17 = vmul.f32 %v11569_v33, %v6732_v38 }
0x38ba   :  { %v6682_v39 = vpop.permute.xlu1 %6681 }
0x38bb   :  { %v6680_v27 = vpop.permute.xlu0 %6679  ;;  %v6688_v63 = vmul.f32 %v11578_v6, %v6682_v39 }
0x38be   :  { %v6638_v37 = vpop.permute.xlu1 %6637 }
0x38bf   :  { %v6642_v48 = vmul.f32 %v11526_v42, %v6638_v37  ;;  %v6636_v35 = vpop.permute.xlu0 %6635 }
0x38c0   :  { %v6641_v51 = vmul.f32 %v11526_v42, %v6636_v35  ;;  %v6723_v42 = vmul.f32 %v11551_v1, %v6716_v34  ;;  %v9331_v35 = vld [vmem:[%s12078_s1 + $0x28c] ss:$12 sps:$4 sm:$0xff]  }
0x38c2   :  { %v6644_v32 = vpack.c.bf16 %v6642_v48, %v6641_v51  ;;  %v6706_v61 = vpop.permute.xlu1 %6705  ;;  %v6727_v22 = vpack.c.bf16 %v6724_v5, %v6723_v42 }
0x38c3   :  { %v6710_v47 = vmul.f32 %v11533_v4, %v6706_v61  ;;  %v6704_v62 = vpop.permute.xlu0 %6703 }
0x38c4   :  { %v6709_v3 = vmul.f32 %v11533_v4, %v6704_v62  ;;  %8574 = vmatpush3.bf16.msra.mxu1 %v6644_v32  ;;  %v6671_v4 = vmul.f32 %v11560_v21, %v6664_v36 }
0x38c5   :  { %8575 = vmatprep.subr.bf16.mxu1 %v6711_v53  ;;  %v9333_v53 = vld [vmem:[%s12078_s1 + $0x288] ss:$12 sps:$4 sm:$0xff]  }
0x38c6   :  { %v6712_v54 = vpack.c.bf16 %v6710_v47, %v6709_v3  ;;  %v6654_v57 = vpop.permute.xlu1 %6653  ;;  %v6675_v59 = vpack.c.bf16 %v6672_v44, %v6671_v4  ;;  %v9330_v47 = vld [vmem:[%s12078_s1 + $0x290] ss:$12 sps:$4 sm:$0xff]  }
0x38c7   :  { %v6658_v55 = vmul.f32 %v11542_v14, %v6654_v57  ;;  %v6652_v56 = vpop.permute.xlu0 %6651 }
0x38c8   :  { %v6657_v58 = vmul.f32 %v11542_v14, %v6652_v56  ;;  %8576 = vmatpush3.bf16.msra.mxu1 %v6659_v10  ;;  %v6740_v14 = vmul.f32 %v11569_v33, %v6734_v40 }
0x38c9   :  { %8577 = vmatprep.subr.bf16.mxu1 %v6712_v54 }
0x38ca   :  { %v6660_v20 = vpack.c.bf16 %v6658_v55, %v6657_v58  ;;  %v6722_v24 = vpop.permute.xlu1 %6721  ;;  %v6743_v16 = vpack.c.bf16 %v6740_v14, %v6739_v17 }
0x38cb   :  { %v6726_v45 = vmul.f32 %v11551_v1, %v6722_v24  ;;  %v6720_v60 = vpop.permute.xlu0 %6719 }
0x38cc   :  { %v6725_v7 = vmul.f32 %v11551_v1, %v6720_v60  ;;  %8578 = vmatpush3.bf16.msra.mxu1 %v6660_v20  ;;  %v6687_v1 = vmul.f32 %v11578_v6, %v6680_v27 }
0x38cd   :  { %8579 = vmatprep.subr.bf16.mxu1 %v6727_v22 }
0x38ce   :  { %v6728_v8 = vpack.c.bf16 %v6726_v45, %v6725_v7  ;;  %v6670_v29 = vpop.permute.xlu1 %6669  ;;  %v6691_v26 = vpack.c.bf16 %v6688_v63, %v6687_v1 }
0x38cf   :  { %v6674_v11 = vmul.f32 %v11560_v21, %v6670_v29  ;;  %v6668_v2 = vpop.permute.xlu0 %6667 }
0x38d0   :  { %v6673_v15 = vmul.f32 %v11560_v21, %v6668_v2  ;;  %8580 = vmatpush3.bf16.msra.mxu1 %v6675_v59 }
0x38d1   :  { %8581 = vmatprep.subr.bf16.mxu1 %v6728_v8 }
0x38d2   :  { %v6676_v28 = vpack.c.bf16 %v6674_v11, %v6673_v15  ;;  %v6738_v30 = vpop.permute.xlu1 %6737 }
0x38d3   :  { %v6742_v23 = vmul.f32 %v11569_v33, %v6738_v30  ;;  %v6736_v18 = vpop.permute.xlu0 %6735 }
0x38d4   :  { %v6741_v34 = vmul.f32 %v11569_v33, %v6736_v18  ;;  %8582 = vmatpush3.bf16.msra.mxu1 %v6676_v28  ;;  %v9326_v33 = vld [vmem:[%s12078_s1 + $0x270] ss:$12 sps:$4 sm:$0xff]  }
0x38d5   :  { %8583 = vmatprep.subr.bf16.mxu1 %v6743_v16 }
0x38d6   :  { %v6744_v36 = vpack.c.bf16 %v6742_v23, %v6741_v34  ;;  %v6686_v40 = vpop.permute.xlu1 %6685 }
0x38d7   :  { %v6690_v21 = vmul.f32 %v11578_v6, %v6686_v40  ;;  %v6684_v38 = vpop.permute.xlu0 %6683 }
0x38d8   :  { %v6689_v39 = vmul.f32 %v11578_v6, %v6684_v38  ;;  %8584 = vmatpush3.bf16.msra.mxu1 %v6691_v26 }
0x38d9   :  { %8585 = vmatprep.subr.bf16.mxu1 %v6744_v36 }
0x38da   :  { %v6692_v27 = vpack.c.bf16 %v6690_v21, %v6689_v39  ;;  %v6750_v37 = vpop.permute.xlu1 %6749 }
0x38db   :  { %v6756_v43 = vmul.f32 %v11589_v0, %v6750_v37  ;;  %v6748_v46 = vpop.permute.xlu0 %6747  ;;  %v7987_v37 = vld [vmem:[%s12081_s5 + $0x128] sm:$0xff] }
0x38dc   :  { %v6755_v48 = vmul.f32 %v11589_v0, %v6748_v46  ;;  %8586 = vmatpush3.bf16.msra.mxu1 %v6692_v27  ;;  %v7986_v27 = vld [vmem:[%s12081_s5 + $0x120] sm:$0xff] }
0x38de   :  { %v6759_v51 = vpack.c.bf16 %v6756_v43, %v6755_v48  ;;  %v6754_v6 = vpop.permute.xlu1 %6753 }
0x38df   :  { %v6758_v41 = vmul.f32 %v11589_v0, %v6754_v6  ;;  %v6752_v52 = vpop.permute.xlu0 %6751  ;;  %6859 = vmatmul.mubr.bf16.vlgmr.msra.gmra.mrb[96].mxu1 %v9326_v33 }
0x38e0   :  { %v6757_v32 = vmul.f32 %v11589_v0, %v6752_v52  ;;  %9007 = vmatprep.subr.bf16.mxu0 %v6759_v51  ;;  %6866 = vmatprep.mubr.bf16.mxu1 %v9331_v35 }
0x38e1   :  { %9008 = vmatpush3.bf16.msra.mxu0 %v6759_v51 }
0x38e2   :  { %v6760_v61 = vpack.c.bf16 %v6758_v41, %v6757_v32 }
0x38e4   :  { %9009 = vmatprep.subr.bf16.mxu0 %v6760_v61 }
0x38e5   :  { %9010 = vmatpush3.bf16.msra.mxu0 %v6760_v61 }
0x38e7   :  { %6867 = vmatmul.mubr.bf16.gmra.mrb[100].mxu1 %v9333_v53 }
0x38e8   :  { %9012 = vmatmul.mubr.msk.bf16.vlgmr.msra.gmra.mrb[132].mxu0 %vm297_vm0, %v9330_v47 }
0x38e9   :  { %9023 = vmatprep.mubr.msk.f32.mxu0 %vm297_vm0, %v11699_v31 }
0x39b2   :  { %v8587_v0 = vpop.f32.mrb[96].mxu1 }
0x39b3   :  { %v8588_v62 = vpop.f32.mrb[97].mxu1 }
0x39b4   :  { %v8589_v3 = vadd.f32 %v8588_v62, %v8587_v0  ;;  %v8590_v10 = vpop.f32.mrb[98].mxu1 }
0x39b5   :  { %v8591_v54 = vpop.f32.mrb[99].mxu1 }
0x39b6   :  { %v8592_v57 = vadd.f32 %v8591_v54, %v8590_v10  ;;  %v7985_v54 = vld [vmem:[%s12082_s4 + $0x138] sm:$0xff] }
0x39ba   :  { %v8593_v5 = vpop.f32.mrb[100].mxu1 }
0x39bb   :  { %v9013_v42 = vpop.f32.mrb[132].mxu0  ;;  %v8594_v55 = vpop.f32.mrb[101].mxu1 }
0x39bc   :  { %v6909_v56 = vpop.f32.mrb[133].mxu0  ;;  %v8595_v58 = vadd.f32 %v8594_v55, %v8593_v5  ;;  %v8596_v44 = vpop.f32.mrb[102].mxu1 }
0x39bd   :  { %v6910_v4 = vadd.f32 %v8589_v3, %v6909_v56  ;;  %v9014_v20 = vpop.f32.mrb[134].mxu0  ;;  %v8597_v24 = vpop.f32.mrb[103].mxu1 }
0x39be   :  { %v6918_v22 = vadd.f32 %v9013_v42, %v8595_v58  ;;  %v6912_v45 = vpop.f32.mrb[135].mxu0  ;;  %v8598_v60 = vadd.f32 %v8597_v24, %v8596_v44  ;;  %v7988_v58 = vld [vmem:[%s12081_s5 + $0x130] sm:$0xff]  ;;  %v7989_v44 = vld [vmem:[%s12081_s5 + $0x138] sm:$0xff] }
0x39bf   :  { %v6913_v7 = vadd.f32 %v8592_v57, %v6912_v45  ;;  %6924 = vadd.xlane.f32.xlu0 %v6910_v4  ;;  %v7984_v57 = vld [vmem:[%s12082_s4 + $0x130] sm:$0xff] }
0x39c0   :  { %v6921_v59 = vadd.f32 %v9014_v20, %v8598_v60 }
0x39c1   :  { %6926 = vadd.xlane.f32.xlu1 %v6913_v7 }
0x39c3   :  { %6928 = vadd.xlane.f32.xlu0 %v6918_v22 }
0x39c7   :  { %6930 = vadd.xlane.f32.xlu0 %v6921_v59 }
0x3a4c   :  { %v6925_v8 = vpop.xlane.xlu0 %6924 }
0x3a4e   :  { %v6927_v29 = vpop.xlane.xlu1 %6926 }
0x3a4f   :  { %v9195_v14 = vpack.c.bf16 %v6927_v29, %v6925_v8 }
0x3a50   :  { %v6929_v17 = vpop.xlane.xlu0 %6928 }
0x3a51   :  { %9196 = vmatprep.subr.bf16.mxu0 %v9195_v14 }
0x3a52   :  { %9198 = vmatpush3.bf16.msra.mxu0 %v9195_v14 }
0x3a54   :  { %v6931_v11 = vpop.xlane.xlu0 %6930 }
0x3a55   :  { %v9199_v2 = vpack.c.bf16 %v6931_v11, %v6929_v17 }
0x3a57   :  { %9200 = vmatprep.subr.bf16.mxu0 %v9199_v2 }
0x3a58   :  { %9202 = vmatpush3.bf16.msra.mxu0 %v9199_v2 }
0x3a5b   :  { %9024 = vmatmul.mubr.msk.f32.vlgmr.msra.gmra.mrb[136].mxu0 %vm297_vm0, %v11706_v12 }
0x3a5c   :  { %9026 = vmatprep.mubr.msk.f32.mxu0 %vm297_vm0, %v11713_v50 }
0x3a5f   :  { %9027 = vmatmul.mubr.msk.f32.gmra.mrb[138].mxu0 %vm297_vm0, %v11720_v9 }
0x3a60   :  { %9037 = vmatprep.mubr.msk.f32.mxu0 %vm297_vm0, %v11699_v31 }
0x3b2e   :  { %v9025_v15 = vpop.f32.mrb[136].mxu0 }
0x3b2f   :  { %7024 = vperm.xlu0 %9220, %v9025_v15   ;;  %v6998_v63 = vpop.f32.mrb[137].mxu0 }
0x3b30   :  { %7019 = vperm.xlu1 %9221, %v6998_v63  }
0x3b32   :  { %v9028_v1 = vpop.f32.mrb[138].mxu0 }
0x3b33   :  { %v7008_v28 = vpop.f32.mrb[139].mxu0 }
0x3b34   :  { %7029 = vperm.xlu1 %9221, %v7008_v28  }
0x3b38   :  { %7034 = vperm.xlu1 %9221, %v9028_v1  }
0x3bae   :  { %v7025_v30 = vpop.permute.xlu0 %7024 }
0x3baf   :  { %v11914_v16 = vsub.f32 %v6913_v7, %v7025_v30  ;;  %v7020_v23 = vpop.permute.xlu1 %7019 }
0x3bb0   :  { %v11916_v18 = vsub.f32 %v6910_v4, %v7020_v23 }
0x3bb1   :  { %v7042_v34 = vmul.f32 %v11914_v16, %v11914_v16 }
0x3bb2   :  { %v7041_v31 = vmul.f32 %v11916_v18, %v11916_v18 }
0x3bb3   :  { %7047 = vadd.xlane.f32.xlu1 %v7042_v34  ;;  %v7030_v26 = vpop.permute.xlu1 %7029  ;;  %v9336_v34 = vld [vmem:[%s12078_s1 + $0x2a4] ss:$12 sps:$4 sm:$0xff]  }
0x3bb4   :  { %v11922_v36 = vsub.f32 %v6918_v22, %v7030_v26  ;;  %7045 = vadd.xlane.f32.xlu0 %v7041_v31  ;;  %7435 = vmatprep.mubr.bf16.mxu1 %v9336_v34  ;;  %v9340_v31 = vld [vmem:[%s12078_s1 + $0x2a8] ss:$12 sps:$4 sm:$0xff]  }
0x3bb5   :  { %v8007_v26 = vld [vmem:[%s12083_s6 + $0x88] sm:$0xff] }
0x3bb6   :  { %v7043_v40 = vmul.f32 %v11922_v36, %v11922_v36 }
0x3bb7   :  { %v7035_v21 = vpop.permute.xlu1 %7034 }
0x3bb8   :  { %v11926_v38 = vsub.f32 %v6921_v59, %v7035_v21  ;;  %7049 = vadd.xlane.f32.xlu0 %v7043_v40  ;;  %v8009_v40 = vld [vmem:[%s12083_s6 + $0x98] sm:$0xff]  ;;  %v8008_v21 = vld [vmem:[%s12083_s6 + $0x90] sm:$0xff] }
0x3bba   :  { %v7044_v39 = vmul.f32 %v11926_v38, %v11926_v38 }
0x3bbc   :  { %7051 = vadd.xlane.f32.xlu0 %v7044_v39  ;;  %v7538_v39 = vld [vmem:[%s12084_s7] sm:$0xff] }
0x3bc4   :  { %7182 = vperm.xlu1 %9221, %v7986_v27   ;;  %v7541_v27 = vld [vmem:[%s12084_s7 + $0x18] sm:$0xff] }
0x3bc8   :  { %7187 = vperm.xlu1 %9221, %v7987_v37   ;;  %v7540_v37 = vld [vmem:[%s12084_s7 + $0x10] sm:$0xff] }
0x3c40   :  { %v7048_v43 = vpop.xlane.xlu1 %7047 }
0x3c41   :  { %v7046_v46 = vpop.xlane.xlu0 %7045 }
0x3c42   :  { %v9203_v33 = vpack.c.bf16 %v7048_v43, %v7046_v46  ;;  %v9470_v46 = vld [vmem:[%s12079_s2] ss:$0 sm:$0xff] }
0x3c44   :  { %9204 = vmatprep.subr.bf16.mxu0 %v9203_v33  ;;  %v7183_v4 = vpop.permute.xlu1 %7182 }
0x3c45   :  { %v7050_v48 = vpop.xlane.xlu0 %7049  ;;  %9206 = vmatpush3.bf16.msra.mxu0 %v9203_v33 }
0x3c48   :  { %v7188_v20 = vpop.permute.xlu1 %7187 }
0x3c49   :  { %v7052_v35 = vpop.xlane.xlu0 %7051 }
0x3c4a   :  { %v9207_v51 = vpack.c.bf16 %v7052_v35, %v7050_v48 }
0x3c4c   :  { %9208 = vmatprep.subr.bf16.mxu0 %v9207_v51 }
0x3c4d   :  { %9210 = vmatpush3.bf16.msra.mxu0 %v9207_v51 }
0x3c50   :  { %9038 = vmatmul.mubr.msk.f32.vlgmr.msra.gmra.mrb[140].mxu0 %vm297_vm0, %v11706_v12  ;;  %v7983_v12 = vld [vmem:[%s12082_s4 + $0x128] sm:$0xff] }
0x3c51   :  { %9040 = vmatprep.mubr.msk.f32.mxu0 %vm297_vm0, %v11713_v50  ;;  %v7982_v50 = vld [vmem:[%s12082_s4 + $0x120] sm:$0xff] }
0x3c54   :  { %9041 = vmatmul.mubr.msk.f32.gmra.mrb[142].mxu0 %vm297_vm0, %v11720_v9 }
0x3c55   :  { %9047 = vmatprep.mubr.msk.bf16.mxu0 %vm297_vm0, %v9340_v31 }
0x3d23   :  { %v9039_v6 = vpop.f32.mrb[140].mxu0 }
0x3d24   :  { %v7125_v41 = vadd.f32 1e-05, %v9039_v6  ;;  %v7119_v52 = vpop.f32.mrb[141].mxu0 }
0x3d25   :  { %v7120_v32 = vadd.f32 1e-05, %v7119_v52 }
0x3d26   :  { %9414 = vrsqrt.f32 %v7125_v41 }
0x3d27   :  { %9416 = vrsqrt.f32 %v7120_v32  ;;  %v9042_v61 = vpop.f32.mrb[142].mxu0 }
0x3d28   :  { %v7135_v53 = vadd.f32 1e-05, %v9042_v61  ;;  %v7129_v47 = vpop.f32.mrb[143].mxu0 }
0x3d29   :  { %v7130_v0 = vadd.f32 1e-05, %v7129_v47 }
0x3d2a   :  { %9418 = vrsqrt.f32 %v7135_v53 }
0x3d2b   :  { %9420 = vrsqrt.f32 %v7130_v0 }
0x3d30   :  { %v9415_v9 = vpop.eup %9414 }
0x3d31   :  { %v9417_v62 = vpop.eup %9416  ;;  %v7148_v3 = vmul.f32 %v9415_v9, %v7983_v12 }
0x3d32   :  { %v7147_v10 = vmul.f32 %v9417_v62, %v7982_v50 }
0x3d33   :  { %7158 = vperm.xlu0 %9220, %v7148_v3  }
0x3d34   :  { %v9419_v5 = vpop.eup %9418  ;;  %7153 = vperm.xlu1 %9221, %v7147_v10   ;;  %v9471_v10 = vld [vmem:[%s12079_s2 + $0x5] ss:$0 sm:$0xff] }
0x3d35   :  { %v9421_v42 = vpop.eup %9420  ;;  %v7150_v55 = vmul.f32 %v9419_v5, %v7985_v54 }
0x3d36   :  { %v7149_v56 = vmul.f32 %v9421_v42, %v7984_v57 }
0x3d38   :  { %7163 = vperm.xlu0 %9220, %v7149_v56   ;;  %7168 = vperm.xlu1 %9221, %v7150_v55   ;;  %v9472_v56 = vld [vmem:[%s12079_s2 + $0x1] ss:$0 sm:$0xff] }
0x3d3c   :  { %7192 = vperm.xlu0 %9220, %v7988_v58   ;;  %7197 = vperm.xlu1 %9221, %v7989_v44  }
0x3db2   :  { %v7159_v24 = vpop.permute.xlu0 %7158 }
0x3db3   :  { %v7172_v22 = vmul.f32 %v7159_v24, %v11914_v16  ;;  %v7154_v45 = vpop.permute.xlu1 %7153 }
0x3db4   :  { %v7171_v60 = vmul.f32 %v7154_v45, %v11916_v18 }
0x3db5   :  { %v7201_v7 = vadd.f32 %v7188_v20, %v7172_v22 }
0x3db6   :  { %v7200_v59 = vadd.f32 %v7183_v4, %v7171_v60 }
0x3db7   :  { %v7205_v8 = vmax.f32 %v7201_v7, 0.0  ;;  %v7164_v29 = vpop.permute.xlu0 %7163  ;;  %v7169_v14 = vpop.permute.xlu1 %7168 }
0x3db8   :  { %v7204_v17 = vmax.f32 %v7200_v59, 0.0  ;;  %v7173_v11 = vmul.f32 %v7164_v29, %v11922_v36  ;;  %v7174_v2 = vmul.f32 %v7169_v14, %v11926_v38  ;;  %v8006_v36 = vld [vmem:[%s12083_s6 + $0x80] sm:$0xff]  ;;  %v7539_v38 = vld [vmem:[%s12084_s7 + $0x8] sm:$0xff] }
0x3db9   :  { %7210 = vrot.lane.b32.xlu1 %v7205_v8, %s9478_s19  ;;  %v9473_v29 = vld [vmem:[%s12079_s2 + $0x6] ss:$0 sm:$0xff] }
0x3dba   :  { %7208 = vrot.lane.b32.xlu0 %v7204_v17, %s9478_s19  ;;  %v7272_v15 = vpack.c.bf16 %v7205_v8, %v7204_v17 }
0x3dbb   :  { %v7193_v63 = vpop.permute.xlu0 %7192  ;;  %v7198_v1 = vpop.permute.xlu1 %7197 }
0x3dbc   :  { %v7202_v28 = vadd.f32 %v7193_v63, %v7173_v11  ;;  %v7203_v30 = vadd.f32 %v7198_v1, %v7174_v2  ;;  %8619 = vmatprep.subr.bf16.mxu1 %v7272_v15  ;;  %v9474_v63 = vld [vmem:[%s12079_s2 + $0x2] ss:$0 sm:$0xff] }
0x3dbd   :  { %7278 = vrot.lane.b32.xlu1 %v7205_v8, %s9479_s22 }
0x3dbe   :  { %v7206_v16 = vmax.f32 %v7202_v28, 0.0  ;;  %v7207_v23 = vmax.f32 %v7203_v30, 0.0  ;;  %7276 = vrot.lane.b32.xlu0 %v7204_v17, %s9479_s22 }
0x3dc0   :  { %v7273_v18 = vpack.c.bf16 %v7207_v23, %v7206_v16 }
0x3dc1   :  { %7226 = vrot.lane.b32.xlu1 %v7205_v8, %s9480_s23 }
0x3dc2   :  { %7224 = vrot.lane.b32.xlu0 %v7204_v17, %s9480_s23 }
0x3dc5   :  { %7294 = vrot.lane.b32.xlu1 %v7205_v8, %s9481_s0 }
0x3dc6   :  { %7292 = vrot.lane.b32.xlu0 %v7204_v17, %s9481_s0 }
0x3dc9   :  { %7242 = vrot.lane.b32.xlu1 %v7205_v8, %s9482_s24 }
0x3dca   :  { %7240 = vrot.lane.b32.xlu0 %v7204_v17, %s9482_s24 }
0x3dcd   :  { %7310 = vrot.lane.b32.xlu1 %v7205_v8, %s9483_s25 }
0x3dce   :  { %7308 = vrot.lane.b32.xlu0 %v7204_v17, %s9483_s25 }
0x3dd1   :  { %7258 = vrot.lane.b32.xlu1 %v7205_v8, %s9484_s26 }
0x3dd2   :  { %7256 = vrot.lane.b32.xlu0 %v7204_v17, %s9484_s26 }
0x3dd5   :  { %7214 = vrot.lane.b32.xlu1 %v7207_v23, %s9478_s19 }
0x3dd6   :  { %7212 = vrot.lane.b32.xlu0 %v7206_v16, %s9478_s19 }
0x3dd9   :  { %7282 = vrot.lane.b32.xlu1 %v7207_v23, %s9479_s22 }
0x3dda   :  { %7280 = vrot.lane.b32.xlu0 %v7206_v16, %s9479_s22 }
0x3ddd   :  { %7230 = vrot.lane.b32.xlu1 %v7207_v23, %s9480_s23 }
0x3dde   :  { %7228 = vrot.lane.b32.xlu0 %v7206_v16, %s9480_s23 }
0x3de1   :  { %7298 = vrot.lane.b32.xlu1 %v7207_v23, %s9481_s0 }
0x3de2   :  { %7296 = vrot.lane.b32.xlu0 %v7206_v16, %s9481_s0 }
0x3de5   :  { %7246 = vrot.lane.b32.xlu1 %v7207_v23, %s9482_s24 }
0x3de6   :  { %7244 = vrot.lane.b32.xlu0 %v7206_v16, %s9482_s24 }
0x3de9   :  { %7314 = vrot.lane.b32.xlu1 %v7207_v23, %s9483_s25 }
0x3dea   :  { %7312 = vrot.lane.b32.xlu0 %v7206_v16, %s9483_s25 }
0x3ded   :  { %7262 = vrot.lane.b32.xlu1 %v7207_v23, %s9484_s26 }
0x3dee   :  { %7260 = vrot.lane.b32.xlu0 %v7206_v16, %s9484_s26 }
0x3df1   :  { %7326 = vrot.lane.b32.xlu1 %v7205_v8, %s9485_s11 }
0x3df2   :  { %7324 = vrot.lane.b32.xlu0 %v7204_v17, %s9485_s11 }
0x3df5   :  { %7330 = vrot.lane.b32.xlu1 %v7207_v23, %s9485_s11 }
0x3df6   :  { %7328 = vrot.lane.b32.xlu0 %v7206_v16, %s9485_s11 }
0x3df9   :  { %7517 = vperm.xlu1 %9221, %v8007_v26  }
0x3dfa   :  { %7512 = vperm.xlu0 %9220, %v8006_v36  }
0x3dfd   :  { %7527 = vperm.xlu1 %9221, %v8009_v40  }
0x3dfe   :  { %7522 = vperm.xlu0 %9220, %v8008_v21   ;;  %v9475_v21 = vld [vmem:[%s12079_s2 + $0x7] ss:$0 sm:$0xff] }
0x3e01   :  { %7549 = vperm.xlu1 %9221, %v7539_v38  }
0x3e02   :  { %7544 = vperm.xlu0 %9220, %v7538_v39  }
0x3e05   :  { %7559 = vperm.xlu1 %9221, %v7541_v27  }
0x3e06   :  { %7554 = vperm.xlu0 %9220, %v7540_v37  }
0x3e2b   :  { %v7211_v43 = vpop.permute.xlu1 %7210 }
0x3e2c   :  { %v7217_v33 = vmul.f32 %v9470_v46, %v7211_v43  ;;  %v7209_v48 = vpop.permute.xlu0 %7208 }
0x3e2d   :  { %v7216_v35 = vmul.f32 %v9470_v46, %v7209_v48 }
0x3e2f   :  { %v7220_v51 = vpack.c.bf16 %v7217_v33, %v7216_v35  ;;  %v7279_v6 = vpop.permute.xlu1 %7278 }
0x3e30   :  { %v7277_v41 = vpop.permute.xlu0 %7276  ;;  %v7285_v54 = vmul.f32 %v9471_v10, %v7279_v6 }
0x3e31   :  { %8620 = vmatpush3.bf16.msra.mxu1 %v7220_v51  ;;  %v7284_v57 = vmul.f32 %v9471_v10, %v7277_v41 }
0x3e32   :  { %8621 = vmatprep.subr.bf16.mxu1 %v7273_v18 }
0x3e33   :  { %v7227_v52 = vpop.permute.xlu1 %7226  ;;  %v7288_v24 = vpack.c.bf16 %v7285_v54, %v7284_v57  ;;  %v9334_v57 = vld [vmem:[%s12078_s1 + $0x2a0] ss:$12 sps:$4 sm:$0xff]  }
0x3e34   :  { %v7225_v32 = vpop.permute.xlu0 %7224  ;;  %v7233_v58 = vmul.f32 %v9472_v56, %v7227_v52 }
0x3e35   :  { %v7232_v44 = vmul.f32 %v9472_v56, %v7225_v32 }
0x3e37   :  { %v7295_v61 = vpop.permute.xlu1 %7294  ;;  %v7236_v7 = vpack.c.bf16 %v7233_v58, %v7232_v44 }
0x3e38   :  { %v7293_v53 = vpop.permute.xlu0 %7292  ;;  %v7301_v14 = vmul.f32 %v9473_v29, %v7295_v61 }
0x3e39   :  { %v7300_v17 = vmul.f32 %v9473_v29, %v7293_v53 }
0x3e3b   :  { %v7243_v47 = vpop.permute.xlu1 %7242  ;;  %v7304_v23 = vpack.c.bf16 %v7301_v14, %v7300_v17 }
0x3e3c   :  { %v7241_v0 = vpop.permute.xlu0 %7240  ;;  %v7249_v1 = vmul.f32 %v9474_v63, %v7243_v47 }
0x3e3d   :  { %v7248_v28 = vmul.f32 %v9474_v63, %v7241_v0 }
0x3e3f   :  { %v7311_v12 = vpop.permute.xlu1 %7310  ;;  %v7252_v26 = vpack.c.bf16 %v7249_v1, %v7248_v28 }
0x3e40   :  { %v7309_v50 = vpop.permute.xlu0 %7308  ;;  %v7317_v38 = vmul.f32 %v9475_v21, %v7311_v12 }
0x3e41   :  { %v7316_v39 = vmul.f32 %v9475_v21, %v7309_v50 }
0x3e43   :  { %v7259_v9 = vpop.permute.xlu1 %7258  ;;  %v7320_v6 = vpack.c.bf16 %v7317_v38, %v7316_v39 }
0x3e44   :  { %v7257_v62 = vpop.permute.xlu0 %7256 }
0x3e47   :  { %v7215_v3 = vpop.permute.xlu1 %7214 }
0x3e48   :  { %v7219_v5 = vmul.f32 %v9470_v46, %v7215_v3  ;;  %v7213_v42 = vpop.permute.xlu0 %7212 }
0x3e49   :  { %v7218_v55 = vmul.f32 %v9470_v46, %v7213_v42  ;;  %v9476_v46 = vld [vmem:[%s12079_s2 + $0x3] ss:$0 sm:$0xff]  ;;  %v9337_v42 = vld [vmem:[%s12078_s1 + $0x2bc] ss:$12 sps:$4 sm:$0xff]  }
0x3e4a   :  { %v7265_v33 = vmul.f32 %v9476_v46, %v7259_v9  ;;  %v7264_v48 = vmul.f32 %v9476_v46, %v7257_v62  ;;  %v9477_v9 = vld [vmem:[%s12079_s2 + $0x8] ss:$0 sm:$0xff] }
0x3e4b   :  { %v7221_v4 = vpack.c.bf16 %v7219_v5, %v7218_v55  ;;  %v7283_v20 = vpop.permute.xlu1 %7282 }
0x3e4c   :  { %v7287_v22 = vmul.f32 %v9471_v10, %v7283_v20  ;;  %v7281_v45 = vpop.permute.xlu0 %7280  ;;  %v7268_v61 = vpack.c.bf16 %v7265_v33, %v7264_v48 }
0x3e4d   :  { %v7286_v60 = vmul.f32 %v9471_v10, %v7281_v45  ;;  %8622 = vmatpush3.bf16.msra.mxu1 %v7221_v4  ;;  %v15_v45 = vstv %s12085_s9 }
0x3e4e   :  { %8623 = vmatprep.subr.bf16.mxu1 %v7288_v24  ;;  %v9339_v24 = vld [vmem:[%s12078_s1 + $0x2b8] ss:$12 sps:$4 sm:$0xff]   ;;  %16 = vst [vmem:[#allocation3] sm:$0x1] %v15_v45 }
0x3e4f   :  { %v7289_v59 = vpack.c.bf16 %v7287_v22, %v7286_v60  ;;  %v7231_v8 = vpop.permute.xlu1 %7230  ;;  %v9341_v22 = vld [vmem:[%s12078_s1 + $0x2c0] ss:$12 sps:$4 sm:$0xff]  }
0x3e50   :  { %v7235_v11 = vmul.f32 %v9472_v56, %v7231_v8  ;;  %v7229_v2 = vpop.permute.xlu0 %7228 }
0x3e51   :  { %v7234_v15 = vmul.f32 %v9472_v56, %v7229_v2  ;;  %8624 = vmatpush3.bf16.msra.mxu1 %v7236_v7 }
0x3e52   :  { %8625 = vmatprep.subr.bf16.mxu1 %v7289_v59 }
0x3e53   :  { %v7237_v30 = vpack.c.bf16 %v7235_v11, %v7234_v15  ;;  %v7299_v16 = vpop.permute.xlu1 %7298 }
0x3e54   :  { %v7303_v18 = vmul.f32 %v9473_v29, %v7299_v16  ;;  %v7297_v34 = vpop.permute.xlu0 %7296 }
0x3e55   :  { %v7302_v31 = vmul.f32 %v9473_v29, %v7297_v34  ;;  %8626 = vmatpush3.bf16.msra.mxu1 %v7237_v30 }
0x3e56   :  { %8627 = vmatprep.subr.bf16.mxu1 %v7304_v23 }
0x3e57   :  { %v7305_v36 = vpack.c.bf16 %v7303_v18, %v7302_v31  ;;  %v7247_v40 = vpop.permute.xlu1 %7246 }
0x3e58   :  { %v7251_v27 = vmul.f32 %v9474_v63, %v7247_v40  ;;  %v7245_v37 = vpop.permute.xlu0 %7244 }
0x3e59   :  { %v7250_v43 = vmul.f32 %v9474_v63, %v7245_v37  ;;  %8628 = vmatpush3.bf16.msra.mxu1 %v7252_v26 }
0x3e5a   :  { %8629 = vmatprep.subr.bf16.mxu1 %v7305_v36 }
0x3e5b   :  { %v7253_v35 = vpack.c.bf16 %v7251_v27, %v7250_v43  ;;  %v7315_v51 = vpop.permute.xlu1 %7314 }
0x3e5c   :  { %v7319_v41 = vmul.f32 %v9475_v21, %v7315_v51  ;;  %v7313_v52 = vpop.permute.xlu0 %7312 }
0x3e5d   :  { %v7318_v32 = vmul.f32 %v9475_v21, %v7313_v52  ;;  %8630 = vmatpush3.bf16.msra.mxu1 %v7253_v35 }
0x3e5e   :  { %8631 = vmatprep.subr.bf16.mxu1 %v7320_v6 }
0x3e5f   :  { %v7321_v53 = vpack.c.bf16 %v7319_v41, %v7318_v32  ;;  %v7263_v47 = vpop.permute.xlu1 %7262 }
0x3e60   :  { %v7267_v0 = vmul.f32 %v9476_v46, %v7263_v47  ;;  %v7261_v12 = vpop.permute.xlu0 %7260 }
0x3e61   :  { %v7266_v50 = vmul.f32 %v9476_v46, %v7261_v12  ;;  %8632 = vmatpush3.bf16.msra.mxu1 %v7268_v61 }
0x3e62   :  { %8633 = vmatprep.subr.bf16.mxu1 %v7321_v53 }
0x3e63   :  { %v7269_v3 = vpack.c.bf16 %v7267_v0, %v7266_v50  ;;  %v7327_v10 = vpop.permute.xlu1 %7326 }
0x3e64   :  { %v7333_v62 = vmul.f32 %v9477_v9, %v7327_v10  ;;  %v7325_v54 = vpop.permute.xlu0 %7324 }
0x3e65   :  { %v7332_v5 = vmul.f32 %v9477_v9, %v7325_v54  ;;  %8634 = vmatpush3.bf16.msra.mxu1 %v7269_v3 }
0x3e67   :  { %v7336_v55 = vpack.c.bf16 %v7333_v62, %v7332_v5  ;;  %v7331_v56 = vpop.permute.xlu1 %7330 }
0x3e68   :  { %v7335_v58 = vmul.f32 %v9477_v9, %v7331_v56  ;;  %v7329_v44 = vpop.permute.xlu0 %7328  ;;  %7436 = vmatmul.mubr.bf16.vlgmr.msra.gmra.mrb[104].mxu1 %v9334_v57  ;;  %v7575_v57 = vld [vmem:[%s12086_s8] sm:$0x3] }
0x3e69   :  { %v7334_v4 = vmul.f32 %v9477_v9, %v7329_v44  ;;  %9043 = vmatprep.subr.bf16.mxu0 %v7336_v55  ;;  %7443 = vmatprep.mubr.bf16.mxu1 %v9337_v42  ;;  %v8010_v56 = vld [vmem:[#allocation3] ss:$0 sm:$0xff] }
0x3e6a   :  { %9044 = vmatpush3.bf16.msra.mxu0 %v7336_v55 }
0x3e6b   :  { %v7337_v20 = vpack.c.bf16 %v7335_v58, %v7334_v4 }
0x3e6d   :  { %9045 = vmatprep.subr.bf16.mxu0 %v7337_v20 }
0x3e6e   :  { %9046 = vmatpush3.bf16.msra.mxu0 %v7337_v20 }
0x3e70   :  { %7444 = vmatmul.mubr.bf16.gmra.mrb[108].mxu1 %v9339_v24 }
0x3e71   :  { %9048 = vmatmul.mubr.msk.bf16.vlgmr.msra.gmra.mrb[144].mxu0 %vm297_vm0, %v9341_v22 }
0x3e78   :  { %v7518_v11 = vpop.permute.xlu1 %7517 }
0x3e79   :  { %v7513_v59 = vpop.permute.xlu0 %7512 }
0x3e7c   :  { %v7528_v31 = vpop.permute.xlu1 %7527 }
0x3e7d   :  { %v7523_v2 = vpop.permute.xlu0 %7522 }
0x3e80   :  { %v7550_v6 = vpop.permute.xlu1 %7549 }
0x3e81   :  { %v7545_v46 = vpop.permute.xlu0 %7544 }
0x3e84   :  { %v7560_v12 = vpop.permute.xlu1 %7559 }
0x3e85   :  { %v7555_v47 = vpop.permute.xlu0 %7554 }
0x3f3b   :  { %v8635_v60 = vpop.f32.mrb[104].mxu1 }
0x3f3c   :  { %v8636_v7 = vpop.f32.mrb[105].mxu1 }
0x3f3d   :  { %v8637_v8 = vadd.f32 %v8636_v7, %v8635_v60  ;;  %v8638_v29 = vpop.f32.mrb[106].mxu1 }
0x3f3e   :  { %v8639_v14 = vpop.f32.mrb[107].mxu1 }
0x3f3f   :  { %v8640_v17 = vadd.f32 %v8639_v14, %v8638_v29 }
0x3f43   :  { %v8641_v15 = vpop.f32.mrb[108].mxu1 }
0x3f44   :  { %v8642_v63 = vpop.f32.mrb[109].mxu1  ;;  %v9049_v1 = vpop.f32.mrb[144].mxu0 }
0x3f45   :  { %v8643_v28 = vadd.f32 %v8642_v63, %v8641_v15  ;;  %v8644_v30 = vpop.f32.mrb[110].mxu1  ;;  %v7486_v16 = vpop.f32.mrb[145].mxu0 }
0x3f46   :  { %v7487_v23 = vadd.f32 %v8637_v8, %v7486_v16  ;;  %v8645_v18 = vpop.f32.mrb[111].mxu1  ;;  %v9050_v34 = vpop.f32.mrb[146].mxu0 }
0x3f47   :  { %v7495_v26 = vadd.f32 %v9049_v1, %v8643_v28  ;;  %v8646_v36 = vadd.f32 %v8645_v18, %v8644_v30  ;;  %v7489_v40 = vpop.f32.mrb[147].mxu0 }
0x3f48   :  { %v7501_v21 = vadd.f32 %v7487_v23, %v11776_v19  ;;  %v7490_v38 = vadd.f32 %v8640_v17, %v7489_v40 }
0x3f49   :  { %v7503_v39 = vadd.f32 %v7495_v26, %v11812_v13  ;;  %v7498_v27 = vadd.f32 %v9050_v34, %v8646_v36 }
0x3f4a   :  { %v7530_v37 = vadd.f32 %v7513_v59, %v7501_v21  ;;  %v7502_v43 = vadd.f32 %v7490_v38, %v11774_v25 }
0x3f4b   :  { %v7532_v33 = vadd.f32 %v7523_v2, %v7503_v39  ;;  %v7504_v48 = vadd.f32 %v7498_v27, %v11810_v49 }
0x3f4c   :  { %v7534_v35 = vmax.f32 %v7530_v37, 0.0  ;;  %v7531_v51 = vadd.f32 %v7518_v11, %v7502_v43 }
0x3f4d   :  { %v7533_v41 = vadd.f32 %v7528_v31, %v7504_v48  ;;  %v7536_v52 = vmax.f32 %v7532_v33, 0.0 }
0x3f4e   :  { %v7535_v32 = vmax.f32 %v7531_v51, 0.0  ;;  %v7562_v61 = vmul.f32 %v7545_v46, %v7534_v35 }
0x3f4f   :  { %v7537_v53 = vmax.f32 %v7533_v41, 0.0  ;;  %v7564_v0 = vmul.f32 %v7555_v47, %v7536_v52 }
0x3f50   :  { %v7563_v19 = vmul.f32 %v7550_v6, %v7535_v32 }
0x3f51   :  { %v7565_v50 = vmul.f32 %v7560_v12, %v7537_v53 }
0x3f52   :  { %v7566_v13 = vadd.f32 %v7563_v19, %v7562_v61 }
0x3f54   :  { %v7567_v3 = vadd.f32 %v7566_v13, %v7564_v0 }
0x3f56   :  { %v7568_v25 = vadd.f32 %v7567_v3, %v7565_v50 }
0x3f58   :  { %v7569_v10 = vrot.slane %v7568_v25, 4 }
0x3f5a   :  { %v7570_v9 = vadd.f32 %v7569_v10, %v7568_v25 }
0x3f5c   :  { %v7571_v62 = vrot.slane %v7570_v9, 2 }
0x3f5e   :  { %v7572_v49 = vadd.f32 %v7571_v62, %v7570_v9 }
0x3f60   :  { %v7573_v54 = vrot.slane %v7572_v49, 1 }
0x3f62   :  { %v7574_v5 = vadd.f32 %v7573_v54, %v7572_v49 }
0x3f64   :  { %v7576_v42 = vmul.f32 %v7575_v57, %v7574_v5 }
0x3f66   :  { %v7578_v55 = vsel %vm7577_vm1, %v7576_v42, 0.0 }
0x3f67   :  { %7579 = vadd.xlane.f32.xlu0 %v7578_v55 }
0x3ff4   :  { %v7580_v58 = vpop.xlane.xlu0 %7579 }
0x3ff5   :  { %v7588_v44 = vadd.f32 %v8010_v56, %v7580_v58 }
0x3ff7   :  { %7590 = vst.msk [vmem:[%s12087_s10] sm:$0x3] %vm7589_vm2, %v7588_v44 }

</bundles_post_ra>
